<compile_context>
chip_gen: v7x
topology: tpu7x:2x2x1
jax: 0.10.0
libtpu: 0.0.40
codegen_flags: <defaults>
</compile_context>

<pallas_src>
import numpy as np
import jax
import jax.numpy as jnp
from jax.experimental import pallas as pl
from jax.experimental.pallas import tpu as pltpu

LANE_PAD = 128  # lane-dense padding for the logits row / prototype lane dim


# ------------------------------ kernel bodies --------------------------------

def _backbone(x_ref, w1_ref, s1_ref, b1_ref, w2_ref, s2_ref, b2_ref,
              y1_scr, pad1_scr, pad2_scr, dims):
    """Conv1(+BN+ReLU) -> MaxPool2 -> Conv2(+BN+ReLU) for B images, all in VMEM.

    Both convs are im2col matmuls built in VMEM (K = 9*Cin).  Returns y2 of
    shape (B*H2*W2, C2), rows in (image, h, w) order, channels on lanes.
    """
    B, H1, W1, C0, C1, H2, W2, C2 = dims

    # block 0: in-kernel im2col (zero pad folded into a VMEM scratch) + matmul.
    # NOTE: the zero border is re-written every grid step on purpose; gating it
    # with pl.program_id(0) == 0 would be unsafe when the "parallel" grid axis
    # is split across TensorCores (each core has its own scratch).
    pad1_scr[...] = jnp.zeros_like(pad1_scr)
    pad1_scr[:, 1:H1 + 1, 1:W1 + 1, :] = x_ref[...]
    cols1 = [pad1_scr[:, dy:dy + H1, dx:dx + W1, :].reshape(B * H1 * W1, C0)
             for dy in range(3) for dx in range(3)]
    p1 = jnp.concatenate(cols1, axis=1)                                # (B*H1*W1, 9*C0)
    y1 = jnp.dot(p1, w1_ref[...], preferred_element_type=jnp.float32)
    y1 = jnp.maximum(y1 * s1_ref[...] + b1_ref[...], 0.0)              # (B*H1*W1, C1)

    # fused MaxPool2d(2): strided sublane loads pick the (w, w+1) pairs (W1 is
    # even, so pairs never straddle a row), the (h, h+1) pairs come from a
    # leading split.  Stays entirely in VMEM.
    y1_scr[...] = y1
    half = (B * H1 * W1) // 2
    wp = jnp.maximum(y1_scr[pl.ds(0, half, stride=2), :],
                     y1_scr[pl.ds(1, half, stride=2), :])               # (B*H1*W2, C1)
    wp = wp.reshape(B * H2, 2, W2, C1)
    pooled = jnp.maximum(wp[:, 0], wp[:, 1]).reshape(B, H2, W2, C1)

    # block 1: zero-pad pooled map in VMEM, im2col, ONE matmul with K = 9*C1.
    pad2_scr[...] = jnp.zeros_like(pad2_scr)
    pad2_scr[:, 1:H2 + 1, 1:W2 + 1, :] = pooled
    cols2 = [pad2_scr[:, dy:dy + H2, dx:dx + W2, :].reshape(B * H2 * W2, C1)
             for dy in range(3) for dx in range(3)]
    p2 = jnp.concatenate(cols2, axis=1)                                 # (B*H2*W2, 9*C1)
    y2 = jnp.dot(p2, w2_ref[...], preferred_element_type=jnp.float32)
    y2 = jnp.maximum(y2 * s2_ref[...] + b2_ref[...], 0.0)               # (B*H2*W2, C2)
    return y2


def _make_forward_kernel(dims):
    """Backbone + flatten + prototype neg-squared-distance (one MXU matmul)."""
    B, H1, W1, C0, C1, H2, W2, C2 = dims

    def kernel(x_ref, w1_ref, s1_ref, b1_ref, w2_ref, s2_ref, b2_ref,
               pt_ref, pn_ref, logit_ref, y1_scr, pad1_scr, pad2_scr):
        y2 = _backbone(x_ref, w1_ref, s1_ref, b1_ref, w2_ref, s2_ref, b2_ref,
                       y1_scr, pad1_scr, pad2_scr, dims)
        y2f = y2.reshape(B, H2 * W2 * C2)                               # (B, D)
        xn = jnp.sum(y2f * y2f, axis=1, keepdims=True)                  # (B, 1)
        cross = jnp.dot(y2f, pt_ref[...],
                        preferred_element_type=jnp.float32)             # (B, 128)
        logit_ref[0] = 2.0 * cross - xn - pn_ref[...]                   # lane-dense store
    return kernel


def _make_feature_kernel(dims):
    """Backbone only (used once on the support set to build prototypes)."""
    def kernel(x_ref, w1_ref, s1_ref, b1_ref, w2_ref, s2_ref, b2_ref,
               feat_ref, y1_scr, pad1_scr, pad2_scr):
        y2 = _backbone(x_ref, w1_ref, s1_ref, b1_ref, w2_ref, s2_ref, b2_ref,
                       y1_scr, pad1_scr, pad2_scr, dims)
        feat_ref[0] = y2.astype(feat_ref.dtype)
    return kernel


# ------------------------------ Pallas wrappers -------------------------------

def _batching(n):
    """Images per grid step (B) and number of steps (G).  Keep G >= 2 so v7x can
    split the batch across both TensorCores; cap B so VMEM stays far below the
    scoped limit on every generation (usage here is ~1 MiB/image)."""
    g = 2 if n >= 2 else 1
    b = min(-(-n // g), 8)
    g = -(-n // b)
    return g, b


def _prep(x_nchw, params):
    # TODO(synk): fused kernel is specialized to num_conv_blocks == 2; a generic
    # block count would need a programmatic kernel builder.
    assert len(params) == 2, "fused Pallas forward supports exactly 2 conv blocks"
    (w1, s1, b1), (w2, s2, b2) = params
    x = jnp.transpose(x_nchw, (0, 2, 3, 1)).astype(jnp.float32)   # NCHW -> NHWC
    N, H1, W1, C0 = x.shape
    assert H1 % 2 == 0 and W1 % 2 == 0, "MaxPool2d(2) fusion needs even H, W"
    C1, C2 = w1.shape[-1], w2.shape[-1]
    H2, W2 = H1 // 2, W1 // 2
    G, B = _batching(N)
    if G * B != N:                                    # pad batch to G*B images
        x = jnp.concatenate(
            [x, jnp.zeros((G * B - N, H1, W1, C0), x.dtype)], axis=0)
    w1_2d = w1.reshape(9 * C0, C1)                     # rows ordered (dy, dx, cin)
    w2_2d = w2.reshape(9 * C1, C2)
    dims = (B, H1, W1, C0, C1, H2, W2, C2)
    return N, G, x, w1_2d, s1, b1, w2_2d, s2, b2, dims


def _backbone_in_specs(dims):
    B, H1, W1, C0, C1, H2, W2, C2 = dims
    return [
        pl.BlockSpec((B, H1, W1, C0), lambda n: (n, 0, 0, 0)),     # raw NHWC images
        pl.BlockSpec((9 * C0, C1), lambda n: (0, 0)),              # w1 (2D, resident)
        pl.BlockSpec((1, C1), lambda n: (0, 0)),                   # bn1 scale
        pl.BlockSpec((1, C1), lambda n: (0, 0)),                   # bn1 shift
        pl.BlockSpec((9 * C1, C2), lambda n: (0, 0)),              # w2 (2D, resident)
        pl.BlockSpec((1, C2), lambda n: (0, 0)),                   # bn2 scale
        pl.BlockSpec((1, C2), lambda n: (0, 0)),                   # bn2 shift
    ]


def _backbone_scratch(dims):
    B, H1, W1, C0, C1, H2, W2, C2 = dims
    return [pltpu.VMEM((B * H1 * W1, C1), jnp.float32),            # conv1 activation
            pltpu.VMEM((B, H1 + 2, W1 + 2, C0), jnp.float32),      # zero-padded input
            pltpu.VMEM((B, H2 + 2, W2 + 2, C1), jnp.float32)]      # zero-padded pooled


def extract_features(x_nchw, params):
    """Backbone only. Returns (N, H2*W2, C2) features ((h, w, c) order)."""
    N, G, x, w1_2d, s1, b1, w2_2d, s2, b2, dims = _prep(x_nchw, params)
    B, H1, W1, C0, C1, H2, W2, C2 = dims
    feats = pl.pallas_call(
        _make_feature_kernel(dims),
        out_shape=jax.ShapeDtypeStruct((G, B * H2 * W2, C2), jnp.float32),
        grid=(G,),
        in_specs=_backbone_in_specs(dims),
        out_specs=pl.BlockSpec((1, B * H2 * W2, C2), lambda n: (n, 0, 0)),
        scratch_shapes=_backbone_scratch(dims),
        compiler_params=pltpu.CompilerParams(dimension_semantics=("parallel",)),
    )(x, w1_2d, s1, b1, w2_2d, s2, b2)
    return feats.reshape(G * B, H2 * W2, C2)[:N]


def forward(x_nchw, params, proto_t, proto_sqnorm_pad, num_classes):
    """Fused forward: backbone + flatten + -(squared distance) to prototypes."""
    N, G, x, w1_2d, s1, b1, w2_2d, s2, b2, dims = _prep(x_nchw, params)
    B, H1, W1, C0, C1, H2, W2, C2 = dims
    D, kpad = proto_t.shape
    assert D == H2 * W2 * C2
    in_specs = _backbone_in_specs(dims) + [
        pl.BlockSpec((D, kpad), lambda n: (0, 0)),                 # P^T (flattened)
        pl.BlockSpec((1, kpad), lambda n: (0, 0)),                 # precomputed ||p||^2
    ]
    logits = pl.pallas_call(
        _make_forward_kernel(dims),
        out_shape=jax.ShapeDtypeStruct((G, B, kpad), jnp.float32),
        grid=(G,),
        in_specs=in_specs,
        out_specs=pl.BlockSpec((1, B, kpad), lambda n: (n, 0, 0)),
        scratch_shapes=_backbone_scratch(dims),
        compiler_params=pltpu.CompilerParams(dimension_semantics=("parallel",)),
    )(x, w1_2d, s1, b1, w2_2d, s2, b2, proto_t, proto_sqnorm_pad)
    return logits.reshape(G * B, kpad)[:N, :num_classes]


# -------------------------------- model glue ---------------------------------

def init_params(cfg, key):
    """Deterministic synthetic parameters: HWIO conv weights + folded eval-mode BN.

    # TODO(synk): train-mode BatchNorm (batch statistics) not modeled.
    """
    params = []
    cin = cfg["in_channels"]
    eps = 1e-5
    for i in range(cfg["num_conv_blocks"]):
        cout = cfg["channels"][i][1]
        key, kw, kg, kb, km, kv = jax.random.split(key, 6)
        bound = 1.0 / np.sqrt(cin * 9)
        w = jax.random.uniform(kw, (3, 3, cin, cout), jnp.float32, -bound, bound)
        gamma = 1.0 + 0.1 * jax.random.normal(kg, (cout,), jnp.float32)
        beta = 0.1 * jax.random.normal(kb, (cout,), jnp.float32)
        rmean = 0.1 * jax.random.normal(km, (cout,), jnp.float32)
        rvar = 1.0 + 0.1 * jax.random.uniform(kv, (cout,), jnp.float32)
        scale = gamma / jnp.sqrt(rvar + eps)
        shift = beta - rmean * scale
        params.append((w, scale.reshape(1, cout), shift.reshape(1, cout)))
        cin = cout
    return params


def compute_prototypes(x_support_nchw, y_support, params, num_classes):
    """Mirrors protoClassifier.compute_prototype: per-class mean of backbone
    features, returned pre-flattened/transposed as (D, 128) plus ||p||^2 (1, 128)
    so the distance in `forward` is a single lane-dense MXU matmul."""
    feats = extract_features(x_support_nchw, params)           # (Ns, H2*W2, C2)
    flat = feats.reshape(feats.shape[0], -1)                   # (Ns, D), (h,w,c) order
    protos = []
    for c in range(num_classes):
        m = (y_support == c).astype(jnp.float32)
        protos.append(jnp.sum(flat * m[:, None], axis=0) / jnp.sum(m))
    P = jnp.stack(protos, axis=0)                              # (K, D)
    D = P.shape[1]
    pn = jnp.sum(P * P, axis=1)                                # (K,)  ||p||^2, hoisted
    proto_t = jnp.zeros((D, LANE_PAD), jnp.float32).at[:, :num_classes].set(P.T)
    pn_pad = jnp.zeros((1, LANE_PAD), jnp.float32).at[0, :num_classes].set(pn)
    return proto_t, pn_pad


# ------------------------------ pure-JAX reference ----------------------------
# The reference uses torch (c,h,w) flatten ordering; the Pallas path uses (h,w,c).
# Since each path builds its prototypes from its own consistently-ordered
# features, the final distances are mathematically identical.

def reference_logits(x_query, x_support, y_support, params, num_classes):
    hp = jax.lax.Precision.HIGHEST

    def feats(x_nchw):
        x = jnp.transpose(x_nchw, (0, 2, 3, 1))
        nb = len(params)
        for i, (w, s, b) in enumerate(params):
            x = jax.lax.conv_general_dilated(
                x, w, (1, 1), "SAME",
                dimension_numbers=("NHWC", "HWIO", "NHWC"), precision=hp)
            x = jnp.maximum(x * s.reshape(1, 1, 1, -1) + b.reshape(1, 1, 1, -1), 0.0)
            if i < nb - 1:
                x = jax.lax.reduce_window(x, -jnp.inf, jax.lax.max,
                                          (1, 2, 2, 1), (1, 2, 2, 1), "VALID")
        return jnp.transpose(x, (0, 3, 1, 2)).reshape(x.shape[0], -1)  # torch order

    fs, fq = feats(x_support), feats(x_query)
    protos = []
    for c in range(num_classes):
        m = (y_support == c).astype(jnp.float32)
        protos.append(jnp.sum(fs * m[:, None], axis=0) / jnp.sum(m))
    P = jnp.stack(protos, axis=0)
    xn = jnp.sum(fq * fq, axis=1, keepdims=True)
    pn = jnp.sum(P * P, axis=1)[None, :]
    cross = jnp.matmul(fq, P.T, precision=hp)
    return 2.0 * cross - xn - pn


# ----------------------------------- main -------------------------------------

if __name__ == "__main__":
    cfg = {"in_channels": 4, "num_conv_blocks": 2, "channels": [[4, 8], [8, 16]]}
    num_classes = 3

    root = jax.random.PRNGKey(0)
    kparam, ksup, kqry = jax.random.split(root, 3)
    params = init_params(cfg, kparam)

    x_support = jax.random.normal(ksup, (6, cfg["in_channels"], 16, 16), jnp.float32)
    y_support = jnp.array([0, 1, 2, 0, 1, 2], jnp.int32)
    x_query = jax.random.normal(kqry, (2, cfg["in_channels"], 16, 16), jnp.float32)

    proto_t, pn_pad = compute_prototypes(x_support, y_support, params, num_classes)
    out = jax.block_until_ready(
        forward(x_query, params, proto_t, pn_pad, num_classes))

    ref = reference_logits(x_query, x_support, y_support, params, num_classes)
    np.testing.assert_allclose(np.asarray(out), np.asarray(ref),
                               rtol=1e-2, atol=1e-1)
    assert out.shape == (2, num_classes)
    print("KERNEL_OK")
</pallas_src>

<mosaic_0001>
module attributes {stable_mosaic.version = 11 : i64} {
  func.func @kernel(%arg0: i32, %arg1: memref<3x16x16x4xf32, #tpu.memory_space<vmem>>, %arg2: memref<36x8xf32, #tpu.memory_space<vmem>>, %arg3: memref<1x8xf32, #tpu.memory_space<vmem>>, %arg4: memref<1x8xf32, #tpu.memory_space<vmem>>, %arg5: memref<72x16xf32, #tpu.memory_space<vmem>>, %arg6: memref<1x16xf32, #tpu.memory_space<vmem>>, %arg7: memref<1x16xf32, #tpu.memory_space<vmem>>, %arg8: memref<1x192x16xf32, #tpu.memory_space<vmem>>, %arg9: memref<768x8xf32, #tpu.memory_space<vmem>>, %arg10: memref<3x18x18x4xf32, #tpu.memory_space<vmem>>, %arg11: memref<3x10x10x8xf32, #tpu.memory_space<vmem>>) attributes {dimension_semantics = [#tpu.dimension_semantics<parallel>], iteration_bounds = array<i64: 2>, scalar_prefetch = 0 : i64, scratch_operands = 3 : i64, tpu.core_type = #tpu.core_type<tc>, window_params = [{transform_indices = @transform_0, window_bounds = array<i64: 3, 16, 16, 4>}, {pipeline_mode = #tpu.pipeline_mode<synchronous>, transform_indices = @transform_1, window_bounds = array<i64: 36, 8>}, {pipeline_mode = #tpu.pipeline_mode<synchronous>, transform_indices = @transform_2, window_bounds = array<i64: 1, 8>}, {pipeline_mode = #tpu.pipeline_mode<synchronous>, transform_indices = @transform_3, window_bounds = array<i64: 1, 8>}, {pipeline_mode = #tpu.pipeline_mode<synchronous>, transform_indices = @transform_4, window_bounds = array<i64: 72, 16>}, {pipeline_mode = #tpu.pipeline_mode<synchronous>, transform_indices = @transform_5, window_bounds = array<i64: 1, 16>}, {pipeline_mode = #tpu.pipeline_mode<synchronous>, transform_indices = @transform_6, window_bounds = array<i64: 1, 16>}, {transform_indices = @transform_7, window_bounds = array<i64: 1, 192, 16>}]} {
    %cst = arith.constant 0.000000e+00 : f32
    %0 = vector.broadcast %cst : f32 to vector<3x18x18x4xf32>
    %c0 = arith.constant 0 : index
    %c0_0 = arith.constant 0 : index
    %c0_1 = arith.constant 0 : index
    %c0_2 = arith.constant 0 : index
    %1 = vector.load %arg10[%c0, %c0_0, %c0_1, %c0_2] : memref<3x18x18x4xf32, #tpu.memory_space<vmem>>, vector<3x18x18x4xf32>
    tpu.vector_store %arg10[%c0, %c0_0, %c0_1, %c0_2], %0 {strides = array<i32>} : memref<3x18x18x4xf32, #tpu.memory_space<vmem>>, vector<3x18x18x4xf32>,
    %c0_3 = arith.constant 0 : index
    %c0_4 = arith.constant 0 : index
    %c0_5 = arith.constant 0 : index
    %c0_6 = arith.constant 0 : index
    %2 = vector.load %arg1[%c0_3, %c0_4, %c0_5, %c0_6] : memref<3x16x16x4xf32, #tpu.memory_space<vmem>>, vector<3x16x16x4xf32>
    %c0_7 = arith.constant 0 : index
    %c1 = arith.constant 1 : index
    %c1_8 = arith.constant 1 : index
    %c0_9 = arith.constant 0 : index
    %3 = vector.load %arg10[%c0_7, %c1, %c1_8, %c0_9] : memref<3x18x18x4xf32, #tpu.memory_space<vmem>>, vector<3x16x16x4xf32>
    tpu.vector_store %arg10[%c0_7, %c1, %c1_8, %c0_9], %2 {strides = array<i32>} : memref<3x18x18x4xf32, #tpu.memory_space<vmem>>, vector<3x16x16x4xf32>,
    %c0_10 = arith.constant 0 : index
    %c0_11 = arith.constant 0 : index
    %c0_12 = arith.constant 0 : index
    %c0_13 = arith.constant 0 : index
    %4 = vector.load %arg10[%c0_10, %c0_11, %c0_12, %c0_13] : memref<3x18x18x4xf32, #tpu.memory_space<vmem>>, vector<3x16x16x4xf32>
    %5 = vector.shape_cast %4 : vector<3x16x16x4xf32> to vector<768x4xf32>
    %c0_14 = arith.constant 0 : index
    %c0_15 = arith.constant 0 : index
    %c1_16 = arith.constant 1 : index
    %c0_17 = arith.constant 0 : index
    %6 = vector.load %arg10[%c0_14, %c0_15, %c1_16, %c0_17] : memref<3x18x18x4xf32, #tpu.memory_space<vmem>>, vector<3x16x16x4xf32>
    %7 = vector.shape_cast %6 : vector<3x16x16x4xf32> to vector<768x4xf32>
    %c0_18 = arith.constant 0 : index
    %c0_19 = arith.constant 0 : index
    %c2 = arith.constant 2 : index
    %c0_20 = arith.constant 0 : index
    %8 = vector.load %arg10[%c0_18, %c0_19, %c2, %c0_20] : memref<3x18x18x4xf32, #tpu.memory_space<vmem>>, vector<3x16x16x4xf32>
    %9 = vector.shape_cast %8 : vector<3x16x16x4xf32> to vector<768x4xf32>
    %c0_21 = arith.constant 0 : index
    %c1_22 = arith.constant 1 : index
    %c0_23 = arith.constant 0 : index
    %c0_24 = arith.constant 0 : index
    %10 = vector.load %arg10[%c0_21, %c1_22, %c0_23, %c0_24] : memref<3x18x18x4xf32, #tpu.memory_space<vmem>>, vector<3x16x16x4xf32>
    %11 = vector.shape_cast %10 : vector<3x16x16x4xf32> to vector<768x4xf32>
    %c0_25 = arith.constant 0 : index
    %c1_26 = arith.constant 1 : index
    %c1_27 = arith.constant 1 : index
    %c0_28 = arith.constant 0 : index
    %12 = vector.load %arg10[%c0_25, %c1_26, %c1_27, %c0_28] : memref<3x18x18x4xf32, #tpu.memory_space<vmem>>, vector<3x16x16x4xf32>
    %13 = vector.shape_cast %12 : vector<3x16x16x4xf32> to vector<768x4xf32>
    %c0_29 = arith.constant 0 : index
    %c1_30 = arith.constant 1 : index
    %c2_31 = arith.constant 2 : index
    %c0_32 = arith.constant 0 : index
    %14 = vector.load %arg10[%c0_29, %c1_30, %c2_31, %c0_32] : memref<3x18x18x4xf32, #tpu.memory_space<vmem>>, vector<3x16x16x4xf32>
    %15 = vector.shape_cast %14 : vector<3x16x16x4xf32> to vector<768x4xf32>
    %c0_33 = arith.constant 0 : index
    %c2_34 = arith.constant 2 : index
    %c0_35 = arith.constant 0 : index
    %c0_36 = arith.constant 0 : index
    %16 = vector.load %arg10[%c0_33, %c2_34, %c0_35, %c0_36] : memref<3x18x18x4xf32, #tpu.memory_space<vmem>>, vector<3x16x16x4xf32>
    %17 = vector.shape_cast %16 : vector<3x16x16x4xf32> to vector<768x4xf32>
    %c0_37 = arith.constant 0 : index
    %c2_38 = arith.constant 2 : index
    %c1_39 = arith.constant 1 : index
    %c0_40 = arith.constant 0 : index
    %18 = vector.load %arg10[%c0_37, %c2_38, %c1_39, %c0_40] : memref<3x18x18x4xf32, #tpu.memory_space<vmem>>, vector<3x16x16x4xf32>
    %19 = vector.shape_cast %18 : vector<3x16x16x4xf32> to vector<768x4xf32>
    %c0_41 = arith.constant 0 : index
    %c2_42 = arith.constant 2 : index
    %c2_43 = arith.constant 2 : index
    %c0_44 = arith.constant 0 : index
    %20 = vector.load %arg10[%c0_41, %c2_42, %c2_43, %c0_44] : memref<3x18x18x4xf32, #tpu.memory_space<vmem>>, vector<3x16x16x4xf32>
    %21 = vector.shape_cast %20 : vector<3x16x16x4xf32> to vector<768x4xf32>
    %22 = tpu.concatenate %5, %7, %9, %11, %13, %15, %17, %19, %21 in 1 : vector<768x4xf32>, vector<768x4xf32>, vector<768x4xf32>, vector<768x4xf32>, vector<768x4xf32>, vector<768x4xf32>, vector<768x4xf32>, vector<768x4xf32>, vector<768x4xf32> -> vector<768x36xf32>
    %c0_45 = arith.constant 0 : index
    %c0_46 = arith.constant 0 : index
    %23 = vector.load %arg2[%c0_45, %c0_46] : memref<36x8xf32, #tpu.memory_space<vmem>>, vector<36x8xf32>
    %cst_47 = arith.constant dense<0.000000e+00> : vector<768x8xf32>
    %24 = tpu.matmul %22, %23, %cst_47 {dimension_numbers = #tpu.dot_dimension_numbers<[1], [0], [0], [1], [0, 0, 1, 1], [], []>} : vector<768x36xf32>, vector<36x8xf32>, vector<768x8xf32> -> vector<768x8xf32>
    %c0_48 = arith.constant 0 : index
    %c0_49 = arith.constant 0 : index
    %25 = vector.load %arg3[%c0_48, %c0_49] : memref<1x8xf32, #tpu.memory_space<vmem>>, vector<1x8xf32>
    %26 = vector.broadcast %25 : vector<1x8xf32> to vector<768x8xf32>
    %27 = arith.mulf %24, %26 : vector<768x8xf32>
    %c0_50 = arith.constant 0 : index
    %c0_51 = arith.constant 0 : index
    %28 = vector.load %arg4[%c0_50, %c0_51] : memref<1x8xf32, #tpu.memory_space<vmem>>, vector<1x8xf32>
    %29 = vector.broadcast %28 : vector<1x8xf32> to vector<768x8xf32>
    %30 = arith.addf %27, %29 : vector<768x8xf32>
    %cst_52 = arith.constant 0.000000e+00 : f32
    %31 = vector.broadcast %cst_52 : f32 to vector<768x8xf32>
    %32 = arith.maximumf %30, %31 : vector<768x8xf32>
    %c0_53 = arith.constant 0 : index
    %c0_54 = arith.constant 0 : index
    %33 = vector.load %arg9[%c0_53, %c0_54] : memref<768x8xf32, #tpu.memory_space<vmem>>, vector<768x8xf32>
    tpu.vector_store %arg9[%c0_53, %c0_54], %32 {strides = array<i32>} : memref<768x8xf32, #tpu.memory_space<vmem>>, vector<768x8xf32>,
    %c0_55 = arith.constant 0 : index
    %c0_56 = arith.constant 0 : index
    %34 = tpu.strided_load %arg9[%c0_55, %c0_56] {strides = array<i32: 2, 1>} : memref<768x8xf32, #tpu.memory_space<vmem>>, vector<384x8xf32>
    %c1_57 = arith.constant 1 : index
    %c0_58 = arith.constant 0 : index
    %35 = tpu.strided_load %arg9[%c1_57, %c0_58] {strides = array<i32: 2, 1>} : memref<768x8xf32, #tpu.memory_space<vmem>>, vector<384x8xf32>
    %36 = arith.maximumf %34, %35 : vector<384x8xf32>
    %37 = vector.shape_cast %36 : vector<384x8xf32> to vector<24x2x8x8xf32>
    %38 = vector.extract_strided_slice %37 {offsets = [0, 0, 0, 0], sizes = [24, 1, 8, 8], strides = [1, 1, 1, 1]} : vector<24x2x8x8xf32> to vector<24x1x8x8xf32>
    %39 = vector.shape_cast %38 : vector<24x1x8x8xf32> to vector<24x8x8xf32>
    %40 = vector.extract_strided_slice %37 {offsets = [0, 1, 0, 0], sizes = [24, 1, 8, 8], strides = [1, 1, 1, 1]} : vector<24x2x8x8xf32> to vector<24x1x8x8xf32>
    %41 = vector.shape_cast %40 : vector<24x1x8x8xf32> to vector<24x8x8xf32>
    %42 = arith.maximumf %39, %41 : vector<24x8x8xf32>
    %43 = vector.shape_cast %42 : vector<24x8x8xf32> to vector<3x8x8x8xf32>
    %cst_59 = arith.constant 0.000000e+00 : f32
    %44 = vector.broadcast %cst_59 : f32 to vector<3x10x10x8xf32>
    %c0_60 = arith.constant 0 : index
    %c0_61 = arith.constant 0 : index
    %c0_62 = arith.constant 0 : index
    %c0_63 = arith.constant 0 : index
    %45 = vector.load %arg11[%c0_60, %c0_61, %c0_62, %c0_63] : memref<3x10x10x8xf32, #tpu.memory_space<vmem>>, vector<3x10x10x8xf32>
    tpu.vector_store %arg11[%c0_60, %c0_61, %c0_62, %c0_63], %44 {strides = array<i32>} : memref<3x10x10x8xf32, #tpu.memory_space<vmem>>, vector<3x10x10x8xf32>,
    %c0_64 = arith.constant 0 : index
    %c1_65 = arith.constant 1 : index
    %c1_66 = arith.constant 1 : index
    %c0_67 = arith.constant 0 : index
    %46 = vector.load %arg11[%c0_64, %c1_65, %c1_66, %c0_67] : memref<3x10x10x8xf32, #tpu.memory_space<vmem>>, vector<3x8x8x8xf32>
    tpu.vector_store %arg11[%c0_64, %c1_65, %c1_66, %c0_67], %43 {strides = array<i32>} : memref<3x10x10x8xf32, #tpu.memory_space<vmem>>, vector<3x8x8x8xf32>,
    %c0_68 = arith.constant 0 : index
    %c0_69 = arith.constant 0 : index
    %c0_70 = arith.constant 0 : index
    %c0_71 = arith.constant 0 : index
    %47 = vector.load %arg11[%c0_68, %c0_69, %c0_70, %c0_71] : memref<3x10x10x8xf32, #tpu.memory_space<vmem>>, vector<3x8x8x8xf32>
    %48 = vector.shape_cast %47 : vector<3x8x8x8xf32> to vector<192x8xf32>
    %c0_72 = arith.constant 0 : index
    %c0_73 = arith.constant 0 : index
    %c1_74 = arith.constant 1 : index
    %c0_75 = arith.constant 0 : index
    %49 = vector.load %arg11[%c0_72, %c0_73, %c1_74, %c0_75] : memref<3x10x10x8xf32, #tpu.memory_space<vmem>>, vector<3x8x8x8xf32>
    %50 = vector.shape_cast %49 : vector<3x8x8x8xf32> to vector<192x8xf32>
    %c0_76 = arith.constant 0 : index
    %c0_77 = arith.constant 0 : index
    %c2_78 = arith.constant 2 : index
    %c0_79 = arith.constant 0 : index
    %51 = vector.load %arg11[%c0_76, %c0_77, %c2_78, %c0_79] : memref<3x10x10x8xf32, #tpu.memory_space<vmem>>, vector<3x8x8x8xf32>
    %52 = vector.shape_cast %51 : vector<3x8x8x8xf32> to vector<192x8xf32>
    %c0_80 = arith.constant 0 : index
    %c1_81 = arith.constant 1 : index
    %c0_82 = arith.constant 0 : index
    %c0_83 = arith.constant 0 : index
    %53 = vector.load %arg11[%c0_80, %c1_81, %c0_82, %c0_83] : memref<3x10x10x8xf32, #tpu.memory_space<vmem>>, vector<3x8x8x8xf32>
    %54 = vector.shape_cast %53 : vector<3x8x8x8xf32> to vector<192x8xf32>
    %c0_84 = arith.constant 0 : index
    %c1_85 = arith.constant 1 : index
    %c1_86 = arith.constant 1 : index
    %c0_87 = arith.constant 0 : index
    %55 = vector.load %arg11[%c0_84, %c1_85, %c1_86, %c0_87] : memref<3x10x10x8xf32, #tpu.memory_space<vmem>>, vector<3x8x8x8xf32>
    %56 = vector.shape_cast %55 : vector<3x8x8x8xf32> to vector<192x8xf32>
    %c0_88 = arith.constant 0 : index
    %c1_89 = arith.constant 1 : index
    %c2_90 = arith.constant 2 : index
    %c0_91 = arith.constant 0 : index
    %57 = vector.load %arg11[%c0_88, %c1_89, %c2_90, %c0_91] : memref<3x10x10x8xf32, #tpu.memory_space<vmem>>, vector<3x8x8x8xf32>
    %58 = vector.shape_cast %57 : vector<3x8x8x8xf32> to vector<192x8xf32>
    %c0_92 = arith.constant 0 : index
    %c2_93 = arith.constant 2 : index
    %c0_94 = arith.constant 0 : index
    %c0_95 = arith.constant 0 : index
    %59 = vector.load %arg11[%c0_92, %c2_93, %c0_94, %c0_95] : memref<3x10x10x8xf32, #tpu.memory_space<vmem>>, vector<3x8x8x8xf32>
    %60 = vector.shape_cast %59 : vector<3x8x8x8xf32> to vector<192x8xf32>
    %c0_96 = arith.constant 0 : index
    %c2_97 = arith.constant 2 : index
    %c1_98 = arith.constant 1 : index
    %c0_99 = arith.constant 0 : index
    %61 = vector.load %arg11[%c0_96, %c2_97, %c1_98, %c0_99] : memref<3x10x10x8xf32, #tpu.memory_space<vmem>>, vector<3x8x8x8xf32>
    %62 = vector.shape_cast %61 : vector<3x8x8x8xf32> to vector<192x8xf32>
    %c0_100 = arith.constant 0 : index
    %c2_101 = arith.constant 2 : index
    %c2_102 = arith.constant 2 : index
    %c0_103 = arith.constant 0 : index
    %63 = vector.load %arg11[%c0_100, %c2_101, %c2_102, %c0_103] : memref<3x10x10x8xf32, #tpu.memory_space<vmem>>, vector<3x8x8x8xf32>
    %64 = vector.shape_cast %63 : vector<3x8x8x8xf32> to vector<192x8xf32>
    %65 = tpu.concatenate %48, %50, %52, %54, %56, %58, %60, %62, %64 in 1 : vector<192x8xf32>, vector<192x8xf32>, vector<192x8xf32>, vector<192x8xf32>, vector<192x8xf32>, vector<192x8xf32>, vector<192x8xf32>, vector<192x8xf32>, vector<192x8xf32> -> vector<192x72xf32>
    %c0_104 = arith.constant 0 : index
    %c0_105 = arith.constant 0 : index
    %66 = vector.load %arg5[%c0_104, %c0_105] : memref<72x16xf32, #tpu.memory_space<vmem>>, vector<72x16xf32>
    %cst_106 = arith.constant dense<0.000000e+00> : vector<192x16xf32>
    %67 = tpu.matmul %65, %66, %cst_106 {dimension_numbers = #tpu.dot_dimension_numbers<[1], [0], [0], [1], [0, 0, 1, 1], [], []>} : vector<192x72xf32>, vector<72x16xf32>, vector<192x16xf32> -> vector<192x16xf32>
    %c0_107 = arith.constant 0 : index
    %c0_108 = arith.constant 0 : index
    %68 = vector.load %arg6[%c0_107, %c0_108] : memref<1x16xf32, #tpu.memory_space<vmem>>, vector<1x16xf32>
    %69 = vector.broadcast %68 : vector<1x16xf32> to vector<192x16xf32>
    %70 = arith.mulf %67, %69 : vector<192x16xf32>
    %c0_109 = arith.constant 0 : index
    %c0_110 = arith.constant 0 : index
    %71 = vector.load %arg7[%c0_109, %c0_110] : memref<1x16xf32, #tpu.memory_space<vmem>>, vector<1x16xf32>
    %72 = vector.broadcast %71 : vector<1x16xf32> to vector<192x16xf32>
    %73 = arith.addf %70, %72 : vector<192x16xf32>
    %cst_111 = arith.constant 0.000000e+00 : f32
    %74 = vector.broadcast %cst_111 : f32 to vector<192x16xf32>
    %75 = arith.maximumf %73, %74 : vector<192x16xf32>
    %c0_112 = arith.constant 0 : index
    %c0_113 = arith.constant 0 : index
    %c0_114 = arith.constant 0 : index
    %76 = vector.load %arg8[%c0_112, %c0_113, %c0_114] : memref<1x192x16xf32, #tpu.memory_space<vmem>>, vector<1x192x16xf32>
    %77 = vector.shape_cast %76 : vector<1x192x16xf32> to vector<192x16xf32>
    %78 = vector.shape_cast %75 : vector<192x16xf32> to vector<1x192x16xf32>
    tpu.vector_store %arg8[%c0_112, %c0_113, %c0_114], %78 {strides = array<i32>} : memref<1x192x16xf32, #tpu.memory_space<vmem>>, vector<1x192x16xf32>,
    return
  }
  func.func @transform_0(%arg0: i32) -> (i32, i32, i32, i32) {
    %c0_i32 = arith.constant 0 : i32
    %c0_i32_0 = arith.constant 0 : i32
    %c0_i32_1 = arith.constant 0 : i32
    %c0_i32_2 = arith.constant 0 : i32
    return %arg0, %c0_i32, %c0_i32_0, %c0_i32_1 : i32, i32, i32, i32
  }
  func.func @transform_1(%arg0: i32) -> (i32, i32) {
    %c0_i32 = arith.constant 0 : i32
    %c0_i32_0 = arith.constant 0 : i32
    %c0_i32_1 = arith.constant 0 : i32
    return %c0_i32, %c0_i32_0 : i32, i32
  }
  func.func @transform_2(%arg0: i32) -> (i32, i32) {
    %c0_i32 = arith.constant 0 : i32
    %c0_i32_0 = arith.constant 0 : i32
    %c0_i32_1 = arith.constant 0 : i32
    return %c0_i32, %c0_i32_0 : i32, i32
  }
  func.func @transform_3(%arg0: i32) -> (i32, i32) {
    %c0_i32 = arith.constant 0 : i32
    %c0_i32_0 = arith.constant 0 : i32
    %c0_i32_1 = arith.constant 0 : i32
    return %c0_i32, %c0_i32_0 : i32, i32
  }
  func.func @transform_4(%arg0: i32) -> (i32, i32) {
    %c0_i32 = arith.constant 0 : i32
    %c0_i32_0 = arith.constant 0 : i32
    %c0_i32_1 = arith.constant 0 : i32
    return %c0_i32, %c0_i32_0 : i32, i32
  }
  func.func @transform_5(%arg0: i32) -> (i32, i32) {
    %c0_i32 = arith.constant 0 : i32
    %c0_i32_0 = arith.constant 0 : i32
    %c0_i32_1 = arith.constant 0 : i32
    return %c0_i32, %c0_i32_0 : i32, i32
  }
  func.func @transform_6(%arg0: i32) -> (i32, i32) {
    %c0_i32 = arith.constant 0 : i32
    %c0_i32_0 = arith.constant 0 : i32
    %c0_i32_1 = arith.constant 0 : i32
    return %c0_i32, %c0_i32_0 : i32, i32
  }
  func.func @transform_7(%arg0: i32) -> (i32, i32, i32) {
    %c0_i32 = arith.constant 0 : i32
    %c0_i32_0 = arith.constant 0 : i32
    %c0_i32_1 = arith.constant 0 : i32
    return %arg0, %c0_i32, %c0_i32_0 : i32, i32, i32
  }
}

</mosaic_0001>

<bundles_post_ra>
// kernel: tpu_custom_call.1
= control target key start
LH: loop header
LB: loop body
LE: loop exit
PB: predicated region body
PF: predicated region fallthrough
CT: control target
= control target key end

     0   :  { %s9151_s24 = smov 0   ;;  %s14622_s0 = inlined_call_operand.vmem [shape: f32[6,16,16,4], index: 0, kind: input, shape index: {}]   ;;  %s14623_s1 = inlined_call_operand.vmem [shape: f32[36,8], index: 1, kind: input, shape index: {}]   ;;  %s14624_s2 = inlined_call_operand.vmem [shape: f32[1,8], index: 2, kind: input, shape index: {}]   ;;  %s14625_s3 = inlined_call_operand.vmem [shape: f32[1,8], index: 3, kind: input, shape index: {}]   ;;  %s14626_s4 = inlined_call_operand.vmem [shape: f32[72,16], index: 4, kind: input, shape index: {}]   ;;  %s14627_s5 = inlined_call_operand.vmem [shape: f32[1,16], index: 5, kind: input, shape index: {}]   ;;  %s14628_s6 = inlined_call_operand.vmem [shape: f32[1,16], index: 6, kind: input, shape index: {}]   ;;  %s14629_s7 = inlined_call_operand.vmem [shape: f32[2,192,16], index: 7, kind: output, shape index: {}]  }
   0x1 LB: > { %s9157_s25 = sadd.s32 4294967295, %s9096_s24   ;;  %p8560_p0 = scmp.ge.s32.totalorder %s9096_s24, 1  ;;  %s9096_s24 = sphi %s9151_s24, %s17_s24  }
   0x2   : > { %p239_p1 = scmp.lt.s32.totalorder %s9096_s24, 3 }
   0x4   : > { %p240_p2 = pnand %p8560_p0, %p239_p1 }
   0x6   : > { %243 = sbr.rel (%p240_p2) target bundleno = 2652 (0xa5c), region = 48 }
   0xd   : > { %vm284_vm0 = vcmask 31744   ;;  %vm287_vm1 = vcmask 25600   ;;  %s272_s26 = smul.u32 3, %s9157_s25  ;;  %v14630_v0 = vmov 0.0   ;;  %s9099_s8 = smov 4   ;;  %vm4674_vm2 = vcmask 64512  }
   0xe   : > { %285 = vst.msk [vmem:[#allocation3] sm:$0xff] %vm284_vm0, %v14630_v0  ;;  %286 = vst.msk [vmem:[#allocation3 + $0x8] sm:$0xff] %vm284_vm0, %v14630_v0  ;;  %s9100_s9 = smov 8   ;;  %s9101_s10 = smov 12   ;;  %vm5647_vm3 = vcmask 1043456   ;;  %vm4771_vm4 = vcmask 97280  }
   0xf   : > { %289 = vst.msk [vmem:[#allocation3 + $0x18] sm:$0xff] %vm284_vm0, %v14630_v0  ;;  %290 = vst.msk [vmem:[#allocation3 + $0x20] sm:$0xff] %vm284_vm0, %v14630_v0  ;;  %p273_p3 = scmp.lt.s32.totalorder %s272_s26, 5  ;;  %s9102_s11 = smov 16   ;;  %vm4868_vm5 = vcmask 130048   ;;  %vm4965_vm6 = vcmask 162816  }
  0x10   : > { %292 = vst.msk [vmem:[#allocation3 + $0x30] sm:$0xff] %vm284_vm0, %v14630_v0  ;;  %293 = vst.msk [vmem:[#allocation3 + $0x38] sm:$0xff] %vm284_vm0, %v14630_v0  ;;  %s9103_s12 = smov 20   ;;  %s9104_s13 = smov 24   ;;  %vm5062_vm7 = vcmask 195584   ;;  %vm5159_vm8 = vcmask 228352  }
  0x11   : > { %295 = vst.msk [vmem:[#allocation3 + $0x48] sm:$0xff] %vm284_vm0, %v14630_v0  ;;  %296 = vst.msk [vmem:[#allocation3 + $0x50] sm:$0xff] %vm284_vm0, %v14630_v0  ;;  %s15748_s26 = smov (!%p273_p3, %s272_s26), 5  ;;  %s9105_s14 = smov 28   ;;  %vm5256_vm9 = vcmask 261120   ;;  %vm5358_vm10 = vcmask 293888  }
  0x12   : > { %298 = vst.msk [vmem:[#allocation3 + $0x60] sm:$0xff] %vm284_vm0, %v14630_v0  ;;  %299 = vst.msk [vmem:[#allocation3 + $0x68] sm:$0xff] %vm284_vm0, %v14630_v0  ;;  %s8691_s27 = sshll.u32 %s15748_s26, 8  ;;  %vm6858_vm11 = vcmask 58368   ;;  %s9107_s20 = smov 40   ;;  %vm8024_vm12 = vcmask 326656  }
  0x13   : > { %301 = vst.msk [vmem:[#allocation3 + $0x78] sm:$0xff] %vm284_vm0, %v14630_v0  ;;  %302 = vst.msk [vmem:[#allocation3 + $0x80] sm:$0xff] %vm284_vm0, %v14630_v0  ;;  %s9493_s30 = scalar_lea.vmem %s14622_s0, %s8691_s27  ;;  %s9106_s27 = smov 32   ;;  %vm8049_vm13 = vcmask 392192   ;;  %vm8074_vm14 = vcmask 457728   ;;  %vm8099_vm15 = vcmask 523264  }
  0x14   : > { %304 = vst.msk [vmem:[#allocation3 + $0x90] sm:$0xff] %vm284_vm0, %v14630_v0  ;;  %305 = vst.msk [vmem:[#allocation3 + $0x98] sm:$0xff] %vm284_vm0, %v14630_v0  ;;  %v450_v3 = vld [vmem:[%s9493_s30 + $0x10] sm:$0xff]  ;;  %v448_v4 = vld [vmem:[%s9493_s30] sm:$0xff]  ;;  %s9109_s21 = smov 56   ;;  %s9110_s26 = smov 64  }
  0x15   : > { %307 = vst.msk [vmem:[#allocation3 + $0xa8] sm:$0xff] %vm284_vm0, %v14630_v0  ;;  %308 = vst.msk [vmem:[#allocation3 + $0xb0] sm:$0xff] %vm284_vm0, %v14630_v0  ;;  %v737_v1 = vld [vmem:[#allocation3 + $0x1] sm:$0xff]  ;;  %v454_v7 = vld [vmem:[%s9493_s30 + $0x30] sm:$0xff]  ;;  %p279_p4 = scmp.lt.s32.totalorder %s9157_s25, 1 }
  0x16   : > { %310 = vst.msk [vmem:[#allocation3 + $0xc0] sm:$0xff] %vm284_vm0, %v14630_v0  ;;  %311 = vst.msk [vmem:[#allocation3 + $0xc8] sm:$0xff] %vm284_vm0, %v14630_v0  ;;  %1602 = vrot.lane.b32.xlu0 %v737_v1, %s9099_s8  ;;  %v452_v5 = vld [vmem:[%s9493_s30 + $0x20] sm:$0xff]  ;;  %v449_v6 = vld [vmem:[%s9493_s30 + $0x8] sm:$0xff] }
  0x17   : > { %313 = vst.msk [vmem:[#allocation3 + $0xd8] sm:$0xff] %vm284_vm0, %v14630_v0  ;;  %314 = vst.msk [vmem:[#allocation3 + $0xe0] sm:$0xff] %vm284_vm0, %v14630_v0  ;;  %v451_v8 = vld [vmem:[%s9493_s30 + $0x18] sm:$0xff]  ;;  %v456_v9 = vld [vmem:[%s9493_s30 + $0x40] sm:$0xff]  ;;  %s15750_s25 = smov (!%p279_p4, %s9157_s25), 1 }
  0x18   : > { %316 = vst.msk [vmem:[#allocation3 + $0xf0] sm:$0xff] %vm284_vm0, %v14630_v0  ;;  %317 = vst.msk [vmem:[#allocation3 + $0xf8] sm:$0xff] %vm284_vm0, %v14630_v0  ;;  %v453_v10 = vld [vmem:[%s9493_s30 + $0x28] sm:$0xff]  ;;  %v458_v11 = vld [vmem:[%s9493_s30 + $0x50] sm:$0xff] }
  0x19   : > { %319 = vst.msk [vmem:[#allocation3 + $0x108] sm:$0xff] %vm284_vm0, %v14630_v0  ;;  %320 = vst.msk [vmem:[#allocation3 + $0x110] sm:$0xff] %vm284_vm0, %v14630_v0  ;;  %v455_v12 = vld [vmem:[%s9493_s30 + $0x38] sm:$0xff]  ;;  %v460_v13 = vld [vmem:[%s9493_s30 + $0x60] sm:$0xff] }
  0x1a   : > { %322 = vst.msk [vmem:[#allocation3 + $0x120] sm:$0xff] %vm284_vm0, %v14630_v0  ;;  %323 = vst.msk [vmem:[#allocation3 + $0x128] sm:$0xff] %vm284_vm0, %v14630_v0  ;;  %v457_v14 = vld [vmem:[%s9493_s30 + $0x48] sm:$0xff]  ;;  %v462_v15 = vld [vmem:[%s9493_s30 + $0x70] sm:$0xff] }
  0x1b   : > { %325 = vst.msk [vmem:[#allocation3 + $0x138] sm:$0xff] %vm284_vm0, %v14630_v0  ;;  %326 = vst.msk [vmem:[#allocation3 + $0x140] sm:$0xff] %vm284_vm0, %v14630_v0  ;;  %v459_v16 = vld [vmem:[%s9493_s30 + $0x58] sm:$0xff]  ;;  %v464_v17 = vld [vmem:[%s9493_s30 + $0x80] sm:$0xff] }
  0x1c   : > { %328 = vst.msk [vmem:[#allocation3 + $0x150] sm:$0xff] %vm284_vm0, %v14630_v0  ;;  %329 = vst.msk [vmem:[#allocation3 + $0x158] sm:$0xff] %vm284_vm0, %v14630_v0  ;;  %v461_v18 = vld [vmem:[%s9493_s30 + $0x68] sm:$0xff]  ;;  %v466_v19 = vld [vmem:[%s9493_s30 + $0x90] sm:$0xff] }
  0x1d   : > { %331 = vst.msk [vmem:[#allocation3 + $0x168] sm:$0xff] %vm284_vm0, %v14630_v0  ;;  %332 = vst.msk [vmem:[#allocation3 + $0x170] sm:$0xff] %vm284_vm0, %v14630_v0  ;;  %v463_v20 = vld [vmem:[%s9493_s30 + $0x78] sm:$0xff]  ;;  %v468_v21 = vld [vmem:[%s9493_s30 + $0xa0] sm:$0xff] }
  0x1e   : > { %334 = vst.msk [vmem:[#allocation3 + $0x180] sm:$0xff] %vm284_vm0, %v14630_v0  ;;  %335 = vst.msk [vmem:[#allocation3 + $0x188] sm:$0xff] %vm284_vm0, %v14630_v0  ;;  %v465_v22 = vld [vmem:[%s9493_s30 + $0x88] sm:$0xff]  ;;  %v470_v23 = vld [vmem:[%s9493_s30 + $0xb0] sm:$0xff] }
  0x1f   : > { %337 = vst.msk [vmem:[#allocation3 + $0x198] sm:$0xff] %vm284_vm0, %v14630_v0  ;;  %338 = vst.msk [vmem:[#allocation3 + $0x1a0] sm:$0xff] %vm284_vm0, %v14630_v0  ;;  %v467_v24 = vld [vmem:[%s9493_s30 + $0x98] sm:$0xff]  ;;  %v472_v26 = vld [vmem:[%s9493_s30 + $0xc0] sm:$0xff] }
  0x20   : > { %340 = vst.msk [vmem:[#allocation3 + $0x1b0] sm:$0xff] %vm284_vm0, %v14630_v0  ;;  %341 = vst.msk [vmem:[#allocation3 + $0x1b8] sm:$0xff] %vm284_vm0, %v14630_v0  ;;  %v469_v27 = vld [vmem:[%s9493_s30 + $0xa8] sm:$0xff]  ;;  %v474_v33 = vld [vmem:[%s9493_s30 + $0xd0] sm:$0xff] }
  0x21   : > { %343 = vst.msk [vmem:[#allocation3 + $0x1c8] sm:$0xff] %vm284_vm0, %v14630_v0  ;;  %344 = vst.msk [vmem:[#allocation3 + $0x1d0] sm:$0xff] %vm284_vm0, %v14630_v0  ;;  %v471_v34 = vld [vmem:[%s9493_s30 + $0xb8] sm:$0xff]  ;;  %v476_v35 = vld [vmem:[%s9493_s30 + $0xe0] sm:$0xff] }
  0x22   : > { %346 = vst.msk [vmem:[#allocation3 + $0x1e0] sm:$0xff] %vm284_vm0, %v14630_v0  ;;  %347 = vst.msk [vmem:[#allocation3 + $0x1e8] sm:$0xff] %vm284_vm0, %v14630_v0  ;;  %v473_v36 = vld [vmem:[%s9493_s30 + $0xc8] sm:$0xff]  ;;  %v475_v38 = vld [vmem:[%s9493_s30 + $0xd8] sm:$0xff] }
  0x23   : > { %349 = vst.msk [vmem:[#allocation3 + $0x1f8] sm:$0xff] %vm284_vm0, %v14630_v0  ;;  %350 = vst.msk [vmem:[#allocation3 + $0x200] sm:$0xff] %vm284_vm0, %v14630_v0  ;;  %v480_v39 = vld [vmem:[%s9493_s30 + $0x100] sm:$0xff]  ;;  %v477_v41 = vld [vmem:[%s9493_s30 + $0xe8] sm:$0xff] }
  0x24   : > { %352 = vst.msk [vmem:[#allocation3 + $0x210] sm:$0xff] %vm284_vm0, %v14630_v0  ;;  %353 = vst.msk [vmem:[#allocation3 + $0x218] sm:$0xff] %vm284_vm0, %v14630_v0  ;;  %v482_v42 = vld [vmem:[%s9493_s30 + $0x110] sm:$0xff]  ;;  %v484_v44 = vld [vmem:[%s9493_s30 + $0x120] sm:$0xff] }
  0x25   : > { %355 = vst.msk [vmem:[#allocation3 + $0x228] sm:$0xff] %vm284_vm0, %v14630_v0  ;;  %356 = vst.msk [vmem:[#allocation3 + $0x230] sm:$0xff] %vm284_vm0, %v14630_v0  ;;  %v481_v45 = vld [vmem:[%s9493_s30 + $0x108] sm:$0xff]  ;;  %v486_v46 = vld [vmem:[%s9493_s30 + $0x130] sm:$0xff] }
  0x26   : > { %358 = vst.msk [vmem:[#allocation3 + $0x240] sm:$0xff] %vm284_vm0, %v14630_v0  ;;  %359 = vst.msk [vmem:[#allocation3 + $0x248] sm:$0xff] %vm284_vm0, %v14630_v0  ;;  %v483_v48 = vld [vmem:[%s9493_s30 + $0x118] sm:$0xff]  ;;  %v488_v49 = vld [vmem:[%s9493_s30 + $0x140] sm:$0xff] }
  0x27   : > { %361 = vst.msk [vmem:[#allocation3 + $0x258] sm:$0xff] %vm284_vm0, %v14630_v0  ;;  %362 = vst.msk [vmem:[#allocation3 + $0x260] sm:$0xff] %vm284_vm0, %v14630_v0  ;;  %v485_v50 = vld [vmem:[%s9493_s30 + $0x128] sm:$0xff]  ;;  %v490_v51 = vld [vmem:[%s9493_s30 + $0x150] sm:$0xff] }
  0x28   : > { %364 = vst.msk [vmem:[#allocation3 + $0x270] sm:$0xff] %vm284_vm0, %v14630_v0  ;;  %365 = vst.msk [vmem:[#allocation3 + $0x278] sm:$0xff] %vm284_vm0, %v14630_v0  ;;  %v487_v52 = vld [vmem:[%s9493_s30 + $0x138] sm:$0xff]  ;;  %v492_v53 = vld [vmem:[%s9493_s30 + $0x160] sm:$0xff] }
  0x29   : > { %367 = vst.msk [vmem:[#allocation3 + $0x288] sm:$0xff] %vm284_vm0, %v14630_v0  ;;  %368 = vst.msk [vmem:[#allocation3 + $0x290] sm:$0xff] %vm284_vm0, %v14630_v0  ;;  %v489_v54 = vld [vmem:[%s9493_s30 + $0x148] sm:$0xff]  ;;  %v494_v55 = vld [vmem:[%s9493_s30 + $0x170] sm:$0xff] }
  0x2a   : > { %370 = vst.msk [vmem:[#allocation3 + $0x2a0] sm:$0xff] %vm284_vm0, %v14630_v0  ;;  %371 = vst.msk [vmem:[#allocation3 + $0x2a8] sm:$0xff] %vm284_vm0, %v14630_v0  ;;  %v491_v56 = vld [vmem:[%s9493_s30 + $0x158] sm:$0xff]  ;;  %v496_v57 = vld [vmem:[%s9493_s30 + $0x180] sm:$0xff] }
  0x2b   : > { %373 = vst.msk [vmem:[#allocation3 + $0x2b8] sm:$0xff] %vm284_vm0, %v14630_v0  ;;  %374 = vst.msk [vmem:[#allocation3 + $0x2c0] sm:$0xff] %vm284_vm0, %v14630_v0  ;;  %v493_v58 = vld [vmem:[%s9493_s30 + $0x168] sm:$0xff]  ;;  %v498_v60 = vld [vmem:[%s9493_s30 + $0x190] sm:$0xff] }
  0x2c   : > { %376 = vst.msk [vmem:[#allocation3 + $0x2d0] sm:$0xff] %vm284_vm0, %v14630_v0  ;;  %377 = vst.msk [vmem:[#allocation3 + $0x2d8] sm:$0xff] %vm284_vm0, %v14630_v0  ;;  %v495_v62 = vld [vmem:[%s9493_s30 + $0x178] sm:$0xff] }
  0x2d   : > { %379 = vst.msk [vmem:[#allocation3 + $0x2e8] sm:$0xff] %vm284_vm0, %v14630_v0  ;;  %380 = vst.msk [vmem:[#allocation3 + $0x2f0] sm:$0xff] %vm284_vm0, %v14630_v0 }
  0x2e   : > { %382 = vst.msk [vmem:[#allocation3 + $0x300] sm:$0xff] %vm284_vm0, %v14630_v0  ;;  %383 = vst.msk [vmem:[#allocation3 + $0x308] sm:$0xff] %vm284_vm0, %v14630_v0 }
  0x2f   : > { %385 = vst.msk [vmem:[#allocation3 + $0x318] sm:$0xff] %vm284_vm0, %v14630_v0  ;;  %386 = vst.msk [vmem:[#allocation3 + $0x320] sm:$0xff] %vm284_vm0, %v14630_v0 }
  0x30   : > { %388 = vst.msk [vmem:[#allocation3 + $0x330] sm:$0xff] %vm284_vm0, %v14630_v0  ;;  %389 = vst.msk [vmem:[#allocation3 + $0x338] sm:$0xff] %vm284_vm0, %v14630_v0 }
  0x31   : > { %391 = vst.msk [vmem:[#allocation3 + $0x348] sm:$0xff] %vm284_vm0, %v14630_v0  ;;  %392 = vst.msk [vmem:[#allocation3 + $0x350] sm:$0xff] %vm284_vm0, %v14630_v0 }
  0x32   : > { %394 = vst.msk [vmem:[#allocation3 + $0x360] sm:$0xff] %vm284_vm0, %v14630_v0  ;;  %395 = vst.msk [vmem:[#allocation3 + $0x368] sm:$0xff] %vm284_vm0, %v14630_v0 }
  0x33   : > { %397 = vst.msk [vmem:[#allocation3 + $0x378] sm:$0xff] %vm284_vm0, %v14630_v0  ;;  %398 = vst.msk [vmem:[#allocation3 + $0x380] sm:$0xff] %vm284_vm0, %v14630_v0 }
  0x34   : > { %400 = vst.msk [vmem:[#allocation3 + $0x390] sm:$0xff] %vm284_vm0, %v14630_v0  ;;  %401 = vst.msk [vmem:[#allocation3 + $0x398] sm:$0xff] %vm284_vm0, %v14630_v0 }
  0x35   : > { %403 = vst.msk [vmem:[#allocation3 + $0x3a8] sm:$0xff] %vm284_vm0, %v14630_v0  ;;  %404 = vst.msk [vmem:[#allocation3 + $0x3b0] sm:$0xff] %vm284_vm0, %v14630_v0 }
  0x36   : > { %406 = vst.msk [vmem:[#allocation3 + $0x3c0] sm:$0xff] %vm284_vm0, %v14630_v0  ;;  %407 = vst.msk [vmem:[#allocation3 + $0x3c8] sm:$0xff] %vm284_vm0, %v14630_v0 }
  0x37   : > { %409 = vst.msk [vmem:[#allocation3 + $0x3d8] sm:$0xff] %vm284_vm0, %v14630_v0  ;;  %410 = vst.msk [vmem:[#allocation3 + $0x3e0] sm:$0xff] %vm284_vm0, %v14630_v0 }
  0x38   : > { %412 = vst.msk [vmem:[#allocation3 + $0x3f0] sm:$0xff] %vm284_vm0, %v14630_v0  ;;  %413 = vst.msk [vmem:[#allocation3 + $0x3f8] sm:$0xff] %vm284_vm0, %v14630_v0 }
  0x39   : > { %415 = vst.msk [vmem:[#allocation3 + $0x408] sm:$0xff] %vm284_vm0, %v14630_v0  ;;  %416 = vst.msk [vmem:[#allocation3 + $0x410] sm:$0xff] %vm284_vm0, %v14630_v0 }
  0x3a   : > { %418 = vst.msk [vmem:[#allocation3 + $0x420] sm:$0xff] %vm284_vm0, %v14630_v0  ;;  %419 = vst.msk [vmem:[#allocation3 + $0x428] sm:$0xff] %vm284_vm0, %v14630_v0 }
  0x3b   : > { %421 = vst.msk [vmem:[#allocation3 + $0x438] sm:$0xff] %vm284_vm0, %v14630_v0  ;;  %422 = vst.msk [vmem:[#allocation3 + $0x440] sm:$0xff] %vm284_vm0, %v14630_v0 }
  0x3c   : > { %424 = vst.msk [vmem:[#allocation3 + $0x450] sm:$0xff] %vm284_vm0, %v14630_v0  ;;  %425 = vst.msk [vmem:[#allocation3 + $0x458] sm:$0xff] %vm284_vm0, %v14630_v0 }
  0x3d   : > { %427 = vst.msk [vmem:[#allocation3 + $0x468] sm:$0xff] %vm284_vm0, %v14630_v0  ;;  %428 = vst.msk [vmem:[#allocation3 + $0x470] sm:$0xff] %vm284_vm0, %v14630_v0 }
  0x3e   : > { %430 = vst.msk [vmem:[#allocation3 + $0x480] sm:$0xff] %vm284_vm0, %v14630_v0  ;;  %431 = vst.msk [vmem:[#allocation3 + $0x488] sm:$0xff] %vm284_vm0, %v14630_v0 }
  0x3f   : > { %433 = vst.msk [vmem:[#allocation3 + $0x498] sm:$0xff] %vm284_vm0, %v14630_v0  ;;  %434 = vst.msk [vmem:[#allocation3 + $0x4a0] sm:$0xff] %vm284_vm0, %v14630_v0 }
  0x40   : > { %436 = vst.msk [vmem:[#allocation3 + $0x4b0] sm:$0xff] %vm284_vm0, %v14630_v0  ;;  %437 = vst.msk [vmem:[#allocation3 + $0x4b8] sm:$0xff] %vm284_vm0, %v14630_v0 }
  0x41   : > { %439 = vst.msk [vmem:[#allocation3 + $0x4c8] sm:$0xff] %vm284_vm0, %v14630_v0  ;;  %440 = vst.msk [vmem:[#allocation3 + $0x4d0] sm:$0xff] %vm284_vm0, %v14630_v0 }
  0x42   : > { %442 = vst.msk [vmem:[#allocation3 + $0x4e0] sm:$0xff] %vm284_vm0, %v14630_v0  ;;  %443 = vst.msk [vmem:[#allocation3 + $0x4e8] sm:$0xff] %vm284_vm0, %v14630_v0 }
  0x43   : > { %445 = vst.msk [vmem:[#allocation3 + $0x4f8] sm:$0xff] %vm284_vm0, %v14630_v0  ;;  %446 = vst.msk [vmem:[#allocation3 + $0x500] sm:$0xff] %vm284_vm0, %v14630_v0 }
  0x44   : > { %288 = vst.msk [vmem:[#allocation3 + $0x10] sm:$0x3] %vm287_vm1, %v14630_v0  ;;  %291 = vst.msk [vmem:[#allocation3 + $0x28] sm:$0x3] %vm287_vm1, %v14630_v0 }
  0x45   : > { %294 = vst.msk [vmem:[#allocation3 + $0x40] sm:$0x3] %vm287_vm1, %v14630_v0  ;;  %297 = vst.msk [vmem:[#allocation3 + $0x58] sm:$0x3] %vm287_vm1, %v14630_v0 }
  0x46   : > { %300 = vst.msk [vmem:[#allocation3 + $0x70] sm:$0x3] %vm287_vm1, %v14630_v0  ;;  %303 = vst.msk [vmem:[#allocation3 + $0x88] sm:$0x3] %vm287_vm1, %v14630_v0 }
  0x47   : > { %306 = vst.msk [vmem:[#allocation3 + $0xa0] sm:$0x3] %vm287_vm1, %v14630_v0  ;;  %309 = vst.msk [vmem:[#allocation3 + $0xb8] sm:$0x3] %vm287_vm1, %v14630_v0 }
  0x48   : > { %312 = vst.msk [vmem:[#allocation3 + $0xd0] sm:$0x3] %vm287_vm1, %v14630_v0  ;;  %315 = vst.msk [vmem:[#allocation3 + $0xe8] sm:$0x3] %vm287_vm1, %v14630_v0 }
  0x49   : > { %318 = vst.msk [vmem:[#allocation3 + $0x100] sm:$0x3] %vm287_vm1, %v14630_v0  ;;  %321 = vst.msk [vmem:[#allocation3 + $0x118] sm:$0x3] %vm287_vm1, %v14630_v0 }
  0x4a   : > { %324 = vst.msk [vmem:[#allocation3 + $0x130] sm:$0x3] %vm287_vm1, %v14630_v0  ;;  %327 = vst.msk [vmem:[#allocation3 + $0x148] sm:$0x3] %vm287_vm1, %v14630_v0 }
  0x4b   : > { %330 = vst.msk [vmem:[#allocation3 + $0x160] sm:$0x3] %vm287_vm1, %v14630_v0  ;;  %333 = vst.msk [vmem:[#allocation3 + $0x178] sm:$0x3] %vm287_vm1, %v14630_v0  ;;  %v738_v2 = vld [vmem:[#allocation3 + $0x9] sm:$0xff] }
  0x4c   : > { %336 = vst.msk [vmem:[#allocation3 + $0x190] sm:$0x3] %vm287_vm1, %v14630_v0  ;;  %339 = vst.msk [vmem:[#allocation3 + $0x1a8] sm:$0x3] %vm287_vm1, %v14630_v0  ;;  %1604 = vrot.lane.b32.xlu0 %v738_v2, %s9099_s8  ;;  %v500_v2 = vld [vmem:[%s9493_s30 + $0x1a0] sm:$0xff] }
  0x4d   : > { %342 = vst.msk [vmem:[#allocation3 + $0x1c0] sm:$0x3] %vm287_vm1, %v14630_v0  ;;  %345 = vst.msk [vmem:[#allocation3 + $0x1d8] sm:$0x3] %vm287_vm1, %v14630_v0 }
  0x4e   : > { %348 = vst.msk [vmem:[#allocation3 + $0x1f0] sm:$0x3] %vm287_vm1, %v14630_v0  ;;  %351 = vst.msk [vmem:[#allocation3 + $0x208] sm:$0x3] %vm287_vm1, %v14630_v0 }
  0x4f   : > { %354 = vst.msk [vmem:[#allocation3 + $0x220] sm:$0x3] %vm287_vm1, %v14630_v0  ;;  %357 = vst.msk [vmem:[#allocation3 + $0x238] sm:$0x3] %vm287_vm1, %v14630_v0 }
  0x50   : > { %360 = vst.msk [vmem:[#allocation3 + $0x250] sm:$0x3] %vm287_vm1, %v14630_v0  ;;  %363 = vst.msk [vmem:[#allocation3 + $0x268] sm:$0x3] %vm287_vm1, %v14630_v0 }
  0x51   : > { %366 = vst.msk [vmem:[#allocation3 + $0x280] sm:$0x3] %vm287_vm1, %v14630_v0  ;;  %369 = vst.msk [vmem:[#allocation3 + $0x298] sm:$0x3] %vm287_vm1, %v14630_v0 }
  0x52   : > { %372 = vst.msk [vmem:[#allocation3 + $0x2b0] sm:$0x3] %vm287_vm1, %v14630_v0  ;;  %375 = vst.msk [vmem:[#allocation3 + $0x2c8] sm:$0x3] %vm287_vm1, %v14630_v0 }
  0x53   : > { %378 = vst.msk [vmem:[#allocation3 + $0x2e0] sm:$0x3] %vm287_vm1, %v14630_v0  ;;  %381 = vst.msk [vmem:[#allocation3 + $0x2f8] sm:$0x3] %vm287_vm1, %v14630_v0 }
  0x54   : > { %384 = vst.msk [vmem:[#allocation3 + $0x310] sm:$0x3] %vm287_vm1, %v14630_v0  ;;  %387 = vst.msk [vmem:[#allocation3 + $0x328] sm:$0x3] %vm287_vm1, %v14630_v0 }
  0x55   : > { %390 = vst.msk [vmem:[#allocation3 + $0x340] sm:$0x3] %vm287_vm1, %v14630_v0  ;;  %393 = vst.msk [vmem:[#allocation3 + $0x358] sm:$0x3] %vm287_vm1, %v14630_v0 }
  0x56   : > { %396 = vst.msk [vmem:[#allocation3 + $0x370] sm:$0x3] %vm287_vm1, %v14630_v0  ;;  %399 = vst.msk [vmem:[#allocation3 + $0x388] sm:$0x3] %vm287_vm1, %v14630_v0 }
  0x57   : > { %402 = vst.msk [vmem:[#allocation3 + $0x3a0] sm:$0x3] %vm287_vm1, %v14630_v0  ;;  %405 = vst.msk [vmem:[#allocation3 + $0x3b8] sm:$0x3] %vm287_vm1, %v14630_v0 }
  0x58   : > { %408 = vst.msk [vmem:[#allocation3 + $0x3d0] sm:$0x3] %vm287_vm1, %v14630_v0  ;;  %411 = vst.msk [vmem:[#allocation3 + $0x3e8] sm:$0x3] %vm287_vm1, %v14630_v0 }
  0x59   : > { %414 = vst.msk [vmem:[#allocation3 + $0x400] sm:$0x3] %vm287_vm1, %v14630_v0  ;;  %417 = vst.msk [vmem:[#allocation3 + $0x418] sm:$0x3] %vm287_vm1, %v14630_v0 }
  0x5a   : > { %420 = vst.msk [vmem:[#allocation3 + $0x430] sm:$0x3] %vm287_vm1, %v14630_v0  ;;  %423 = vst.msk [vmem:[#allocation3 + $0x448] sm:$0x3] %vm287_vm1, %v14630_v0 }
  0x5b   : > { %426 = vst.msk [vmem:[#allocation3 + $0x460] sm:$0x3] %vm287_vm1, %v14630_v0  ;;  %429 = vst.msk [vmem:[#allocation3 + $0x478] sm:$0x3] %vm287_vm1, %v14630_v0 }
  0x5c   : > { %432 = vst.msk [vmem:[#allocation3 + $0x490] sm:$0x3] %vm287_vm1, %v14630_v0  ;;  %435 = vst.msk [vmem:[#allocation3 + $0x4a8] sm:$0x3] %vm287_vm1, %v14630_v0 }
  0x5d   : > { %438 = vst.msk [vmem:[#allocation3 + $0x4c0] sm:$0x3] %vm287_vm1, %v14630_v0  ;;  %441 = vst.msk [vmem:[#allocation3 + $0x4d8] sm:$0x3] %vm287_vm1, %v14630_v0 }
  0x5e   : > { %444 = vst.msk [vmem:[#allocation3 + $0x4f0] sm:$0x3] %vm287_vm1, %v14630_v0  ;;  %447 = vst.msk [vmem:[#allocation3 + $0x508] sm:$0x3] %vm287_vm1, %v14630_v0 }
  0x5f   : > { %547 = vst.msk [vmem:[#allocation3 + $0x31] sm:$0xff] %vm284_vm0, %v450_v3  ;;  %545 = vst.msk [vmem:[#allocation3 + $0x19] sm:$0xff] %vm284_vm0, %v448_v4  ;;  %v497_v3 = vld [vmem:[%s9493_s30 + $0x188] sm:$0xff]  ;;  %v502_v4 = vld [vmem:[%s9493_s30 + $0x1b0] sm:$0xff] }
  0x60   : > { %549 = vst.msk [vmem:[#allocation3 + $0x49] sm:$0xff] %vm284_vm0, %v452_v5  ;;  %546 = vst.msk [vmem:[#allocation3 + $0x21] sm:$0xff] %vm284_vm0, %v449_v6  ;;  %v499_v5 = vld [vmem:[%s9493_s30 + $0x198] sm:$0xff] }
  0x61   : > { %551 = vst.msk [vmem:[#allocation3 + $0x61] sm:$0xff] %vm284_vm0, %v454_v7  ;;  %548 = vst.msk [vmem:[#allocation3 + $0x39] sm:$0xff] %vm284_vm0, %v451_v8  ;;  %v504_v7 = vld [vmem:[%s9493_s30 + $0x1c0] sm:$0xff] }
  0x62   : > { %553 = vst.msk [vmem:[#allocation3 + $0x79] sm:$0xff] %vm284_vm0, %v456_v9  ;;  %550 = vst.msk [vmem:[#allocation3 + $0x51] sm:$0xff] %vm284_vm0, %v453_v10  ;;  %v501_v9 = vld [vmem:[%s9493_s30 + $0x1a8] sm:$0xff]  ;;  %v506_v10 = vld [vmem:[%s9493_s30 + $0x1d0] sm:$0xff] }
  0x63   : > { %555 = vst.msk [vmem:[#allocation3 + $0x91] sm:$0xff] %vm284_vm0, %v458_v11  ;;  %552 = vst.msk [vmem:[#allocation3 + $0x69] sm:$0xff] %vm284_vm0, %v455_v12  ;;  %v503_v11 = vld [vmem:[%s9493_s30 + $0x1b8] sm:$0xff]  ;;  %v508_v12 = vld [vmem:[%s9493_s30 + $0x1e0] sm:$0xff] }
  0x64   : > { %557 = vst.msk [vmem:[#allocation3 + $0xa9] sm:$0xff] %vm284_vm0, %v460_v13  ;;  %554 = vst.msk [vmem:[#allocation3 + $0x81] sm:$0xff] %vm284_vm0, %v457_v14  ;;  %v505_v13 = vld [vmem:[%s9493_s30 + $0x1c8] sm:$0xff] }
  0x65   : > { %559 = vst.msk [vmem:[#allocation3 + $0xc1] sm:$0xff] %vm284_vm0, %v462_v15  ;;  %556 = vst.msk [vmem:[#allocation3 + $0x99] sm:$0xff] %vm284_vm0, %v459_v16  ;;  %v507_v16 = vld [vmem:[%s9493_s30 + $0x1d8] sm:$0xff] }
  0x66   : > { %561 = vst.msk [vmem:[#allocation3 + $0xd9] sm:$0xff] %vm284_vm0, %v464_v17  ;;  %558 = vst.msk [vmem:[#allocation3 + $0xb1] sm:$0xff] %vm284_vm0, %v461_v18  ;;  %v741_v25 = vld [vmem:[#allocation3 + $0x31] sm:$0xff]  ;;  %v739_v28 = vld [vmem:[#allocation3 + $0x19] sm:$0xff] }
  0x67   : > { %563 = vst.msk [vmem:[#allocation3 + $0xf1] sm:$0xff] %vm284_vm0, %v466_v19  ;;  %560 = vst.msk [vmem:[#allocation3 + $0xc9] sm:$0xff] %vm284_vm0, %v463_v20  ;;  %1610 = vrot.lane.b32.xlu0 %v741_v25, %s9099_s8  ;;  %1606 = vrot.lane.b32.xlu1 %v739_v28, %s9099_s8  ;;  %v743_v29 = vld [vmem:[#allocation3 + $0x49] sm:$0xff]  ;;  %v740_v30 = vld [vmem:[#allocation3 + $0x21] sm:$0xff] }
  0x68   : > { %565 = vst.msk [vmem:[#allocation3 + $0x109] sm:$0xff] %vm284_vm0, %v468_v21  ;;  %562 = vst.msk [vmem:[#allocation3 + $0xe1] sm:$0xff] %vm284_vm0, %v465_v22  ;;  %v745_v31 = vld [vmem:[#allocation3 + $0x61] sm:$0xff]  ;;  %v742_v32 = vld [vmem:[#allocation3 + $0x39] sm:$0xff] }
  0x69   : > { %567 = vst.msk [vmem:[#allocation3 + $0x121] sm:$0xff] %vm284_vm0, %v470_v23  ;;  %564 = vst.msk [vmem:[#allocation3 + $0xf9] sm:$0xff] %vm284_vm0, %v467_v24  ;;  %v747_v37 = vld [vmem:[#allocation3 + $0x79] sm:$0xff]  ;;  %v744_v40 = vld [vmem:[#allocation3 + $0x51] sm:$0xff] }
  0x6a   : > { %569 = vst.msk [vmem:[#allocation3 + $0x139] sm:$0xff] %vm284_vm0, %v472_v26  ;;  %566 = vst.msk [vmem:[#allocation3 + $0x111] sm:$0xff] %vm284_vm0, %v469_v27  ;;  %v749_v43 = vld [vmem:[#allocation3 + $0x91] sm:$0xff]  ;;  %v746_v47 = vld [vmem:[#allocation3 + $0x69] sm:$0xff] }
  0x6b   : > { %1614 = vrot.lane.b32.xlu0 %v743_v29, %s9099_s8  ;;  %1608 = vrot.lane.b32.xlu1 %v740_v30, %s9099_s8  ;;  %571 = vst.msk [vmem:[#allocation3 + $0x151] sm:$0xff] %vm284_vm0, %v474_v33  ;;  %568 = vst.msk [vmem:[#allocation3 + $0x129] sm:$0xff] %vm284_vm0, %v471_v34  ;;  %v751_v59 = vld [vmem:[#allocation3 + $0xa9] sm:$0xff]  ;;  %v748_v61 = vld [vmem:[#allocation3 + $0x81] sm:$0xff] }
  0x6c   : > { %573 = vst.msk [vmem:[#allocation3 + $0x169] sm:$0xff] %vm284_vm0, %v476_v35  ;;  %570 = vst.msk [vmem:[#allocation3 + $0x141] sm:$0xff] %vm284_vm0, %v473_v36  ;;  %v753_v63 = vld [vmem:[#allocation3 + $0xc1] sm:$0xff]  ;;  %v750_v1 = vld [vmem:[#allocation3 + $0x99] sm:$0xff] }
  0x6d   : > { %572 = vst.msk [vmem:[#allocation3 + $0x159] sm:$0xff] %vm284_vm0, %v475_v38  ;;  %577 = vst.msk [vmem:[#allocation3 + $0x1c9] sm:$0xff] %vm284_vm0, %v480_v39  ;;  %v755_v6 = vld [vmem:[#allocation3 + $0xd9] sm:$0xff]  ;;  %v752_v8 = vld [vmem:[#allocation3 + $0xb1] sm:$0xff] }
  0x6e   : > { %574 = vst.msk [vmem:[#allocation3 + $0x171] sm:$0xff] %vm284_vm0, %v477_v41  ;;  %579 = vst.msk [vmem:[#allocation3 + $0x1e1] sm:$0xff] %vm284_vm0, %v482_v42  ;;  %v757_v14 = vld [vmem:[#allocation3 + $0xf1] sm:$0xff]  ;;  %v754_v15 = vld [vmem:[#allocation3 + $0xc9] sm:$0xff] }
  0x6f   : > { %1618 = vrot.lane.b32.xlu0 %v745_v31, %s9099_s8  ;;  %1612 = vrot.lane.b32.xlu1 %v742_v32, %s9099_s8  ;;  %581 = vst.msk [vmem:[#allocation3 + $0x1f9] sm:$0xff] %vm284_vm0, %v484_v44  ;;  %578 = vst.msk [vmem:[#allocation3 + $0x1d1] sm:$0xff] %vm284_vm0, %v481_v45  ;;  %v512_v17 = vld [vmem:[%s9493_s30 + $0x200] sm:$0xff]  ;;  %v509_v18 = vld [vmem:[%s9493_s30 + $0x1e8] sm:$0xff] }
  0x70   : > { %583 = vst.msk [vmem:[#allocation3 + $0x211] sm:$0xff] %vm284_vm0, %v486_v46  ;;  %580 = vst.msk [vmem:[#allocation3 + $0x1e9] sm:$0xff] %vm284_vm0, %v483_v48  ;;  %v759_v19 = vld [vmem:[#allocation3 + $0x109] sm:$0xff]  ;;  %v756_v20 = vld [vmem:[#allocation3 + $0xe1] sm:$0xff] }
  0x71   : > { %585 = vst.msk [vmem:[#allocation3 + $0x229] sm:$0xff] %vm284_vm0, %v488_v49  ;;  %582 = vst.msk [vmem:[#allocation3 + $0x201] sm:$0xff] %vm284_vm0, %v485_v50  ;;  %v514_v21 = vld [vmem:[%s9493_s30 + $0x210] sm:$0xff]  ;;  %v761_v22 = vld [vmem:[#allocation3 + $0x121] sm:$0xff] }
  0x72   : > { %587 = vst.msk [vmem:[#allocation3 + $0x241] sm:$0xff] %vm284_vm0, %v490_v51  ;;  %584 = vst.msk [vmem:[#allocation3 + $0x219] sm:$0xff] %vm284_vm0, %v487_v52  ;;  %v516_v23 = vld [vmem:[%s9493_s30 + $0x220] sm:$0xff]  ;;  %v513_v24 = vld [vmem:[%s9493_s30 + $0x208] sm:$0xff] }
  0x73   : > { %1622 = vrot.lane.b32.xlu0 %v747_v37, %s9099_s8  ;;  %1616 = vrot.lane.b32.xlu1 %v744_v40, %s9099_s8  ;;  %589 = vst.msk [vmem:[#allocation3 + $0x259] sm:$0xff] %vm284_vm0, %v492_v53  ;;  %586 = vst.msk [vmem:[#allocation3 + $0x231] sm:$0xff] %vm284_vm0, %v489_v54  ;;  %v758_v25 = vld [vmem:[#allocation3 + $0xf9] sm:$0xff]  ;;  %v518_v26 = vld [vmem:[%s9493_s30 + $0x230] sm:$0xff] }
  0x74   : > { %591 = vst.msk [vmem:[#allocation3 + $0x271] sm:$0xff] %vm284_vm0, %v494_v55  ;;  %588 = vst.msk [vmem:[#allocation3 + $0x249] sm:$0xff] %vm284_vm0, %v491_v56  ;;  %v515_v27 = vld [vmem:[%s9493_s30 + $0x218] sm:$0xff]  ;;  %v520_v28 = vld [vmem:[%s9493_s30 + $0x240] sm:$0xff] }
  0x75   : > { %593 = vst.msk [vmem:[#allocation3 + $0x289] sm:$0xff] %vm284_vm0, %v496_v57  ;;  %590 = vst.msk [vmem:[#allocation3 + $0x261] sm:$0xff] %vm284_vm0, %v493_v58  ;;  %v763_v29 = vld [vmem:[#allocation3 + $0x139] sm:$0xff]  ;;  %v517_v30 = vld [vmem:[%s9493_s30 + $0x228] sm:$0xff] }
  0x76   : > { %595 = vst.msk [vmem:[#allocation3 + $0x2a1] sm:$0xff] %vm284_vm0, %v498_v60  ;;  %592 = vst.msk [vmem:[#allocation3 + $0x279] sm:$0xff] %vm284_vm0, %v495_v62  ;;  %v760_v31 = vld [vmem:[#allocation3 + $0x111] sm:$0xff]  ;;  %v524_v34 = vld [vmem:[%s9493_s30 + $0x260] sm:$0xff] }
  0x77   : > { %1626 = vrot.lane.b32.xlu0 %v749_v43, %s9099_s8  ;;  %1620 = vrot.lane.b32.xlu1 %v746_v47, %s9099_s8  ;;  %597 = vst.msk [vmem:[#allocation3 + $0x2b9] sm:$0xff] %vm284_vm0, %v500_v2  ;;  %594 = vst.msk [vmem:[#allocation3 + $0x291] sm:$0xff] %vm284_vm0, %v497_v3  ;;  %v522_v32 = vld [vmem:[%s9493_s30 + $0x250] sm:$0xff]  ;;  %v519_v33 = vld [vmem:[%s9493_s30 + $0x238] sm:$0xff] }
  0x78   : > { %599 = vst.msk [vmem:[#allocation3 + $0x2d1] sm:$0xff] %vm284_vm0, %v502_v4  ;;  %596 = vst.msk [vmem:[#allocation3 + $0x2a9] sm:$0xff] %vm284_vm0, %v499_v5  ;;  %v521_v35 = vld [vmem:[%s9493_s30 + $0x248] sm:$0xff]  ;;  %v765_v36 = vld [vmem:[#allocation3 + $0x151] sm:$0xff] }
  0x79   : > { %601 = vst.msk [vmem:[#allocation3 + $0x2e9] sm:$0xff] %vm284_vm0, %v504_v7  ;;  %598 = vst.msk [vmem:[#allocation3 + $0x2c1] sm:$0xff] %vm284_vm0, %v501_v9  ;;  %v526_v37 = vld [vmem:[%s9493_s30 + $0x270] sm:$0xff]  ;;  %v523_v39 = vld [vmem:[%s9493_s30 + $0x258] sm:$0xff] }
  0x7a   : > { %603 = vst.msk [vmem:[#allocation3 + $0x301] sm:$0xff] %vm284_vm0, %v506_v10  ;;  %600 = vst.msk [vmem:[#allocation3 + $0x2d9] sm:$0xff] %vm284_vm0, %v503_v11  ;;  %v762_v38 = vld [vmem:[#allocation3 + $0x129] sm:$0xff]  ;;  %v528_v40 = vld [vmem:[%s9493_s30 + $0x280] sm:$0xff] }
  0x7b   : > { %1630 = vrot.lane.b32.xlu0 %v751_v59, %s9099_s8  ;;  %1624 = vrot.lane.b32.xlu1 %v748_v61, %s9099_s8  ;;  %605 = vst.msk [vmem:[#allocation3 + $0x319] sm:$0xff] %vm284_vm0, %v508_v12  ;;  %602 = vst.msk [vmem:[#allocation3 + $0x2f1] sm:$0xff] %vm284_vm0, %v505_v13  ;;  %v525_v41 = vld [vmem:[%s9493_s30 + $0x268] sm:$0xff]  ;;  %v530_v43 = vld [vmem:[%s9493_s30 + $0x290] sm:$0xff] }
  0x7c   : > { %604 = vst.msk [vmem:[#allocation3 + $0x309] sm:$0xff] %vm284_vm0, %v507_v16  ;;  %609 = vst.msk [vmem:[#allocation3 + $0x379] sm:$0xff] %vm284_vm0, %v512_v17  ;;  %v767_v42 = vld [vmem:[#allocation3 + $0x169] sm:$0xff]  ;;  %v764_v44 = vld [vmem:[#allocation3 + $0x141] sm:$0xff] }
  0x7d   : > { %606 = vst.msk [vmem:[#allocation3 + $0x321] sm:$0xff] %vm284_vm0, %v509_v18  ;;  %611 = vst.msk [vmem:[#allocation3 + $0x391] sm:$0xff] %vm284_vm0, %v514_v21  ;;  %v527_v45 = vld [vmem:[%s9493_s30 + $0x278] sm:$0xff]  ;;  %v532_v46 = vld [vmem:[%s9493_s30 + $0x2a0] sm:$0xff] }
  0x7e   : > { %613 = vst.msk [vmem:[#allocation3 + $0x3a9] sm:$0xff] %vm284_vm0, %v516_v23  ;;  %610 = vst.msk [vmem:[#allocation3 + $0x381] sm:$0xff] %vm284_vm0, %v513_v24  ;;  %v529_v47 = vld [vmem:[%s9493_s30 + $0x288] sm:$0xff]  ;;  %v769_v48 = vld [vmem:[#allocation3 + $0x1b1] sm:$0xff] }
  0x7f   : > { %1634 = vrot.lane.b32.xlu0 %v753_v63, %s9099_s8  ;;  %1628 = vrot.lane.b32.xlu1 %v750_v1, %s9099_s8  ;;  %615 = vst.msk [vmem:[#allocation3 + $0x3c1] sm:$0xff] %vm284_vm0, %v518_v26  ;;  %612 = vst.msk [vmem:[#allocation3 + $0x399] sm:$0xff] %vm284_vm0, %v515_v27  ;;  %v766_v49 = vld [vmem:[#allocation3 + $0x159] sm:$0xff]  ;;  %v534_v50 = vld [vmem:[%s9493_s30 + $0x2b0] sm:$0xff] }
  0x80   : > { %617 = vst.msk [vmem:[#allocation3 + $0x3d9] sm:$0xff] %vm284_vm0, %v520_v28  ;;  %614 = vst.msk [vmem:[#allocation3 + $0x3b1] sm:$0xff] %vm284_vm0, %v517_v30  ;;  %v531_v51 = vld [vmem:[%s9493_s30 + $0x298] sm:$0xff]  ;;  %v536_v52 = vld [vmem:[%s9493_s30 + $0x2c0] sm:$0xff] }
  0x81   : > { %619 = vst.msk [vmem:[#allocation3 + $0x3f1] sm:$0xff] %vm284_vm0, %v522_v32  ;;  %616 = vst.msk [vmem:[#allocation3 + $0x3c9] sm:$0xff] %vm284_vm0, %v519_v33  ;;  %v533_v53 = vld [vmem:[%s9493_s30 + $0x2a8] sm:$0xff]  ;;  %v768_v55 = vld [vmem:[#allocation3 + $0x171] sm:$0xff] }
  0x82   : > { %621 = vst.msk [vmem:[#allocation3 + $0x409] sm:$0xff] %vm284_vm0, %v524_v34  ;;  %618 = vst.msk [vmem:[#allocation3 + $0x3e1] sm:$0xff] %vm284_vm0, %v521_v35  ;;  %v771_v54 = vld [vmem:[#allocation3 + $0x1c9] sm:$0xff]  ;;  %v535_v57 = vld [vmem:[%s9493_s30 + $0x2b8] sm:$0xff] }
  0x83   : > { %1638 = vrot.lane.b32.xlu0 %v755_v6, %s9099_s8  ;;  %1632 = vrot.lane.b32.xlu1 %v752_v8, %s9099_s8  ;;  %623 = vst.msk [vmem:[#allocation3 + $0x421] sm:$0xff] %vm284_vm0, %v526_v37  ;;  %620 = vst.msk [vmem:[#allocation3 + $0x3f9] sm:$0xff] %vm284_vm0, %v523_v39  ;;  %v538_v56 = vld [vmem:[%s9493_s30 + $0x2d0] sm:$0xff]  ;;  %v540_v58 = vld [vmem:[%s9493_s30 + $0x2e0] sm:$0xff] }
  0x84   : > { %625 = vst.msk [vmem:[#allocation3 + $0x439] sm:$0xff] %vm284_vm0, %v528_v40  ;;  %622 = vst.msk [vmem:[#allocation3 + $0x411] sm:$0xff] %vm284_vm0, %v525_v41  ;;  %v537_v59 = vld [vmem:[%s9493_s30 + $0x2c8] sm:$0xff]  ;;  %v770_v61 = vld [vmem:[#allocation3 + $0x1b9] sm:$0xff] }
  0x85   : > { %627 = vst.msk [vmem:[#allocation3 + $0x451] sm:$0xff] %vm284_vm0, %v530_v43  ;;  %624 = vst.msk [vmem:[#allocation3 + $0x429] sm:$0xff] %vm284_vm0, %v527_v45  ;;  %v773_v60 = vld [vmem:[#allocation3 + $0x1e1] sm:$0xff]  ;;  %v539_v62 = vld [vmem:[%s9493_s30 + $0x2d8] sm:$0xff] }
  0x86   : > { %629 = vst.msk [vmem:[#allocation3 + $0x469] sm:$0xff] %vm284_vm0, %v532_v46  ;;  %626 = vst.msk [vmem:[#allocation3 + $0x441] sm:$0xff] %vm284_vm0, %v529_v47  ;;  %v541_v63 = vld [vmem:[%s9493_s30 + $0x2e8] sm:$0xff]  ;;  %v775_v1 = vld [vmem:[#allocation3 + $0x1f9] sm:$0xff] }
  0x87   : > { %1642 = vrot.lane.b32.xlu0 %v757_v14, %s9099_s8  ;;  %1636 = vrot.lane.b32.xlu1 %v754_v15, %s9099_s8  ;;  %631 = vst.msk [vmem:[#allocation3 + $0x481] sm:$0xff] %vm284_vm0, %v534_v50  ;;  %628 = vst.msk [vmem:[#allocation3 + $0x459] sm:$0xff] %vm284_vm0, %v531_v51  ;;  %v772_v2 = vld [vmem:[#allocation3 + $0x1d1] sm:$0xff]  ;;  %v774_v4 = vld [vmem:[#allocation3 + $0x1e9] sm:$0xff] }
  0x88   : > { %633 = vst.msk [vmem:[#allocation3 + $0x499] sm:$0xff] %vm284_vm0, %v536_v52  ;;  %630 = vst.msk [vmem:[#allocation3 + $0x471] sm:$0xff] %vm284_vm0, %v533_v53  ;;  %v777_v3 = vld [vmem:[#allocation3 + $0x211] sm:$0xff]  ;;  %v779_v5 = vld [vmem:[#allocation3 + $0x229] sm:$0xff] }
  0x89   : > { %635 = vst.msk [vmem:[#allocation3 + $0x4b1] sm:$0xff] %vm284_vm0, %v538_v56  ;;  %632 = vst.msk [vmem:[#allocation3 + $0x489] sm:$0xff] %vm284_vm0, %v535_v57  ;;  %v776_v6 = vld [vmem:[#allocation3 + $0x201] sm:$0xff]  ;;  %v778_v8 = vld [vmem:[#allocation3 + $0x219] sm:$0xff] }
  0x8a   : > { %637 = vst.msk [vmem:[#allocation3 + $0x4c9] sm:$0xff] %vm284_vm0, %v540_v58  ;;  %634 = vst.msk [vmem:[#allocation3 + $0x4a1] sm:$0xff] %vm284_vm0, %v537_v59  ;;  %v781_v7 = vld [vmem:[#allocation3 + $0x241] sm:$0xff]  ;;  %v783_v9 = vld [vmem:[#allocation3 + $0x259] sm:$0xff] }
  0x8b   : > { %1646 = vrot.lane.b32.xlu0 %v759_v19, %s9099_s8  ;;  %1640 = vrot.lane.b32.xlu1 %v756_v20, %s9099_s8  ;;  %636 = vst.msk [vmem:[#allocation3 + $0x4b9] sm:$0xff] %vm284_vm0, %v539_v62  ;;  %638 = vst.msk [vmem:[#allocation3 + $0x4d1] sm:$0xff] %vm284_vm0, %v541_v63  ;;  %v780_v10 = vld [vmem:[#allocation3 + $0x231] sm:$0xff]  ;;  %v782_v12 = vld [vmem:[#allocation3 + $0x249] sm:$0xff] }
  0x8c   : > { %v785_v11 = vld [vmem:[#allocation3 + $0x271] sm:$0xff]  ;;  %v787_v13 = vld [vmem:[#allocation3 + $0x289] sm:$0xff]  ;;  %v784_v14 = vld [vmem:[#allocation3 + $0x261] sm:$0xff]  ;;  %6857 = vst.msk [vmem:[#allocation4] sm:$0xff] %vm4674_vm2, %v14630_v0 }
  0x8d   : > { %v789_v15 = vld [vmem:[#allocation3 + $0x2a1] sm:$0xff]  ;;  %v786_v16 = vld [vmem:[#allocation3 + $0x279] sm:$0xff]  ;;  %v788_v18 = vld [vmem:[#allocation3 + $0x291] sm:$0xff]  ;;  %6860 = vst.msk [vmem:[#allocation4 + $0x10] sm:$0xff] %vm4674_vm2, %v14630_v0 }
  0x8e   : > { %v791_v17 = vld [vmem:[#allocation3 + $0x2b9] sm:$0xff]  ;;  %v793_v19 = vld [vmem:[#allocation3 + $0x2d1] sm:$0xff]  ;;  %v790_v20 = vld [vmem:[#allocation3 + $0x2a9] sm:$0xff]  ;;  %6862 = vst.msk [vmem:[#allocation4 + $0x20] sm:$0xff] %vm4674_vm2, %v14630_v0 }
  0x8f   : > { %1650 = vrot.lane.b32.xlu0 %v761_v22, %s9099_s8  ;;  %1644 = vrot.lane.b32.xlu1 %v758_v25, %s9099_s8  ;;  %v795_v21 = vld [vmem:[#allocation3 + $0x2e9] sm:$0xff]  ;;  %v9731_v22 = vpop.permute.xlu0 %1602  ;;  %v792_v23 = vld [vmem:[#allocation3 + $0x2c1] sm:$0xff]  ;;  %v794_v26 = vld [vmem:[#allocation3 + $0x2d9] sm:$0xff]  ;;  %6864 = vst.msk [vmem:[#allocation4 + $0x30] sm:$0xff] %vm4674_vm2, %v14630_v0 }
  0x90   : > { %v797_v24 = vld [vmem:[#allocation3 + $0x301] sm:$0xff]  ;;  %v799_v27 = vld [vmem:[#allocation3 + $0x319] sm:$0xff]  ;;  %v798_v33 = vld [vmem:[#allocation3 + $0x309] sm:$0xff]  ;;  %6866 = vst.msk [vmem:[#allocation4 + $0x40] sm:$0xff] %vm4674_vm2, %v14630_v0 }
  0x91   : > { %v803_v35 = vld [vmem:[#allocation3 + $0x379] sm:$0xff]  ;;  %v800_v37 = vld [vmem:[#allocation3 + $0x321] sm:$0xff]  ;;  %v805_v39 = vld [vmem:[#allocation3 + $0x391] sm:$0xff]  ;;  %6868 = vst.msk [vmem:[#allocation4 + $0x50] sm:$0xff] %vm4674_vm2, %v14630_v0 }
  0x92   : > { %v802_v41 = vld [vmem:[#allocation3 + $0x369] sm:$0xff]  ;;  %v804_v45 = vld [vmem:[#allocation3 + $0x381] sm:$0xff]  ;;  %v811_v51 = vld [vmem:[#allocation3 + $0x3d9] sm:$0xff]  ;;  %6870 = vst.msk [vmem:[#allocation4 + $0x60] sm:$0xff] %vm4674_vm2, %v14630_v0 }
  0x93   : > { %1654 = vrot.lane.b32.xlu0 %v763_v29, %s9099_s8  ;;  %1648 = vrot.lane.b32.xlu1 %v760_v31, %s9099_s8  ;;  %v796_v29 = vld [vmem:[#allocation3 + $0x2f1] sm:$0xff]  ;;  %v801_v31 = vld [vmem:[#allocation3 + $0x361] sm:$0xff]  ;;  %v807_v43 = vld [vmem:[#allocation3 + $0x3a9] sm:$0xff]  ;;  %6872 = vst.msk [vmem:[#allocation4 + $0x70] sm:$0xff] %vm4674_vm2, %v14630_v0 }
  0x94   : > { %v809_v47 = vld [vmem:[#allocation3 + $0x3c1] sm:$0xff]  ;;  %v808_v53 = vld [vmem:[#allocation3 + $0x3b1] sm:$0xff]  ;;  %v810_v57 = vld [vmem:[#allocation3 + $0x3c9] sm:$0xff]  ;;  %6874 = vst.msk [vmem:[#allocation4 + $0x80] sm:$0xff] %vm4674_vm2, %v14630_v0 }
  0x95   : > { %v815_v59 = vld [vmem:[#allocation3 + $0x409] sm:$0xff]  ;;  %v817_v63 = vld [vmem:[#allocation3 + $0x421] sm:$0xff]  ;;  %6876 = vst.msk [vmem:[#allocation4 + $0x90] sm:$0xff] %vm4674_vm2, %v14630_v0  ;;  %6878 = vst.msk [vmem:[#allocation4 + $0xa0] sm:$0xff] %vm4674_vm2, %v14630_v0 }
  0x96   : > { %6880 = vst.msk [vmem:[#allocation4 + $0xb0] sm:$0xff] %vm4674_vm2, %v14630_v0  ;;  %6882 = vst.msk [vmem:[#allocation4 + $0xc0] sm:$0xff] %vm4674_vm2, %v14630_v0 }
  0x97   : > { %1658 = vrot.lane.b32.xlu0 %v765_v36, %s9099_s8  ;;  %1652 = vrot.lane.b32.xlu1 %v762_v38, %s9099_s8  ;;  %6884 = vst.msk [vmem:[#allocation4 + $0xd0] sm:$0xff] %vm4674_vm2, %v14630_v0  ;;  %6886 = vst.msk [vmem:[#allocation4 + $0xe0] sm:$0xff] %vm4674_vm2, %v14630_v0 }
  0x98   : > { %6888 = vst.msk [vmem:[#allocation4 + $0xf0] sm:$0xff] %vm4674_vm2, %v14630_v0  ;;  %6890 = vst.msk [vmem:[#allocation4 + $0x100] sm:$0xff] %vm4674_vm2, %v14630_v0 }
  0x99   : > { %6892 = vst.msk [vmem:[#allocation4 + $0x110] sm:$0xff] %vm4674_vm2, %v14630_v0  ;;  %6894 = vst.msk [vmem:[#allocation4 + $0x120] sm:$0xff] %vm4674_vm2, %v14630_v0 }
  0x9a   : > { %6896 = vst.msk [vmem:[#allocation4 + $0x130] sm:$0xff] %vm4674_vm2, %v14630_v0  ;;  %6898 = vst.msk [vmem:[#allocation4 + $0x140] sm:$0xff] %vm4674_vm2, %v14630_v0 }
  0x9b   : > { %1662 = vrot.lane.b32.xlu0 %v767_v42, %s9099_s8  ;;  %1656 = vrot.lane.b32.xlu1 %v764_v44, %s9099_s8  ;;  %6900 = vst.msk [vmem:[#allocation4 + $0x150] sm:$0xff] %vm4674_vm2, %v14630_v0  ;;  %6902 = vst.msk [vmem:[#allocation4 + $0x160] sm:$0xff] %vm4674_vm2, %v14630_v0 }
  0x9c   : > { %6904 = vst.msk [vmem:[#allocation4 + $0x170] sm:$0xff] %vm4674_vm2, %v14630_v0  ;;  %6906 = vst.msk [vmem:[#allocation4 + $0x180] sm:$0xff] %vm4674_vm2, %v14630_v0 }
  0x9d   : > { %6908 = vst.msk [vmem:[#allocation4 + $0x190] sm:$0xff] %vm4674_vm2, %v14630_v0  ;;  %6910 = vst.msk [vmem:[#allocation4 + $0x1a0] sm:$0xff] %vm4674_vm2, %v14630_v0 }
  0x9e   : > { %6912 = vst.msk [vmem:[#allocation4 + $0x1b0] sm:$0xff] %vm4674_vm2, %v14630_v0  ;;  %6914 = vst.msk [vmem:[#allocation4 + $0x1c0] sm:$0xff] %vm4674_vm2, %v14630_v0 }
  0x9f   : > { %1666 = vrot.lane.b32.xlu0 %v769_v48, %s9099_s8  ;;  %1660 = vrot.lane.b32.xlu1 %v766_v49, %s9099_s8  ;;  %v806_v49 = vld [vmem:[#allocation3 + $0x399] sm:$0xff]  ;;  %6916 = vst.msk [vmem:[#allocation4 + $0x1d0] sm:$0xff] %vm4674_vm2, %v14630_v0 }
  0xa3   : > { %1670 = vrot.lane.b32.xlu0 %v771_v54, %s9099_s8  ;;  %1664 = vrot.lane.b32.xlu1 %v768_v55, %s9099_s8  ;;  %v813_v55 = vld [vmem:[#allocation3 + $0x3f1] sm:$0xff] }
  0xa7   : > { %1674 = vrot.lane.b32.xlu0 %v773_v60, %s9099_s8  ;;  %1668 = vrot.lane.b32.xlu1 %v770_v61, %s9099_s8  ;;  %v812_v61 = vld [vmem:[#allocation3 + $0x3e1] sm:$0xff] }
  0xab   : > { %1678 = vrot.lane.b32.xlu0 %v775_v1, %s9099_s8  ;;  %1672 = vrot.lane.b32.xlu1 %v772_v2, %s9099_s8  ;;  %v814_v2 = vld [vmem:[#allocation3 + $0x3f9] sm:$0xff] }
  0xaf   : > { %1682 = vrot.lane.b32.xlu0 %v777_v3, %s9099_s8  ;;  %1676 = vrot.lane.b32.xlu1 %v774_v4, %s9099_s8  ;;  %v819_v4 = vld [vmem:[#allocation3 + $0x439] sm:$0xff] }
  0xb3   : > { %1686 = vrot.lane.b32.xlu0 %v779_v5, %s9099_s8  ;;  %1680 = vrot.lane.b32.xlu1 %v776_v6, %s9099_s8  ;;  %v816_v6 = vld [vmem:[#allocation3 + $0x411] sm:$0xff] }
  0xb7   : > { %1690 = vrot.lane.b32.xlu0 %v781_v7, %s9099_s8  ;;  %1684 = vrot.lane.b32.xlu1 %v778_v8, %s9099_s8  ;;  %v821_v8 = vld [vmem:[#allocation3 + $0x451] sm:$0xff] }
  0xbb   : > { %1694 = vrot.lane.b32.xlu0 %v783_v9, %s9099_s8  ;;  %1688 = vrot.lane.b32.xlu1 %v780_v10, %s9099_s8  ;;  %v818_v10 = vld [vmem:[#allocation3 + $0x429] sm:$0xff] }
  0xbe   : > { %v9735_v25 = vpop.permute.xlu0 %1604 }
  0xbf   : > { %1698 = vrot.lane.b32.xlu0 %v785_v11, %s9099_s8  ;;  %1692 = vrot.lane.b32.xlu1 %v782_v12, %s9099_s8  ;;  %v823_v12 = vld [vmem:[#allocation3 + $0x469] sm:$0xff] }
  0xc3   : > { %1702 = vrot.lane.b32.xlu0 %v787_v13, %s9099_s8  ;;  %1696 = vrot.lane.b32.xlu1 %v784_v14, %s9099_s8  ;;  %v820_v14 = vld [vmem:[#allocation3 + $0x441] sm:$0xff] }
  0xc7   : > { %1706 = vrot.lane.b32.xlu0 %v789_v15, %s9099_s8  ;;  %1700 = vrot.lane.b32.xlu1 %v786_v16, %s9099_s8  ;;  %v825_v16 = vld [vmem:[#allocation3 + $0x481] sm:$0xff] }
  0xcb   : > { %1710 = vrot.lane.b32.xlu0 %v791_v17, %s9099_s8  ;;  %1704 = vrot.lane.b32.xlu1 %v788_v18, %s9099_s8  ;;  %v822_v18 = vld [vmem:[#allocation3 + $0x459] sm:$0xff] }
  0xcf   : > { %1714 = vrot.lane.b32.xlu0 %v793_v19, %s9099_s8  ;;  %1708 = vrot.lane.b32.xlu1 %v790_v20, %s9099_s8  ;;  %v827_v20 = vld [vmem:[#allocation3 + $0x499] sm:$0xff] }
  0xd3   : > { %1718 = vrot.lane.b32.xlu0 %v795_v21, %s9099_s8  ;;  %1712 = vrot.lane.b32.xlu1 %v792_v23, %s9099_s8  ;;  %v824_v23 = vld [vmem:[#allocation3 + $0x471] sm:$0xff] }
  0xd7   : > { %1722 = vrot.lane.b32.xlu0 %v797_v24, %s9099_s8  ;;  %1716 = vrot.lane.b32.xlu1 %v794_v26, %s9099_s8  ;;  %v829_v26 = vld [vmem:[#allocation3 + $0x4b1] sm:$0xff] }
  0xd9   : > { %v9739_v28 = vpop.permute.xlu0 %1610  ;;  %v9741_v30 = vpop.permute.xlu1 %1606 }
  0xdb   : > { %1726 = vrot.lane.b32.xlu0 %v799_v27, %s9099_s8  ;;  %1720 = vrot.lane.b32.xlu1 %v796_v29, %s9099_s8  ;;  %v826_v29 = vld [vmem:[#allocation3 + $0x489] sm:$0xff] }
  0xdd   : > { %v9745_v32 = vpop.permute.xlu0 %1614  ;;  %v9747_v34 = vpop.permute.xlu1 %1608 }
  0xdf   : > { %1730 = vrot.lane.b32.xlu0 %v801_v31, %s9099_s8  ;;  %1724 = vrot.lane.b32.xlu1 %v798_v33, %s9099_s8  ;;  %v831_v33 = vld [vmem:[#allocation3 + $0x4c9] sm:$0xff] }
  0xe1   : > { %v9751_v36 = vpop.permute.xlu0 %1618  ;;  %v9753_v38 = vpop.permute.xlu1 %1612 }
  0xe3   : > { %1734 = vrot.lane.b32.xlu0 %v803_v35, %s9099_s8  ;;  %1728 = vrot.lane.b32.xlu1 %v800_v37, %s9099_s8  ;;  %v828_v37 = vld [vmem:[#allocation3 + $0x4a1] sm:$0xff] }
  0xe5   : > { %v9757_v40 = vpop.permute.xlu0 %1622  ;;  %v9759_v42 = vpop.permute.xlu1 %1616 }
  0xe7   : > { %1738 = vrot.lane.b32.xlu0 %v805_v39, %s9099_s8  ;;  %1732 = vrot.lane.b32.xlu1 %v802_v41, %s9099_s8  ;;  %v833_v41 = vld [vmem:[#allocation3 + $0x2] sm:$0xff] }
  0xe9   : > { %v9763_v44 = vpop.permute.xlu0 %1626  ;;  %v9765_v46 = vpop.permute.xlu1 %1620 }
  0xeb   : > { %1742 = vrot.lane.b32.xlu0 %v807_v43, %s9099_s8  ;;  %1736 = vrot.lane.b32.xlu1 %v804_v45, %s9099_s8  ;;  %v830_v45 = vld [vmem:[#allocation3 + $0x4b9] sm:$0xff] }
  0xed   : > { %v9769_v48 = vpop.permute.xlu0 %1630  ;;  %v9771_v50 = vpop.permute.xlu1 %1624 }
  0xef   : > { %1746 = vrot.lane.b32.xlu0 %v809_v47, %s9099_s8  ;;  %1740 = vrot.lane.b32.xlu1 %v806_v49, %s9099_s8  ;;  %v835_v49 = vld [vmem:[#allocation3 + $0x1a] sm:$0xff] }
  0xf1   : > { %v9775_v52 = vpop.permute.xlu0 %1634  ;;  %v9777_v54 = vpop.permute.xlu1 %1628 }
  0xf3   : > { %1750 = vrot.lane.b32.xlu0 %v811_v51, %s9099_s8  ;;  %1744 = vrot.lane.b32.xlu1 %v808_v53, %s9099_s8  ;;  %v832_v53 = vld [vmem:[#allocation3 + $0x4d1] sm:$0xff] }
  0xf5   : > { %v9781_v56 = vpop.permute.xlu0 %1638  ;;  %v9783_v58 = vpop.permute.xlu1 %1632 }
  0xf7   : > { %1754 = vrot.lane.b32.xlu0 %v813_v55, %s9099_s8  ;;  %1748 = vrot.lane.b32.xlu1 %v810_v57, %s9099_s8  ;;  %v837_v57 = vld [vmem:[#allocation3 + $0x32] sm:$0xff] }
  0xf9   : > { %v9787_v60 = vpop.permute.xlu0 %1642  ;;  %v9789_v62 = vpop.permute.xlu1 %1636 }
  0xfa   : > { %14632 = vst [vmem:[#allocation5_spill] sm:$0xff] %v9789_v62 }
  0xfb   : > { %1758 = vrot.lane.b32.xlu0 %v815_v59, %s9099_s8  ;;  %1752 = vrot.lane.b32.xlu1 %v812_v61, %s9099_s8  ;;  %v834_v61 = vld [vmem:[#allocation3 + $0xa] sm:$0xff] }
  0xfd   : > { %v9793_v1 = vpop.permute.xlu0 %1646  ;;  %v9795_v3 = vpop.permute.xlu1 %1640 }
  0xfe   : > { %14633 = vst [vmem:[#allocation6_spill] sm:$0xff] %v9793_v1  ;;  %14634 = vst [vmem:[#allocation7_spill] sm:$0xff] %v9795_v3 }
  0xff   : > { %1762 = vrot.lane.b32.xlu0 %v817_v63, %s9099_s8  ;;  %1756 = vrot.lane.b32.xlu1 %v814_v2, %s9099_s8  ;;  %v839_v2 = vld [vmem:[#allocation3 + $0x4a] sm:$0xff] }
 0x101   : > { %v9799_v5 = vpop.permute.xlu0 %1650  ;;  %v9801_v7 = vpop.permute.xlu1 %1644 }
 0x102   : > { %14635 = vst [vmem:[#allocation8_spill] sm:$0xff] %v9799_v5  ;;  %14636 = vst [vmem:[#allocation9_spill] sm:$0xff] %v9801_v7 }
 0x103   : > { %1766 = vrot.lane.b32.xlu0 %v819_v4, %s9099_s8  ;;  %1760 = vrot.lane.b32.xlu1 %v816_v6, %s9099_s8  ;;  %v836_v6 = vld [vmem:[#allocation3 + $0x22] sm:$0xff] }
 0x105   : > { %v9805_v9 = vpop.permute.xlu0 %1654  ;;  %v9807_v11 = vpop.permute.xlu1 %1648 }
 0x106   : > { %14637 = vst [vmem:[#allocation10_spill] sm:$0xff] %v9805_v9  ;;  %14638 = vst [vmem:[#allocation11_spill] sm:$0xff] %v9807_v11  ;;  %v1002_v9 = vld [vmem:[#allocation3 + $0x3e0] sm:$0xff] }
 0x107   : > { %1770 = vrot.lane.b32.xlu0 %v821_v8, %s9099_s8  ;;  %1764 = vrot.lane.b32.xlu1 %v818_v10, %s9099_s8  ;;  %v841_v10 = vld [vmem:[#allocation3 + $0x62] sm:$0xff] }
 0x109   : > { %v9811_v13 = vpop.permute.xlu0 %1658  ;;  %v9813_v15 = vpop.permute.xlu1 %1652 }
 0x10a   : > { %14639 = vst [vmem:[#allocation12_spill] sm:$0xff] %v9811_v13  ;;  %14640 = vst [vmem:[#allocation13_spill] sm:$0xff] %v9813_v15  ;;  %v996_v15 = vld [vmem:[#allocation3 + $0x398] sm:$0xff] }
 0x10b   : > { %1774 = vrot.lane.b32.xlu0 %v823_v12, %s9099_s8  ;;  %1768 = vrot.lane.b32.xlu1 %v820_v14, %s9099_s8  ;;  %v838_v14 = vld [vmem:[#allocation3 + $0x3a] sm:$0xff] }
 0x10d   : > { %v9817_v17 = vpop.permute.xlu0 %1662  ;;  %v9819_v19 = vpop.permute.xlu1 %1656 }
 0x10e   : > { %14641 = vst [vmem:[#allocation14_spill] sm:$0xff] %v9817_v17  ;;  %14642 = vst [vmem:[#allocation15_spill] sm:$0xff] %v9819_v19  ;;  %v918_v17 = vld [vmem:[#allocation3 + $0x45a] sm:$0xff] }
 0x10f   : > { %1778 = vrot.lane.b32.xlu0 %v825_v16, %s9099_s8  ;;  %1772 = vrot.lane.b32.xlu1 %v822_v18, %s9099_s8  ;;  %v843_v18 = vld [vmem:[#allocation3 + $0x7a] sm:$0xff] }
 0x111   : > { %v9823_v21 = vpop.permute.xlu0 %1666  ;;  %v9885_v24 = vpop.permute.xlu1 %1660 }
 0x112   : > { %14643 = vst [vmem:[#allocation16_spill] sm:$0xff] %v9823_v21  ;;  %14644 = vst [vmem:[#allocation17_spill] sm:$0xff] %v9885_v24  ;;  %v916_v21 = vld [vmem:[#allocation3 + $0x442] sm:$0xff] }
 0x113   : > { %1782 = vrot.lane.b32.xlu0 %v827_v20, %s9099_s8  ;;  %1776 = vrot.lane.b32.xlu1 %v824_v23, %s9099_s8  ;;  %v840_v23 = vld [vmem:[#allocation3 + $0x52] sm:$0xff] }
 0x115   : > { %v9889_v27 = vpop.permute.xlu0 %1670  ;;  %v9891_v31 = vpop.permute.xlu1 %1664 }
 0x116   : > { %14645 = vst [vmem:[#allocation18_spill] sm:$0xff] %v9889_v27  ;;  %14646 = vst [vmem:[#allocation19_spill] sm:$0xff] %v9891_v31 }
 0x117   : > { %1786 = vrot.lane.b32.xlu0 %v829_v26, %s9099_s8  ;;  %1780 = vrot.lane.b32.xlu1 %v826_v29, %s9099_s8  ;;  %v845_v29 = vld [vmem:[#allocation3 + $0x92] sm:$0xff] }
 0x119   : > { %v9895_v35 = vpop.permute.xlu0 %1674  ;;  %v9897_v39 = vpop.permute.xlu1 %1668 }
 0x11a   : > { %14647 = vst [vmem:[#allocation20_spill] sm:$0xff] %v9895_v35  ;;  %14648 = vst [vmem:[#allocation21_spill] sm:$0xff] %v9897_v39  ;;  %v914_v39 = vld [vmem:[#allocation3 + $0x42a] sm:$0xff] }
 0x11b   : > { %1790 = vrot.lane.b32.xlu0 %v831_v33, %s9099_s8  ;;  %1784 = vrot.lane.b32.xlu1 %v828_v37, %s9099_s8  ;;  %v842_v37 = vld [vmem:[#allocation3 + $0x6a] sm:$0xff] }
 0x11d   : > { %v9901_v43 = vpop.permute.xlu0 %1678  ;;  %v9903_v47 = vpop.permute.xlu1 %1672 }
 0x11e   : > { %14649 = vst [vmem:[#allocation22_spill] sm:$0xff] %v9901_v43  ;;  %14650 = vst [vmem:[#allocation23_spill] sm:$0xff] %v9903_v47  ;;  %v910_v47 = vld [vmem:[#allocation3 + $0x3fa] sm:$0xff] }
 0x11f   : > { %1986 = vrot.lane.b32.xlu0 %v833_v41, %s9100_s9  ;;  %1788 = vrot.lane.b32.xlu1 %v830_v45, %s9099_s8  ;;  %v847_v45 = vld [vmem:[#allocation3 + $0xaa] sm:$0xff] }
 0x121   : > { %v9907_v51 = vpop.permute.xlu0 %1682  ;;  %v9909_v55 = vpop.permute.xlu1 %1676 }
 0x122   : > { %14651 = vst [vmem:[#allocation24_spill] sm:$0xff] %v9907_v51  ;;  %14652 = vst [vmem:[#allocation25_spill] sm:$0xff] %v9909_v55  ;;  %v906_v55 = vld [vmem:[#allocation3 + $0x3ca] sm:$0xff] }
 0x123   : > { %1990 = vrot.lane.b32.xlu0 %v835_v49, %s9100_s9  ;;  %1792 = vrot.lane.b32.xlu1 %v832_v53, %s9099_s8  ;;  %v844_v53 = vld [vmem:[#allocation3 + $0x82] sm:$0xff] }
 0x125   : > { %v9913_v59 = vpop.permute.xlu0 %1686  ;;  %v9915_v63 = vpop.permute.xlu1 %1680 }
 0x126   : > { %14653 = vst [vmem:[#allocation26_spill] sm:$0xff] %v9913_v59  ;;  %14654 = vst [vmem:[#allocation27_spill] sm:$0xff] %v9915_v63  ;;  %v902_v63 = vld [vmem:[#allocation3 + $0x39a] sm:$0xff] }
 0x127   : > { %1994 = vrot.lane.b32.xlu0 %v837_v57, %s9100_s9  ;;  %1988 = vrot.lane.b32.xlu1 %v834_v61, %s9100_s9  ;;  %v849_v61 = vld [vmem:[#allocation3 + $0xc2] sm:$0xff] }
 0x129   : > { %v9919_v4 = vpop.permute.xlu0 %1690  ;;  %v9921_v8 = vpop.permute.xlu1 %1684 }
 0x12a   : > { %14655 = vst [vmem:[#allocation28_spill] sm:$0xff] %v9919_v4  ;;  %14656 = vst [vmem:[#allocation29_spill] sm:$0xff] %v9921_v8  ;;  %v898_v8 = vld [vmem:[#allocation3 + $0x36a] sm:$0xff] }
 0x12b   : > { %1998 = vrot.lane.b32.xlu0 %v839_v2, %s9100_s9  ;;  %1992 = vrot.lane.b32.xlu1 %v836_v6, %s9100_s9  ;;  %v846_v6 = vld [vmem:[#allocation3 + $0x9a] sm:$0xff] }
 0x12d   : > { %v9925_v12 = vpop.permute.xlu0 %1694  ;;  %v9927_v16 = vpop.permute.xlu1 %1688 }
 0x12e   : > { %14657 = vst [vmem:[#allocation30_spill] sm:$0xff] %v9925_v12  ;;  %14658 = vst [vmem:[#allocation31_spill] sm:$0xff] %v9927_v16 }
 0x12f   : > { %2002 = vrot.lane.b32.xlu0 %v841_v10, %s9100_s9  ;;  %1996 = vrot.lane.b32.xlu1 %v838_v14, %s9100_s9  ;;  %v851_v14 = vld [vmem:[#allocation3 + $0xda] sm:$0xff] }
 0x131   : > { %v9931_v20 = vpop.permute.xlu0 %1698  ;;  %v9933_v26 = vpop.permute.xlu1 %1692 }
 0x132   : > { %14659 = vst [vmem:[#allocation32_spill] sm:$0xff] %v9931_v20  ;;  %14660 = vst [vmem:[#allocation33_spill] sm:$0xff] %v9933_v26  ;;  %v866_v26 = vld [vmem:[#allocation3 + $0x1ba] sm:$0xff] }
 0x133   : > { %2006 = vrot.lane.b32.xlu0 %v843_v18, %s9100_s9  ;;  %2000 = vrot.lane.b32.xlu1 %v840_v23, %s9100_s9  ;;  %v848_v23 = vld [vmem:[#allocation3 + $0xb2] sm:$0xff] }
 0x135   : > { %v9937_v33 = vpop.permute.xlu0 %1702  ;;  %v9939_v41 = vpop.permute.xlu1 %1696 }
 0x136   : > { %14661 = vst [vmem:[#allocation34_spill] sm:$0xff] %v9937_v33  ;;  %14662 = vst [vmem:[#allocation35_spill] sm:$0xff] %v9939_v41  ;;  %v864_v41 = vld [vmem:[#allocation3 + $0x172] sm:$0xff] }
 0x137   : > { %2010 = vrot.lane.b32.xlu0 %v845_v29, %s9100_s9  ;;  %2004 = vrot.lane.b32.xlu1 %v842_v37, %s9100_s9  ;;  %v853_v37 = vld [vmem:[#allocation3 + $0xf2] sm:$0xff] }
 0x139   : > { %v9943_v49 = vpop.permute.xlu0 %1706  ;;  %v9945_v57 = vpop.permute.xlu1 %1700 }
 0x13a   : > { %14663 = vst [vmem:[#allocation36_spill] sm:$0xff] %v9943_v49  ;;  %14664 = vst [vmem:[#allocation37_spill] sm:$0xff] %v9945_v57  ;;  %v862_v57 = vld [vmem:[#allocation3 + $0x15a] sm:$0xff] }
 0x13b   : > { %2014 = vrot.lane.b32.xlu0 %v847_v45, %s9100_s9  ;;  %2008 = vrot.lane.b32.xlu1 %v844_v53, %s9100_s9  ;;  %v850_v53 = vld [vmem:[#allocation3 + $0xca] sm:$0xff] }
 0x13d   : > { %v9949_v2 = vpop.permute.xlu0 %1710  ;;  %v9951_v10 = vpop.permute.xlu1 %1704 }
 0x13e   : > { %14665 = vst [vmem:[#allocation38_spill] sm:$0xff] %v9949_v2  ;;  %14666 = vst [vmem:[#allocation39_spill] sm:$0xff] %v9951_v10 }
 0x13f   : > { %2018 = vrot.lane.b32.xlu0 %v849_v61, %s9100_s9  ;;  %2012 = vrot.lane.b32.xlu1 %v846_v6, %s9100_s9  ;;  %v855_v61 = vld [vmem:[#allocation3 + $0x10a] sm:$0xff] }
 0x141   : > { %v9955_v18 = vpop.permute.xlu0 %1714  ;;  %v9957_v29 = vpop.permute.xlu1 %1708 }
 0x142   : > { %14667 = vst [vmem:[#allocation40_spill] sm:$0xff] %v9955_v18  ;;  %14668 = vst [vmem:[#allocation41_spill] sm:$0xff] %v9957_v29  ;;  %v852_v18 = vld [vmem:[#allocation3 + $0xe2] sm:$0xff] }
 0x143   : > { %2022 = vrot.lane.b32.xlu0 %v851_v14, %s9100_s9  ;;  %2016 = vrot.lane.b32.xlu1 %v848_v23, %s9100_s9  ;;  %v857_v14 = vld [vmem:[#allocation3 + $0x122] sm:$0xff] }
 0x145   : > { %v9961_v45 = vpop.permute.xlu0 %1718  ;;  %v9963_v0 = vpop.permute.xlu1 %1712 }
 0x146   : > { %14669 = vst [vmem:[#allocation42_spill] sm:$0xff] %v9961_v45  ;;  %14670 = vst [vmem:[#allocation43_spill] sm:$0xff] %v9963_v0  ;;  %v854_v45 = vld [vmem:[#allocation3 + $0xfa] sm:$0xff]  ;;  %v856_v0 = vld [vmem:[#allocation3 + $0x112] sm:$0xff] }
 0x147   : > { %2026 = vrot.lane.b32.xlu0 %v853_v37, %s9100_s9  ;;  %2020 = vrot.lane.b32.xlu1 %v850_v53, %s9100_s9  ;;  %v859_v37 = vld [vmem:[#allocation3 + $0x13a] sm:$0xff] }
 0x149   : > { %v9967_v6 = vpop.permute.xlu0 %1722  ;;  %v9969_v2 = vpop.permute.xlu1 %1716 }
 0x14a   : > { %14671 = vst [vmem:[#allocation44_spill] sm:$0xff] %v9967_v6  ;;  %14672 = vst [vmem:[#allocation45_spill] sm:$0xff] %v9969_v2  ;;  %v858_v2 = vld [vmem:[#allocation3 + $0x12a] sm:$0xff] }
 0x14b   : > { %2030 = vrot.lane.b32.xlu0 %v855_v61, %s9100_s9  ;;  %2024 = vrot.lane.b32.xlu1 %v852_v18, %s9100_s9  ;;  %v861_v18 = vld [vmem:[#allocation3 + $0x152] sm:$0xff] }
 0x14d   : > { %v9973_v23 = vpop.permute.xlu0 %1726  ;;  %v9975_v29 = vpop.permute.xlu1 %1720 }
 0x14e   : > { %14673 = vst [vmem:[#allocation46_spill] sm:$0xff] %v9973_v23  ;;  %14674 = vst [vmem:[#allocation47_spill] sm:$0xff] %v9975_v29  ;;  %v860_v29 = vld [vmem:[#allocation3 + $0x142] sm:$0xff] }
 0x14f   : > { %2034 = vrot.lane.b32.xlu0 %v857_v14, %s9100_s9  ;;  %2028 = vrot.lane.b32.xlu1 %v854_v45, %s9100_s9  ;;  %v863_v45 = vld [vmem:[#allocation3 + $0x16a] sm:$0xff] }
 0x151   : > { %v9979_v53 = vpop.permute.xlu0 %1730  ;;  %v9981_v49 = vpop.permute.xlu1 %1724 }
 0x152   : > { %14675 = vst [vmem:[#allocation48_spill] sm:$0xff] %v9979_v53  ;;  %14676 = vst [vmem:[#allocation49_spill] sm:$0xff] %v9981_v49  ;;  %v912_v49 = vld [vmem:[#allocation3 + $0x412] sm:$0xff] }
 0x153   : > { %2038 = vrot.lane.b32.xlu0 %v859_v37, %s9100_s9  ;;  %2032 = vrot.lane.b32.xlu1 %v856_v0, %s9100_s9  ;;  %v865_v0 = vld [vmem:[#allocation3 + $0x1b2] sm:$0xff] }
 0x155   : > { %v9985_v61 = vpop.permute.xlu0 %1734  ;;  %v9987_v10 = vpop.permute.xlu1 %1728 }
 0x156   : > { %14677 = vst [vmem:[#allocation50_spill] sm:$0xff] %v9985_v61  ;;  %14678 = vst [vmem:[#allocation51_spill] sm:$0xff] %v9987_v10  ;;  %v908_v10 = vld [vmem:[#allocation3 + $0x3e2] sm:$0xff] }
 0x157   : > { %2042 = vrot.lane.b32.xlu0 %v861_v18, %s9100_s9  ;;  %2036 = vrot.lane.b32.xlu1 %v858_v2, %s9100_s9  ;;  %v867_v2 = vld [vmem:[#allocation3 + $0x1ca] sm:$0xff] }
 0x159   : > { %v9991_v14 = vpop.permute.xlu0 %1738  ;;  %v9993_v33 = vpop.permute.xlu1 %1732 }
 0x15a   : > { %14679 = vst [vmem:[#allocation52_spill] sm:$0xff] %v9991_v14  ;;  %14680 = vst [vmem:[#allocation53_spill] sm:$0xff] %v9993_v33  ;;  %v896_v14 = vld [vmem:[#allocation3 + $0x322] sm:$0xff]  ;;  %v904_v33 = vld [vmem:[#allocation3 + $0x3b2] sm:$0xff] }
 0x15b   : > { %2046 = vrot.lane.b32.xlu0 %v863_v45, %s9100_s9  ;;  %2040 = vrot.lane.b32.xlu1 %v860_v29, %s9100_s9  ;;  %v869_v29 = vld [vmem:[#allocation3 + $0x1e2] sm:$0xff] }
 0x15d   : > { %v9997_v37 = vpop.permute.xlu0 %1742  ;;  %v9999_v20 = vpop.permute.xlu1 %1736 }
 0x15e   : > { %14681 = vst [vmem:[#allocation54_spill] sm:$0xff] %v9997_v37  ;;  %14682 = vst [vmem:[#allocation55_spill] sm:$0xff] %v9999_v20  ;;  %v900_v20 = vld [vmem:[#allocation3 + $0x382] sm:$0xff] }
 0x15f   : > { %2050 = vrot.lane.b32.xlu0 %v865_v0, %s9100_s9  ;;  %2044 = vrot.lane.b32.xlu1 %v862_v57, %s9100_s9  ;;  %v871_v57 = vld [vmem:[#allocation3 + $0x1fa] sm:$0xff] }
 0x161   : > { %v10003_v18 = vpop.permute.xlu0 %1746  ;;  %v10005_v12 = vpop.permute.xlu1 %1740 }
 0x162   : > { %14683 = vst [vmem:[#allocation56_spill] sm:$0xff] %v10003_v18  ;;  %14684 = vst [vmem:[#allocation57_spill] sm:$0xff] %v10005_v12  ;;  %v868_v18 = vld [vmem:[#allocation3 + $0x1d2] sm:$0xff] }
 0x163   : > { %2054 = vrot.lane.b32.xlu0 %v867_v2, %s9100_s9  ;;  %2048 = vrot.lane.b32.xlu1 %v864_v41, %s9100_s9  ;;  %v873_v41 = vld [vmem:[#allocation3 + $0x212] sm:$0xff] }
 0x165   : > { %v10009_v45 = vpop.permute.xlu0 %1750  ;;  %v10011_v4 = vpop.permute.xlu1 %1744 }
 0x166   : > { %14685 = vst [vmem:[#allocation58_spill] sm:$0xff] %v10009_v45  ;;  %14686 = vst [vmem:[#allocation59_spill] sm:$0xff] %v10011_v4  ;;  %v870_v45 = vld [vmem:[#allocation3 + $0x1ea] sm:$0xff] }
 0x167   : > { %2058 = vrot.lane.b32.xlu0 %v869_v29, %s9100_s9  ;;  %2052 = vrot.lane.b32.xlu1 %v866_v26, %s9100_s9  ;;  %v875_v26 = vld [vmem:[#allocation3 + $0x22a] sm:$0xff] }
 0x169   : > { %v10015_v0 = vpop.permute.xlu0 %1754  ;;  %v10017_v37 = vpop.permute.xlu1 %1748 }
 0x16a   : > { %14687 = vst [vmem:[#allocation60_spill] sm:$0xff] %v10015_v0  ;;  %14688 = vst [vmem:[#allocation61_spill] sm:$0xff] %v10017_v37  ;;  %v872_v0 = vld [vmem:[#allocation3 + $0x202] sm:$0xff] }
 0x16b   : > { %2062 = vrot.lane.b32.xlu0 %v871_v57, %s9100_s9  ;;  %2056 = vrot.lane.b32.xlu1 %v868_v18, %s9100_s9  ;;  %v877_v18 = vld [vmem:[#allocation3 + $0x242] sm:$0xff] }
 0x16d   : > { %v10021_v2 = vpop.permute.xlu0 %1758  ;;  %v10023_v16 = vpop.permute.xlu1 %1752 }
 0x16e   : > { %14689 = vst [vmem:[#allocation62_spill] sm:$0xff] %v10021_v2  ;;  %14690 = vst [vmem:[#allocation63_spill] sm:$0xff] %v10023_v16  ;;  %v874_v2 = vld [vmem:[#allocation3 + $0x21a] sm:$0xff] }
 0x16f   : > { %2066 = vrot.lane.b32.xlu0 %v873_v41, %s9100_s9  ;;  %2060 = vrot.lane.b32.xlu1 %v870_v45, %s9100_s9  ;;  %v879_v45 = vld [vmem:[#allocation3 + $0x25a] sm:$0xff] }
 0x171   : > { %v10027_v29 = vpop.permute.xlu0 %1762  ;;  %v10029_v4 = vpop.permute.xlu1 %1756 }
 0x172   : > { %14691 = vst [vmem:[#allocation64_spill] sm:$0xff] %v10027_v29  ;;  %14692 = vst [vmem:[#allocation65_spill] sm:$0xff] %v10029_v4  ;;  %v876_v29 = vld [vmem:[#allocation3 + $0x232] sm:$0xff] }
 0x173   : > { %2070 = vrot.lane.b32.xlu0 %v875_v26, %s9100_s9  ;;  %2064 = vrot.lane.b32.xlu1 %v872_v0, %s9100_s9  ;;  %v881_v0 = vld [vmem:[#allocation3 + $0x272] sm:$0xff] }
 0x175   : > { %v10033_v57 = vpop.permute.xlu0 %1766  ;;  %v10035_v37 = vpop.permute.xlu1 %1760 }
 0x176   : > { %14693 = vst [vmem:[#allocation66_spill] sm:$0xff] %v10033_v57  ;;  %14694 = vst [vmem:[#allocation67_spill] sm:$0xff] %v10035_v37  ;;  %v878_v57 = vld [vmem:[#allocation3 + $0x24a] sm:$0xff] }
 0x177   : > { %2074 = vrot.lane.b32.xlu0 %v877_v18, %s9100_s9  ;;  %2068 = vrot.lane.b32.xlu1 %v874_v2, %s9100_s9  ;;  %v883_v2 = vld [vmem:[#allocation3 + $0x28a] sm:$0xff] }
 0x179   : > { %v10039_v41 = vpop.permute.xlu0 %1770  ;;  %v10041_v16 = vpop.permute.xlu1 %1764 }
 0x17a   : > { %14695 = vst [vmem:[#allocation68_spill] sm:$0xff] %v10039_v41  ;;  %14696 = vst [vmem:[#allocation69_spill] sm:$0xff] %v10041_v16  ;;  %v880_v41 = vld [vmem:[#allocation3 + $0x262] sm:$0xff] }
 0x17b   : > { %2078 = vrot.lane.b32.xlu0 %v879_v45, %s9100_s9  ;;  %2072 = vrot.lane.b32.xlu1 %v876_v29, %s9100_s9  ;;  %v885_v29 = vld [vmem:[#allocation3 + $0x2a2] sm:$0xff] }
 0x17d   : > { %v10045_v26 = vpop.permute.xlu0 %1774  ;;  %v10047_v4 = vpop.permute.xlu1 %1768 }
 0x17e   : > { %14697 = vst [vmem:[#allocation70_spill] sm:$0xff] %v10045_v26  ;;  %14698 = vst [vmem:[#allocation71_spill] sm:$0xff] %v10047_v4  ;;  %v882_v26 = vld [vmem:[#allocation3 + $0x27a] sm:$0xff] }
 0x17f   : > { %2082 = vrot.lane.b32.xlu0 %v881_v0, %s9100_s9  ;;  %2076 = vrot.lane.b32.xlu1 %v878_v57, %s9100_s9  ;;  %v887_v57 = vld [vmem:[#allocation3 + $0x2ba] sm:$0xff] }
 0x181   : > { %v10051_v18 = vpop.permute.xlu0 %1778  ;;  %v10053_v37 = vpop.permute.xlu1 %1772 }
 0x182   : > { %14699 = vst [vmem:[#allocation72_spill] sm:$0xff] %v10051_v18  ;;  %14700 = vst [vmem:[#allocation73_spill] sm:$0xff] %v10053_v37  ;;  %v884_v18 = vld [vmem:[#allocation3 + $0x292] sm:$0xff] }
 0x183   : > { %2086 = vrot.lane.b32.xlu0 %v883_v2, %s9100_s9  ;;  %2080 = vrot.lane.b32.xlu1 %v880_v41, %s9100_s9  ;;  %v889_v41 = vld [vmem:[#allocation3 + $0x2d2] sm:$0xff] }
 0x185   : > { %v10057_v45 = vpop.permute.xlu0 %1782  ;;  %v10059_v16 = vpop.permute.xlu1 %1776 }
 0x186   : > { %14701 = vst [vmem:[#allocation74_spill] sm:$0xff] %v10057_v45  ;;  %14702 = vst [vmem:[#allocation75_spill] sm:$0xff] %v10059_v16  ;;  %v886_v45 = vld [vmem:[#allocation3 + $0x2aa] sm:$0xff] }
 0x187   : > { %2090 = vrot.lane.b32.xlu0 %v885_v29, %s9100_s9  ;;  %2084 = vrot.lane.b32.xlu1 %v882_v26, %s9100_s9  ;;  %v891_v26 = vld [vmem:[#allocation3 + $0x2ea] sm:$0xff] }
 0x189   : > { %v10063_v0 = vpop.permute.xlu0 %1786  ;;  %v10065_v37 = vpop.permute.xlu1 %1780 }
 0x18a   : > { %14703 = vst [vmem:[#allocation76_spill] sm:$0xff] %v10063_v0  ;;  %14704 = vst [vmem:[#allocation77_spill] sm:$0xff] %v10065_v37  ;;  %v888_v0 = vld [vmem:[#allocation3 + $0x2c2] sm:$0xff]  ;;  %v892_v37 = vld [vmem:[#allocation3 + $0x2f2] sm:$0xff] }
 0x18b   : > { %2094 = vrot.lane.b32.xlu0 %v887_v57, %s9100_s9  ;;  %2088 = vrot.lane.b32.xlu1 %v884_v18, %s9100_s9  ;;  %v478_v18 = vld [vmem:[%s9493_s30 + $0xf0] sm:$0xff]  ;;  %v893_v57 = vld [vmem:[#allocation3 + $0x302] sm:$0xff] }
 0x18c   : > { %575 = vst.msk [vmem:[#allocation3 + $0x181] sm:$0xff] %vm284_vm0, %v478_v18  ;;  %v897_v18 = vld [vmem:[#allocation3 + $0x362] sm:$0xff] }
 0x18d   : > { %v10069_v2 = vpop.permute.xlu0 %1790  ;;  %v10071_v16 = vpop.permute.xlu1 %1784 }
 0x18e   : > { %14705 = vst [vmem:[#allocation78_spill] sm:$0xff] %v10069_v2  ;;  %14706 = vst [vmem:[#allocation79_spill] sm:$0xff] %v10071_v16 }
 0x18f   : > { %2098 = vrot.lane.b32.xlu0 %v889_v41, %s9100_s9  ;;  %2092 = vrot.lane.b32.xlu1 %v886_v45, %s9100_s9  ;;  %v890_v41 = vld [vmem:[#allocation3 + $0x2da] sm:$0xff] }
 0x190   : > { %v895_v45 = vld [vmem:[#allocation3 + $0x31a] sm:$0xff] }
 0x191   : > { %v10075_v29 = vpop.permute.xlu0 %1986  ;;  %v10077_v4 = vpop.permute.xlu1 %1788 }
 0x192   : > { %14707 = vst [vmem:[#allocation80_spill] sm:$0xff] %v10077_v4 }
 0x193   : > { %2102 = vrot.lane.b32.xlu0 %v891_v26, %s9100_s9  ;;  %2096 = vrot.lane.b32.xlu1 %v888_v0, %s9100_s9  ;;  %v479_v0 = vld [vmem:[%s9493_s30 + $0xf8] sm:$0xff] }
 0x194   : > { %576 = vst.msk [vmem:[#allocation3 + $0x189] sm:$0xff] %vm284_vm0, %v479_v0 }
 0x195   : > { %v10083_v2 = vpop.permute.xlu0 %1990  ;;  %v10085_v16 = vpop.permute.xlu1 %1792 }
 0x196   : > { %14708 = vst [vmem:[#allocation81_spill] sm:$0xff] %v10085_v16  ;;  %v894_v16 = vld [vmem:[#allocation3 + $0x30a] sm:$0xff] }
 0x197   : > { %2106 = vrot.lane.b32.xlu0 %v893_v57, %s9100_s9  ;;  %2100 = vrot.lane.b32.xlu1 %v890_v41, %s9100_s9  ;;  %v899_v41 = vld [vmem:[#allocation3 + $0x37a] sm:$0xff] }
 0x199   : > { %v10089_v4 = vpop.permute.xlu0 %1994  ;;  %v10091_v26 = vpop.permute.xlu1 %1988 }
 0x19b   : > { %2110 = vrot.lane.b32.xlu0 %v895_v45, %s9100_s9  ;;  %2104 = vrot.lane.b32.xlu1 %v892_v37, %s9100_s9  ;;  %v901_v37 = vld [vmem:[#allocation3 + $0x392] sm:$0xff] }
 0x19d   : > { %v10097_v59 = vpop.permute.xlu0 %1998  ;;  %v10099_v57 = vpop.permute.xlu1 %1992 }
 0x19f   : > { %2114 = vrot.lane.b32.xlu0 %v897_v18, %s9100_s9  ;;  %2108 = vrot.lane.b32.xlu1 %v894_v16, %s9100_s9  ;;  %v903_v16 = vld [vmem:[#allocation3 + $0x3aa] sm:$0xff] }
 0x1a1   : > { %v10103_v12 = vpop.permute.xlu0 %2002  ;;  %v10105_v45 = vpop.permute.xlu1 %1996 }
 0x1a2   : > { %14709 = vst [vmem:[#allocation82_spill] sm:$0xff] %v10103_v12 }
 0x1a3   : > { %2118 = vrot.lane.b32.xlu0 %v899_v41, %s9100_s9  ;;  %2112 = vrot.lane.b32.xlu1 %v896_v14, %s9100_s9  ;;  %v905_v14 = vld [vmem:[#allocation3 + $0x3c2] sm:$0xff] }
 0x1a5   : > { %v10109_v0 = vpop.permute.xlu0 %2006  ;;  %v10111_v51 = vpop.permute.xlu1 %2000 }
 0x1a6   : > { %14710 = vst [vmem:[#allocation83_spill] sm:$0xff] %v10109_v0  ;;  %14711 = vst [vmem:[#allocation84_spill] sm:$0xff] %v10111_v51  ;;  %v1186_v0 = vld [vmem:[#allocation3 + $0x382] sm:$0xff] }
 0x1a7   : > { %2122 = vrot.lane.b32.xlu0 %v901_v37, %s9100_s9  ;;  %2116 = vrot.lane.b32.xlu1 %v898_v8, %s9100_s9  ;;  %v907_v8 = vld [vmem:[#allocation3 + $0x3da] sm:$0xff] }
 0x1a9   : > { %v10115_v18 = vpop.permute.xlu0 %2010  ;;  %v10117_v61 = vpop.permute.xlu1 %2004 }
 0x1aa   : > { %14712 = vst [vmem:[#allocation85_spill] sm:$0xff] %v10115_v18  ;;  %14713 = vst [vmem:[#allocation86_spill] sm:$0xff] %v10117_v61  ;;  %v1094_v18 = vld [vmem:[#allocation3 + $0x3b1] sm:$0xff] }
 0x1ab   : > { %2126 = vrot.lane.b32.xlu0 %v903_v16, %s9100_s9  ;;  %2120 = vrot.lane.b32.xlu1 %v900_v20, %s9100_s9  ;;  %v909_v20 = vld [vmem:[#allocation3 + $0x3f2] sm:$0xff] }
 0x1ad   : > { %v10121_v41 = vpop.permute.xlu0 %2014  ;;  %v10123_v43 = vpop.permute.xlu1 %2008 }
 0x1ae   : > { %14714 = vst [vmem:[#allocation87_spill] sm:$0xff] %v10121_v41  ;;  %14715 = vst [vmem:[#allocation88_spill] sm:$0xff] %v10123_v43 }
 0x1af   : > { %2130 = vrot.lane.b32.xlu0 %v905_v14, %s9100_s9  ;;  %2124 = vrot.lane.b32.xlu1 %v902_v63, %s9100_s9  ;;  %v911_v63 = vld [vmem:[#allocation3 + $0x40a] sm:$0xff] }
 0x1b1   : > { %v10127_v37 = vpop.permute.xlu0 %2018  ;;  %v10129_v53 = vpop.permute.xlu1 %2012 }
 0x1b2   : > { %14716 = vst [vmem:[#allocation89_spill] sm:$0xff] %v10127_v37  ;;  %14717 = vst [vmem:[#allocation90_spill] sm:$0xff] %v10129_v53  ;;  %v1090_v53 = vld [vmem:[#allocation3 + $0x381] sm:$0xff] }
 0x1b3   : > { %2134 = vrot.lane.b32.xlu0 %v907_v8, %s9100_s9  ;;  %2128 = vrot.lane.b32.xlu1 %v904_v33, %s9100_s9  ;;  %v913_v33 = vld [vmem:[#allocation3 + $0x422] sm:$0xff] }
 0x1b5   : > { %v10133_v16 = vpop.permute.xlu0 %2022  ;;  %v10135_v35 = vpop.permute.xlu1 %2016 }
 0x1b6   : > { %14718 = vst [vmem:[#allocation91_spill] sm:$0xff] %v10133_v16  ;;  %14719 = vst [vmem:[#allocation92_spill] sm:$0xff] %v10135_v35  ;;  %v1000_v16 = vld [vmem:[#allocation3 + $0x3c8] sm:$0xff] }
 0x1b7   : > { %2138 = vrot.lane.b32.xlu0 %v909_v20, %s9100_s9  ;;  %2132 = vrot.lane.b32.xlu1 %v906_v55, %s9100_s9  ;;  %v915_v55 = vld [vmem:[#allocation3 + $0x43a] sm:$0xff] }
 0x1b9   : > { %v10139_v14 = vpop.permute.xlu0 %2026  ;;  %v10141_v23 = vpop.permute.xlu1 %2020 }
 0x1ba   : > { %14720 = vst [vmem:[#allocation93_spill] sm:$0xff] %v10139_v14  ;;  %14721 = vst [vmem:[#allocation94_spill] sm:$0xff] %v10141_v23 }
 0x1bb   : > { %2142 = vrot.lane.b32.xlu0 %v911_v63, %s9100_s9  ;;  %2136 = vrot.lane.b32.xlu1 %v908_v10, %s9100_s9  ;;  %v917_v10 = vld [vmem:[#allocation3 + $0x452] sm:$0xff] }
 0x1bd   : > { %v10145_v8 = vpop.permute.xlu0 %2030  ;;  %v10147_v27 = vpop.permute.xlu1 %2024 }
 0x1be   : > { %14722 = vst [vmem:[#allocation95_spill] sm:$0xff] %v10145_v8  ;;  %14723 = vst [vmem:[#allocation96_spill] sm:$0xff] %v10147_v27  ;;  %v994_v8 = vld [vmem:[#allocation3 + $0x380] sm:$0xff]  ;;  %v998_v27 = vld [vmem:[#allocation3 + $0x3b0] sm:$0xff] }
 0x1bf   : > { %2146 = vrot.lane.b32.xlu0 %v913_v33, %s9100_s9  ;;  %2140 = vrot.lane.b32.xlu1 %v910_v47, %s9100_s9  ;;  %v919_v47 = vld [vmem:[#allocation3 + $0x46a] sm:$0xff] }
 0x1c1   : > { %v10151_v20 = vpop.permute.xlu0 %2034  ;;  %v10153_v6 = vpop.permute.xlu1 %2028 }
 0x1c2   : > { %14724 = vst [vmem:[#allocation97_spill] sm:$0xff] %v10151_v20  ;;  %14725 = vst [vmem:[#allocation98_spill] sm:$0xff] %v10153_v6 }
 0x1c3   : > { %2150 = vrot.lane.b32.xlu0 %v915_v55, %s9100_s9  ;;  %2144 = vrot.lane.b32.xlu1 %v912_v49, %s9100_s9  ;;  %v921_v49 = vld [vmem:[#allocation3 + $0x482] sm:$0xff] }
 0x1c5   : > { %v10157_v63 = vpop.permute.xlu0 %2038  ;;  %v10159_v31 = vpop.permute.xlu1 %2032 }
 0x1c6   : > { %14726 = vst [vmem:[#allocation99_spill] sm:$0xff] %v10157_v63  ;;  %14727 = vst [vmem:[#allocation100_spill] sm:$0xff] %v10159_v31 }
 0x1c7   : > { %2154 = vrot.lane.b32.xlu0 %v917_v10, %s9100_s9  ;;  %2148 = vrot.lane.b32.xlu1 %v914_v39, %s9100_s9  ;;  %v923_v39 = vld [vmem:[#allocation3 + $0x49a] sm:$0xff] }
 0x1c9   : > { %v10163_v33 = vpop.permute.xlu0 %2042  ;;  %v10165_v24 = vpop.permute.xlu1 %2036 }
 0x1ca   : > { %14728 = vst [vmem:[#allocation101_spill] sm:$0xff] %v10163_v33  ;;  %14729 = vst [vmem:[#allocation102_spill] sm:$0xff] %v10165_v24  ;;  %v920_v33 = vld [vmem:[#allocation3 + $0x472] sm:$0xff] }
 0x1cb   : > { %2158 = vrot.lane.b32.xlu0 %v919_v47, %s9100_s9  ;;  %2152 = vrot.lane.b32.xlu1 %v916_v21, %s9100_s9  ;;  %v510_v21 = vld [vmem:[%s9493_s30 + $0x1f0] sm:$0xff] }
 0x1cc   : > { %v925_v47 = vld [vmem:[#allocation3 + $0x4b2] sm:$0xff]  ;;  %607 = vst.msk [vmem:[#allocation3 + $0x331] sm:$0xff] %vm284_vm0, %v510_v21 }
 0x1cd   : > { %v10169_v55 = vpop.permute.xlu0 %2046  ;;  %v10171_v19 = vpop.permute.xlu1 %2040  ;;  %v929_v21 = vld [vmem:[#allocation3 + $0x18] sm:$0xff] }
 0x1ce   : > { %14730 = vst [vmem:[#allocation103_spill] sm:$0xff] %v10169_v55  ;;  %14731 = vst [vmem:[#allocation104_spill] sm:$0xff] %v10171_v19 }
 0x1cf   : > { %2162 = vrot.lane.b32.xlu0 %v921_v49, %s9100_s9  ;;  %2156 = vrot.lane.b32.xlu1 %v918_v17, %s9100_s9  ;;  %v922_v49 = vld [vmem:[#allocation3 + $0x48a] sm:$0xff] }
 0x1d0   : > { %v927_v17 = vld [vmem:[#allocation3 + $0x4ca] sm:$0xff] }
 0x1d1   : > { %v10175_v10 = vpop.permute.xlu0 %2050  ;;  %v10177_v13 = vpop.permute.xlu1 %2044 }
 0x1d2   : > { %14732 = vst [vmem:[#allocation105_spill] sm:$0xff] %v10175_v10  ;;  %14733 = vst [vmem:[#allocation106_spill] sm:$0xff] %v10177_v13  ;;  %v924_v13 = vld [vmem:[#allocation3 + $0x4a2] sm:$0xff] }
 0x1d3   : > { %2166 = vrot.lane.b32.xlu0 %v923_v39, %s9100_s9  ;;  %2160 = vrot.lane.b32.xlu1 %v920_v33, %s9100_s9  ;;  %v511_v33 = vld [vmem:[%s9493_s30 + $0x1f8] sm:$0xff] }
 0x1d4   : > { %608 = vst.msk [vmem:[#allocation3 + $0x339] sm:$0xff] %vm284_vm0, %v511_v33 }
 0x1d5   : > { %v10183_v55 = vpop.permute.xlu0 %2054  ;;  %v10185_v19 = vpop.permute.xlu1 %2048 }
 0x1d6   : > { %14734 = vst [vmem:[#allocation107_spill] sm:$0xff] %v10183_v55  ;;  %14735 = vst [vmem:[#allocation108_spill] sm:$0xff] %v10185_v19  ;;  %v926_v19 = vld [vmem:[#allocation3 + $0x4ba] sm:$0xff] }
 0x1d7   : > { %2170 = vrot.lane.b32.xlu0 %v925_v47, %s9100_s9  ;;  %2164 = vrot.lane.b32.xlu1 %v922_v49, %s9100_s9  ;;  %v931_v49 = vld [vmem:[#allocation3 + $0x30] sm:$0xff] }
 0x1d9   : > { %v10189_v10 = vpop.permute.xlu0 %2058  ;;  %v10191_v39 = vpop.permute.xlu1 %2052 }
 0x1da   : > { %14736 = vst [vmem:[#allocation109_spill] sm:$0xff] %v10189_v10  ;;  %14737 = vst [vmem:[#allocation110_spill] sm:$0xff] %v10191_v39 }
 0x1db   : > { %2174 = vrot.lane.b32.xlu0 %v927_v17, %s9100_s9  ;;  %2168 = vrot.lane.b32.xlu1 %v924_v13, %s9100_s9  ;;  %v928_v17 = vld [vmem:[#allocation3 + $0x4d2] sm:$0xff]  ;;  %v933_v13 = vld [vmem:[#allocation3 + $0x48] sm:$0xff] }
 0x1dd   : > { %v10197_v55 = vpop.permute.xlu0 %2062  ;;  %v10199_v47 = vpop.permute.xlu1 %2056 }
 0x1de   : > { %14738 = vst [vmem:[#allocation111_spill] sm:$0xff] %v10197_v55  ;;  %14739 = vst [vmem:[#allocation112_spill] sm:$0xff] %v10199_v47  ;;  %v930_v55 = vld [vmem:[#allocation3 + $0x20] sm:$0xff] }
 0x1df   : > { %2370 = vrot.lane.b32.xlu0 %v929_v21, %s9101_s10  ;;  %2172 = vrot.lane.b32.xlu1 %v926_v19, %s9100_s9  ;;  %v935_v19 = vld [vmem:[#allocation3 + $0x60] sm:$0xff] }
 0x1e1   : > { %v10203_v10 = vpop.permute.xlu0 %2066  ;;  %v10205_v39 = vpop.permute.xlu1 %2060 }
 0x1e2   : > { %14740 = vst [vmem:[#allocation113_spill] sm:$0xff] %v10203_v10  ;;  %14741 = vst [vmem:[#allocation114_spill] sm:$0xff] %v10205_v39  ;;  %v932_v10 = vld [vmem:[#allocation3 + $0x38] sm:$0xff] }
 0x1e3   : > { %2374 = vrot.lane.b32.xlu0 %v931_v49, %s9101_s10  ;;  %2176 = vrot.lane.b32.xlu1 %v928_v17, %s9100_s9  ;;  %v937_v49 = vld [vmem:[#allocation3 + $0x78] sm:$0xff] }
 0x1e5   : > { %v10209_v33 = vpop.permute.xlu0 %2070  ;;  %v10211_v47 = vpop.permute.xlu1 %2064 }
 0x1e6   : > { %14742 = vst [vmem:[#allocation115_spill] sm:$0xff] %v10209_v33  ;;  %14743 = vst [vmem:[#allocation116_spill] sm:$0xff] %v10211_v47  ;;  %v934_v33 = vld [vmem:[#allocation3 + $0x50] sm:$0xff] }
 0x1e7   : > { %2378 = vrot.lane.b32.xlu0 %v933_v13, %s9101_s10  ;;  %2372 = vrot.lane.b32.xlu1 %v930_v55, %s9101_s10  ;;  %v939_v55 = vld [vmem:[#allocation3 + $0x90] sm:$0xff] }
 0x1e9   : > { %v10215_v21 = vpop.permute.xlu0 %2074  ;;  %v10217_v24 = vpop.permute.xlu1 %2068 }
 0x1ea   : > { %14744 = vst [vmem:[#allocation117_spill] sm:$0xff] %v10215_v21  ;;  %14745 = vst [vmem:[#allocation118_spill] sm:$0xff] %v10217_v24  ;;  %v936_v21 = vld [vmem:[#allocation3 + $0x68] sm:$0xff] }
 0x1eb   : > { %2382 = vrot.lane.b32.xlu0 %v935_v19, %s9101_s10  ;;  %2376 = vrot.lane.b32.xlu1 %v932_v10, %s9101_s10  ;;  %v941_v10 = vld [vmem:[#allocation3 + $0xa8] sm:$0xff] }
 0x1ed   : > { %v10221_v17 = vpop.permute.xlu0 %2078  ;;  %v10223_v39 = vpop.permute.xlu1 %2072 }
 0x1ee   : > { %14746 = vst [vmem:[#allocation119_spill] sm:$0xff] %v10221_v17  ;;  %14747 = vst [vmem:[#allocation120_spill] sm:$0xff] %v10223_v39  ;;  %v938_v17 = vld [vmem:[#allocation3 + $0x80] sm:$0xff] }
 0x1ef   : > { %2386 = vrot.lane.b32.xlu0 %v937_v49, %s9101_s10  ;;  %2380 = vrot.lane.b32.xlu1 %v934_v33, %s9101_s10  ;;  %v943_v33 = vld [vmem:[#allocation3 + $0xc0] sm:$0xff] }
 0x1f1   : > { %v10227_v13 = vpop.permute.xlu0 %2082  ;;  %v10229_v47 = vpop.permute.xlu1 %2076 }
 0x1f2   : > { %14748 = vst [vmem:[#allocation121_spill] sm:$0xff] %v10227_v13  ;;  %14749 = vst [vmem:[#allocation122_spill] sm:$0xff] %v10229_v47  ;;  %v940_v13 = vld [vmem:[#allocation3 + $0x98] sm:$0xff] }
 0x1f3   : > { %2390 = vrot.lane.b32.xlu0 %v939_v55, %s9101_s10  ;;  %2384 = vrot.lane.b32.xlu1 %v936_v21, %s9101_s10  ;;  %v945_v21 = vld [vmem:[#allocation3 + $0xd8] sm:$0xff] }
 0x1f5   : > { %v10233_v19 = vpop.permute.xlu0 %2086  ;;  %v10235_v24 = vpop.permute.xlu1 %2080 }
 0x1f6   : > { %14750 = vst [vmem:[#allocation123_spill] sm:$0xff] %v10233_v19  ;;  %14751 = vst [vmem:[#allocation124_spill] sm:$0xff] %v10235_v24  ;;  %v942_v19 = vld [vmem:[#allocation3 + $0xb0] sm:$0xff] }
 0x1f7   : > { %2394 = vrot.lane.b32.xlu0 %v941_v10, %s9101_s10  ;;  %2388 = vrot.lane.b32.xlu1 %v938_v17, %s9101_s10  ;;  %v947_v17 = vld [vmem:[#allocation3 + $0xf0] sm:$0xff] }
 0x1f9   : > { %v10239_v49 = vpop.permute.xlu0 %2090  ;;  %v10241_v39 = vpop.permute.xlu1 %2084 }
 0x1fa   : > { %14752 = vst [vmem:[#allocation125_spill] sm:$0xff] %v10239_v49  ;;  %14753 = vst [vmem:[#allocation126_spill] sm:$0xff] %v10241_v39  ;;  %v944_v49 = vld [vmem:[#allocation3 + $0xc8] sm:$0xff] }
 0x1fb   : > { %2398 = vrot.lane.b32.xlu0 %v943_v33, %s9101_s10  ;;  %2392 = vrot.lane.b32.xlu1 %v940_v13, %s9101_s10  ;;  %v949_v13 = vld [vmem:[#allocation3 + $0x108] sm:$0xff] }
 0x1fd   : > { %v10245_v55 = vpop.permute.xlu0 %2094  ;;  %v10247_v47 = vpop.permute.xlu1 %2088 }
 0x1fe   : > { %14754 = vst [vmem:[#allocation127_spill] sm:$0xff] %v10245_v55  ;;  %14755 = vst [vmem:[#allocation128_spill] sm:$0xff] %v10247_v47  ;;  %v946_v55 = vld [vmem:[#allocation3 + $0xe0] sm:$0xff]  ;;  %v952_v47 = vld [vmem:[#allocation3 + $0x128] sm:$0xff] }
 0x1ff   : > { %2402 = vrot.lane.b32.xlu0 %v945_v21, %s9101_s10  ;;  %2396 = vrot.lane.b32.xlu1 %v942_v19, %s9101_s10  ;;  %v951_v19 = vld [vmem:[#allocation3 + $0x120] sm:$0xff] }
 0x201   : > { %v10251_v10 = vpop.permute.xlu0 %2098  ;;  %v10253_v24 = vpop.permute.xlu1 %2092 }
 0x202   : > { %14756 = vst [vmem:[#allocation129_spill] sm:$0xff] %v10251_v10  ;;  %14757 = vst [vmem:[#allocation130_spill] sm:$0xff] %v10253_v24  ;;  %v948_v10 = vld [vmem:[#allocation3 + $0xf8] sm:$0xff] }
 0x203   : > { %2406 = vrot.lane.b32.xlu0 %v947_v17, %s9101_s10  ;;  %2400 = vrot.lane.b32.xlu1 %v944_v49, %s9101_s10  ;;  %v953_v49 = vld [vmem:[#allocation3 + $0x138] sm:$0xff] }
 0x205   : > { %v10257_v33 = vpop.permute.xlu0 %2102  ;;  %v10259_v39 = vpop.permute.xlu1 %2096 }
 0x206   : > { %14758 = vst [vmem:[#allocation131_spill] sm:$0xff] %v10257_v33  ;;  %14759 = vst [vmem:[#allocation132_spill] sm:$0xff] %v10259_v39  ;;  %v950_v33 = vld [vmem:[#allocation3 + $0x110] sm:$0xff] }
 0x207   : > { %2410 = vrot.lane.b32.xlu0 %v949_v13, %s9101_s10  ;;  %2404 = vrot.lane.b32.xlu1 %v946_v55, %s9101_s10  ;;  %v955_v55 = vld [vmem:[#allocation3 + $0x150] sm:$0xff] }
 0x209   : > { %v10263_v21 = vpop.permute.xlu0 %2106  ;;  %v10265_v24 = vpop.permute.xlu1 %2100 }
 0x20a   : > { %14760 = vst [vmem:[#allocation133_spill] sm:$0xff] %v10263_v21  ;;  %14761 = vst [vmem:[#allocation134_spill] sm:$0xff] %v10265_v24 }
 0x20b   : > { %2414 = vrot.lane.b32.xlu0 %v951_v19, %s9101_s10  ;;  %2408 = vrot.lane.b32.xlu1 %v948_v10, %s9101_s10  ;;  %v542_v10 = vld [vmem:[%s9493_s30 + $0x2f0] sm:$0xff]  ;;  %v957_v19 = vld [vmem:[#allocation3 + $0x168] sm:$0xff] }
 0x20c   : > { %639 = vst.msk [vmem:[#allocation3 + $0x4e1] sm:$0xff] %vm284_vm0, %v542_v10  ;;  %v961_v10 = vld [vmem:[#allocation3 + $0x1c8] sm:$0xff] }
 0x20d   : > { %v10269_v17 = vpop.permute.xlu0 %2110  ;;  %v10271_v39 = vpop.permute.xlu1 %2104 }
 0x20e   : > { %14762 = vst [vmem:[#allocation135_spill] sm:$0xff] %v10269_v17  ;;  %14763 = vst [vmem:[#allocation136_spill] sm:$0xff] %v10271_v39  ;;  %v956_v17 = vld [vmem:[#allocation3 + $0x158] sm:$0xff] }
 0x20f   : > { %2418 = vrot.lane.b32.xlu0 %v953_v49, %s9101_s10  ;;  %2412 = vrot.lane.b32.xlu1 %v950_v33, %s9101_s10  ;;  %v954_v49 = vld [vmem:[#allocation3 + $0x140] sm:$0xff] }
 0x210   : > { %v959_v33 = vld [vmem:[#allocation3 + $0x180] sm:$0xff] }
 0x211   : > { %v10275_v13 = vpop.permute.xlu0 %2114  ;;  %v10277_v21 = vpop.permute.xlu1 %2108 }
 0x212   : > { %14764 = vst [vmem:[#allocation137_spill] sm:$0xff] %v10275_v13  ;;  %14765 = vst [vmem:[#allocation138_spill] sm:$0xff] %v10277_v21 }
 0x213   : > { %2422 = vrot.lane.b32.xlu0 %v955_v55, %s9101_s10  ;;  %2416 = vrot.lane.b32.xlu1 %v952_v47, %s9101_s10  ;;  %v543_v47 = vld [vmem:[%s9493_s30 + $0x2f8] sm:$0xff] }
 0x214   : > { %640 = vst.msk [vmem:[#allocation3 + $0x4e9] sm:$0xff] %vm284_vm0, %v543_v47 }
 0x215   : > { %v10283_v39 = vpop.permute.xlu0 %2118  ;;  %v10285_v24 = vpop.permute.xlu1 %2112 }
 0x216   : > { %14766 = vst [vmem:[#allocation139_spill] sm:$0xff] %v10283_v39  ;;  %14767 = vst [vmem:[#allocation140_spill] sm:$0xff] %v10285_v24  ;;  %v958_v24 = vld [vmem:[#allocation3 + $0x170] sm:$0xff] }
 0x217   : > { %2426 = vrot.lane.b32.xlu0 %v957_v19, %s9101_s10  ;;  %2420 = vrot.lane.b32.xlu1 %v954_v49, %s9101_s10  ;;  %v963_v49 = vld [vmem:[#allocation3 + $0x1e0] sm:$0xff] }
 0x219   : > { %v10289_v13 = vpop.permute.xlu0 %2122  ;;  %v10291_v55 = vpop.permute.xlu1 %2116 }
 0x21a   : > { %14768 = vst [vmem:[#allocation141_spill] sm:$0xff] %v10289_v13  ;;  %14769 = vst [vmem:[#allocation142_spill] sm:$0xff] %v10291_v55  ;;  %v960_v55 = vld [vmem:[#allocation3 + $0x188] sm:$0xff] }
 0x21b   : > { %2430 = vrot.lane.b32.xlu0 %v959_v33, %s9101_s10  ;;  %2424 = vrot.lane.b32.xlu1 %v956_v17, %s9101_s10  ;;  %v965_v17 = vld [vmem:[#allocation3 + $0x1f8] sm:$0xff] }
 0x21d   : > { %v10297_v39 = vpop.permute.xlu0 %2126  ;;  %v10299_v19 = vpop.permute.xlu1 %2120 }
 0x21e   : > { %14770 = vst [vmem:[#allocation143_spill] sm:$0xff] %v10297_v39  ;;  %14771 = vst [vmem:[#allocation144_spill] sm:$0xff] %v10299_v19  ;;  %v962_v39 = vld [vmem:[#allocation3 + $0x1d0] sm:$0xff] }
 0x21f   : > { %2434 = vrot.lane.b32.xlu0 %v961_v10, %s9101_s10  ;;  %2428 = vrot.lane.b32.xlu1 %v958_v24, %s9101_s10  ;;  %v967_v24 = vld [vmem:[#allocation3 + $0x210] sm:$0xff] }
 0x221   : > { %v10303_v13 = vpop.permute.xlu0 %2130  ;;  %v10305_v33 = vpop.permute.xlu1 %2124 }
 0x222   : > { %14772 = vst [vmem:[#allocation145_spill] sm:$0xff] %v10303_v13  ;;  %14773 = vst [vmem:[#allocation146_spill] sm:$0xff] %v10305_v33  ;;  %v964_v13 = vld [vmem:[#allocation3 + $0x1e8] sm:$0xff] }
 0x223   : > { %2438 = vrot.lane.b32.xlu0 %v963_v49, %s9101_s10  ;;  %2432 = vrot.lane.b32.xlu1 %v960_v55, %s9101_s10  ;;  %v969_v55 = vld [vmem:[#allocation3 + $0x228] sm:$0xff] }
 0x225   : > { %v10309_v47 = vpop.permute.xlu0 %2134  ;;  %v10311_v21 = vpop.permute.xlu1 %2128 }
 0x226   : > { %14774 = vst [vmem:[#allocation147_spill] sm:$0xff] %v10309_v47  ;;  %14775 = vst [vmem:[#allocation148_spill] sm:$0xff] %v10311_v21  ;;  %v966_v47 = vld [vmem:[#allocation3 + $0x200] sm:$0xff] }
 0x227   : > { %2442 = vrot.lane.b32.xlu0 %v965_v17, %s9101_s10  ;;  %2436 = vrot.lane.b32.xlu1 %v962_v39, %s9101_s10  ;;  %v971_v39 = vld [vmem:[#allocation3 + $0x240] sm:$0xff] }
 0x229   : > { %v10315_v10 = vpop.permute.xlu0 %2138  ;;  %v10317_v19 = vpop.permute.xlu1 %2132 }
 0x22a   : > { %14776 = vst [vmem:[#allocation149_spill] sm:$0xff] %v10315_v10  ;;  %14777 = vst [vmem:[#allocation150_spill] sm:$0xff] %v10317_v19  ;;  %v968_v10 = vld [vmem:[#allocation3 + $0x218] sm:$0xff] }
 0x22b   : > { %2446 = vrot.lane.b32.xlu0 %v967_v24, %s9101_s10  ;;  %2440 = vrot.lane.b32.xlu1 %v964_v13, %s9101_s10  ;;  %v973_v13 = vld [vmem:[#allocation3 + $0x258] sm:$0xff] }
 0x22d   : > { %v10321_v49 = vpop.permute.xlu0 %2142  ;;  %v10323_v33 = vpop.permute.xlu1 %2136 }
 0x22e   : > { %14778 = vst [vmem:[#allocation151_spill] sm:$0xff] %v10321_v49  ;;  %14779 = vst [vmem:[#allocation152_spill] sm:$0xff] %v10323_v33  ;;  %v970_v49 = vld [vmem:[#allocation3 + $0x230] sm:$0xff] }
 0x22f   : > { %2450 = vrot.lane.b32.xlu0 %v969_v55, %s9101_s10  ;;  %2444 = vrot.lane.b32.xlu1 %v966_v47, %s9101_s10  ;;  %v975_v47 = vld [vmem:[#allocation3 + $0x270] sm:$0xff] }
 0x231   : > { %v10327_v17 = vpop.permute.xlu0 %2146  ;;  %v10329_v21 = vpop.permute.xlu1 %2140 }
 0x232   : > { %14780 = vst [vmem:[#allocation153_spill] sm:$0xff] %v10327_v17  ;;  %14781 = vst [vmem:[#allocation154_spill] sm:$0xff] %v10329_v21  ;;  %v972_v17 = vld [vmem:[#allocation3 + $0x248] sm:$0xff] }
 0x233   : > { %2454 = vrot.lane.b32.xlu0 %v971_v39, %s9101_s10  ;;  %2448 = vrot.lane.b32.xlu1 %v968_v10, %s9101_s10  ;;  %v977_v10 = vld [vmem:[#allocation3 + $0x288] sm:$0xff] }
 0x235   : > { %v10333_v24 = vpop.permute.xlu0 %2150  ;;  %v10335_v19 = vpop.permute.xlu1 %2144 }
 0x236   : > { %14782 = vst [vmem:[#allocation155_spill] sm:$0xff] %v10333_v24  ;;  %14783 = vst [vmem:[#allocation156_spill] sm:$0xff] %v10335_v19  ;;  %v974_v24 = vld [vmem:[#allocation3 + $0x260] sm:$0xff] }
 0x237   : > { %2458 = vrot.lane.b32.xlu0 %v973_v13, %s9101_s10  ;;  %2452 = vrot.lane.b32.xlu1 %v970_v49, %s9101_s10  ;;  %v979_v49 = vld [vmem:[#allocation3 + $0x2a0] sm:$0xff] }
 0x239   : > { %v10339_v55 = vpop.permute.xlu0 %2154  ;;  %v10341_v33 = vpop.permute.xlu1 %2148 }
 0x23a   : > { %14784 = vst [vmem:[#allocation157_spill] sm:$0xff] %v10339_v55  ;;  %14785 = vst [vmem:[#allocation158_spill] sm:$0xff] %v10341_v33  ;;  %v976_v55 = vld [vmem:[#allocation3 + $0x278] sm:$0xff] }
 0x23b   : > { %2462 = vrot.lane.b32.xlu0 %v975_v47, %s9101_s10  ;;  %2456 = vrot.lane.b32.xlu1 %v972_v17, %s9101_s10  ;;  %v981_v17 = vld [vmem:[#allocation3 + $0x2b8] sm:$0xff] }
 0x23d   : > { %v10345_v39 = vpop.permute.xlu0 %2158  ;;  %v10347_v21 = vpop.permute.xlu1 %2152 }
 0x23e   : > { %14786 = vst [vmem:[#allocation159_spill] sm:$0xff] %v10345_v39  ;;  %14787 = vst [vmem:[#allocation160_spill] sm:$0xff] %v10347_v21  ;;  %v978_v39 = vld [vmem:[#allocation3 + $0x290] sm:$0xff] }
 0x23f   : > { %2466 = vrot.lane.b32.xlu0 %v977_v10, %s9101_s10  ;;  %2460 = vrot.lane.b32.xlu1 %v974_v24, %s9101_s10  ;;  %v983_v24 = vld [vmem:[#allocation3 + $0x2d0] sm:$0xff] }
 0x241   : > { %v10351_v13 = vpop.permute.xlu0 %2162  ;;  %v10353_v19 = vpop.permute.xlu1 %2156 }
 0x242   : > { %14788 = vst [vmem:[#allocation161_spill] sm:$0xff] %v10351_v13  ;;  %14789 = vst [vmem:[#allocation162_spill] sm:$0xff] %v10353_v19  ;;  %v980_v13 = vld [vmem:[#allocation3 + $0x2a8] sm:$0xff] }
 0x243   : > { %2470 = vrot.lane.b32.xlu0 %v979_v49, %s9101_s10  ;;  %2464 = vrot.lane.b32.xlu1 %v976_v55, %s9101_s10  ;;  %v985_v55 = vld [vmem:[#allocation3 + $0x2e8] sm:$0xff] }
 0x245   : > { %v10357_v47 = vpop.permute.xlu0 %2166  ;;  %v10359_v33 = vpop.permute.xlu1 %2160 }
 0x246   : > { %14790 = vst [vmem:[#allocation163_spill] sm:$0xff] %v10357_v47  ;;  %14791 = vst [vmem:[#allocation164_spill] sm:$0xff] %v10359_v33  ;;  %v982_v47 = vld [vmem:[#allocation3 + $0x2c0] sm:$0xff] }
 0x247   : > { %2474 = vrot.lane.b32.xlu0 %v981_v17, %s9101_s10  ;;  %2468 = vrot.lane.b32.xlu1 %v978_v39, %s9101_s10  ;;  %v987_v39 = vld [vmem:[#allocation3 + $0x300] sm:$0xff] }
 0x249   : > { %v10363_v10 = vpop.permute.xlu0 %2170  ;;  %v10365_v21 = vpop.permute.xlu1 %2164 }
 0x24a   : > { %14792 = vst [vmem:[#allocation165_spill] sm:$0xff] %v10363_v10  ;;  %14793 = vst [vmem:[#allocation166_spill] sm:$0xff] %v10365_v21  ;;  %v984_v10 = vld [vmem:[#allocation3 + $0x2d8] sm:$0xff] }
 0x24b   : > { %2478 = vrot.lane.b32.xlu0 %v983_v24, %s9101_s10  ;;  %2472 = vrot.lane.b32.xlu1 %v980_v13, %s9101_s10  ;;  %v989_v13 = vld [vmem:[#allocation3 + $0x318] sm:$0xff] }
 0x24d   : > { %v10369_v49 = vpop.permute.xlu0 %2174  ;;  %v10371_v19 = vpop.permute.xlu1 %2168 }
 0x24e   : > { %14794 = vst [vmem:[#allocation167_spill] sm:$0xff] %v10369_v49  ;;  %14795 = vst [vmem:[#allocation168_spill] sm:$0xff] %v10371_v19  ;;  %v986_v49 = vld [vmem:[#allocation3 + $0x2f0] sm:$0xff]  ;;  %v988_v19 = vld [vmem:[#allocation3 + $0x308] sm:$0xff] }
 0x24f   : > { %2482 = vrot.lane.b32.xlu0 %v985_v55, %s9101_s10  ;;  %2476 = vrot.lane.b32.xlu1 %v982_v47, %s9101_s10  ;;  %v991_v47 = vld [vmem:[#allocation3 + $0x330] sm:$0xff] }
 0x251   : > { %v10375_v17 = vpop.permute.xlu0 %2370  ;;  %v10377_v33 = vpop.permute.xlu1 %2172 }
 0x252   : > { %14796 = vst [vmem:[#allocation169_spill] sm:$0xff] %v10377_v33  ;;  %v990_v33 = vld [vmem:[#allocation3 + $0x320] sm:$0xff] }
 0x253   : > { %2486 = vrot.lane.b32.xlu0 %v987_v39, %s9101_s10  ;;  %2480 = vrot.lane.b32.xlu1 %v984_v10, %s9101_s10  ;;  %v993_v10 = vld [vmem:[#allocation3 + $0x378] sm:$0xff] }
 0x255   : > { %v10381_v24 = vpop.permute.xlu0 %2374  ;;  %v10383_v21 = vpop.permute.xlu1 %2176 }
 0x256   : > { %14797 = vst [vmem:[#allocation170_spill] sm:$0xff] %v10383_v21  ;;  %v992_v21 = vld [vmem:[#allocation3 + $0x338] sm:$0xff] }
 0x257   : > { %2490 = vrot.lane.b32.xlu0 %v989_v13, %s9101_s10  ;;  %2484 = vrot.lane.b32.xlu1 %v986_v49, %s9101_s10  ;;  %v995_v49 = vld [vmem:[#allocation3 + $0x390] sm:$0xff] }
 0x259   : > { %v10387_v55 = vpop.permute.xlu0 %2378  ;;  %v10389_v63 = vpop.permute.xlu1 %2372 }
 0x25b   : > { %2494 = vrot.lane.b32.xlu0 %v991_v47, %s9101_s10  ;;  %2488 = vrot.lane.b32.xlu1 %v988_v19, %s9101_s10  ;;  %v997_v19 = vld [vmem:[#allocation3 + $0x3a8] sm:$0xff] }
 0x25d   : > { %v10393_v39 = vpop.permute.xlu0 %2382  ;;  %v10395_v31 = vpop.permute.xlu1 %2376 }
 0x25e   : > { %14798 = vst [vmem:[#allocation171_spill] sm:$0xff] %v10393_v39 }
 0x25f   : > { %2498 = vrot.lane.b32.xlu0 %v993_v10, %s9101_s10  ;;  %2492 = vrot.lane.b32.xlu1 %v990_v33, %s9101_s10  ;;  %v999_v33 = vld [vmem:[#allocation3 + $0x3c0] sm:$0xff] }
 0x261   : > { %v10399_v13 = vpop.permute.xlu0 %2386  ;;  %v10401_v20 = vpop.permute.xlu1 %2380 }
 0x262   : > { %14799 = vst [vmem:[#allocation172_spill] sm:$0xff] %v10399_v13 }
 0x263   : > { %2502 = vrot.lane.b32.xlu0 %v995_v49, %s9101_s10  ;;  %2496 = vrot.lane.b32.xlu1 %v992_v21, %s9101_s10  ;;  %v1001_v21 = vld [vmem:[#allocation3 + $0x3d8] sm:$0xff] }
 0x265   : > { %v10405_v47 = vpop.permute.xlu0 %2390  ;;  %v10407_v6 = vpop.permute.xlu1 %2384 }
 0x266   : > { %14800 = vst [vmem:[#allocation173_spill] sm:$0xff] %v10405_v47  ;;  %14801 = vst [vmem:[#allocation174_spill] sm:$0xff] %v10407_v6 }
 0x267   : > { %2506 = vrot.lane.b32.xlu0 %v997_v19, %s9101_s10  ;;  %2500 = vrot.lane.b32.xlu1 %v994_v8, %s9101_s10  ;;  %v1003_v8 = vld [vmem:[#allocation3 + $0x3f0] sm:$0xff] }
 0x269   : > { %v10411_v10 = vpop.permute.xlu0 %2394  ;;  %v10413_v14 = vpop.permute.xlu1 %2388 }
 0x26a   : > { %14802 = vst [vmem:[#allocation175_spill] sm:$0xff] %v10411_v10  ;;  %14803 = vst [vmem:[#allocation176_spill] sm:$0xff] %v10413_v14  ;;  %v1092_v10 = vld [vmem:[#allocation3 + $0x399] sm:$0xff] }
 0x26b   : > { %2510 = vrot.lane.b32.xlu0 %v999_v33, %s9101_s10  ;;  %2504 = vrot.lane.b32.xlu1 %v996_v15, %s9101_s10  ;;  %v1005_v15 = vld [vmem:[#allocation3 + $0x408] sm:$0xff] }
 0x26d   : > { %v10417_v49 = vpop.permute.xlu0 %2398  ;;  %v10419_v11 = vpop.permute.xlu1 %2392 }
 0x26e   : > { %14804 = vst [vmem:[#allocation177_spill] sm:$0xff] %v10417_v49  ;;  %14805 = vst [vmem:[#allocation178_spill] sm:$0xff] %v10419_v11 }
 0x26f   : > { %2514 = vrot.lane.b32.xlu0 %v1001_v21, %s9101_s10  ;;  %2508 = vrot.lane.b32.xlu1 %v998_v27, %s9101_s10  ;;  %v1007_v27 = vld [vmem:[#allocation3 + $0x420] sm:$0xff] }
 0x271   : > { %v10423_v19 = vpop.permute.xlu0 %2402  ;;  %v10425_v23 = vpop.permute.xlu1 %2396 }
 0x272   : > { %14806 = vst [vmem:[#allocation179_spill] sm:$0xff] %v10423_v19  ;;  %14807 = vst [vmem:[#allocation180_spill] sm:$0xff] %v10425_v23  ;;  %v1004_v19 = vld [vmem:[#allocation3 + $0x3f8] sm:$0xff] }
 0x273   : > { %2518 = vrot.lane.b32.xlu0 %v1003_v8, %s9101_s10  ;;  %2512 = vrot.lane.b32.xlu1 %v1000_v16, %s9101_s10  ;;  %v1009_v16 = vld [vmem:[#allocation3 + $0x438] sm:$0xff] }
 0x275   : > { %v10429_v33 = vpop.permute.xlu0 %2406  ;;  %v10431_v37 = vpop.permute.xlu1 %2400 }
 0x276   : > { %14808 = vst [vmem:[#allocation181_spill] sm:$0xff] %v10429_v33  ;;  %14809 = vst [vmem:[#allocation182_spill] sm:$0xff] %v10431_v37  ;;  %v1006_v33 = vld [vmem:[#allocation3 + $0x410] sm:$0xff] }
 0x277   : > { %2522 = vrot.lane.b32.xlu0 %v1005_v15, %s9101_s10  ;;  %2516 = vrot.lane.b32.xlu1 %v1002_v9, %s9101_s10  ;;  %v1011_v9 = vld [vmem:[#allocation3 + $0x450] sm:$0xff] }
 0x279   : > { %v10435_v21 = vpop.permute.xlu0 %2410  ;;  %v10437_v35 = vpop.permute.xlu1 %2404 }
 0x27a   : > { %14810 = vst [vmem:[#allocation183_spill] sm:$0xff] %v10435_v21  ;;  %14811 = vst [vmem:[#allocation184_spill] sm:$0xff] %v10437_v35  ;;  %v1008_v21 = vld [vmem:[#allocation3 + $0x428] sm:$0xff] }
 0x27b   : > { %2526 = vrot.lane.b32.xlu0 %v1007_v27, %s9101_s10  ;;  %2520 = vrot.lane.b32.xlu1 %v1004_v19, %s9101_s10  ;;  %v1013_v19 = vld [vmem:[#allocation3 + $0x468] sm:$0xff] }
 0x27d   : > { %v10441_v8 = vpop.permute.xlu0 %2414  ;;  %v10443_v7 = vpop.permute.xlu1 %2408 }
 0x27e   : > { %14812 = vst [vmem:[#allocation185_spill] sm:$0xff] %v10441_v8  ;;  %14813 = vst [vmem:[#allocation186_spill] sm:$0xff] %v10443_v7  ;;  %v1010_v8 = vld [vmem:[#allocation3 + $0x440] sm:$0xff] }
 0x27f   : > { %2530 = vrot.lane.b32.xlu0 %v1009_v16, %s9101_s10  ;;  %2524 = vrot.lane.b32.xlu1 %v1006_v33, %s9101_s10  ;;  %v1015_v33 = vld [vmem:[#allocation3 + $0x480] sm:$0xff] }
 0x281   : > { %v10447_v15 = vpop.permute.xlu0 %2418  ;;  %v10449_v37 = vpop.permute.xlu1 %2412 }
 0x282   : > { %14814 = vst [vmem:[#allocation187_spill] sm:$0xff] %v10447_v15  ;;  %14815 = vst [vmem:[#allocation188_spill] sm:$0xff] %v10449_v37  ;;  %v1012_v15 = vld [vmem:[#allocation3 + $0x458] sm:$0xff] }
 0x283   : > { %2534 = vrot.lane.b32.xlu0 %v1011_v9, %s9101_s10  ;;  %2528 = vrot.lane.b32.xlu1 %v1008_v21, %s9101_s10  ;;  %v1017_v21 = vld [vmem:[#allocation3 + $0x498] sm:$0xff] }
 0x285   : > { %v10453_v27 = vpop.permute.xlu0 %2422  ;;  %v10455_v35 = vpop.permute.xlu1 %2416 }
 0x286   : > { %14816 = vst [vmem:[#allocation189_spill] sm:$0xff] %v10453_v27  ;;  %14817 = vst [vmem:[#allocation190_spill] sm:$0xff] %v10455_v35  ;;  %v1014_v27 = vld [vmem:[#allocation3 + $0x470] sm:$0xff] }
 0x287   : > { %2538 = vrot.lane.b32.xlu0 %v1013_v19, %s9101_s10  ;;  %2532 = vrot.lane.b32.xlu1 %v1010_v8, %s9101_s10  ;;  %v1019_v8 = vld [vmem:[#allocation3 + $0x4b0] sm:$0xff] }
 0x289   : > { %v10459_v16 = vpop.permute.xlu0 %2426  ;;  %v10461_v7 = vpop.permute.xlu1 %2420 }
 0x28a   : > { %14818 = vst [vmem:[#allocation191_spill] sm:$0xff] %v10459_v16  ;;  %14819 = vst [vmem:[#allocation192_spill] sm:$0xff] %v10461_v7  ;;  %v1016_v16 = vld [vmem:[#allocation3 + $0x488] sm:$0xff] }
 0x28b   : > { %2542 = vrot.lane.b32.xlu0 %v1015_v33, %s9101_s10  ;;  %2536 = vrot.lane.b32.xlu1 %v1012_v15, %s9101_s10  ;;  %v1021_v15 = vld [vmem:[#allocation3 + $0x4c8] sm:$0xff] }
 0x28d   : > { %v10465_v9 = vpop.permute.xlu0 %2430  ;;  %v10467_v37 = vpop.permute.xlu1 %2424 }
 0x28e   : > { %14820 = vst [vmem:[#allocation193_spill] sm:$0xff] %v10465_v9  ;;  %14821 = vst [vmem:[#allocation194_spill] sm:$0xff] %v10467_v37  ;;  %v1018_v9 = vld [vmem:[#allocation3 + $0x4a0] sm:$0xff] }
 0x28f   : > { %2546 = vrot.lane.b32.xlu0 %v1017_v21, %s9101_s10  ;;  %2540 = vrot.lane.b32.xlu1 %v1014_v27, %s9101_s10  ;;  %v1023_v27 = vld [vmem:[#allocation3 + $0x4e0] sm:$0xff] }
 0x291   : > { %v10471_v19 = vpop.permute.xlu0 %2434  ;;  %v10473_v35 = vpop.permute.xlu1 %2428 }
 0x292   : > { %14822 = vst [vmem:[#allocation195_spill] sm:$0xff] %v10471_v19  ;;  %14823 = vst [vmem:[#allocation196_spill] sm:$0xff] %v10473_v35  ;;  %v1020_v19 = vld [vmem:[#allocation3 + $0x4b8] sm:$0xff] }
 0x293   : > { %2550 = vrot.lane.b32.xlu0 %v1019_v8, %s9101_s10  ;;  %2544 = vrot.lane.b32.xlu1 %v1016_v16, %s9101_s10  ;;  %v1025_v16 = vld [vmem:[#allocation3 + $0x19] sm:$0xff] }
 0x295   : > { %v10477_v33 = vpop.permute.xlu0 %2438  ;;  %v10479_v7 = vpop.permute.xlu1 %2432 }
 0x296   : > { %14824 = vst [vmem:[#allocation197_spill] sm:$0xff] %v10477_v33  ;;  %14825 = vst [vmem:[#allocation198_spill] sm:$0xff] %v10479_v7  ;;  %v1022_v33 = vld [vmem:[#allocation3 + $0x4d0] sm:$0xff] }
 0x297   : > { %2554 = vrot.lane.b32.xlu0 %v1021_v15, %s9101_s10  ;;  %2548 = vrot.lane.b32.xlu1 %v1018_v9, %s9101_s10  ;;  %v1027_v9 = vld [vmem:[#allocation3 + $0x31] sm:$0xff] }
 0x299   : > { %v10483_v21 = vpop.permute.xlu0 %2442  ;;  %v10485_v37 = vpop.permute.xlu1 %2436 }
 0x29a   : > { %14826 = vst [vmem:[#allocation199_spill] sm:$0xff] %v10483_v21  ;;  %14827 = vst [vmem:[#allocation200_spill] sm:$0xff] %v10485_v37  ;;  %v1024_v21 = vld [vmem:[#allocation3 + $0x4e8] sm:$0xff] }
 0x29b   : > { %2558 = vrot.lane.b32.xlu0 %v1023_v27, %s9101_s10  ;;  %2552 = vrot.lane.b32.xlu1 %v1020_v19, %s9101_s10  ;;  %v1029_v19 = vld [vmem:[#allocation3 + $0x49] sm:$0xff] }
 0x29d   : > { %v10489_v8 = vpop.permute.xlu0 %2446  ;;  %v10491_v35 = vpop.permute.xlu1 %2440 }
 0x29e   : > { %14828 = vst [vmem:[#allocation201_spill] sm:$0xff] %v10489_v8  ;;  %14829 = vst [vmem:[#allocation202_spill] sm:$0xff] %v10491_v35  ;;  %v1026_v8 = vld [vmem:[#allocation3 + $0x21] sm:$0xff] }
 0x29f   : > { %2754 = vrot.lane.b32.xlu0 %v1025_v16, %s9102_s11  ;;  %2556 = vrot.lane.b32.xlu1 %v1022_v33, %s9101_s10  ;;  %v1031_v33 = vld [vmem:[#allocation3 + $0x61] sm:$0xff] }
 0x2a1   : > { %v10495_v15 = vpop.permute.xlu0 %2450  ;;  %v10497_v37 = vpop.permute.xlu1 %2444 }
 0x2a2   : > { %14830 = vst [vmem:[#allocation203_spill] sm:$0xff] %v10495_v15  ;;  %14831 = vst [vmem:[#allocation204_spill] sm:$0xff] %v10497_v37  ;;  %v1028_v15 = vld [vmem:[#allocation3 + $0x39] sm:$0xff] }
 0x2a3   : > { %2758 = vrot.lane.b32.xlu0 %v1027_v9, %s9102_s11  ;;  %2560 = vrot.lane.b32.xlu1 %v1024_v21, %s9101_s10  ;;  %v1033_v21 = vld [vmem:[#allocation3 + $0x79] sm:$0xff] }
 0x2a5   : > { %v10501_v27 = vpop.permute.xlu0 %2454  ;;  %v10503_v35 = vpop.permute.xlu1 %2448 }
 0x2a6   : > { %14832 = vst [vmem:[#allocation205_spill] sm:$0xff] %v10501_v27  ;;  %14833 = vst [vmem:[#allocation206_spill] sm:$0xff] %v10503_v35  ;;  %v1030_v27 = vld [vmem:[#allocation3 + $0x51] sm:$0xff] }
 0x2a7   : > { %2762 = vrot.lane.b32.xlu0 %v1029_v19, %s9102_s11  ;;  %2756 = vrot.lane.b32.xlu1 %v1026_v8, %s9102_s11  ;;  %v1035_v8 = vld [vmem:[#allocation3 + $0x91] sm:$0xff] }
 0x2a9   : > { %v10507_v16 = vpop.permute.xlu0 %2458  ;;  %v10509_v7 = vpop.permute.xlu1 %2452 }
 0x2aa   : > { %14834 = vst [vmem:[#allocation207_spill] sm:$0xff] %v10507_v16  ;;  %14835 = vst [vmem:[#allocation208_spill] sm:$0xff] %v10509_v7  ;;  %v1032_v16 = vld [vmem:[#allocation3 + $0x69] sm:$0xff] }
 0x2ab   : > { %2766 = vrot.lane.b32.xlu0 %v1031_v33, %s9102_s11  ;;  %2760 = vrot.lane.b32.xlu1 %v1028_v15, %s9102_s11  ;;  %v1037_v15 = vld [vmem:[#allocation3 + $0xa9] sm:$0xff] }
 0x2ad   : > { %v10513_v9 = vpop.permute.xlu0 %2462  ;;  %v10515_v37 = vpop.permute.xlu1 %2456 }
 0x2ae   : > { %14836 = vst [vmem:[#allocation209_spill] sm:$0xff] %v10513_v9  ;;  %14837 = vst [vmem:[#allocation210_spill] sm:$0xff] %v10515_v37  ;;  %v1034_v9 = vld [vmem:[#allocation3 + $0x81] sm:$0xff] }
 0x2af   : > { %2770 = vrot.lane.b32.xlu0 %v1033_v21, %s9102_s11  ;;  %2764 = vrot.lane.b32.xlu1 %v1030_v27, %s9102_s11  ;;  %v1039_v27 = vld [vmem:[#allocation3 + $0xc1] sm:$0xff] }
 0x2b1   : > { %v10519_v19 = vpop.permute.xlu0 %2466  ;;  %v10521_v35 = vpop.permute.xlu1 %2460 }
 0x2b2   : > { %14838 = vst [vmem:[#allocation211_spill] sm:$0xff] %v10519_v19  ;;  %14839 = vst [vmem:[#allocation212_spill] sm:$0xff] %v10521_v35  ;;  %v1036_v19 = vld [vmem:[#allocation3 + $0x99] sm:$0xff] }
 0x2b3   : > { %2774 = vrot.lane.b32.xlu0 %v1035_v8, %s9102_s11  ;;  %2768 = vrot.lane.b32.xlu1 %v1032_v16, %s9102_s11  ;;  %v1041_v16 = vld [vmem:[#allocation3 + $0xd9] sm:$0xff] }
 0x2b5   : > { %v10525_v33 = vpop.permute.xlu0 %2470  ;;  %v10527_v7 = vpop.permute.xlu1 %2464 }
 0x2b6   : > { %14840 = vst [vmem:[#allocation213_spill] sm:$0xff] %v10525_v33  ;;  %14841 = vst [vmem:[#allocation214_spill] sm:$0xff] %v10527_v7  ;;  %v1038_v33 = vld [vmem:[#allocation3 + $0xb1] sm:$0xff] }
 0x2b7   : > { %2778 = vrot.lane.b32.xlu0 %v1037_v15, %s9102_s11  ;;  %2772 = vrot.lane.b32.xlu1 %v1034_v9, %s9102_s11  ;;  %v1043_v9 = vld [vmem:[#allocation3 + $0xf1] sm:$0xff] }
 0x2b9   : > { %v10531_v21 = vpop.permute.xlu0 %2474  ;;  %v10533_v37 = vpop.permute.xlu1 %2468 }
 0x2ba   : > { %14842 = vst [vmem:[#allocation215_spill] sm:$0xff] %v10531_v21  ;;  %14843 = vst [vmem:[#allocation216_spill] sm:$0xff] %v10533_v37  ;;  %v1040_v21 = vld [vmem:[#allocation3 + $0xc9] sm:$0xff] }
 0x2bb   : > { %2782 = vrot.lane.b32.xlu0 %v1039_v27, %s9102_s11  ;;  %2776 = vrot.lane.b32.xlu1 %v1036_v19, %s9102_s11  ;;  %v1045_v19 = vld [vmem:[#allocation3 + $0x109] sm:$0xff] }
 0x2bd   : > { %v10537_v8 = vpop.permute.xlu0 %2478  ;;  %v10539_v35 = vpop.permute.xlu1 %2472 }
 0x2be   : > { %14844 = vst [vmem:[#allocation217_spill] sm:$0xff] %v10537_v8  ;;  %14845 = vst [vmem:[#allocation218_spill] sm:$0xff] %v10539_v35  ;;  %v1042_v8 = vld [vmem:[#allocation3 + $0xe1] sm:$0xff] }
 0x2bf   : > { %2786 = vrot.lane.b32.xlu0 %v1041_v16, %s9102_s11  ;;  %2780 = vrot.lane.b32.xlu1 %v1038_v33, %s9102_s11  ;;  %v1047_v33 = vld [vmem:[#allocation3 + $0x121] sm:$0xff] }
 0x2c1   : > { %v10543_v15 = vpop.permute.xlu0 %2482  ;;  %v10545_v7 = vpop.permute.xlu1 %2476 }
 0x2c2   : > { %14846 = vst [vmem:[#allocation219_spill] sm:$0xff] %v10543_v15  ;;  %14847 = vst [vmem:[#allocation220_spill] sm:$0xff] %v10545_v7  ;;  %v1044_v15 = vld [vmem:[#allocation3 + $0xf9] sm:$0xff] }
 0x2c3   : > { %2790 = vrot.lane.b32.xlu0 %v1043_v9, %s9102_s11  ;;  %2784 = vrot.lane.b32.xlu1 %v1040_v21, %s9102_s11  ;;  %v1049_v21 = vld [vmem:[#allocation3 + $0x139] sm:$0xff] }
 0x2c5   : > { %v10549_v27 = vpop.permute.xlu0 %2486  ;;  %v10551_v37 = vpop.permute.xlu1 %2480 }
 0x2c6   : > { %14848 = vst [vmem:[#allocation221_spill] sm:$0xff] %v10549_v27  ;;  %14849 = vst [vmem:[#allocation222_spill] sm:$0xff] %v10551_v37  ;;  %v1046_v27 = vld [vmem:[#allocation3 + $0x111] sm:$0xff]  ;;  %v1048_v37 = vld [vmem:[#allocation3 + $0x129] sm:$0xff] }
 0x2c7   : > { %2794 = vrot.lane.b32.xlu0 %v1045_v19, %s9102_s11  ;;  %2788 = vrot.lane.b32.xlu1 %v1042_v8, %s9102_s11  ;;  %v1051_v8 = vld [vmem:[#allocation3 + $0x151] sm:$0xff] }
 0x2c9   : > { %v10555_v16 = vpop.permute.xlu0 %2490  ;;  %v10557_v35 = vpop.permute.xlu1 %2484 }
 0x2ca   : > { %14850 = vst [vmem:[#allocation223_spill] sm:$0xff] %v10555_v16  ;;  %14851 = vst [vmem:[#allocation224_spill] sm:$0xff] %v10557_v35  ;;  %v1050_v35 = vld [vmem:[#allocation3 + $0x141] sm:$0xff] }
 0x2cb   : > { %2798 = vrot.lane.b32.xlu0 %v1047_v33, %s9102_s11  ;;  %2792 = vrot.lane.b32.xlu1 %v1044_v15, %s9102_s11  ;;  %v1053_v15 = vld [vmem:[#allocation3 + $0x169] sm:$0xff] }
 0x2cd   : > { %v10561_v9 = vpop.permute.xlu0 %2494  ;;  %v10563_v7 = vpop.permute.xlu1 %2488 }
 0x2ce   : > { %14852 = vst [vmem:[#allocation225_spill] sm:$0xff] %v10561_v9  ;;  %14853 = vst [vmem:[#allocation226_spill] sm:$0xff] %v10563_v7  ;;  %v1052_v7 = vld [vmem:[#allocation3 + $0x159] sm:$0xff] }
 0x2cf   : > { %2802 = vrot.lane.b32.xlu0 %v1049_v21, %s9102_s11  ;;  %2796 = vrot.lane.b32.xlu1 %v1046_v27, %s9102_s11  ;;  %v1055_v27 = vld [vmem:[#allocation3 + $0x181] sm:$0xff] }
 0x2d1   : > { %v10567_v19 = vpop.permute.xlu0 %2498  ;;  %v10569_v16 = vpop.permute.xlu1 %2492 }
 0x2d2   : > { %14854 = vst [vmem:[#allocation227_spill] sm:$0xff] %v10567_v19  ;;  %14855 = vst [vmem:[#allocation228_spill] sm:$0xff] %v10569_v16 }
 0x2d3   : > { %2806 = vrot.lane.b32.xlu0 %v1051_v8, %s9102_s11  ;;  %2800 = vrot.lane.b32.xlu1 %v1048_v37, %s9102_s11  ;;  %v1057_v37 = vld [vmem:[#allocation3 + $0x1c9] sm:$0xff] }
 0x2d5   : > { %v10573_v33 = vpop.permute.xlu0 %2502  ;;  %v10575_v9 = vpop.permute.xlu1 %2496 }
 0x2d6   : > { %14856 = vst [vmem:[#allocation229_spill] sm:$0xff] %v10573_v33  ;;  %14857 = vst [vmem:[#allocation230_spill] sm:$0xff] %v10575_v9  ;;  %v1054_v33 = vld [vmem:[#allocation3 + $0x171] sm:$0xff] }
 0x2d7   : > { %2810 = vrot.lane.b32.xlu0 %v1053_v15, %s9102_s11  ;;  %2804 = vrot.lane.b32.xlu1 %v1050_v35, %s9102_s11  ;;  %v1059_v35 = vld [vmem:[#allocation3 + $0x1e1] sm:$0xff] }
 0x2d9   : > { %v10579_v21 = vpop.permute.xlu0 %2506  ;;  %v10581_v19 = vpop.permute.xlu1 %2500 }
 0x2da   : > { %14858 = vst [vmem:[#allocation231_spill] sm:$0xff] %v10579_v21  ;;  %14859 = vst [vmem:[#allocation232_spill] sm:$0xff] %v10581_v19  ;;  %v1056_v21 = vld [vmem:[#allocation3 + $0x189] sm:$0xff] }
 0x2db   : > { %2814 = vrot.lane.b32.xlu0 %v1055_v27, %s9102_s11  ;;  %2808 = vrot.lane.b32.xlu1 %v1052_v7, %s9102_s11  ;;  %v1061_v7 = vld [vmem:[#allocation3 + $0x1f9] sm:$0xff] }
 0x2dd   : > { %v10585_v8 = vpop.permute.xlu0 %2510  ;;  %v10587_v16 = vpop.permute.xlu1 %2504 }
 0x2de   : > { %14860 = vst [vmem:[#allocation233_spill] sm:$0xff] %v10585_v8  ;;  %14861 = vst [vmem:[#allocation234_spill] sm:$0xff] %v10587_v16  ;;  %v1058_v8 = vld [vmem:[#allocation3 + $0x1d1] sm:$0xff] }
 0x2df   : > { %2818 = vrot.lane.b32.xlu0 %v1057_v37, %s9102_s11  ;;  %2812 = vrot.lane.b32.xlu1 %v1054_v33, %s9102_s11  ;;  %v1063_v33 = vld [vmem:[#allocation3 + $0x211] sm:$0xff] }
 0x2e1   : > { %v10591_v15 = vpop.permute.xlu0 %2514  ;;  %v10593_v9 = vpop.permute.xlu1 %2508 }
 0x2e2   : > { %14862 = vst [vmem:[#allocation235_spill] sm:$0xff] %v10591_v15  ;;  %14863 = vst [vmem:[#allocation236_spill] sm:$0xff] %v10593_v9  ;;  %v1060_v15 = vld [vmem:[#allocation3 + $0x1e9] sm:$0xff] }
 0x2e3   : > { %2822 = vrot.lane.b32.xlu0 %v1059_v35, %s9102_s11  ;;  %2816 = vrot.lane.b32.xlu1 %v1056_v21, %s9102_s11  ;;  %v1065_v21 = vld [vmem:[#allocation3 + $0x229] sm:$0xff] }
 0x2e5   : > { %v10597_v27 = vpop.permute.xlu0 %2518  ;;  %v10599_v19 = vpop.permute.xlu1 %2512 }
 0x2e6   : > { %14864 = vst [vmem:[#allocation237_spill] sm:$0xff] %v10597_v27  ;;  %14865 = vst [vmem:[#allocation238_spill] sm:$0xff] %v10599_v19  ;;  %v1062_v27 = vld [vmem:[#allocation3 + $0x201] sm:$0xff] }
 0x2e7   : > { %2826 = vrot.lane.b32.xlu0 %v1061_v7, %s9102_s11  ;;  %2820 = vrot.lane.b32.xlu1 %v1058_v8, %s9102_s11  ;;  %v1067_v8 = vld [vmem:[#allocation3 + $0x241] sm:$0xff] }
 0x2e9   : > { %v10603_v37 = vpop.permute.xlu0 %2522  ;;  %v10605_v16 = vpop.permute.xlu1 %2516 }
 0x2ea   : > { %14866 = vst [vmem:[#allocation239_spill] sm:$0xff] %v10603_v37  ;;  %14867 = vst [vmem:[#allocation240_spill] sm:$0xff] %v10605_v16  ;;  %v1064_v37 = vld [vmem:[#allocation3 + $0x219] sm:$0xff] }
 0x2eb   : > { %2830 = vrot.lane.b32.xlu0 %v1063_v33, %s9102_s11  ;;  %2824 = vrot.lane.b32.xlu1 %v1060_v15, %s9102_s11  ;;  %v1069_v15 = vld [vmem:[#allocation3 + $0x259] sm:$0xff] }
 0x2ed   : > { %v10609_v35 = vpop.permute.xlu0 %2526  ;;  %v10611_v9 = vpop.permute.xlu1 %2520 }
 0x2ee   : > { %14868 = vst [vmem:[#allocation241_spill] sm:$0xff] %v10609_v35  ;;  %14869 = vst [vmem:[#allocation242_spill] sm:$0xff] %v10611_v9  ;;  %v1066_v35 = vld [vmem:[#allocation3 + $0x231] sm:$0xff] }
 0x2ef   : > { %2834 = vrot.lane.b32.xlu0 %v1065_v21, %s9102_s11  ;;  %2828 = vrot.lane.b32.xlu1 %v1062_v27, %s9102_s11  ;;  %v1071_v27 = vld [vmem:[#allocation3 + $0x271] sm:$0xff] }
 0x2f1   : > { %v10615_v7 = vpop.permute.xlu0 %2530  ;;  %v10617_v19 = vpop.permute.xlu1 %2524 }
 0x2f2   : > { %14870 = vst [vmem:[#allocation243_spill] sm:$0xff] %v10615_v7  ;;  %14871 = vst [vmem:[#allocation244_spill] sm:$0xff] %v10617_v19  ;;  %v1068_v7 = vld [vmem:[#allocation3 + $0x249] sm:$0xff] }
 0x2f3   : > { %2838 = vrot.lane.b32.xlu0 %v1067_v8, %s9102_s11  ;;  %2832 = vrot.lane.b32.xlu1 %v1064_v37, %s9102_s11  ;;  %v1073_v37 = vld [vmem:[#allocation3 + $0x289] sm:$0xff] }
 0x2f5   : > { %v10621_v33 = vpop.permute.xlu0 %2534  ;;  %v10623_v16 = vpop.permute.xlu1 %2528 }
 0x2f6   : > { %14872 = vst [vmem:[#allocation245_spill] sm:$0xff] %v10621_v33  ;;  %14873 = vst [vmem:[#allocation246_spill] sm:$0xff] %v10623_v16  ;;  %v1070_v33 = vld [vmem:[#allocation3 + $0x261] sm:$0xff] }
 0x2f7   : > { %2842 = vrot.lane.b32.xlu0 %v1069_v15, %s9102_s11  ;;  %2836 = vrot.lane.b32.xlu1 %v1066_v35, %s9102_s11  ;;  %v1075_v35 = vld [vmem:[#allocation3 + $0x2a1] sm:$0xff] }
 0x2f9   : > { %v10627_v21 = vpop.permute.xlu0 %2538  ;;  %v10629_v9 = vpop.permute.xlu1 %2532 }
 0x2fa   : > { %14874 = vst [vmem:[#allocation247_spill] sm:$0xff] %v10627_v21  ;;  %14875 = vst [vmem:[#allocation248_spill] sm:$0xff] %v10629_v9  ;;  %v1072_v21 = vld [vmem:[#allocation3 + $0x279] sm:$0xff] }
 0x2fb   : > { %2846 = vrot.lane.b32.xlu0 %v1071_v27, %s9102_s11  ;;  %2840 = vrot.lane.b32.xlu1 %v1068_v7, %s9102_s11  ;;  %v1077_v7 = vld [vmem:[#allocation3 + $0x2b9] sm:$0xff] }
 0x2fd   : > { %v10633_v8 = vpop.permute.xlu0 %2542  ;;  %v10635_v19 = vpop.permute.xlu1 %2536 }
 0x2fe   : > { %14876 = vst [vmem:[#allocation249_spill] sm:$0xff] %v10633_v8  ;;  %14877 = vst [vmem:[#allocation250_spill] sm:$0xff] %v10635_v19  ;;  %v1074_v8 = vld [vmem:[#allocation3 + $0x291] sm:$0xff] }
 0x2ff   : > { %2850 = vrot.lane.b32.xlu0 %v1073_v37, %s9102_s11  ;;  %2844 = vrot.lane.b32.xlu1 %v1070_v33, %s9102_s11  ;;  %v1079_v33 = vld [vmem:[#allocation3 + $0x2d1] sm:$0xff] }
 0x301   : > { %v10639_v15 = vpop.permute.xlu0 %2546  ;;  %v10641_v16 = vpop.permute.xlu1 %2540 }
 0x302   : > { %14878 = vst [vmem:[#allocation251_spill] sm:$0xff] %v10639_v15  ;;  %14879 = vst [vmem:[#allocation252_spill] sm:$0xff] %v10641_v16  ;;  %v1076_v15 = vld [vmem:[#allocation3 + $0x2a9] sm:$0xff] }
 0x303   : > { %2854 = vrot.lane.b32.xlu0 %v1075_v35, %s9102_s11  ;;  %2848 = vrot.lane.b32.xlu1 %v1072_v21, %s9102_s11  ;;  %v1081_v21 = vld [vmem:[#allocation3 + $0x2e9] sm:$0xff] }
 0x305   : > { %v10645_v27 = vpop.permute.xlu0 %2550  ;;  %v10647_v9 = vpop.permute.xlu1 %2544 }
 0x306   : > { %14880 = vst [vmem:[#allocation253_spill] sm:$0xff] %v10645_v27  ;;  %14881 = vst [vmem:[#allocation254_spill] sm:$0xff] %v10647_v9  ;;  %v1078_v27 = vld [vmem:[#allocation3 + $0x2c1] sm:$0xff] }
 0x307   : > { %2858 = vrot.lane.b32.xlu0 %v1077_v7, %s9102_s11  ;;  %2852 = vrot.lane.b32.xlu1 %v1074_v8, %s9102_s11  ;;  %v1083_v8 = vld [vmem:[#allocation3 + $0x301] sm:$0xff] }
 0x309   : > { %v10651_v37 = vpop.permute.xlu0 %2554  ;;  %v10653_v19 = vpop.permute.xlu1 %2548 }
 0x30a   : > { %14882 = vst [vmem:[#allocation255_spill] sm:$0xff] %v10651_v37  ;;  %14883 = vst [vmem:[#allocation256_spill] sm:$0xff] %v10653_v19  ;;  %v1080_v37 = vld [vmem:[#allocation3 + $0x2d9] sm:$0xff] }
 0x30b   : > { %2862 = vrot.lane.b32.xlu0 %v1079_v33, %s9102_s11  ;;  %2856 = vrot.lane.b32.xlu1 %v1076_v15, %s9102_s11  ;;  %v1085_v15 = vld [vmem:[#allocation3 + $0x319] sm:$0xff] }
 0x30d   : > { %v10657_v35 = vpop.permute.xlu0 %2558  ;;  %v10659_v16 = vpop.permute.xlu1 %2552 }
 0x30e   : > { %14884 = vst [vmem:[#allocation257_spill] sm:$0xff] %v10657_v35  ;;  %14885 = vst [vmem:[#allocation258_spill] sm:$0xff] %v10659_v16  ;;  %v1082_v35 = vld [vmem:[#allocation3 + $0x2f1] sm:$0xff]  ;;  %v1084_v16 = vld [vmem:[#allocation3 + $0x309] sm:$0xff] }
 0x30f   : > { %2866 = vrot.lane.b32.xlu0 %v1081_v21, %s9102_s11  ;;  %2860 = vrot.lane.b32.xlu1 %v1078_v27, %s9102_s11  ;;  %v1087_v27 = vld [vmem:[#allocation3 + $0x331] sm:$0xff] }
 0x311   : > { %v10663_v7 = vpop.permute.xlu0 %2754  ;;  %v10665_v9 = vpop.permute.xlu1 %2556 }
 0x312   : > { %14886 = vst [vmem:[#allocation259_spill] sm:$0xff] %v10665_v9  ;;  %v1086_v9 = vld [vmem:[#allocation3 + $0x321] sm:$0xff] }
 0x313   : > { %2870 = vrot.lane.b32.xlu0 %v1083_v8, %s9102_s11  ;;  %2864 = vrot.lane.b32.xlu1 %v1080_v37, %s9102_s11  ;;  %v1089_v37 = vld [vmem:[#allocation3 + $0x379] sm:$0xff] }
 0x315   : > { %v10669_v33 = vpop.permute.xlu0 %2758  ;;  %v10671_v19 = vpop.permute.xlu1 %2560 }
 0x316   : > { %14887 = vst [vmem:[#allocation260_spill] sm:$0xff] %v10671_v19  ;;  %v1088_v19 = vld [vmem:[#allocation3 + $0x339] sm:$0xff] }
 0x317   : > { %2874 = vrot.lane.b32.xlu0 %v1085_v15, %s9102_s11  ;;  %2868 = vrot.lane.b32.xlu1 %v1082_v35, %s9102_s11  ;;  %v1091_v35 = vld [vmem:[#allocation3 + $0x391] sm:$0xff] }
 0x319   : > { %v10675_v21 = vpop.permute.xlu0 %2762  ;;  %v10677_v49 = vpop.permute.xlu1 %2756 }
 0x31b   : > { %2878 = vrot.lane.b32.xlu0 %v1087_v27, %s9102_s11  ;;  %2872 = vrot.lane.b32.xlu1 %v1084_v16, %s9102_s11  ;;  %v1093_v16 = vld [vmem:[#allocation3 + $0x3a9] sm:$0xff] }
 0x31d   : > { %v10681_v8 = vpop.permute.xlu0 %2766  ;;  %v10683_v23 = vpop.permute.xlu1 %2760 }
 0x31e   : > { %14888 = vst [vmem:[#allocation261_spill] sm:$0xff] %v10681_v8 }
 0x31f   : > { %2882 = vrot.lane.b32.xlu0 %v1089_v37, %s9102_s11  ;;  %2876 = vrot.lane.b32.xlu1 %v1086_v9, %s9102_s11  ;;  %v1095_v9 = vld [vmem:[#allocation3 + $0x3c1] sm:$0xff] }
 0x321   : > { %v10687_v15 = vpop.permute.xlu0 %2770  ;;  %v10689_v41 = vpop.permute.xlu1 %2764 }
 0x322   : > { %14889 = vst [vmem:[#allocation262_spill] sm:$0xff] %v10687_v15  ;;  %14890 = vst [vmem:[#allocation263_spill] sm:$0xff] %v10689_v41  ;;  %v1351_v41 = vld [vmem:[#allocation3 + $0x219] sm:$0xff] }
 0x323   : > { %2886 = vrot.lane.b32.xlu0 %v1091_v35, %s9102_s11  ;;  %2880 = vrot.lane.b32.xlu1 %v1088_v19, %s9102_s11  ;;  %v1097_v19 = vld [vmem:[#allocation3 + $0x3d9] sm:$0xff] }
 0x325   : > { %v10693_v27 = vpop.permute.xlu0 %2774  ;;  %v10695_v5 = vpop.permute.xlu1 %2768 }
 0x326   : > { %14891 = vst [vmem:[#allocation264_spill] sm:$0xff] %v10693_v27  ;;  %14892 = vst [vmem:[#allocation265_spill] sm:$0xff] %v10695_v5 }
 0x327   : > { %2890 = vrot.lane.b32.xlu0 %v1093_v16, %s9102_s11  ;;  %2884 = vrot.lane.b32.xlu1 %v1090_v53, %s9102_s11  ;;  %v1099_v53 = vld [vmem:[#allocation3 + $0x3f1] sm:$0xff] }
 0x329   : > { %v10699_v37 = vpop.permute.xlu0 %2778  ;;  %v10701_v11 = vpop.permute.xlu1 %2772 }
 0x32a   : > { %14893 = vst [vmem:[#allocation266_spill] sm:$0xff] %v10699_v37  ;;  %14894 = vst [vmem:[#allocation267_spill] sm:$0xff] %v10701_v11  ;;  %v1096_v37 = vld [vmem:[#allocation3 + $0x3c9] sm:$0xff] }
 0x32b   : > { %2894 = vrot.lane.b32.xlu0 %v1095_v9, %s9102_s11  ;;  %2888 = vrot.lane.b32.xlu1 %v1092_v10, %s9102_s11  ;;  %v1101_v10 = vld [vmem:[#allocation3 + $0x409] sm:$0xff] }
 0x32d   : > { %v10705_v35 = vpop.permute.xlu0 %2782  ;;  %v10707_v43 = vpop.permute.xlu1 %2776 }
 0x32e   : > { %14895 = vst [vmem:[#allocation268_spill] sm:$0xff] %v10705_v35  ;;  %14896 = vst [vmem:[#allocation269_spill] sm:$0xff] %v10707_v43  ;;  %v1098_v35 = vld [vmem:[#allocation3 + $0x3e1] sm:$0xff] }
 0x32f   : > { %2898 = vrot.lane.b32.xlu0 %v1097_v19, %s9102_s11  ;;  %2892 = vrot.lane.b32.xlu1 %v1094_v18, %s9102_s11  ;;  %v1103_v18 = vld [vmem:[#allocation3 + $0x421] sm:$0xff] }
 0x331   : > { %v10711_v16 = vpop.permute.xlu0 %2786  ;;  %v10713_v3 = vpop.permute.xlu1 %2780 }
 0x332   : > { %14897 = vst [vmem:[#allocation270_spill] sm:$0xff] %v10711_v16  ;;  %14898 = vst [vmem:[#allocation271_spill] sm:$0xff] %v10713_v3  ;;  %v1100_v16 = vld [vmem:[#allocation3 + $0x3f9] sm:$0xff] }
 0x333   : > { %2902 = vrot.lane.b32.xlu0 %v1099_v53, %s9102_s11  ;;  %2896 = vrot.lane.b32.xlu1 %v1096_v37, %s9102_s11  ;;  %v1105_v37 = vld [vmem:[#allocation3 + $0x439] sm:$0xff] }
 0x335   : > { %v10717_v9 = vpop.permute.xlu0 %2790  ;;  %v10719_v27 = vpop.permute.xlu1 %2784 }
 0x336   : > { %14899 = vst [vmem:[#allocation272_spill] sm:$0xff] %v10717_v9  ;;  %14900 = vst [vmem:[#allocation273_spill] sm:$0xff] %v10719_v27  ;;  %v1102_v9 = vld [vmem:[#allocation3 + $0x411] sm:$0xff] }
 0x337   : > { %2906 = vrot.lane.b32.xlu0 %v1101_v10, %s9102_s11  ;;  %2900 = vrot.lane.b32.xlu1 %v1098_v35, %s9102_s11  ;;  %v1107_v35 = vld [vmem:[#allocation3 + $0x451] sm:$0xff] }
 0x339   : > { %v10723_v19 = vpop.permute.xlu0 %2794  ;;  %v10725_v43 = vpop.permute.xlu1 %2788 }
 0x33a   : > { %14901 = vst [vmem:[#allocation274_spill] sm:$0xff] %v10723_v19  ;;  %14902 = vst [vmem:[#allocation275_spill] sm:$0xff] %v10725_v43  ;;  %v1104_v19 = vld [vmem:[#allocation3 + $0x429] sm:$0xff] }
 0x33b   : > { %2910 = vrot.lane.b32.xlu0 %v1103_v18, %s9102_s11  ;;  %2904 = vrot.lane.b32.xlu1 %v1100_v16, %s9102_s11  ;;  %v1109_v16 = vld [vmem:[#allocation3 + $0x469] sm:$0xff] }
 0x33d   : > { %v10729_v53 = vpop.permute.xlu0 %2798  ;;  %v10731_v3 = vpop.permute.xlu1 %2792 }
 0x33e   : > { %14903 = vst [vmem:[#allocation276_spill] sm:$0xff] %v10729_v53  ;;  %14904 = vst [vmem:[#allocation277_spill] sm:$0xff] %v10731_v3  ;;  %v1106_v53 = vld [vmem:[#allocation3 + $0x441] sm:$0xff] }
 0x33f   : > { %2914 = vrot.lane.b32.xlu0 %v1105_v37, %s9102_s11  ;;  %2908 = vrot.lane.b32.xlu1 %v1102_v9, %s9102_s11  ;;  %v1111_v9 = vld [vmem:[#allocation3 + $0x481] sm:$0xff] }
 0x341   : > { %v10735_v10 = vpop.permute.xlu0 %2802  ;;  %v10737_v27 = vpop.permute.xlu1 %2796 }
 0x342   : > { %14905 = vst [vmem:[#allocation278_spill] sm:$0xff] %v10735_v10  ;;  %14906 = vst [vmem:[#allocation279_spill] sm:$0xff] %v10737_v27  ;;  %v1108_v10 = vld [vmem:[#allocation3 + $0x459] sm:$0xff] }
 0x343   : > { %2918 = vrot.lane.b32.xlu0 %v1107_v35, %s9102_s11  ;;  %2912 = vrot.lane.b32.xlu1 %v1104_v19, %s9102_s11  ;;  %v1113_v19 = vld [vmem:[#allocation3 + $0x499] sm:$0xff] }
 0x345   : > { %v10741_v18 = vpop.permute.xlu0 %2806  ;;  %v10743_v43 = vpop.permute.xlu1 %2800 }
 0x346   : > { %14907 = vst [vmem:[#allocation280_spill] sm:$0xff] %v10741_v18  ;;  %14908 = vst [vmem:[#allocation281_spill] sm:$0xff] %v10743_v43  ;;  %v1110_v18 = vld [vmem:[#allocation3 + $0x471] sm:$0xff] }
 0x347   : > { %2922 = vrot.lane.b32.xlu0 %v1109_v16, %s9102_s11  ;;  %2916 = vrot.lane.b32.xlu1 %v1106_v53, %s9102_s11  ;;  %v1115_v53 = vld [vmem:[#allocation3 + $0x4b1] sm:$0xff] }
 0x349   : > { %v10747_v37 = vpop.permute.xlu0 %2810  ;;  %v10749_v3 = vpop.permute.xlu1 %2804 }
 0x34a   : > { %14909 = vst [vmem:[#allocation282_spill] sm:$0xff] %v10747_v37  ;;  %14910 = vst [vmem:[#allocation283_spill] sm:$0xff] %v10749_v3  ;;  %v1112_v37 = vld [vmem:[#allocation3 + $0x489] sm:$0xff] }
 0x34b   : > { %2926 = vrot.lane.b32.xlu0 %v1111_v9, %s9102_s11  ;;  %2920 = vrot.lane.b32.xlu1 %v1108_v10, %s9102_s11  ;;  %v1117_v10 = vld [vmem:[#allocation3 + $0x4c9] sm:$0xff] }
 0x34d   : > { %v10753_v35 = vpop.permute.xlu0 %2814  ;;  %v10755_v27 = vpop.permute.xlu1 %2808 }
 0x34e   : > { %14911 = vst [vmem:[#allocation284_spill] sm:$0xff] %v10753_v35  ;;  %14912 = vst [vmem:[#allocation285_spill] sm:$0xff] %v10755_v27  ;;  %v1114_v35 = vld [vmem:[#allocation3 + $0x4a1] sm:$0xff] }
 0x34f   : > { %2930 = vrot.lane.b32.xlu0 %v1113_v19, %s9102_s11  ;;  %2924 = vrot.lane.b32.xlu1 %v1110_v18, %s9102_s11  ;;  %v1119_v18 = vld [vmem:[#allocation3 + $0x4e1] sm:$0xff] }
 0x351   : > { %v10759_v16 = vpop.permute.xlu0 %2818  ;;  %v10761_v43 = vpop.permute.xlu1 %2812 }
 0x352   : > { %14913 = vst [vmem:[#allocation286_spill] sm:$0xff] %v10759_v16  ;;  %14914 = vst [vmem:[#allocation287_spill] sm:$0xff] %v10761_v43  ;;  %v1116_v16 = vld [vmem:[#allocation3 + $0x4b9] sm:$0xff] }
 0x353   : > { %2934 = vrot.lane.b32.xlu0 %v1115_v53, %s9102_s11  ;;  %2928 = vrot.lane.b32.xlu1 %v1112_v37, %s9102_s11  ;;  %v1121_v37 = vld [vmem:[#allocation3 + $0x1a] sm:$0xff] }
 0x355   : > { %v10765_v9 = vpop.permute.xlu0 %2822  ;;  %v10767_v3 = vpop.permute.xlu1 %2816 }
 0x356   : > { %14915 = vst [vmem:[#allocation288_spill] sm:$0xff] %v10765_v9  ;;  %14916 = vst [vmem:[#allocation289_spill] sm:$0xff] %v10767_v3  ;;  %v1118_v9 = vld [vmem:[#allocation3 + $0x4d1] sm:$0xff] }
 0x357   : > { %2938 = vrot.lane.b32.xlu0 %v1117_v10, %s9102_s11  ;;  %2932 = vrot.lane.b32.xlu1 %v1114_v35, %s9102_s11  ;;  %v1123_v35 = vld [vmem:[#allocation3 + $0x32] sm:$0xff] }
 0x359   : > { %v10771_v19 = vpop.permute.xlu0 %2826  ;;  %v10773_v27 = vpop.permute.xlu1 %2820 }
 0x35a   : > { %14917 = vst [vmem:[#allocation290_spill] sm:$0xff] %v10771_v19  ;;  %14918 = vst [vmem:[#allocation291_spill] sm:$0xff] %v10773_v27  ;;  %v1120_v19 = vld [vmem:[#allocation3 + $0x4e9] sm:$0xff] }
 0x35b   : > { %2942 = vrot.lane.b32.xlu0 %v1119_v18, %s9102_s11  ;;  %2936 = vrot.lane.b32.xlu1 %v1116_v16, %s9102_s11  ;;  %v1125_v16 = vld [vmem:[#allocation3 + $0x4a] sm:$0xff] }
 0x35d   : > { %v10777_v53 = vpop.permute.xlu0 %2830  ;;  %v10779_v43 = vpop.permute.xlu1 %2824 }
 0x35e   : > { %14919 = vst [vmem:[#allocation292_spill] sm:$0xff] %v10777_v53  ;;  %14920 = vst [vmem:[#allocation293_spill] sm:$0xff] %v10779_v43  ;;  %v1122_v53 = vld [vmem:[#allocation3 + $0x22] sm:$0xff] }
 0x35f   : > { %3138 = vrot.lane.b32.xlu0 %v1121_v37, %s9103_s12  ;;  %2940 = vrot.lane.b32.xlu1 %v1118_v9, %s9102_s11  ;;  %v1127_v9 = vld [vmem:[#allocation3 + $0x62] sm:$0xff] }
 0x361   : > { %v10783_v10 = vpop.permute.xlu0 %2834  ;;  %v10785_v27 = vpop.permute.xlu1 %2828 }
 0x362   : > { %14921 = vst [vmem:[#allocation294_spill] sm:$0xff] %v10783_v10  ;;  %14922 = vst [vmem:[#allocation295_spill] sm:$0xff] %v10785_v27  ;;  %v1124_v10 = vld [vmem:[#allocation3 + $0x3a] sm:$0xff] }
 0x363   : > { %3142 = vrot.lane.b32.xlu0 %v1123_v35, %s9103_s12  ;;  %2944 = vrot.lane.b32.xlu1 %v1120_v19, %s9102_s11  ;;  %v1129_v19 = vld [vmem:[#allocation3 + $0x7a] sm:$0xff] }
 0x365   : > { %v10789_v18 = vpop.permute.xlu0 %2838  ;;  %v10791_v43 = vpop.permute.xlu1 %2832 }
 0x366   : > { %14923 = vst [vmem:[#allocation296_spill] sm:$0xff] %v10789_v18  ;;  %14924 = vst [vmem:[#allocation297_spill] sm:$0xff] %v10791_v43  ;;  %v1126_v18 = vld [vmem:[#allocation3 + $0x52] sm:$0xff] }
 0x367   : > { %3146 = vrot.lane.b32.xlu0 %v1125_v16, %s9103_s12  ;;  %3140 = vrot.lane.b32.xlu1 %v1122_v53, %s9103_s12  ;;  %v1131_v53 = vld [vmem:[#allocation3 + $0x92] sm:$0xff] }
 0x369   : > { %v10795_v37 = vpop.permute.xlu0 %2842  ;;  %v10797_v3 = vpop.permute.xlu1 %2836 }
 0x36a   : > { %14925 = vst [vmem:[#allocation298_spill] sm:$0xff] %v10795_v37  ;;  %14926 = vst [vmem:[#allocation299_spill] sm:$0xff] %v10797_v3  ;;  %v1128_v37 = vld [vmem:[#allocation3 + $0x6a] sm:$0xff] }
 0x36b   : > { %3150 = vrot.lane.b32.xlu0 %v1127_v9, %s9103_s12  ;;  %3144 = vrot.lane.b32.xlu1 %v1124_v10, %s9103_s12  ;;  %v1133_v10 = vld [vmem:[#allocation3 + $0xaa] sm:$0xff] }
 0x36d   : > { %v10801_v35 = vpop.permute.xlu0 %2846  ;;  %v10803_v27 = vpop.permute.xlu1 %2840 }
 0x36e   : > { %14927 = vst [vmem:[#allocation300_spill] sm:$0xff] %v10801_v35  ;;  %14928 = vst [vmem:[#allocation301_spill] sm:$0xff] %v10803_v27  ;;  %v1130_v35 = vld [vmem:[#allocation3 + $0x82] sm:$0xff] }
 0x36f   : > { %3154 = vrot.lane.b32.xlu0 %v1129_v19, %s9103_s12  ;;  %3148 = vrot.lane.b32.xlu1 %v1126_v18, %s9103_s12  ;;  %v1135_v18 = vld [vmem:[#allocation3 + $0xc2] sm:$0xff] }
 0x371   : > { %v10807_v16 = vpop.permute.xlu0 %2850  ;;  %v10809_v43 = vpop.permute.xlu1 %2844 }
 0x372   : > { %14929 = vst [vmem:[#allocation302_spill] sm:$0xff] %v10807_v16  ;;  %14930 = vst [vmem:[#allocation303_spill] sm:$0xff] %v10809_v43  ;;  %v1132_v16 = vld [vmem:[#allocation3 + $0x9a] sm:$0xff] }
 0x373   : > { %3158 = vrot.lane.b32.xlu0 %v1131_v53, %s9103_s12  ;;  %3152 = vrot.lane.b32.xlu1 %v1128_v37, %s9103_s12  ;;  %v1137_v37 = vld [vmem:[#allocation3 + $0xda] sm:$0xff] }
 0x375   : > { %v10813_v9 = vpop.permute.xlu0 %2854  ;;  %v10815_v3 = vpop.permute.xlu1 %2848 }
 0x376   : > { %14931 = vst [vmem:[#allocation304_spill] sm:$0xff] %v10813_v9  ;;  %14932 = vst [vmem:[#allocation305_spill] sm:$0xff] %v10815_v3  ;;  %v1134_v9 = vld [vmem:[#allocation3 + $0xb2] sm:$0xff] }
 0x377   : > { %3162 = vrot.lane.b32.xlu0 %v1133_v10, %s9103_s12  ;;  %3156 = vrot.lane.b32.xlu1 %v1130_v35, %s9103_s12  ;;  %v1139_v35 = vld [vmem:[#allocation3 + $0xf2] sm:$0xff] }
 0x379   : > { %v10819_v19 = vpop.permute.xlu0 %2858  ;;  %v10821_v27 = vpop.permute.xlu1 %2852 }
 0x37a   : > { %14933 = vst [vmem:[#allocation306_spill] sm:$0xff] %v10819_v19  ;;  %14934 = vst [vmem:[#allocation307_spill] sm:$0xff] %v10821_v27  ;;  %v1136_v19 = vld [vmem:[#allocation3 + $0xca] sm:$0xff] }
 0x37b   : > { %3166 = vrot.lane.b32.xlu0 %v1135_v18, %s9103_s12  ;;  %3160 = vrot.lane.b32.xlu1 %v1132_v16, %s9103_s12  ;;  %v1141_v16 = vld [vmem:[#allocation3 + $0x10a] sm:$0xff] }
 0x37d   : > { %v10825_v53 = vpop.permute.xlu0 %2862  ;;  %v10827_v43 = vpop.permute.xlu1 %2856 }
 0x37e   : > { %14935 = vst [vmem:[#allocation308_spill] sm:$0xff] %v10825_v53  ;;  %14936 = vst [vmem:[#allocation309_spill] sm:$0xff] %v10827_v43  ;;  %v1138_v53 = vld [vmem:[#allocation3 + $0xe2] sm:$0xff] }
 0x37f   : > { %3170 = vrot.lane.b32.xlu0 %v1137_v37, %s9103_s12  ;;  %3164 = vrot.lane.b32.xlu1 %v1134_v9, %s9103_s12  ;;  %v1143_v9 = vld [vmem:[#allocation3 + $0x122] sm:$0xff] }
 0x381   : > { %v10831_v10 = vpop.permute.xlu0 %2866  ;;  %v10833_v3 = vpop.permute.xlu1 %2860 }
 0x382   : > { %14937 = vst [vmem:[#allocation310_spill] sm:$0xff] %v10831_v10  ;;  %14938 = vst [vmem:[#allocation311_spill] sm:$0xff] %v10833_v3  ;;  %v1140_v10 = vld [vmem:[#allocation3 + $0xfa] sm:$0xff] }
 0x383   : > { %3174 = vrot.lane.b32.xlu0 %v1139_v35, %s9103_s12  ;;  %3168 = vrot.lane.b32.xlu1 %v1136_v19, %s9103_s12  ;;  %v1145_v19 = vld [vmem:[#allocation3 + $0x13a] sm:$0xff] }
 0x385   : > { %v10837_v18 = vpop.permute.xlu0 %2870  ;;  %v10839_v27 = vpop.permute.xlu1 %2864 }
 0x386   : > { %14939 = vst [vmem:[#allocation312_spill] sm:$0xff] %v10837_v18  ;;  %14940 = vst [vmem:[#allocation313_spill] sm:$0xff] %v10839_v27  ;;  %v1142_v18 = vld [vmem:[#allocation3 + $0x112] sm:$0xff]  ;;  %v1144_v27 = vld [vmem:[#allocation3 + $0x12a] sm:$0xff] }
 0x387   : > { %3178 = vrot.lane.b32.xlu0 %v1141_v16, %s9103_s12  ;;  %3172 = vrot.lane.b32.xlu1 %v1138_v53, %s9103_s12  ;;  %v1147_v53 = vld [vmem:[#allocation3 + $0x152] sm:$0xff] }
 0x389   : > { %v10843_v37 = vpop.permute.xlu0 %2874  ;;  %v10845_v43 = vpop.permute.xlu1 %2868 }
 0x38a   : > { %14941 = vst [vmem:[#allocation314_spill] sm:$0xff] %v10843_v37  ;;  %14942 = vst [vmem:[#allocation315_spill] sm:$0xff] %v10845_v43  ;;  %v1146_v43 = vld [vmem:[#allocation3 + $0x142] sm:$0xff] }
 0x38b   : > { %3182 = vrot.lane.b32.xlu0 %v1143_v9, %s9103_s12  ;;  %3176 = vrot.lane.b32.xlu1 %v1140_v10, %s9103_s12  ;;  %v1149_v10 = vld [vmem:[#allocation3 + $0x16a] sm:$0xff] }
 0x38d   : > { %v10849_v35 = vpop.permute.xlu0 %2878  ;;  %v10851_v3 = vpop.permute.xlu1 %2872 }
 0x38e   : > { %14943 = vst [vmem:[#allocation316_spill] sm:$0xff] %v10849_v35  ;;  %14944 = vst [vmem:[#allocation317_spill] sm:$0xff] %v10851_v3  ;;  %v1148_v3 = vld [vmem:[#allocation3 + $0x15a] sm:$0xff] }
 0x38f   : > { %3186 = vrot.lane.b32.xlu0 %v1145_v19, %s9103_s12  ;;  %3180 = vrot.lane.b32.xlu1 %v1142_v18, %s9103_s12  ;;  %v1151_v18 = vld [vmem:[#allocation3 + $0x182] sm:$0xff] }
 0x391   : > { %v10855_v16 = vpop.permute.xlu0 %2882  ;;  %v10857_v37 = vpop.permute.xlu1 %2876 }
 0x392   : > { %14945 = vst [vmem:[#allocation318_spill] sm:$0xff] %v10855_v16  ;;  %14946 = vst [vmem:[#allocation319_spill] sm:$0xff] %v10857_v37 }
 0x393   : > { %3190 = vrot.lane.b32.xlu0 %v1147_v53, %s9103_s12  ;;  %3184 = vrot.lane.b32.xlu1 %v1144_v27, %s9103_s12  ;;  %v1153_v27 = vld [vmem:[#allocation3 + $0x1ca] sm:$0xff] }
 0x395   : > { %v10861_v9 = vpop.permute.xlu0 %2886  ;;  %v10863_v35 = vpop.permute.xlu1 %2880 }
 0x396   : > { %14947 = vst [vmem:[#allocation320_spill] sm:$0xff] %v10861_v9  ;;  %14948 = vst [vmem:[#allocation321_spill] sm:$0xff] %v10863_v35  ;;  %v1150_v9 = vld [vmem:[#allocation3 + $0x172] sm:$0xff] }
 0x397   : > { %3194 = vrot.lane.b32.xlu0 %v1149_v10, %s9103_s12  ;;  %3188 = vrot.lane.b32.xlu1 %v1146_v43, %s9103_s12  ;;  %v1155_v43 = vld [vmem:[#allocation3 + $0x1e2] sm:$0xff] }
 0x399   : > { %v10867_v19 = vpop.permute.xlu0 %2890  ;;  %v10869_v16 = vpop.permute.xlu1 %2884 }
 0x39a   : > { %14949 = vst [vmem:[#allocation322_spill] sm:$0xff] %v10867_v19  ;;  %14950 = vst [vmem:[#allocation323_spill] sm:$0xff] %v10869_v16  ;;  %v1152_v19 = vld [vmem:[#allocation3 + $0x18a] sm:$0xff] }
 0x39b   : > { %3198 = vrot.lane.b32.xlu0 %v1151_v18, %s9103_s12  ;;  %3192 = vrot.lane.b32.xlu1 %v1148_v3, %s9103_s12  ;;  %v1157_v3 = vld [vmem:[#allocation3 + $0x1fa] sm:$0xff] }
 0x39d   : > { %v10873_v53 = vpop.permute.xlu0 %2894  ;;  %v10875_v37 = vpop.permute.xlu1 %2888 }
 0x39e   : > { %14951 = vst [vmem:[#allocation324_spill] sm:$0xff] %v10873_v53  ;;  %14952 = vst [vmem:[#allocation325_spill] sm:$0xff] %v10875_v37  ;;  %v1154_v53 = vld [vmem:[#allocation3 + $0x1d2] sm:$0xff] }
 0x39f   : > { %3202 = vrot.lane.b32.xlu0 %v1153_v27, %s9103_s12  ;;  %3196 = vrot.lane.b32.xlu1 %v1150_v9, %s9103_s12  ;;  %v1159_v9 = vld [vmem:[#allocation3 + $0x212] sm:$0xff] }
 0x3a1   : > { %v10879_v10 = vpop.permute.xlu0 %2898  ;;  %v10881_v35 = vpop.permute.xlu1 %2892 }
 0x3a2   : > { %14953 = vst [vmem:[#allocation326_spill] sm:$0xff] %v10879_v10  ;;  %14954 = vst [vmem:[#allocation327_spill] sm:$0xff] %v10881_v35  ;;  %v1156_v10 = vld [vmem:[#allocation3 + $0x1ea] sm:$0xff] }
 0x3a3   : > { %3206 = vrot.lane.b32.xlu0 %v1155_v43, %s9103_s12  ;;  %3200 = vrot.lane.b32.xlu1 %v1152_v19, %s9103_s12  ;;  %v1161_v19 = vld [vmem:[#allocation3 + $0x22a] sm:$0xff] }
 0x3a5   : > { %v10885_v18 = vpop.permute.xlu0 %2902  ;;  %v10887_v16 = vpop.permute.xlu1 %2896 }
 0x3a6   : > { %14955 = vst [vmem:[#allocation328_spill] sm:$0xff] %v10885_v18  ;;  %14956 = vst [vmem:[#allocation329_spill] sm:$0xff] %v10887_v16  ;;  %v1158_v18 = vld [vmem:[#allocation3 + $0x202] sm:$0xff] }
 0x3a7   : > { %3210 = vrot.lane.b32.xlu0 %v1157_v3, %s9103_s12  ;;  %3204 = vrot.lane.b32.xlu1 %v1154_v53, %s9103_s12  ;;  %v1163_v53 = vld [vmem:[#allocation3 + $0x242] sm:$0xff] }
 0x3a9   : > { %v10891_v27 = vpop.permute.xlu0 %2906  ;;  %v10893_v37 = vpop.permute.xlu1 %2900 }
 0x3aa   : > { %14957 = vst [vmem:[#allocation330_spill] sm:$0xff] %v10891_v27  ;;  %14958 = vst [vmem:[#allocation331_spill] sm:$0xff] %v10893_v37  ;;  %v1160_v27 = vld [vmem:[#allocation3 + $0x21a] sm:$0xff] }
 0x3ab   : > { %3214 = vrot.lane.b32.xlu0 %v1159_v9, %s9103_s12  ;;  %3208 = vrot.lane.b32.xlu1 %v1156_v10, %s9103_s12  ;;  %v1165_v10 = vld [vmem:[#allocation3 + $0x25a] sm:$0xff] }
 0x3ad   : > { %v10897_v43 = vpop.permute.xlu0 %2910  ;;  %v10899_v35 = vpop.permute.xlu1 %2904 }
 0x3ae   : > { %14959 = vst [vmem:[#allocation332_spill] sm:$0xff] %v10897_v43  ;;  %14960 = vst [vmem:[#allocation333_spill] sm:$0xff] %v10899_v35  ;;  %v1162_v43 = vld [vmem:[#allocation3 + $0x232] sm:$0xff] }
 0x3af   : > { %3218 = vrot.lane.b32.xlu0 %v1161_v19, %s9103_s12  ;;  %3212 = vrot.lane.b32.xlu1 %v1158_v18, %s9103_s12  ;;  %v1167_v18 = vld [vmem:[#allocation3 + $0x272] sm:$0xff] }
 0x3b1   : > { %v10903_v3 = vpop.permute.xlu0 %2914  ;;  %v10905_v16 = vpop.permute.xlu1 %2908 }
 0x3b2   : > { %14961 = vst [vmem:[#allocation334_spill] sm:$0xff] %v10903_v3  ;;  %14962 = vst [vmem:[#allocation335_spill] sm:$0xff] %v10905_v16  ;;  %v1164_v3 = vld [vmem:[#allocation3 + $0x24a] sm:$0xff] }
 0x3b3   : > { %3222 = vrot.lane.b32.xlu0 %v1163_v53, %s9103_s12  ;;  %3216 = vrot.lane.b32.xlu1 %v1160_v27, %s9103_s12  ;;  %v1169_v27 = vld [vmem:[#allocation3 + $0x28a] sm:$0xff] }
 0x3b5   : > { %v10909_v9 = vpop.permute.xlu0 %2918  ;;  %v10911_v37 = vpop.permute.xlu1 %2912 }
 0x3b6   : > { %14963 = vst [vmem:[#allocation336_spill] sm:$0xff] %v10909_v9  ;;  %14964 = vst [vmem:[#allocation337_spill] sm:$0xff] %v10911_v37  ;;  %v1166_v9 = vld [vmem:[#allocation3 + $0x262] sm:$0xff] }
 0x3b7   : > { %3226 = vrot.lane.b32.xlu0 %v1165_v10, %s9103_s12  ;;  %3220 = vrot.lane.b32.xlu1 %v1162_v43, %s9103_s12  ;;  %v1171_v43 = vld [vmem:[#allocation3 + $0x2a2] sm:$0xff] }
 0x3b9   : > { %v10915_v19 = vpop.permute.xlu0 %2922  ;;  %v10917_v35 = vpop.permute.xlu1 %2916 }
 0x3ba   : > { %14965 = vst [vmem:[#allocation338_spill] sm:$0xff] %v10915_v19  ;;  %14966 = vst [vmem:[#allocation339_spill] sm:$0xff] %v10917_v35  ;;  %v1168_v19 = vld [vmem:[#allocation3 + $0x27a] sm:$0xff] }
 0x3bb   : > { %3230 = vrot.lane.b32.xlu0 %v1167_v18, %s9103_s12  ;;  %3224 = vrot.lane.b32.xlu1 %v1164_v3, %s9103_s12  ;;  %v1173_v3 = vld [vmem:[#allocation3 + $0x2ba] sm:$0xff] }
 0x3bd   : > { %v10921_v53 = vpop.permute.xlu0 %2926  ;;  %v10923_v16 = vpop.permute.xlu1 %2920 }
 0x3be   : > { %14967 = vst [vmem:[#allocation340_spill] sm:$0xff] %v10921_v53  ;;  %14968 = vst [vmem:[#allocation341_spill] sm:$0xff] %v10923_v16  ;;  %v1170_v53 = vld [vmem:[#allocation3 + $0x292] sm:$0xff] }
 0x3bf   : > { %3234 = vrot.lane.b32.xlu0 %v1169_v27, %s9103_s12  ;;  %3228 = vrot.lane.b32.xlu1 %v1166_v9, %s9103_s12  ;;  %v1175_v9 = vld [vmem:[#allocation3 + $0x2d2] sm:$0xff] }
 0x3c1   : > { %v10927_v10 = vpop.permute.xlu0 %2930  ;;  %v10929_v37 = vpop.permute.xlu1 %2924 }
 0x3c2   : > { %14969 = vst [vmem:[#allocation342_spill] sm:$0xff] %v10927_v10  ;;  %14970 = vst [vmem:[#allocation343_spill] sm:$0xff] %v10929_v37  ;;  %v1172_v10 = vld [vmem:[#allocation3 + $0x2aa] sm:$0xff] }
 0x3c3   : > { %3238 = vrot.lane.b32.xlu0 %v1171_v43, %s9103_s12  ;;  %3232 = vrot.lane.b32.xlu1 %v1168_v19, %s9103_s12  ;;  %v1177_v19 = vld [vmem:[#allocation3 + $0x2ea] sm:$0xff] }
 0x3c5   : > { %v10933_v18 = vpop.permute.xlu0 %2934  ;;  %v10935_v35 = vpop.permute.xlu1 %2928 }
 0x3c6   : > { %14971 = vst [vmem:[#allocation344_spill] sm:$0xff] %v10933_v18  ;;  %14972 = vst [vmem:[#allocation345_spill] sm:$0xff] %v10935_v35  ;;  %v1174_v18 = vld [vmem:[#allocation3 + $0x2c2] sm:$0xff] }
 0x3c7   : > { %3242 = vrot.lane.b32.xlu0 %v1173_v3, %s9103_s12  ;;  %3236 = vrot.lane.b32.xlu1 %v1170_v53, %s9103_s12  ;;  %v1179_v53 = vld [vmem:[#allocation3 + $0x302] sm:$0xff] }
 0x3c9   : > { %v10939_v27 = vpop.permute.xlu0 %2938  ;;  %v10941_v16 = vpop.permute.xlu1 %2932 }
 0x3ca   : > { %14973 = vst [vmem:[#allocation346_spill] sm:$0xff] %v10939_v27  ;;  %14974 = vst [vmem:[#allocation347_spill] sm:$0xff] %v10941_v16  ;;  %v1176_v27 = vld [vmem:[#allocation3 + $0x2da] sm:$0xff] }
 0x3cb   : > { %3246 = vrot.lane.b32.xlu0 %v1175_v9, %s9103_s12  ;;  %3240 = vrot.lane.b32.xlu1 %v1172_v10, %s9103_s12  ;;  %v1181_v10 = vld [vmem:[#allocation3 + $0x31a] sm:$0xff] }
 0x3cd   : > { %v10945_v43 = vpop.permute.xlu0 %2942  ;;  %v10947_v37 = vpop.permute.xlu1 %2936 }
 0x3ce   : > { %14975 = vst [vmem:[#allocation348_spill] sm:$0xff] %v10945_v43  ;;  %14976 = vst [vmem:[#allocation349_spill] sm:$0xff] %v10947_v37  ;;  %v1178_v43 = vld [vmem:[#allocation3 + $0x2f2] sm:$0xff]  ;;  %v1180_v37 = vld [vmem:[#allocation3 + $0x30a] sm:$0xff] }
 0x3cf   : > { %3250 = vrot.lane.b32.xlu0 %v1177_v19, %s9103_s12  ;;  %3244 = vrot.lane.b32.xlu1 %v1174_v18, %s9103_s12  ;;  %v1183_v18 = vld [vmem:[#allocation3 + $0x332] sm:$0xff] }
 0x3d1   : > { %v10951_v3 = vpop.permute.xlu0 %3138  ;;  %v10953_v35 = vpop.permute.xlu1 %2940 }
 0x3d2   : > { %14977 = vst [vmem:[#allocation350_spill] sm:$0xff] %v10953_v35  ;;  %v1182_v35 = vld [vmem:[#allocation3 + $0x322] sm:$0xff] }
 0x3d3   : > { %3254 = vrot.lane.b32.xlu0 %v1179_v53, %s9103_s12  ;;  %3248 = vrot.lane.b32.xlu1 %v1176_v27, %s9103_s12  ;;  %v1185_v27 = vld [vmem:[#allocation3 + $0x37a] sm:$0xff] }
 0x3d5   : > { %v10957_v9 = vpop.permute.xlu0 %3142  ;;  %v10959_v16 = vpop.permute.xlu1 %2944 }
 0x3d6   : > { %14978 = vst [vmem:[#allocation351_spill] sm:$0xff] %v10959_v16  ;;  %v1184_v16 = vld [vmem:[#allocation3 + $0x33a] sm:$0xff] }
 0x3d7   : > { %3258 = vrot.lane.b32.xlu0 %v1181_v10, %s9103_s12  ;;  %3252 = vrot.lane.b32.xlu1 %v1178_v43, %s9103_s12  ;;  %v1187_v43 = vld [vmem:[#allocation3 + $0x392] sm:$0xff] }
 0x3d9   : > { %v10963_v19 = vpop.permute.xlu0 %3146  ;;  %v10965_v11 = vpop.permute.xlu1 %3140 }
 0x3db   : > { %3262 = vrot.lane.b32.xlu0 %v1183_v18, %s9103_s12  ;;  %3256 = vrot.lane.b32.xlu1 %v1180_v37, %s9103_s12  ;;  %v1189_v37 = vld [vmem:[#allocation3 + $0x3aa] sm:$0xff] }
 0x3dd   : > { %v10969_v53 = vpop.permute.xlu0 %3150  ;;  %v10971_v47 = vpop.permute.xlu1 %3144 }
 0x3de   : > { %14979 = vst [vmem:[#allocation352_spill] sm:$0xff] %v10969_v53 }
 0x3df   : > { %3266 = vrot.lane.b32.xlu0 %v1185_v27, %s9103_s12  ;;  %3260 = vrot.lane.b32.xlu1 %v1182_v35, %s9103_s12  ;;  %v1191_v35 = vld [vmem:[#allocation3 + $0x3c2] sm:$0xff] }
 0x3e1   : > { %v10975_v10 = vpop.permute.xlu0 %3154  ;;  %v10977_v14 = vpop.permute.xlu1 %3148 }
 0x3e2   : > { %14980 = vst [vmem:[#allocation353_spill] sm:$0xff] %v10975_v10  ;;  %14981 = vst [vmem:[#allocation354_spill] sm:$0xff] %v10977_v14  ;;  %v1188_v10 = vld [vmem:[#allocation3 + $0x39a] sm:$0xff] }
 0x3e3   : > { %3270 = vrot.lane.b32.xlu0 %v1187_v43, %s9103_s12  ;;  %3264 = vrot.lane.b32.xlu1 %v1184_v16, %s9103_s12  ;;  %v1193_v16 = vld [vmem:[#allocation3 + $0x3da] sm:$0xff] }
 0x3e5   : > { %v10981_v18 = vpop.permute.xlu0 %3158  ;;  %v10983_v61 = vpop.permute.xlu1 %3152 }
 0x3e6   : > { %14982 = vst [vmem:[#allocation355_spill] sm:$0xff] %v10981_v18  ;;  %14983 = vst [vmem:[#allocation356_spill] sm:$0xff] %v10983_v61  ;;  %v1190_v18 = vld [vmem:[#allocation3 + $0x3b2] sm:$0xff] }
 0x3e7   : > { %3274 = vrot.lane.b32.xlu0 %v1189_v37, %s9103_s12  ;;  %3268 = vrot.lane.b32.xlu1 %v1186_v0, %s9103_s12  ;;  %v1195_v0 = vld [vmem:[#allocation3 + $0x3f2] sm:$0xff] }
 0x3e9   : > { %v10987_v27 = vpop.permute.xlu0 %3162  ;;  %v10989_v1 = vpop.permute.xlu1 %3156 }
 0x3ea   : > { %14984 = vst [vmem:[#allocation357_spill] sm:$0xff] %v10987_v27  ;;  %14985 = vst [vmem:[#allocation358_spill] sm:$0xff] %v10989_v1  ;;  %v1192_v27 = vld [vmem:[#allocation3 + $0x3ca] sm:$0xff] }
 0x3eb   : > { %3278 = vrot.lane.b32.xlu0 %v1191_v35, %s9103_s12  ;;  %3272 = vrot.lane.b32.xlu1 %v1188_v10, %s9103_s12  ;;  %v1197_v10 = vld [vmem:[#allocation3 + $0x40a] sm:$0xff] }
 0x3ed   : > { %v10993_v43 = vpop.permute.xlu0 %3166  ;;  %v10995_v15 = vpop.permute.xlu1 %3160 }
 0x3ee   : > { %14986 = vst [vmem:[#allocation359_spill] sm:$0xff] %v10993_v43  ;;  %14987 = vst [vmem:[#allocation360_spill] sm:$0xff] %v10995_v15  ;;  %v1194_v43 = vld [vmem:[#allocation3 + $0x3e2] sm:$0xff] }
 0x3ef   : > { %3282 = vrot.lane.b32.xlu0 %v1193_v16, %s9103_s12  ;;  %3276 = vrot.lane.b32.xlu1 %v1190_v18, %s9103_s12  ;;  %v1199_v18 = vld [vmem:[#allocation3 + $0x422] sm:$0xff] }
 0x3f1   : > { %v10999_v37 = vpop.permute.xlu0 %3170  ;;  %v11001_v61 = vpop.permute.xlu1 %3164 }
 0x3f2   : > { %14988 = vst [vmem:[#allocation361_spill] sm:$0xff] %v10999_v37  ;;  %14989 = vst [vmem:[#allocation362_spill] sm:$0xff] %v11001_v61  ;;  %v1196_v37 = vld [vmem:[#allocation3 + $0x3fa] sm:$0xff] }
 0x3f3   : > { %3286 = vrot.lane.b32.xlu0 %v1195_v0, %s9103_s12  ;;  %3280 = vrot.lane.b32.xlu1 %v1192_v27, %s9103_s12  ;;  %v1201_v27 = vld [vmem:[#allocation3 + $0x43a] sm:$0xff] }
 0x3f5   : > { %v11005_v35 = vpop.permute.xlu0 %3174  ;;  %v11007_v1 = vpop.permute.xlu1 %3168 }
 0x3f6   : > { %14990 = vst [vmem:[#allocation363_spill] sm:$0xff] %v11005_v35  ;;  %14991 = vst [vmem:[#allocation364_spill] sm:$0xff] %v11007_v1  ;;  %v1198_v35 = vld [vmem:[#allocation3 + $0x412] sm:$0xff] }
 0x3f7   : > { %3290 = vrot.lane.b32.xlu0 %v1197_v10, %s9103_s12  ;;  %3284 = vrot.lane.b32.xlu1 %v1194_v43, %s9103_s12  ;;  %v1203_v43 = vld [vmem:[#allocation3 + $0x452] sm:$0xff] }
 0x3f9   : > { %v11011_v16 = vpop.permute.xlu0 %3178  ;;  %v11013_v15 = vpop.permute.xlu1 %3172 }
 0x3fa   : > { %14992 = vst [vmem:[#allocation365_spill] sm:$0xff] %v11011_v16  ;;  %14993 = vst [vmem:[#allocation366_spill] sm:$0xff] %v11013_v15  ;;  %v1200_v16 = vld [vmem:[#allocation3 + $0x42a] sm:$0xff] }
 0x3fb   : > { %3294 = vrot.lane.b32.xlu0 %v1199_v18, %s9103_s12  ;;  %3288 = vrot.lane.b32.xlu1 %v1196_v37, %s9103_s12  ;;  %v1205_v37 = vld [vmem:[#allocation3 + $0x46a] sm:$0xff] }
 0x3fd   : > { %v11017_v0 = vpop.permute.xlu0 %3182  ;;  %v11019_v61 = vpop.permute.xlu1 %3176 }
 0x3fe   : > { %14994 = vst [vmem:[#allocation367_spill] sm:$0xff] %v11017_v0  ;;  %14995 = vst [vmem:[#allocation368_spill] sm:$0xff] %v11019_v61  ;;  %v1202_v0 = vld [vmem:[#allocation3 + $0x442] sm:$0xff] }
 0x3ff   : > { %3298 = vrot.lane.b32.xlu0 %v1201_v27, %s9103_s12  ;;  %3292 = vrot.lane.b32.xlu1 %v1198_v35, %s9103_s12  ;;  %v1207_v35 = vld [vmem:[#allocation3 + $0x482] sm:$0xff] }
 0x401   : > { %v11023_v10 = vpop.permute.xlu0 %3186  ;;  %v11025_v1 = vpop.permute.xlu1 %3180 }
 0x402   : > { %14996 = vst [vmem:[#allocation369_spill] sm:$0xff] %v11023_v10  ;;  %14997 = vst [vmem:[#allocation370_spill] sm:$0xff] %v11025_v1  ;;  %v1204_v10 = vld [vmem:[#allocation3 + $0x45a] sm:$0xff] }
 0x403   : > { %3302 = vrot.lane.b32.xlu0 %v1203_v43, %s9103_s12  ;;  %3296 = vrot.lane.b32.xlu1 %v1200_v16, %s9103_s12  ;;  %v1209_v16 = vld [vmem:[#allocation3 + $0x49a] sm:$0xff] }
 0x405   : > { %v11029_v18 = vpop.permute.xlu0 %3190  ;;  %v11031_v15 = vpop.permute.xlu1 %3184 }
 0x406   : > { %14998 = vst [vmem:[#allocation371_spill] sm:$0xff] %v11029_v18  ;;  %14999 = vst [vmem:[#allocation372_spill] sm:$0xff] %v11031_v15  ;;  %v1206_v18 = vld [vmem:[#allocation3 + $0x472] sm:$0xff] }
 0x407   : > { %3306 = vrot.lane.b32.xlu0 %v1205_v37, %s9103_s12  ;;  %3300 = vrot.lane.b32.xlu1 %v1202_v0, %s9103_s12  ;;  %v1211_v0 = vld [vmem:[#allocation3 + $0x4b2] sm:$0xff] }
 0x409   : > { %v11035_v27 = vpop.permute.xlu0 %3194  ;;  %v11037_v61 = vpop.permute.xlu1 %3188 }
 0x40a   : > { %15000 = vst [vmem:[#allocation373_spill] sm:$0xff] %v11035_v27  ;;  %15001 = vst [vmem:[#allocation374_spill] sm:$0xff] %v11037_v61  ;;  %v1208_v27 = vld [vmem:[#allocation3 + $0x48a] sm:$0xff] }
 0x40b   : > { %3310 = vrot.lane.b32.xlu0 %v1207_v35, %s9103_s12  ;;  %3304 = vrot.lane.b32.xlu1 %v1204_v10, %s9103_s12  ;;  %v1213_v10 = vld [vmem:[#allocation3 + $0x4ca] sm:$0xff] }
 0x40d   : > { %v11041_v43 = vpop.permute.xlu0 %3198  ;;  %v11043_v1 = vpop.permute.xlu1 %3192 }
 0x40e   : > { %15002 = vst [vmem:[#allocation375_spill] sm:$0xff] %v11041_v43  ;;  %15003 = vst [vmem:[#allocation376_spill] sm:$0xff] %v11043_v1  ;;  %v1210_v43 = vld [vmem:[#allocation3 + $0x4a2] sm:$0xff] }
 0x40f   : > { %3314 = vrot.lane.b32.xlu0 %v1209_v16, %s9103_s12  ;;  %3308 = vrot.lane.b32.xlu1 %v1206_v18, %s9103_s12  ;;  %v1215_v18 = vld [vmem:[#allocation3 + $0x4e2] sm:$0xff] }
 0x411   : > { %v11047_v37 = vpop.permute.xlu0 %3202  ;;  %v11049_v15 = vpop.permute.xlu1 %3196 }
 0x412   : > { %15004 = vst [vmem:[#allocation377_spill] sm:$0xff] %v11047_v37  ;;  %15005 = vst [vmem:[#allocation378_spill] sm:$0xff] %v11049_v15  ;;  %v1212_v37 = vld [vmem:[#allocation3 + $0x4ba] sm:$0xff] }
 0x413   : > { %3318 = vrot.lane.b32.xlu0 %v1211_v0, %s9103_s12  ;;  %3312 = vrot.lane.b32.xlu1 %v1208_v27, %s9103_s12  ;;  %v1218_v27 = vld [vmem:[#allocation3 + $0x30] sm:$0xff] }
 0x415   : > { %v11053_v35 = vpop.permute.xlu0 %3206  ;;  %v11055_v61 = vpop.permute.xlu1 %3200 }
 0x416   : > { %15006 = vst [vmem:[#allocation379_spill] sm:$0xff] %v11053_v35  ;;  %15007 = vst [vmem:[#allocation380_spill] sm:$0xff] %v11055_v61  ;;  %v1214_v35 = vld [vmem:[#allocation3 + $0x4d2] sm:$0xff] }
 0x417   : > { %3322 = vrot.lane.b32.xlu0 %v1213_v10, %s9103_s12  ;;  %3316 = vrot.lane.b32.xlu1 %v1210_v43, %s9103_s12  ;;  %v1220_v43 = vld [vmem:[#allocation3 + $0x48] sm:$0xff] }
 0x419   : > { %v11059_v16 = vpop.permute.xlu0 %3210  ;;  %v11061_v1 = vpop.permute.xlu1 %3204 }
 0x41a   : > { %15008 = vst [vmem:[#allocation381_spill] sm:$0xff] %v11059_v16  ;;  %15009 = vst [vmem:[#allocation382_spill] sm:$0xff] %v11061_v1  ;;  %v1216_v16 = vld [vmem:[#allocation3 + $0x4ea] sm:$0xff] }
 0x41b   : > { %3326 = vrot.lane.b32.xlu0 %v1215_v18, %s9103_s12  ;;  %3320 = vrot.lane.b32.xlu1 %v1212_v37, %s9103_s12  ;;  %v1222_v37 = vld [vmem:[#allocation3 + $0x60] sm:$0xff] }
 0x41d   : > { %v11065_v0 = vpop.permute.xlu0 %3214  ;;  %v11067_v15 = vpop.permute.xlu1 %3208 }
 0x41e   : > { %15010 = vst [vmem:[#allocation383_spill] sm:$0xff] %v11065_v0  ;;  %15011 = vst [vmem:[#allocation384_spill] sm:$0xff] %v11067_v15  ;;  %v1219_v0 = vld [vmem:[#allocation3 + $0x38] sm:$0xff] }
 0x41f   : > { %3522 = vrot.lane.b32.xlu0 %v1218_v27, %s9104_s13  ;;  %3324 = vrot.lane.b32.xlu1 %v1214_v35, %s9103_s12  ;;  %v1224_v35 = vld [vmem:[#allocation3 + $0x78] sm:$0xff] }
 0x421   : > { %v11071_v10 = vpop.permute.xlu0 %3218  ;;  %v11073_v1 = vpop.permute.xlu1 %3212 }
 0x422   : > { %15012 = vst [vmem:[#allocation385_spill] sm:$0xff] %v11071_v10  ;;  %15013 = vst [vmem:[#allocation386_spill] sm:$0xff] %v11073_v1  ;;  %v1221_v10 = vld [vmem:[#allocation3 + $0x50] sm:$0xff] }
 0x423   : > { %3526 = vrot.lane.b32.xlu0 %v1220_v43, %s9104_s13  ;;  %3328 = vrot.lane.b32.xlu1 %v1216_v16, %s9103_s12  ;;  %v1226_v16 = vld [vmem:[#allocation3 + $0x90] sm:$0xff] }
 0x425   : > { %v11077_v18 = vpop.permute.xlu0 %3222  ;;  %v11079_v15 = vpop.permute.xlu1 %3216 }
 0x426   : > { %15014 = vst [vmem:[#allocation387_spill] sm:$0xff] %v11077_v18  ;;  %15015 = vst [vmem:[#allocation388_spill] sm:$0xff] %v11079_v15  ;;  %v1223_v18 = vld [vmem:[#allocation3 + $0x68] sm:$0xff] }
 0x427   : > { %3530 = vrot.lane.b32.xlu0 %v1222_v37, %s9104_s13  ;;  %3524 = vrot.lane.b32.xlu1 %v1219_v0, %s9104_s13  ;;  %v1228_v0 = vld [vmem:[#allocation3 + $0xa8] sm:$0xff] }
 0x429   : > { %v11083_v27 = vpop.permute.xlu0 %3226  ;;  %v11085_v61 = vpop.permute.xlu1 %3220 }
 0x42a   : > { %15016 = vst [vmem:[#allocation389_spill] sm:$0xff] %v11083_v27  ;;  %15017 = vst [vmem:[#allocation390_spill] sm:$0xff] %v11085_v61  ;;  %v1225_v27 = vld [vmem:[#allocation3 + $0x80] sm:$0xff] }
 0x42b   : > { %3534 = vrot.lane.b32.xlu0 %v1224_v35, %s9104_s13  ;;  %3528 = vrot.lane.b32.xlu1 %v1221_v10, %s9104_s13  ;;  %v1230_v10 = vld [vmem:[#allocation3 + $0xc0] sm:$0xff] }
 0x42d   : > { %v11089_v43 = vpop.permute.xlu0 %3230  ;;  %v11091_v1 = vpop.permute.xlu1 %3224 }
 0x42e   : > { %15018 = vst [vmem:[#allocation391_spill] sm:$0xff] %v11089_v43  ;;  %15019 = vst [vmem:[#allocation392_spill] sm:$0xff] %v11091_v1  ;;  %v1227_v43 = vld [vmem:[#allocation3 + $0x98] sm:$0xff] }
 0x42f   : > { %3538 = vrot.lane.b32.xlu0 %v1226_v16, %s9104_s13  ;;  %3532 = vrot.lane.b32.xlu1 %v1223_v18, %s9104_s13  ;;  %v1232_v18 = vld [vmem:[#allocation3 + $0xd8] sm:$0xff] }
 0x431   : > { %v11095_v37 = vpop.permute.xlu0 %3234  ;;  %v11097_v15 = vpop.permute.xlu1 %3228 }
 0x432   : > { %15020 = vst [vmem:[#allocation393_spill] sm:$0xff] %v11095_v37  ;;  %15021 = vst [vmem:[#allocation394_spill] sm:$0xff] %v11097_v15  ;;  %v1229_v37 = vld [vmem:[#allocation3 + $0xb0] sm:$0xff] }
 0x433   : > { %3542 = vrot.lane.b32.xlu0 %v1228_v0, %s9104_s13  ;;  %3536 = vrot.lane.b32.xlu1 %v1225_v27, %s9104_s13  ;;  %v1234_v27 = vld [vmem:[#allocation3 + $0xf0] sm:$0xff] }
 0x435   : > { %v11101_v35 = vpop.permute.xlu0 %3238  ;;  %v11103_v61 = vpop.permute.xlu1 %3232 }
 0x436   : > { %15022 = vst [vmem:[#allocation395_spill] sm:$0xff] %v11101_v35  ;;  %15023 = vst [vmem:[#allocation396_spill] sm:$0xff] %v11103_v61  ;;  %v1231_v35 = vld [vmem:[#allocation3 + $0xc8] sm:$0xff] }
 0x437   : > { %3546 = vrot.lane.b32.xlu0 %v1230_v10, %s9104_s13  ;;  %3540 = vrot.lane.b32.xlu1 %v1227_v43, %s9104_s13  ;;  %v1236_v43 = vld [vmem:[#allocation3 + $0x108] sm:$0xff] }
 0x439   : > { %v11107_v16 = vpop.permute.xlu0 %3242  ;;  %v11109_v1 = vpop.permute.xlu1 %3236 }
 0x43a   : > { %15024 = vst [vmem:[#allocation397_spill] sm:$0xff] %v11107_v16  ;;  %15025 = vst [vmem:[#allocation398_spill] sm:$0xff] %v11109_v1  ;;  %v1233_v16 = vld [vmem:[#allocation3 + $0xe0] sm:$0xff] }
 0x43b   : > { %3550 = vrot.lane.b32.xlu0 %v1232_v18, %s9104_s13  ;;  %3544 = vrot.lane.b32.xlu1 %v1229_v37, %s9104_s13  ;;  %v1238_v37 = vld [vmem:[#allocation3 + $0x120] sm:$0xff] }
 0x43d   : > { %v11113_v0 = vpop.permute.xlu0 %3246  ;;  %v11115_v15 = vpop.permute.xlu1 %3240 }
 0x43e   : > { %15026 = vst [vmem:[#allocation399_spill] sm:$0xff] %v11113_v0  ;;  %15027 = vst [vmem:[#allocation400_spill] sm:$0xff] %v11115_v15  ;;  %v1235_v0 = vld [vmem:[#allocation3 + $0xf8] sm:$0xff] }
 0x43f   : > { %3554 = vrot.lane.b32.xlu0 %v1234_v27, %s9104_s13  ;;  %3548 = vrot.lane.b32.xlu1 %v1231_v35, %s9104_s13  ;;  %v1240_v35 = vld [vmem:[#allocation3 + $0x138] sm:$0xff] }
 0x441   : > { %v11119_v10 = vpop.permute.xlu0 %3250  ;;  %v11121_v61 = vpop.permute.xlu1 %3244 }
 0x442   : > { %15028 = vst [vmem:[#allocation401_spill] sm:$0xff] %v11119_v10  ;;  %15029 = vst [vmem:[#allocation402_spill] sm:$0xff] %v11121_v61  ;;  %v1237_v10 = vld [vmem:[#allocation3 + $0x110] sm:$0xff] }
 0x443   : > { %3558 = vrot.lane.b32.xlu0 %v1236_v43, %s9104_s13  ;;  %3552 = vrot.lane.b32.xlu1 %v1233_v16, %s9104_s13  ;;  %v1242_v16 = vld [vmem:[#allocation3 + $0x150] sm:$0xff] }
 0x445   : > { %v11125_v18 = vpop.permute.xlu0 %3254  ;;  %v11127_v1 = vpop.permute.xlu1 %3248 }
 0x446   : > { %15030 = vst [vmem:[#allocation403_spill] sm:$0xff] %v11125_v18  ;;  %15031 = vst [vmem:[#allocation404_spill] sm:$0xff] %v11127_v1  ;;  %v1239_v18 = vld [vmem:[#allocation3 + $0x128] sm:$0xff]  ;;  %v1241_v1 = vld [vmem:[#allocation3 + $0x140] sm:$0xff] }
 0x447   : > { %3562 = vrot.lane.b32.xlu0 %v1238_v37, %s9104_s13  ;;  %3556 = vrot.lane.b32.xlu1 %v1235_v0, %s9104_s13  ;;  %v1244_v0 = vld [vmem:[#allocation3 + $0x168] sm:$0xff] }
 0x449   : > { %v11131_v27 = vpop.permute.xlu0 %3258  ;;  %v11133_v15 = vpop.permute.xlu1 %3252 }
 0x44a   : > { %15032 = vst [vmem:[#allocation405_spill] sm:$0xff] %v11131_v27  ;;  %15033 = vst [vmem:[#allocation406_spill] sm:$0xff] %v11133_v15  ;;  %v1243_v15 = vld [vmem:[#allocation3 + $0x158] sm:$0xff] }
 0x44b   : > { %3566 = vrot.lane.b32.xlu0 %v1240_v35, %s9104_s13  ;;  %3560 = vrot.lane.b32.xlu1 %v1237_v10, %s9104_s13  ;;  %v1246_v10 = vld [vmem:[#allocation3 + $0x180] sm:$0xff] }
 0x44d   : > { %v11137_v43 = vpop.permute.xlu0 %3262  ;;  %v11139_v61 = vpop.permute.xlu1 %3256 }
 0x44e   : > { %15034 = vst [vmem:[#allocation407_spill] sm:$0xff] %v11137_v43  ;;  %15035 = vst [vmem:[#allocation408_spill] sm:$0xff] %v11139_v61  ;;  %v1245_v61 = vld [vmem:[#allocation3 + $0x170] sm:$0xff] }
 0x44f   : > { %3570 = vrot.lane.b32.xlu0 %v1242_v16, %s9104_s13  ;;  %3564 = vrot.lane.b32.xlu1 %v1239_v18, %s9104_s13  ;;  %v1248_v18 = vld [vmem:[#allocation3 + $0x198] sm:$0xff] }
 0x451   : > { %v11143_v37 = vpop.permute.xlu0 %3266  ;;  %v11145_v27 = vpop.permute.xlu1 %3260 }
 0x452   : > { %15036 = vst [vmem:[#allocation409_spill] sm:$0xff] %v11143_v37  ;;  %15037 = vst [vmem:[#allocation410_spill] sm:$0xff] %v11145_v27 }
 0x453   : > { %3574 = vrot.lane.b32.xlu0 %v1244_v0, %s9104_s13  ;;  %3568 = vrot.lane.b32.xlu1 %v1241_v1, %s9104_s13  ;;  %v1250_v1 = vld [vmem:[#allocation3 + $0x1e0] sm:$0xff] }
 0x455   : > { %v11149_v35 = vpop.permute.xlu0 %3270  ;;  %v11151_v43 = vpop.permute.xlu1 %3264 }
 0x456   : > { %15038 = vst [vmem:[#allocation411_spill] sm:$0xff] %v11149_v35  ;;  %15039 = vst [vmem:[#allocation412_spill] sm:$0xff] %v11151_v43  ;;  %v1247_v35 = vld [vmem:[#allocation3 + $0x188] sm:$0xff] }
 0x457   : > { %3578 = vrot.lane.b32.xlu0 %v1246_v10, %s9104_s13  ;;  %3572 = vrot.lane.b32.xlu1 %v1243_v15, %s9104_s13  ;;  %v1252_v15 = vld [vmem:[#allocation3 + $0x1f8] sm:$0xff] }
 0x459   : > { %v11155_v16 = vpop.permute.xlu0 %3274  ;;  %v11157_v37 = vpop.permute.xlu1 %3268 }
 0x45a   : > { %15040 = vst [vmem:[#allocation413_spill] sm:$0xff] %v11155_v16  ;;  %15041 = vst [vmem:[#allocation414_spill] sm:$0xff] %v11157_v37  ;;  %v1249_v16 = vld [vmem:[#allocation3 + $0x1a0] sm:$0xff] }
 0x45b   : > { %3582 = vrot.lane.b32.xlu0 %v1248_v18, %s9104_s13  ;;  %3576 = vrot.lane.b32.xlu1 %v1245_v61, %s9104_s13  ;;  %v1254_v61 = vld [vmem:[#allocation3 + $0x210] sm:$0xff] }
 0x45d   : > { %v11161_v0 = vpop.permute.xlu0 %3278  ;;  %v11163_v27 = vpop.permute.xlu1 %3272 }
 0x45e   : > { %15042 = vst [vmem:[#allocation415_spill] sm:$0xff] %v11161_v0  ;;  %15043 = vst [vmem:[#allocation416_spill] sm:$0xff] %v11163_v27  ;;  %v1251_v0 = vld [vmem:[#allocation3 + $0x1e8] sm:$0xff] }
 0x45f   : > { %3586 = vrot.lane.b32.xlu0 %v1250_v1, %s9104_s13  ;;  %3580 = vrot.lane.b32.xlu1 %v1247_v35, %s9104_s13  ;;  %v1256_v35 = vld [vmem:[#allocation3 + $0x228] sm:$0xff] }
 0x461   : > { %v11167_v10 = vpop.permute.xlu0 %3282  ;;  %v11169_v43 = vpop.permute.xlu1 %3276 }
 0x462   : > { %15044 = vst [vmem:[#allocation417_spill] sm:$0xff] %v11167_v10  ;;  %15045 = vst [vmem:[#allocation418_spill] sm:$0xff] %v11169_v43  ;;  %v1253_v10 = vld [vmem:[#allocation3 + $0x200] sm:$0xff] }
 0x463   : > { %3590 = vrot.lane.b32.xlu0 %v1252_v15, %s9104_s13  ;;  %3584 = vrot.lane.b32.xlu1 %v1249_v16, %s9104_s13  ;;  %v1258_v16 = vld [vmem:[#allocation3 + $0x240] sm:$0xff] }
 0x465   : > { %v11173_v18 = vpop.permute.xlu0 %3286  ;;  %v11175_v37 = vpop.permute.xlu1 %3280 }
 0x466   : > { %15046 = vst [vmem:[#allocation419_spill] sm:$0xff] %v11173_v18  ;;  %15047 = vst [vmem:[#allocation420_spill] sm:$0xff] %v11175_v37  ;;  %v1255_v18 = vld [vmem:[#allocation3 + $0x218] sm:$0xff] }
 0x467   : > { %3594 = vrot.lane.b32.xlu0 %v1254_v61, %s9104_s13  ;;  %3588 = vrot.lane.b32.xlu1 %v1251_v0, %s9104_s13  ;;  %v1260_v0 = vld [vmem:[#allocation3 + $0x258] sm:$0xff] }
 0x469   : > { %v11179_v1 = vpop.permute.xlu0 %3290  ;;  %v11181_v27 = vpop.permute.xlu1 %3284 }
 0x46a   : > { %15048 = vst [vmem:[#allocation421_spill] sm:$0xff] %v11179_v1  ;;  %15049 = vst [vmem:[#allocation422_spill] sm:$0xff] %v11181_v27  ;;  %v1257_v1 = vld [vmem:[#allocation3 + $0x230] sm:$0xff] }
 0x46b   : > { %3598 = vrot.lane.b32.xlu0 %v1256_v35, %s9104_s13  ;;  %3592 = vrot.lane.b32.xlu1 %v1253_v10, %s9104_s13  ;;  %v1262_v10 = vld [vmem:[#allocation3 + $0x270] sm:$0xff] }
 0x46d   : > { %v11185_v15 = vpop.permute.xlu0 %3294  ;;  %v11187_v43 = vpop.permute.xlu1 %3288 }
 0x46e   : > { %15050 = vst [vmem:[#allocation423_spill] sm:$0xff] %v11185_v15  ;;  %15051 = vst [vmem:[#allocation424_spill] sm:$0xff] %v11187_v43  ;;  %v1259_v15 = vld [vmem:[#allocation3 + $0x248] sm:$0xff] }
 0x46f   : > { %3602 = vrot.lane.b32.xlu0 %v1258_v16, %s9104_s13  ;;  %3596 = vrot.lane.b32.xlu1 %v1255_v18, %s9104_s13  ;;  %v1264_v18 = vld [vmem:[#allocation3 + $0x288] sm:$0xff] }
 0x471   : > { %v11191_v61 = vpop.permute.xlu0 %3298  ;;  %v11193_v37 = vpop.permute.xlu1 %3292 }
 0x472   : > { %15052 = vst [vmem:[#allocation425_spill] sm:$0xff] %v11191_v61  ;;  %15053 = vst [vmem:[#allocation426_spill] sm:$0xff] %v11193_v37  ;;  %v1261_v61 = vld [vmem:[#allocation3 + $0x260] sm:$0xff] }
 0x473   : > { %3606 = vrot.lane.b32.xlu0 %v1260_v0, %s9104_s13  ;;  %3600 = vrot.lane.b32.xlu1 %v1257_v1, %s9104_s13  ;;  %v1266_v1 = vld [vmem:[#allocation3 + $0x2a0] sm:$0xff] }
 0x475   : > { %v11197_v35 = vpop.permute.xlu0 %3302  ;;  %v11199_v27 = vpop.permute.xlu1 %3296 }
 0x476   : > { %15054 = vst [vmem:[#allocation427_spill] sm:$0xff] %v11197_v35  ;;  %15055 = vst [vmem:[#allocation428_spill] sm:$0xff] %v11199_v27  ;;  %v1263_v35 = vld [vmem:[#allocation3 + $0x278] sm:$0xff] }
 0x477   : > { %3610 = vrot.lane.b32.xlu0 %v1262_v10, %s9104_s13  ;;  %3604 = vrot.lane.b32.xlu1 %v1259_v15, %s9104_s13  ;;  %v1268_v15 = vld [vmem:[#allocation3 + $0x2b8] sm:$0xff] }
 0x479   : > { %v11203_v16 = vpop.permute.xlu0 %3306  ;;  %v11205_v43 = vpop.permute.xlu1 %3300 }
 0x47a   : > { %15056 = vst [vmem:[#allocation429_spill] sm:$0xff] %v11203_v16  ;;  %15057 = vst [vmem:[#allocation430_spill] sm:$0xff] %v11205_v43  ;;  %v1265_v16 = vld [vmem:[#allocation3 + $0x290] sm:$0xff] }
 0x47b   : > { %3614 = vrot.lane.b32.xlu0 %v1264_v18, %s9104_s13  ;;  %3608 = vrot.lane.b32.xlu1 %v1261_v61, %s9104_s13  ;;  %v1270_v61 = vld [vmem:[#allocation3 + $0x2d0] sm:$0xff] }
 0x47d   : > { %v11209_v0 = vpop.permute.xlu0 %3310  ;;  %v11211_v37 = vpop.permute.xlu1 %3304 }
 0x47e   : > { %15058 = vst [vmem:[#allocation431_spill] sm:$0xff] %v11209_v0  ;;  %15059 = vst [vmem:[#allocation432_spill] sm:$0xff] %v11211_v37  ;;  %v1267_v0 = vld [vmem:[#allocation3 + $0x2a8] sm:$0xff] }
 0x47f   : > { %3618 = vrot.lane.b32.xlu0 %v1266_v1, %s9104_s13  ;;  %3612 = vrot.lane.b32.xlu1 %v1263_v35, %s9104_s13  ;;  %v1272_v35 = vld [vmem:[#allocation3 + $0x2e8] sm:$0xff] }
 0x481   : > { %v11215_v10 = vpop.permute.xlu0 %3314  ;;  %v11217_v27 = vpop.permute.xlu1 %3308 }
 0x482   : > { %15060 = vst [vmem:[#allocation433_spill] sm:$0xff] %v11215_v10  ;;  %15061 = vst [vmem:[#allocation434_spill] sm:$0xff] %v11217_v27  ;;  %v1269_v10 = vld [vmem:[#allocation3 + $0x2c0] sm:$0xff] }
 0x483   : > { %3622 = vrot.lane.b32.xlu0 %v1268_v15, %s9104_s13  ;;  %3616 = vrot.lane.b32.xlu1 %v1265_v16, %s9104_s13  ;;  %v1274_v16 = vld [vmem:[#allocation3 + $0x300] sm:$0xff] }
 0x485   : > { %v11221_v18 = vpop.permute.xlu0 %3318  ;;  %v11223_v43 = vpop.permute.xlu1 %3312 }
 0x486   : > { %15062 = vst [vmem:[#allocation435_spill] sm:$0xff] %v11221_v18  ;;  %15063 = vst [vmem:[#allocation436_spill] sm:$0xff] %v11223_v43  ;;  %v1271_v18 = vld [vmem:[#allocation3 + $0x2d8] sm:$0xff] }
 0x487   : > { %3626 = vrot.lane.b32.xlu0 %v1270_v61, %s9104_s13  ;;  %3620 = vrot.lane.b32.xlu1 %v1267_v0, %s9104_s13  ;;  %v1276_v0 = vld [vmem:[#allocation3 + $0x318] sm:$0xff] }
 0x489   : > { %v11227_v1 = vpop.permute.xlu0 %3322  ;;  %v11229_v37 = vpop.permute.xlu1 %3316 }
 0x48a   : > { %15064 = vst [vmem:[#allocation437_spill] sm:$0xff] %v11227_v1  ;;  %15065 = vst [vmem:[#allocation438_spill] sm:$0xff] %v11229_v37  ;;  %v1273_v1 = vld [vmem:[#allocation3 + $0x2f0] sm:$0xff] }
 0x48b   : > { %3630 = vrot.lane.b32.xlu0 %v1272_v35, %s9104_s13  ;;  %3624 = vrot.lane.b32.xlu1 %v1269_v10, %s9104_s13  ;;  %v1278_v10 = vld [vmem:[#allocation3 + $0x330] sm:$0xff] }
 0x48d   : > { %v11233_v15 = vpop.permute.xlu0 %3326  ;;  %v11235_v27 = vpop.permute.xlu1 %3320 }
 0x48e   : > { %15066 = vst [vmem:[#allocation439_spill] sm:$0xff] %v11233_v15  ;;  %15067 = vst [vmem:[#allocation440_spill] sm:$0xff] %v11235_v27  ;;  %v1275_v15 = vld [vmem:[#allocation3 + $0x308] sm:$0xff]  ;;  %v1277_v27 = vld [vmem:[#allocation3 + $0x320] sm:$0xff] }
 0x48f   : > { %3634 = vrot.lane.b32.xlu0 %v1274_v16, %s9104_s13  ;;  %3628 = vrot.lane.b32.xlu1 %v1271_v18, %s9104_s13  ;;  %v1280_v18 = vld [vmem:[#allocation3 + $0x348] sm:$0xff] }
 0x491   : > { %v11239_v61 = vpop.permute.xlu0 %3522  ;;  %v11241_v43 = vpop.permute.xlu1 %3324 }
 0x492   : > { %15068 = vst [vmem:[#allocation441_spill] sm:$0xff] %v11241_v43  ;;  %v1279_v43 = vld [vmem:[#allocation3 + $0x338] sm:$0xff] }
 0x493   : > { %3638 = vrot.lane.b32.xlu0 %v1276_v0, %s9104_s13  ;;  %3632 = vrot.lane.b32.xlu1 %v1273_v1, %s9104_s13  ;;  %v1282_v1 = vld [vmem:[#allocation3 + $0x390] sm:$0xff] }
 0x495   : > { %v11245_v35 = vpop.permute.xlu0 %3526  ;;  %v11247_v37 = vpop.permute.xlu1 %3328 }
 0x496   : > { %15069 = vst [vmem:[#allocation442_spill] sm:$0xff] %v11247_v37  ;;  %v1281_v37 = vld [vmem:[#allocation3 + $0x350] sm:$0xff] }
 0x497   : > { %3642 = vrot.lane.b32.xlu0 %v1278_v10, %s9104_s13  ;;  %3636 = vrot.lane.b32.xlu1 %v1275_v15, %s9104_s13  ;;  %v1284_v15 = vld [vmem:[#allocation3 + $0x3a8] sm:$0xff] }
 0x499   : > { %v11251_v16 = vpop.permute.xlu0 %3530  ;;  %v11253_v5 = vpop.permute.xlu1 %3524 }
 0x49a   : > { %15070 = vst [vmem:[#allocation443_spill] sm:$0xff] %v11251_v16  ;;  %v650_v16 = vld [vmem:[#allocation3 + $0x68] sm:$0xff] }
 0x49b   : > { %3646 = vrot.lane.b32.xlu0 %v1280_v18, %s9104_s13  ;;  %3640 = vrot.lane.b32.xlu1 %v1277_v27, %s9104_s13  ;;  %v1286_v27 = vld [vmem:[#allocation3 + $0x3c0] sm:$0xff] }
 0x49d   : > { %v11257_v0 = vpop.permute.xlu0 %3534  ;;  %v11259_v13 = vpop.permute.xlu1 %3528 }
 0x49e   : > { %15071 = vst [vmem:[#allocation444_spill] sm:$0xff] %v11257_v0  ;;  %v1283_v0 = vld [vmem:[#allocation3 + $0x398] sm:$0xff] }
 0x49f   : > { %3650 = vrot.lane.b32.xlu0 %v1282_v1, %s9104_s13  ;;  %3644 = vrot.lane.b32.xlu1 %v1279_v43, %s9104_s13  ;;  %v1288_v43 = vld [vmem:[#allocation3 + $0x3d8] sm:$0xff] }
 0x4a1   : > { %v11263_v10 = vpop.permute.xlu0 %3538  ;;  %v11265_v6 = vpop.permute.xlu1 %3532 }
 0x4a2   : > { %15072 = vst [vmem:[#allocation445_spill] sm:$0xff] %v11263_v10  ;;  %15073 = vst [vmem:[#allocation446_spill] sm:$0xff] %v11265_v6  ;;  %v1285_v10 = vld [vmem:[#allocation3 + $0x3b0] sm:$0xff] }
 0x4a3   : > { %3654 = vrot.lane.b32.xlu0 %v1284_v15, %s9104_s13  ;;  %3648 = vrot.lane.b32.xlu1 %v1281_v37, %s9104_s13  ;;  %v1290_v37 = vld [vmem:[#allocation3 + $0x3f0] sm:$0xff] }
 0x4a5   : > { %v11269_v18 = vpop.permute.xlu0 %3542  ;;  %v11271_v12 = vpop.permute.xlu1 %3536 }
 0x4a6   : > { %15074 = vst [vmem:[#allocation447_spill] sm:$0xff] %v11269_v18  ;;  %15075 = vst [vmem:[#allocation448_spill] sm:$0xff] %v11271_v12  ;;  %v1287_v18 = vld [vmem:[#allocation3 + $0x3c8] sm:$0xff] }
 0x4a7   : > { %3658 = vrot.lane.b32.xlu0 %v1286_v27, %s9104_s13  ;;  %3652 = vrot.lane.b32.xlu1 %v1283_v0, %s9104_s13  ;;  %v1292_v0 = vld [vmem:[#allocation3 + $0x408] sm:$0xff] }
 0x4a9   : > { %v11275_v1 = vpop.permute.xlu0 %3546  ;;  %v11277_v53 = vpop.permute.xlu1 %3540 }
 0x4aa   : > { %15076 = vst [vmem:[#allocation449_spill] sm:$0xff] %v11275_v1  ;;  %15077 = vst [vmem:[#allocation450_spill] sm:$0xff] %v11277_v53  ;;  %v1289_v1 = vld [vmem:[#allocation3 + $0x3e0] sm:$0xff] }
 0x4ab   : > { %3662 = vrot.lane.b32.xlu0 %v1288_v43, %s9104_s13  ;;  %3656 = vrot.lane.b32.xlu1 %v1285_v10, %s9104_s13  ;;  %v1294_v10 = vld [vmem:[#allocation3 + $0x420] sm:$0xff] }
 0x4ad   : > { %v11281_v15 = vpop.permute.xlu0 %3550  ;;  %v11283_v6 = vpop.permute.xlu1 %3544 }
 0x4ae   : > { %15078 = vst [vmem:[#allocation451_spill] sm:$0xff] %v11281_v15  ;;  %15079 = vst [vmem:[#allocation452_spill] sm:$0xff] %v11283_v6  ;;  %v1291_v15 = vld [vmem:[#allocation3 + $0x3f8] sm:$0xff] }
 0x4af   : > { %3666 = vrot.lane.b32.xlu0 %v1290_v37, %s9104_s13  ;;  %3660 = vrot.lane.b32.xlu1 %v1287_v18, %s9104_s13  ;;  %v1296_v18 = vld [vmem:[#allocation3 + $0x438] sm:$0xff] }
 0x4b1   : > { %v11287_v27 = vpop.permute.xlu0 %3554  ;;  %v11289_v12 = vpop.permute.xlu1 %3548 }
 0x4b2   : > { %15080 = vst [vmem:[#allocation453_spill] sm:$0xff] %v11287_v27  ;;  %15081 = vst [vmem:[#allocation454_spill] sm:$0xff] %v11289_v12  ;;  %v1293_v27 = vld [vmem:[#allocation3 + $0x410] sm:$0xff] }
 0x4b3   : > { %3670 = vrot.lane.b32.xlu0 %v1292_v0, %s9104_s13  ;;  %3664 = vrot.lane.b32.xlu1 %v1289_v1, %s9104_s13  ;;  %v1298_v1 = vld [vmem:[#allocation3 + $0x450] sm:$0xff] }
 0x4b5   : > { %v11293_v43 = vpop.permute.xlu0 %3558  ;;  %v11295_v53 = vpop.permute.xlu1 %3552 }
 0x4b6   : > { %15082 = vst [vmem:[#allocation455_spill] sm:$0xff] %v11293_v43  ;;  %15083 = vst [vmem:[#allocation456_spill] sm:$0xff] %v11295_v53  ;;  %v1295_v43 = vld [vmem:[#allocation3 + $0x428] sm:$0xff] }
 0x4b7   : > { %3674 = vrot.lane.b32.xlu0 %v1294_v10, %s9104_s13  ;;  %3668 = vrot.lane.b32.xlu1 %v1291_v15, %s9104_s13  ;;  %v1300_v15 = vld [vmem:[#allocation3 + $0x468] sm:$0xff] }
 0x4b9   : > { %v11299_v37 = vpop.permute.xlu0 %3562  ;;  %v11301_v6 = vpop.permute.xlu1 %3556 }
 0x4ba   : > { %15084 = vst [vmem:[#allocation457_spill] sm:$0xff] %v11299_v37  ;;  %15085 = vst [vmem:[#allocation458_spill] sm:$0xff] %v11301_v6  ;;  %v1297_v37 = vld [vmem:[#allocation3 + $0x440] sm:$0xff] }
 0x4bb   : > { %3678 = vrot.lane.b32.xlu0 %v1296_v18, %s9104_s13  ;;  %3672 = vrot.lane.b32.xlu1 %v1293_v27, %s9104_s13  ;;  %v1302_v27 = vld [vmem:[#allocation3 + $0x480] sm:$0xff] }
 0x4bd   : > { %v11305_v0 = vpop.permute.xlu0 %3566  ;;  %v11307_v12 = vpop.permute.xlu1 %3560 }
 0x4be   : > { %15086 = vst [vmem:[#allocation459_spill] sm:$0xff] %v11305_v0  ;;  %15087 = vst [vmem:[#allocation460_spill] sm:$0xff] %v11307_v12  ;;  %v1299_v0 = vld [vmem:[#allocation3 + $0x458] sm:$0xff] }
 0x4bf   : > { %3682 = vrot.lane.b32.xlu0 %v1298_v1, %s9104_s13  ;;  %3676 = vrot.lane.b32.xlu1 %v1295_v43, %s9104_s13  ;;  %v1304_v43 = vld [vmem:[#allocation3 + $0x498] sm:$0xff] }
 0x4c1   : > { %v11311_v10 = vpop.permute.xlu0 %3570  ;;  %v11313_v53 = vpop.permute.xlu1 %3564 }
 0x4c2   : > { %15088 = vst [vmem:[#allocation461_spill] sm:$0xff] %v11311_v10  ;;  %15089 = vst [vmem:[#allocation462_spill] sm:$0xff] %v11313_v53  ;;  %v1301_v10 = vld [vmem:[#allocation3 + $0x470] sm:$0xff] }
 0x4c3   : > { %3686 = vrot.lane.b32.xlu0 %v1300_v15, %s9104_s13  ;;  %3680 = vrot.lane.b32.xlu1 %v1297_v37, %s9104_s13  ;;  %v1306_v37 = vld [vmem:[#allocation3 + $0x4b0] sm:$0xff] }
 0x4c5   : > { %v11317_v18 = vpop.permute.xlu0 %3574  ;;  %v11319_v6 = vpop.permute.xlu1 %3568 }
 0x4c6   : > { %15090 = vst [vmem:[#allocation463_spill] sm:$0xff] %v11317_v18  ;;  %15091 = vst [vmem:[#allocation464_spill] sm:$0xff] %v11319_v6  ;;  %v1303_v18 = vld [vmem:[#allocation3 + $0x488] sm:$0xff] }
 0x4c7   : > { %3690 = vrot.lane.b32.xlu0 %v1302_v27, %s9104_s13  ;;  %3684 = vrot.lane.b32.xlu1 %v1299_v0, %s9104_s13  ;;  %v1308_v0 = vld [vmem:[#allocation3 + $0x4c8] sm:$0xff] }
 0x4c9   : > { %v11323_v1 = vpop.permute.xlu0 %3578  ;;  %v11325_v12 = vpop.permute.xlu1 %3572 }
 0x4ca   : > { %15092 = vst [vmem:[#allocation465_spill] sm:$0xff] %v11323_v1  ;;  %15093 = vst [vmem:[#allocation466_spill] sm:$0xff] %v11325_v12  ;;  %v1305_v1 = vld [vmem:[#allocation3 + $0x4a0] sm:$0xff] }
 0x4cb   : > { %3694 = vrot.lane.b32.xlu0 %v1304_v43, %s9104_s13  ;;  %3688 = vrot.lane.b32.xlu1 %v1301_v10, %s9104_s13  ;;  %v1310_v10 = vld [vmem:[#allocation3 + $0x4e0] sm:$0xff] }
 0x4cd   : > { %v11329_v15 = vpop.permute.xlu0 %3582  ;;  %v11331_v53 = vpop.permute.xlu1 %3576 }
 0x4ce   : > { %15094 = vst [vmem:[#allocation467_spill] sm:$0xff] %v11329_v15  ;;  %15095 = vst [vmem:[#allocation468_spill] sm:$0xff] %v11331_v53  ;;  %v1307_v15 = vld [vmem:[#allocation3 + $0x4b8] sm:$0xff] }
 0x4cf   : > { %3698 = vrot.lane.b32.xlu0 %v1306_v37, %s9104_s13  ;;  %3692 = vrot.lane.b32.xlu1 %v1303_v18, %s9104_s13  ;;  %v1312_v18 = vld [vmem:[#allocation3 + $0x4f8] sm:$0xff] }
 0x4d1   : > { %v11335_v27 = vpop.permute.xlu0 %3586  ;;  %v11337_v6 = vpop.permute.xlu1 %3580 }
 0x4d2   : > { %15096 = vst [vmem:[#allocation469_spill] sm:$0xff] %v11335_v27  ;;  %15097 = vst [vmem:[#allocation470_spill] sm:$0xff] %v11337_v6  ;;  %v1309_v27 = vld [vmem:[#allocation3 + $0x4d0] sm:$0xff] }
 0x4d3   : > { %3702 = vrot.lane.b32.xlu0 %v1308_v0, %s9104_s13  ;;  %3696 = vrot.lane.b32.xlu1 %v1305_v1, %s9104_s13  ;;  %v1314_v1 = vld [vmem:[#allocation3 + $0x31] sm:$0xff] }
 0x4d5   : > { %v11341_v43 = vpop.permute.xlu0 %3590  ;;  %v11343_v12 = vpop.permute.xlu1 %3584 }
 0x4d6   : > { %15098 = vst [vmem:[#allocation471_spill] sm:$0xff] %v11341_v43  ;;  %15099 = vst [vmem:[#allocation472_spill] sm:$0xff] %v11343_v12  ;;  %v1311_v43 = vld [vmem:[#allocation3 + $0x4e8] sm:$0xff] }
 0x4d7   : > { %3706 = vrot.lane.b32.xlu0 %v1310_v10, %s9104_s13  ;;  %3700 = vrot.lane.b32.xlu1 %v1307_v15, %s9104_s13  ;;  %v1316_v15 = vld [vmem:[#allocation3 + $0x49] sm:$0xff] }
 0x4d9   : > { %v11347_v37 = vpop.permute.xlu0 %3594  ;;  %v11349_v53 = vpop.permute.xlu1 %3588 }
 0x4da   : > { %15100 = vst [vmem:[#allocation473_spill] sm:$0xff] %v11347_v37  ;;  %15101 = vst [vmem:[#allocation474_spill] sm:$0xff] %v11349_v53  ;;  %v1313_v37 = vld [vmem:[#allocation3 + $0x500] sm:$0xff] }
 0x4db   : > { %3710 = vrot.lane.b32.xlu0 %v1312_v18, %s9104_s13  ;;  %3704 = vrot.lane.b32.xlu1 %v1309_v27, %s9104_s13  ;;  %v1318_v27 = vld [vmem:[#allocation3 + $0x61] sm:$0xff] }
 0x4dd   : > { %v11353_v0 = vpop.permute.xlu0 %3598  ;;  %v11355_v6 = vpop.permute.xlu1 %3592 }
 0x4de   : > { %15102 = vst [vmem:[#allocation475_spill] sm:$0xff] %v11353_v0  ;;  %15103 = vst [vmem:[#allocation476_spill] sm:$0xff] %v11355_v6  ;;  %v1315_v0 = vld [vmem:[#allocation3 + $0x39] sm:$0xff] }
 0x4df   : > { %3906 = vrot.lane.b32.xlu0 %v1314_v1, %s9105_s14  ;;  %3708 = vrot.lane.b32.xlu1 %v1311_v43, %s9104_s13  ;;  %v1320_v43 = vld [vmem:[#allocation3 + $0x79] sm:$0xff] }
 0x4e1   : > { %v11359_v10 = vpop.permute.xlu0 %3602  ;;  %v11361_v53 = vpop.permute.xlu1 %3596 }
 0x4e2   : > { %15104 = vst [vmem:[#allocation477_spill] sm:$0xff] %v11359_v10  ;;  %15105 = vst [vmem:[#allocation478_spill] sm:$0xff] %v11361_v53  ;;  %v1317_v10 = vld [vmem:[#allocation3 + $0x51] sm:$0xff] }
 0x4e3   : > { %3910 = vrot.lane.b32.xlu0 %v1316_v15, %s9105_s14  ;;  %3712 = vrot.lane.b32.xlu1 %v1313_v37, %s9104_s13  ;;  %v1322_v37 = vld [vmem:[#allocation3 + $0x91] sm:$0xff] }
 0x4e5   : > { %v11365_v18 = vpop.permute.xlu0 %3606  ;;  %v11367_v6 = vpop.permute.xlu1 %3600 }
 0x4e6   : > { %15106 = vst [vmem:[#allocation479_spill] sm:$0xff] %v11365_v18  ;;  %15107 = vst [vmem:[#allocation480_spill] sm:$0xff] %v11367_v6  ;;  %v1319_v18 = vld [vmem:[#allocation3 + $0x69] sm:$0xff] }
 0x4e7   : > { %3914 = vrot.lane.b32.xlu0 %v1318_v27, %s9105_s14  ;;  %3908 = vrot.lane.b32.xlu1 %v1315_v0, %s9105_s14  ;;  %v1324_v0 = vld [vmem:[#allocation3 + $0xa9] sm:$0xff] }
 0x4e9   : > { %v11371_v1 = vpop.permute.xlu0 %3610  ;;  %v11373_v12 = vpop.permute.xlu1 %3604 }
 0x4ea   : > { %15108 = vst [vmem:[#allocation481_spill] sm:$0xff] %v11371_v1  ;;  %15109 = vst [vmem:[#allocation482_spill] sm:$0xff] %v11373_v12  ;;  %v1321_v1 = vld [vmem:[#allocation3 + $0x81] sm:$0xff] }
 0x4eb   : > { %3918 = vrot.lane.b32.xlu0 %v1320_v43, %s9105_s14  ;;  %3912 = vrot.lane.b32.xlu1 %v1317_v10, %s9105_s14  ;;  %v1326_v10 = vld [vmem:[#allocation3 + $0xc1] sm:$0xff] }
 0x4ed   : > { %v11377_v15 = vpop.permute.xlu0 %3614  ;;  %v11379_v53 = vpop.permute.xlu1 %3608 }
 0x4ee   : > { %15110 = vst [vmem:[#allocation483_spill] sm:$0xff] %v11377_v15  ;;  %15111 = vst [vmem:[#allocation484_spill] sm:$0xff] %v11379_v53  ;;  %v1323_v15 = vld [vmem:[#allocation3 + $0x99] sm:$0xff] }
 0x4ef   : > { %3922 = vrot.lane.b32.xlu0 %v1322_v37, %s9105_s14  ;;  %3916 = vrot.lane.b32.xlu1 %v1319_v18, %s9105_s14  ;;  %v1328_v18 = vld [vmem:[#allocation3 + $0xd9] sm:$0xff] }
 0x4f1   : > { %v11383_v27 = vpop.permute.xlu0 %3618  ;;  %v11385_v6 = vpop.permute.xlu1 %3612 }
 0x4f2   : > { %15112 = vst [vmem:[#allocation485_spill] sm:$0xff] %v11383_v27  ;;  %15113 = vst [vmem:[#allocation486_spill] sm:$0xff] %v11385_v6  ;;  %v1325_v27 = vld [vmem:[#allocation3 + $0xb1] sm:$0xff] }
 0x4f3   : > { %3926 = vrot.lane.b32.xlu0 %v1324_v0, %s9105_s14  ;;  %3920 = vrot.lane.b32.xlu1 %v1321_v1, %s9105_s14  ;;  %v1330_v1 = vld [vmem:[#allocation3 + $0xf1] sm:$0xff] }
 0x4f5   : > { %v11389_v43 = vpop.permute.xlu0 %3622  ;;  %v11391_v12 = vpop.permute.xlu1 %3616 }
 0x4f6   : > { %15114 = vst [vmem:[#allocation487_spill] sm:$0xff] %v11389_v43  ;;  %15115 = vst [vmem:[#allocation488_spill] sm:$0xff] %v11391_v12  ;;  %v1327_v43 = vld [vmem:[#allocation3 + $0xc9] sm:$0xff] }
 0x4f7   : > { %3930 = vrot.lane.b32.xlu0 %v1326_v10, %s9105_s14  ;;  %3924 = vrot.lane.b32.xlu1 %v1323_v15, %s9105_s14  ;;  %v1332_v15 = vld [vmem:[#allocation3 + $0x109] sm:$0xff] }
 0x4f9   : > { %v11395_v37 = vpop.permute.xlu0 %3626  ;;  %v11397_v53 = vpop.permute.xlu1 %3620 }
 0x4fa   : > { %15116 = vst [vmem:[#allocation489_spill] sm:$0xff] %v11395_v37  ;;  %15117 = vst [vmem:[#allocation490_spill] sm:$0xff] %v11397_v53  ;;  %v1329_v37 = vld [vmem:[#allocation3 + $0xe1] sm:$0xff] }
 0x4fb   : > { %3934 = vrot.lane.b32.xlu0 %v1328_v18, %s9105_s14  ;;  %3928 = vrot.lane.b32.xlu1 %v1325_v27, %s9105_s14  ;;  %v5353_v27 = vld [vmem:[%s14623_s1] sm:$0xff] }
 0x4fc   : > { %v1334_v18 = vld [vmem:[#allocation3 + $0x121] sm:$0xff] }
 0x4fd   : > { %v11401_v0 = vpop.permute.xlu0 %3630  ;;  %v11403_v6 = vpop.permute.xlu1 %3624 }
 0x4fe   : > { %15118 = vst [vmem:[#allocation491_spill] sm:$0xff] %v11401_v0  ;;  %15119 = vst [vmem:[#allocation492_spill] sm:$0xff] %v11403_v6  ;;  %v1331_v0 = vld [vmem:[#allocation3 + $0xf9] sm:$0xff] }
 0x4ff   : > { %3938 = vrot.lane.b32.xlu0 %v1330_v1, %s9105_s14  ;;  %3932 = vrot.lane.b32.xlu1 %v1327_v43, %s9105_s14  ;;  %v5354_v1 = vld [vmem:[%s14623_s1 + $0x8] sm:$0xff] }
 0x501   : > { %v11407_v10 = vpop.permute.xlu0 %3634  ;;  %v11409_v12 = vpop.permute.xlu1 %3628 }
 0x502   : > { %15120 = vst [vmem:[#allocation493_spill] sm:$0xff] %v11407_v10  ;;  %15121 = vst [vmem:[#allocation494_spill] sm:$0xff] %v11409_v12  ;;  %v9034_v10 = vpack.c.bf16 %v5354_v1, %v5353_v27  ;;  %v5356_v12 = vld [vmem:[%s14623_s1 + $0x18] sm:$0xff] }
 0x503   : > { %3942 = vrot.lane.b32.xlu0 %v1332_v15, %s9105_s14  ;;  %3936 = vrot.lane.b32.xlu1 %v1329_v37, %s9105_s14  ;;  %v5355_v15 = vld [vmem:[%s14623_s1 + $0x10] sm:$0xff]  ;;  %v1336_v37 = vld [vmem:[#allocation3 + $0x139] sm:$0xff] }
 0x504   : > { %9035 = vmatprep.subr.bf16.mxu0 %v9034_v10  ;;  %v1333_v27 = vld [vmem:[#allocation3 + $0x111] sm:$0xff]  ;;  %v9038_v1 = vpack.c.bf16 %v5356_v12, %v5355_v15  ;;  %9058 = vmatprep.subr.bf16.mxu1 %v9034_v10 }
 0x505   : > { %v11419_v43 = vpop.permute.xlu0 %3638  ;;  %v11421_v6 = vpop.permute.xlu1 %3632  ;;  %9037 = vmatpush3.bf16.msra.mxu0 %v9034_v10  ;;  %9061 = vmatpush3.bf16.msra.mxu1 %v9034_v10  ;;  %v1410_v10 = vld [vmem:[#allocation3 + $0x32] sm:$0xff] }
 0x506   : > { %15122 = vst [vmem:[#allocation495_spill] sm:$0xff] %v11419_v43  ;;  %15123 = vst [vmem:[#allocation496_spill] sm:$0xff] %v11421_v6  ;;  %9039 = vmatprep.subr.bf16.mxu0 %v9038_v1  ;;  %9059 = vmatprep.subr.bf16.mxu1 %v9038_v1 }
 0x507   : > { %3946 = vrot.lane.b32.xlu0 %v1334_v18, %s9105_s14  ;;  %3940 = vrot.lane.b32.xlu1 %v1331_v0, %s9105_s14  ;;  %v1338_v0 = vld [vmem:[#allocation3 + $0x151] sm:$0xff]  ;;  %v5357_v18 = vld [vmem:[%s14623_s1 + $0x20] sm:$0xf] }
 0x509   : > { %v11431_v43 = vpop.permute.xlu0 %3642  ;;  %v11433_v6 = vpop.permute.xlu1 %3636  ;;  %9041 = vmatpush3.bf16.msra.mxu0 %v9038_v1  ;;  %9062 = vmatpush3.bf16.msra.mxu1 %v9038_v1 }
 0x50a   : > { %15124 = vst [vmem:[#allocation497_spill] sm:$0xff] %v11431_v43  ;;  %15125 = vst [vmem:[#allocation498_spill] sm:$0xff] %v11433_v6  ;;  %v1335_v43 = vld [vmem:[#allocation3 + $0x129] sm:$0xff]  ;;  %8834 = vmatprep.subr.msk.mxu0 %vm5647_vm3, %v5357_v18  ;;  %9060 = vmatprep.subr.msk.mxu1 %vm5647_vm3, %v5357_v18 }
 0x50b   : > { %3950 = vrot.lane.b32.xlu0 %v1336_v37, %s9105_s14  ;;  %3944 = vrot.lane.b32.xlu1 %v1333_v27, %s9105_s14  ;;  %v1337_v37 = vld [vmem:[#allocation3 + $0x141] sm:$0xff] }
 0x50d   : > { %v11440_v53 = vpop.permute.xlu0 %3646  ;;  %v11442_v12 = vpop.permute.xlu1 %3640  ;;  %8835 = vmatpush3.msk.msra.mxu0 %vm5647_vm3, %v5357_v18  ;;  %9063 = vmatpush3.msk.msra.mxu1 %vm5647_vm3, %v5357_v18 }
 0x50e   : > { %15126 = vst [vmem:[#allocation499_spill] sm:$0xff] %v11440_v53  ;;  %15127 = vst [vmem:[#allocation500_spill] sm:$0xff] %v11442_v12  ;;  %v1412_v12 = vld [vmem:[#allocation3 + $0x4a] sm:$0xff]  ;;  %v1411_v53 = vld [vmem:[#allocation3 + $0x3a] sm:$0xff] }
 0x50f   : > { %3954 = vrot.lane.b32.xlu0 %v1338_v0, %s9105_s14  ;;  %3948 = vrot.lane.b32.xlu1 %v1335_v43, %s9105_s14  ;;  %v1339_v0 = vld [vmem:[#allocation3 + $0x159] sm:$0xff]  ;;  %v1414_v43 = vld [vmem:[#allocation3 + $0x62] sm:$0xff] }
 0x511   : > { %v11446_v15 = vpop.permute.xlu0 %3650  ;;  %v11448_v27 = vpop.permute.xlu1 %3644 }
 0x512   : > { %15128 = vst [vmem:[#allocation501_spill] sm:$0xff] %v11446_v15  ;;  %15129 = vst [vmem:[#allocation502_spill] sm:$0xff] %v11448_v27 }
 0x513   : > { %4290 = vrot.lane.b32.xlu0 %v1410_v10, %s9106_s27  ;;  %3952 = vrot.lane.b32.xlu1 %v1337_v37, %s9105_s14  ;;  %v1416_v10 = vld [vmem:[#allocation3 + $0x7a] sm:$0xff] }
 0x515   : > { %v11452_v1 = vpop.permute.xlu0 %3654  ;;  %v11454_v6 = vpop.permute.xlu1 %3648 }
 0x516   : > { %15130 = vst [vmem:[#allocation503_spill] sm:$0xff] %v11452_v1  ;;  %15131 = vst [vmem:[#allocation504_spill] sm:$0xff] %v11454_v6  ;;  %v1413_v1 = vld [vmem:[#allocation3 + $0x52] sm:$0xff] }
 0x517   : > { %4294 = vrot.lane.b32.xlu0 %v1412_v12, %s9106_s27  ;;  %3956 = vrot.lane.b32.xlu1 %v1339_v0, %s9105_s14  ;;  %v1418_v12 = vld [vmem:[#allocation3 + $0x92] sm:$0xff] }
 0x519   : > { %v11458_v15 = vpop.permute.xlu0 %3658  ;;  %v11460_v18 = vpop.permute.xlu1 %3652 }
 0x51a   : > { %15132 = vst [vmem:[#allocation505_spill] sm:$0xff] %v11458_v15  ;;  %15133 = vst [vmem:[#allocation506_spill] sm:$0xff] %v11460_v18  ;;  %v1415_v15 = vld [vmem:[#allocation3 + $0x6a] sm:$0xff] }
 0x51b   : > { %4298 = vrot.lane.b32.xlu0 %v1414_v43, %s9106_s27  ;;  %4292 = vrot.lane.b32.xlu1 %v1411_v53, %s9106_s27  ;;  %v1420_v53 = vld [vmem:[#allocation3 + $0xaa] sm:$0xff] }
 0x51d   : > { %v11464_v37 = vpop.permute.xlu0 %3662  ;;  %v11466_v27 = vpop.permute.xlu1 %3656 }
 0x51e   : > { %15134 = vst [vmem:[#allocation507_spill] sm:$0xff] %v11464_v37  ;;  %15135 = vst [vmem:[#allocation508_spill] sm:$0xff] %v11466_v27  ;;  %v1417_v37 = vld [vmem:[#allocation3 + $0x82] sm:$0xff] }
 0x51f   : > { %4302 = vrot.lane.b32.xlu0 %v1416_v10, %s9106_s27  ;;  %4296 = vrot.lane.b32.xlu1 %v1413_v1, %s9106_s27  ;;  %v1422_v1 = vld [vmem:[#allocation3 + $0xc2] sm:$0xff] }
 0x521   : > { %v11470_v0 = vpop.permute.xlu0 %3666  ;;  %v11472_v6 = vpop.permute.xlu1 %3660 }
 0x522   : > { %15136 = vst [vmem:[#allocation509_spill] sm:$0xff] %v11470_v0  ;;  %15137 = vst [vmem:[#allocation510_spill] sm:$0xff] %v11472_v6  ;;  %v1419_v0 = vld [vmem:[#allocation3 + $0x9a] sm:$0xff] }
 0x523   : > { %4306 = vrot.lane.b32.xlu0 %v1418_v12, %s9106_s27  ;;  %4300 = vrot.lane.b32.xlu1 %v1415_v15, %s9106_s27  ;;  %v1424_v15 = vld [vmem:[#allocation3 + $0xda] sm:$0xff] }
 0x525   : > { %v11476_v43 = vpop.permute.xlu0 %3670  ;;  %v11478_v18 = vpop.permute.xlu1 %3664 }
 0x526   : > { %15138 = vst [vmem:[#allocation511_spill] sm:$0xff] %v11476_v43  ;;  %15139 = vst [vmem:[#allocation512_spill] sm:$0xff] %v11478_v18  ;;  %v1421_v43 = vld [vmem:[#allocation3 + $0xb2] sm:$0xff] }
 0x527   : > { %4310 = vrot.lane.b32.xlu0 %v1420_v53, %s9106_s27  ;;  %4304 = vrot.lane.b32.xlu1 %v1417_v37, %s9106_s27  ;;  %v1426_v37 = vld [vmem:[#allocation3 + $0xf2] sm:$0xff] }
 0x529   : > { %v11482_v10 = vpop.permute.xlu0 %3674  ;;  %v11484_v27 = vpop.permute.xlu1 %3668 }
 0x52a   : > { %15140 = vst [vmem:[#allocation513_spill] sm:$0xff] %v11482_v10  ;;  %15141 = vst [vmem:[#allocation514_spill] sm:$0xff] %v11484_v27  ;;  %v1423_v10 = vld [vmem:[#allocation3 + $0xca] sm:$0xff] }
 0x52b   : > { %4314 = vrot.lane.b32.xlu0 %v1422_v1, %s9106_s27  ;;  %4308 = vrot.lane.b32.xlu1 %v1419_v0, %s9106_s27  ;;  %v1428_v0 = vld [vmem:[#allocation3 + $0x10a] sm:$0xff] }
 0x52d   : > { %v11488_v12 = vpop.permute.xlu0 %3678  ;;  %v11490_v6 = vpop.permute.xlu1 %3672 }
 0x52e   : > { %15142 = vst [vmem:[#allocation515_spill] sm:$0xff] %v11488_v12  ;;  %15143 = vst [vmem:[#allocation516_spill] sm:$0xff] %v11490_v6  ;;  %v1425_v12 = vld [vmem:[#allocation3 + $0xe2] sm:$0xff] }
 0x52f   : > { %4318 = vrot.lane.b32.xlu0 %v1424_v15, %s9106_s27  ;;  %4312 = vrot.lane.b32.xlu1 %v1421_v43, %s9106_s27  ;;  %v1430_v43 = vld [vmem:[#allocation3 + $0x122] sm:$0xff] }
 0x531   : > { %v11494_v53 = vpop.permute.xlu0 %3682  ;;  %v11496_v18 = vpop.permute.xlu1 %3676 }
 0x532   : > { %15144 = vst [vmem:[#allocation517_spill] sm:$0xff] %v11494_v53  ;;  %15145 = vst [vmem:[#allocation518_spill] sm:$0xff] %v11496_v18  ;;  %v1427_v53 = vld [vmem:[#allocation3 + $0xfa] sm:$0xff] }
 0x533   : > { %4322 = vrot.lane.b32.xlu0 %v1426_v37, %s9106_s27  ;;  %4316 = vrot.lane.b32.xlu1 %v1423_v10, %s9106_s27  ;;  %v1432_v10 = vld [vmem:[#allocation3 + $0x13a] sm:$0xff] }
 0x535   : > { %v11500_v1 = vpop.permute.xlu0 %3686  ;;  %v11502_v27 = vpop.permute.xlu1 %3680 }
 0x536   : > { %15146 = vst [vmem:[#allocation519_spill] sm:$0xff] %v11500_v1  ;;  %15147 = vst [vmem:[#allocation520_spill] sm:$0xff] %v11502_v27  ;;  %v1429_v1 = vld [vmem:[#allocation3 + $0x112] sm:$0xff] }
 0x537   : > { %4326 = vrot.lane.b32.xlu0 %v1428_v0, %s9106_s27  ;;  %4320 = vrot.lane.b32.xlu1 %v1425_v12, %s9106_s27  ;;  %v1434_v12 = vld [vmem:[#allocation3 + $0x152] sm:$0xff] }
 0x539   : > { %v11506_v15 = vpop.permute.xlu0 %3690  ;;  %v11508_v6 = vpop.permute.xlu1 %3684 }
 0x53a   : > { %15148 = vst [vmem:[#allocation521_spill] sm:$0xff] %v11506_v15  ;;  %15149 = vst [vmem:[#allocation522_spill] sm:$0xff] %v11508_v6  ;;  %v1431_v15 = vld [vmem:[#allocation3 + $0x12a] sm:$0xff] }
 0x53b   : > { %4330 = vrot.lane.b32.xlu0 %v1430_v43, %s9106_s27  ;;  %4324 = vrot.lane.b32.xlu1 %v1427_v53, %s9106_s27  ;;  %v1340_v53 = vld [vmem:[#allocation3 + $0x169] sm:$0xff] }
 0x53d   : > { %v11512_v37 = vpop.permute.xlu0 %3694  ;;  %v11514_v18 = vpop.permute.xlu1 %3688 }
 0x53e   : > { %15150 = vst [vmem:[#allocation523_spill] sm:$0xff] %v11512_v37  ;;  %15151 = vst [vmem:[#allocation524_spill] sm:$0xff] %v11514_v18  ;;  %v1433_v37 = vld [vmem:[#allocation3 + $0x142] sm:$0xff] }
 0x53f   : > { %4334 = vrot.lane.b32.xlu0 %v1432_v10, %s9106_s27  ;;  %4328 = vrot.lane.b32.xlu1 %v1429_v1, %s9106_s27  ;;  %v1436_v1 = vld [vmem:[#allocation3 + $0x16a] sm:$0xff] }
 0x541   : > { %v11518_v0 = vpop.permute.xlu0 %3698  ;;  %v11520_v27 = vpop.permute.xlu1 %3692 }
 0x542   : > { %15152 = vst [vmem:[#allocation525_spill] sm:$0xff] %v11518_v0  ;;  %15153 = vst [vmem:[#allocation526_spill] sm:$0xff] %v11520_v27  ;;  %v1435_v0 = vld [vmem:[#allocation3 + $0x15a] sm:$0xff] }
 0x543   : > { %4338 = vrot.lane.b32.xlu0 %v1434_v12, %s9106_s27  ;;  %4332 = vrot.lane.b32.xlu1 %v1431_v15, %s9106_s27  ;;  %v1342_v15 = vld [vmem:[#allocation3 + $0x181] sm:$0xff] }
 0x545   : > { %v11524_v43 = vpop.permute.xlu0 %3702  ;;  %v11526_v6 = vpop.permute.xlu1 %3696 }
 0x546   : > { %15154 = vst [vmem:[#allocation527_spill] sm:$0xff] %v11524_v43  ;;  %15155 = vst [vmem:[#allocation528_spill] sm:$0xff] %v11526_v6  ;;  %v1341_v43 = vld [vmem:[#allocation3 + $0x171] sm:$0xff] }
 0x547   : > { %3958 = vrot.lane.b32.xlu0 %v1340_v53, %s9105_s14  ;;  %4336 = vrot.lane.b32.xlu1 %v1433_v37, %s9106_s27  ;;  %v1438_v37 = vld [vmem:[#allocation3 + $0x182] sm:$0xff] }
 0x549   : > { %v11530_v10 = vpop.permute.xlu0 %3706  ;;  %v11532_v18 = vpop.permute.xlu1 %3700 }
 0x54a   : > { %15156 = vst [vmem:[#allocation529_spill] sm:$0xff] %v11530_v10  ;;  %15157 = vst [vmem:[#allocation530_spill] sm:$0xff] %v11532_v18  ;;  %v1437_v10 = vld [vmem:[#allocation3 + $0x172] sm:$0xff] }
 0x54b   : > { %4342 = vrot.lane.b32.xlu0 %v1436_v1, %s9106_s27  ;;  %4340 = vrot.lane.b32.xlu1 %v1435_v0, %s9106_s27  ;;  %v1344_v0 = vld [vmem:[#allocation3 + $0x199] sm:$0xff] }
 0x54d   : > { %v11536_v12 = vpop.permute.xlu0 %3710  ;;  %v11538_v27 = vpop.permute.xlu1 %3704 }
 0x54e   : > { %15158 = vst [vmem:[#allocation531_spill] sm:$0xff] %v11536_v12  ;;  %15159 = vst [vmem:[#allocation532_spill] sm:$0xff] %v11538_v27  ;;  %v1343_v12 = vld [vmem:[#allocation3 + $0x189] sm:$0xff] }
 0x54f   : > { %3962 = vrot.lane.b32.xlu0 %v1342_v15, %s9105_s14  ;;  %3960 = vrot.lane.b32.xlu1 %v1341_v43, %s9105_s14  ;;  %v1440_v43 = vld [vmem:[#allocation3 + $0x19a] sm:$0xff]  ;;  %v1439_v27 = vld [vmem:[#allocation3 + $0x18a] sm:$0xff] }
 0x551   : > { %v11542_v53 = vpop.permute.xlu0 %3906  ;;  %v11544_v6 = vpop.permute.xlu1 %3708 }
 0x552   : > { %15160 = vst [vmem:[#allocation533_spill] sm:$0xff] %v11544_v6  ;;  %v1345_v6 = vld [vmem:[#allocation3 + $0x1a1] sm:$0xff] }
 0x553   : > { %4346 = vrot.lane.b32.xlu0 %v1438_v37, %s9106_s27  ;;  %4344 = vrot.lane.b32.xlu1 %v1437_v10, %s9106_s27  ;;  %v1346_v10 = vld [vmem:[#allocation3 + $0x1e1] sm:$0xff] }
 0x555   : > { %v11548_v1 = vpop.permute.xlu0 %3910  ;;  %v11550_v18 = vpop.permute.xlu1 %3712 }
 0x556   : > { %15161 = vst [vmem:[#allocation534_spill] sm:$0xff] %v11550_v18  ;;  %v1441_v18 = vld [vmem:[#allocation3 + $0x1a2] sm:$0xff] }
 0x557   : > { %3966 = vrot.lane.b32.xlu0 %v1344_v0, %s9105_s14  ;;  %3964 = vrot.lane.b32.xlu1 %v1343_v12, %s9105_s14  ;;  %v1442_v12 = vld [vmem:[#allocation3 + $0x1e2] sm:$0xff] }
 0x559   : > { %v11554_v15 = vpop.permute.xlu0 %3914  ;;  %v11556_v51 = vpop.permute.xlu1 %3908 }
 0x55a   : > { %15162 = vst [vmem:[#allocation535_spill] sm:$0xff] %v11554_v15 }
 0x55b   : > { %4350 = vrot.lane.b32.xlu0 %v1440_v43, %s9106_s27  ;;  %4348 = vrot.lane.b32.xlu1 %v1439_v27, %s9106_s27  ;;  %v1443_v27 = vld [vmem:[#allocation3 + $0x1ea] sm:$0xff] }
 0x55d   : > { %v11560_v37 = vpop.permute.xlu0 %3918  ;;  %v11562_v62 = vpop.permute.xlu1 %3912 }
 0x55e   : > { %15163 = vst [vmem:[#allocation536_spill] sm:$0xff] %v11560_v37  ;;  %15164 = vst [vmem:[#allocation537_spill] sm:$0xff] %v11562_v62  ;;  %v1347_v37 = vld [vmem:[#allocation3 + $0x1e9] sm:$0xff] }
 0x55f   : > { %3970 = vrot.lane.b32.xlu0 %v1346_v10, %s9105_s14  ;;  %3968 = vrot.lane.b32.xlu1 %v1345_v6, %s9105_s14  ;;  %v1470_v6 = vld [vmem:[#allocation3 + $0x332] sm:$0xff] }
 0x561   : > { %v11566_v0 = vpop.permute.xlu0 %3922  ;;  %v11568_v14 = vpop.permute.xlu1 %3916 }
 0x562   : > { %15165 = vst [vmem:[#allocation538_spill] sm:$0xff] %v11566_v0  ;;  %15166 = vst [vmem:[#allocation539_spill] sm:$0xff] %v11568_v14  ;;  %v1374_v0 = vld [vmem:[#allocation3 + $0x331] sm:$0xff] }
 0x563   : > { %4354 = vrot.lane.b32.xlu0 %v1442_v12, %s9106_s27  ;;  %4352 = vrot.lane.b32.xlu1 %v1441_v18, %s9106_s27  ;;  %v1471_v18 = vld [vmem:[#allocation3 + $0x33a] sm:$0xff] }
 0x565   : > { %v11572_v43 = vpop.permute.xlu0 %3926  ;;  %v11574_v8 = vpop.permute.xlu1 %3920 }
 0x566   : > { %15167 = vst [vmem:[#allocation540_spill] sm:$0xff] %v11572_v43  ;;  %15168 = vst [vmem:[#allocation541_spill] sm:$0xff] %v11574_v8  ;;  %v1375_v43 = vld [vmem:[#allocation3 + $0x339] sm:$0xff] }
 0x567   : > { %4356 = vrot.lane.b32.xlu0 %v1443_v27, %s9106_s27  ;;  %3972 = vrot.lane.b32.xlu1 %v1347_v37, %s9105_s14  ;;  %v1444_v37 = vld [vmem:[#allocation3 + $0x1fa] sm:$0xff] }
 0x569   : > { %v11578_v10 = vpop.permute.xlu0 %3930  ;;  %v11580_v15 = vpop.permute.xlu1 %3924 }
 0x56a   : > { %15169 = vst [vmem:[#allocation542_spill] sm:$0xff] %v11578_v10  ;;  %15170 = vst [vmem:[#allocation543_spill] sm:$0xff] %v11580_v15  ;;  %v1348_v10 = vld [vmem:[#allocation3 + $0x1f9] sm:$0xff] }
 0x56b   : > { %4410 = vrot.lane.b32.xlu0 %v1470_v6, %s9106_s27  ;;  %4026 = vrot.lane.b32.xlu1 %v1374_v0, %s9105_s14  ;;  %v1445_v0 = vld [vmem:[#allocation3 + $0x202] sm:$0xff] }
 0x56d   : > { %v11584_v12 = vpop.permute.xlu0 %3934  ;;  %v11586_v14 = vpop.permute.xlu1 %3928 }
 0x56e   : > { %15171 = vst [vmem:[#allocation544_spill] sm:$0xff] %v11584_v12  ;;  %15172 = vst [vmem:[#allocation545_spill] sm:$0xff] %v11586_v14  ;;  %v1349_v12 = vld [vmem:[#allocation3 + $0x201] sm:$0xff] }
 0x56f   : > { %4412 = vrot.lane.b32.xlu0 %v1471_v18, %s9106_s27  ;;  %4028 = vrot.lane.b32.xlu1 %v1375_v43, %s9105_s14  ;;  %v1472_v43 = vld [vmem:[#allocation3 + $0x34a] sm:$0xff] }
 0x571   : > { %v11590_v27 = vpop.permute.xlu0 %3938  ;;  %v11592_v8 = vpop.permute.xlu1 %3932 }
 0x572   : > { %15173 = vst [vmem:[#allocation546_spill] sm:$0xff] %v11590_v27  ;;  %15174 = vst [vmem:[#allocation547_spill] sm:$0xff] %v11592_v8  ;;  %v1376_v27 = vld [vmem:[#allocation3 + $0x349] sm:$0xff]  ;;  %v1377_v8 = vld [vmem:[#allocation3 + $0x351] sm:$0xff] }
 0x573   : > { %4358 = vrot.lane.b32.xlu0 %v1444_v37, %s9106_s27  ;;  %3974 = vrot.lane.b32.xlu1 %v1348_v10, %s9105_s14  ;;  %v641_v37 = vld [vmem:[#allocation3] sm:$0xff]  ;;  %v1473_v10 = vld [vmem:[#allocation3 + $0x352] sm:$0xff] }
 0x575   : > { %v11596_v6 = vpop.permute.xlu0 %3942  ;;  %v11598_v15 = vpop.permute.xlu1 %3936 }
 0x576   : > { %15175 = vst [vmem:[#allocation548_spill] sm:$0xff] %v11596_v6  ;;  %15176 = vst [vmem:[#allocation549_spill] sm:$0xff] %v11598_v15 }
 0x577   : > { %4360 = vrot.lane.b32.xlu0 %v1445_v0, %s9106_s27  ;;  %3976 = vrot.lane.b32.xlu1 %v1349_v12, %s9105_s14  ;;  %v4578_v12 = vsel %vm284_vm0, %v641_v37, %v9731_v22 }
 0x578   : > { %v4675_v0 = vsel %vm4674_vm2, %v4578_v12, %v10075_v29  ;;  %v643_v29 = vld [vmem:[#allocation3 + $0x18] sm:$0xff]  ;;  %v644_v12 = vld [vmem:[#allocation3 + $0x20] sm:$0xff] }
 0x579   : > { %v11602_v18 = vpop.permute.xlu0 %3946  ;;  %v11604_v14 = vpop.permute.xlu1 %3940 }
 0x57a   : > { %15177 = vst [vmem:[#allocation550_spill] sm:$0xff] %v11602_v18  ;;  %15178 = vst [vmem:[#allocation551_spill] sm:$0xff] %v11604_v14  ;;  %v1350_v18 = vld [vmem:[#allocation3 + $0x211] sm:$0xff] }
 0x57b   : > { %4414 = vrot.lane.b32.xlu0 %v1472_v43, %s9106_s27  ;;  %4030 = vrot.lane.b32.xlu1 %v1376_v27, %s9105_s14  ;;  %v1446_v27 = vld [vmem:[#allocation3 + $0x212] sm:$0xff]  ;;  %v4772_v43 = vsel %vm4771_vm4, %v4675_v0, %v10375_v17  ;;  %v647_v17 = vld [vmem:[#allocation3 + $0x48] sm:$0xff] }
 0x57c   : > { %v4869_v22 = vsel %vm4868_vm5, %v4772_v43, %v10663_v7  ;;  %v1447_v7 = vld [vmem:[#allocation3 + $0x21a] sm:$0xff] }
 0x57d   : > { %v11608_v6 = vpop.permute.xlu0 %3950  ;;  %v11610_v15 = vpop.permute.xlu1 %3944  ;;  %v649_v43 = vld [vmem:[#allocation3 + $0x60] sm:$0xff] }
 0x57e   : > { %15179 = vst [vmem:[#allocation552_spill] sm:$0xff] %v11608_v6  ;;  %15180 = vst [vmem:[#allocation553_spill] sm:$0xff] %v11610_v15  ;;  %v645_v15 = vld [vmem:[#allocation3 + $0x30] sm:$0xff] }
 0x57f   : > { %4416 = vrot.lane.b32.xlu0 %v1473_v10, %s9106_s27  ;;  %4032 = vrot.lane.b32.xlu1 %v1377_v8, %s9105_s14  ;;  %v642_v10 = vld [vmem:[#allocation3 + $0x8] sm:$0xff]  ;;  %v4966_v8 = vsel %vm4965_vm6, %v4869_v22, %v10951_v3  ;;  %v651_v3 = vld [vmem:[#allocation3 + $0x78] sm:$0xff]  ;;  %v648_v22 = vld [vmem:[#allocation3 + $0x50] sm:$0xff] }
 0x580   : > { %v5063_v0 = vsel %vm5062_vm7, %v4966_v8, %v11239_v61  ;;  %v4579_v61 = vsel %vm284_vm0, %v642_v10, %v9735_v25  ;;  %v4580_v8 = vsel %vm284_vm0, %v643_v29, %v9741_v30  ;;  %v11653_v25 = vsel %vm284_vm0, %v649_v43, %v9751_v36  ;;  %v652_v30 = vld [vmem:[#allocation3 + $0x80] sm:$0xff]  ;;  %v654_v36 = vld [vmem:[#allocation3 + $0x98] sm:$0xff] }
 0x581   : > { %v11620_v6 = vpop.permute.xlu0 %3954  ;;  %v11624_v37 = vpop.permute.xlu1 %3948  ;;  %v659_v10 = vld [vmem:[#allocation3 + $0xd8] sm:$0xff]  ;;  %v11674_v29 = vsel %vm284_vm0, %v650_v16, %v9765_v46 }
 0x582   : > { %15181 = vst [vmem:[#allocation554_spill] sm:$0xff] %v11620_v6  ;;  %15182 = vst [vmem:[#allocation555_spill] sm:$0xff] %v11624_v37  ;;  %v646_v6 = vld [vmem:[#allocation3 + $0x38] sm:$0xff]  ;;  %v5160_v37 = vsel %vm5159_vm8, %v5063_v0, %v11542_v53  ;;  %v655_v53 = vld [vmem:[#allocation3 + $0xa8] sm:$0xff]  ;;  %v11647_v0 = vsel %vm284_vm0, %v647_v17, %v9745_v32  ;;  %v11664_v32 = vsel %vm284_vm0, %v648_v22, %v9759_v42 }
 0x583   : > { %4362 = vrot.lane.b32.xlu0 %v1446_v27, %s9106_s27  ;;  %3978 = vrot.lane.b32.xlu1 %v1350_v18, %s9105_s14  ;;  %v653_v27 = vld [vmem:[#allocation3 + $0x90] sm:$0xff]  ;;  %v4582_v18 = vsel %vm284_vm0, %v645_v15, %v9739_v28  ;;  %v4583_v28 = vsel %vm284_vm0, %v646_v6, %v9753_v38  ;;  %v657_v15 = vld [vmem:[#allocation3 + $0xc0] sm:$0xff]  ;;  %v4676_v38 = vsel %vm4674_vm2, %v4579_v61, %v10091_v26 }
 0x584   : > { %v656_v42 = vld [vmem:[#allocation3 + $0xb0] sm:$0xff]  ;;  %v4773_v17 = vsel %vm4771_vm4, %v4676_v38, %v10389_v63  ;;  %v11688_v26 = vsel %vm284_vm0, %v652_v30, %v9771_v50  ;;  %v11692_v46 = vsel %vm284_vm0, %v657_v15, %v9775_v52  ;;  %v11705_v50 = vsel %vm284_vm0, %v659_v10, %v9781_v56  ;;  %v1379_v43 = vld [vmem:[#allocation3 + $0x399] sm:$0xff] }
 0x585   : > { %v4291_v14 = vpop.permute.xlu0 %4290  ;;  %v11634_v39 = vpop.permute.xlu1 %3952  ;;  %v4870_v16 = vsel %vm4868_vm5, %v4773_v17, %v10677_v49  ;;  %v11714_v49 = vsel %vm284_vm0, %v656_v42, %v9783_v58  ;;  %v15183_v30 = vld [vmem:[#allocation443_spill] sm:$0xff]  ;;  %v1449_v17 = vld [vmem:[#allocation3 + $0x232] sm:$0xff] }
 0x586   : > { %v5257_v62 = vsel %vm5256_vm9, %v5160_v37, %v4291_v14  ;;  %v4581_v14 = vsel %vm284_vm0, %v644_v12, %v9747_v34  ;;  %v1474_v37 = vld [vmem:[#allocation3 + $0x392] sm:$0xff]  ;;  %v11668_v34 = vsel %vm284_vm0, %v653_v27, %v9763_v44  ;;  %v4677_v44 = vsel %vm4674_vm2, %v4580_v8, %v10083_v2  ;;  %v1352_v8 = vld [vmem:[#allocation3 + $0x229] sm:$0xff]  ;;  %v15187_v38 = vld [vmem:[#allocation535_spill] sm:$0xff] }
 0x587   : > { %4364 = vrot.lane.b32.xlu0 %v1447_v7, %s9106_s27  ;;  %8836 = vmatprep.mubr.msk.f32.mxu0 %vm5358_vm10, %v5257_v62  ;;  %v11660_v62 = vsel %vm284_vm0, %v651_v3, %v9757_v40  ;;  %v11678_v40 = vsel %vm284_vm0, %v655_v53, %v9769_v48  ;;  %v4774_v48 = vsel %vm4771_vm4, %v4677_v44, %v10381_v24  ;;  %v1475_v24 = vld [vmem:[#allocation3 + $0x39a] sm:$0xff]  ;;  %v661_v3 = vld [vmem:[#allocation3 + $0xf0] sm:$0xff]  ;;  %v658_v53 = vld [vmem:[#allocation3 + $0xc8] sm:$0xff] }
 0x588   : > { %3980 = vrot.lane.b32.xlu1 %v1351_v41, %s9105_s14  ;;  %v1378_v41 = vld [vmem:[#allocation3 + $0x391] sm:$0xff]  ;;  %v11701_v2 = vsel %vm284_vm0, %v654_v36, %v9777_v54  ;;  %v4871_v52 = vsel %vm4868_vm5, %v4774_v48, %v10669_v33  ;;  %v4967_v63 = vsel %vm4965_vm6, %v4870_v16, %v10965_v11  ;;  %v4678_v54 = vsel %vm4674_vm2, %v4581_v14, %v10099_v57  ;;  %v15186_v36 = vld [vmem:[#allocation263_spill] sm:$0xff] }
 0x589   : > { %v4295_v6 = vpop.permute.xlu0 %4294  ;;  %v11684_v12 = vpop.permute.xlu1 %3956  ;;  %v4968_v56 = vsel %vm4965_vm6, %v4871_v52, %v10957_v9  ;;  %v5064_v7 = vsel %vm5062_vm7, %v4967_v63, %v11253_v5  ;;  %v4679_v11 = vsel %vm4674_vm2, %v4582_v18, %v10089_v4  ;;  %v4775_v22 = vsel %vm4771_vm4, %v4678_v54, %v10395_v31  ;;  %v15190_v48 = vld [vmem:[#allocation5_spill] sm:$0xff]  ;;  %v15191_v52 = vld [vmem:[#allocation84_spill] sm:$0xff] }
 0x58a   : > { %v5065_v58 = vsel %vm5062_vm7, %v4968_v56, %v11245_v35  ;;  %v5161_v57 = vsel %vm5159_vm8, %v5064_v7, %v11556_v51  ;;  %v4776_v9 = vsel %vm4771_vm4, %v4679_v11, %v10387_v55  ;;  %v4872_v5 = vsel %vm4868_vm5, %v4775_v22, %v10683_v23  ;;  %v1448_v23 = vld [vmem:[#allocation3 + $0x22a] sm:$0xff]  ;;  %v15193_v56 = vld [vmem:[#allocation446_spill] sm:$0xff] }
 0x58b   : > { %4418 = vrot.lane.b32.xlu0 %v1474_v37, %s9106_s27  ;;  %v5162_v61 = vsel %vm5159_vm8, %v5065_v58, %v11548_v1  ;;  %v4873_v31 = vsel %vm4868_vm5, %v4776_v9, %v10675_v21  ;;  %v4969_v51 = vsel %vm4965_vm6, %v4872_v5, %v10971_v47  ;;  %v11747_v55 = vsel %vm284_vm0, %v661_v3, %v9787_v60  ;;  %v663_v3 = vld [vmem:[#allocation3 + $0x108] sm:$0xff]  ;;  %v15194_v11 = vld [vmem:[#allocation82_spill] sm:$0xff]  ;;  %v15197_v9 = vld [vmem:[#allocation539_spill] sm:$0xff] }
 0x58c   : > { %4034 = vrot.lane.b32.xlu1 %v1378_v41, %s9105_s14  ;;  %v5259_v35 = vsel %vm5256_vm9, %v5162_v61, %v4295_v6  ;;  %v4680_v1 = vsel %vm4674_vm2, %v4583_v28, %v10105_v45  ;;  %v4970_v21 = vsel %vm4965_vm6, %v4873_v31, %v10963_v19  ;;  %v5066_v47 = vsel %vm5062_vm7, %v4969_v51, %v11259_v13  ;;  %v15184_v28 = vld [vmem:[#allocation537_spill] sm:$0xff]  ;;  %v15185_v13 = vld [vmem:[#allocation171_spill] sm:$0xff]  ;;  %v15189_v41 = vld [vmem:[#allocation354_spill] sm:$0xff] }
 0x58d   : > { %v4299_v33 = vpop.permute.xlu0 %4298  ;;  %v4293_v27 = vpop.permute.xlu1 %4292  ;;  %v4681_v14 = vsel %vm4674_vm2, %v11647_v0, %v10097_v59  ;;  %v4777_v60 = vsel %vm4771_vm4, %v4680_v1, %v10401_v20  ;;  %v5067_v45 = vsel %vm5062_vm7, %v4970_v21, %v15183_v30  ;;  %v5163_v19 = vsel %vm5159_vm8, %v5066_v47, %v15184_v28  ;;  %v15188_v20 = vld [vmem:[#allocation261_spill] sm:$0xff]  ;;  %v15195_v58 = vld [vmem:[#allocation174_spill] sm:$0xff] }
 0x58e   : > { %v5258_v4 = vsel %vm5256_vm9, %v5161_v57, %v4293_v27  ;;  %v4778_v37 = vsel %vm4771_vm4, %v4681_v14, %v15185_v13  ;;  %v4874_v10 = vsel %vm4868_vm5, %v4777_v60, %v15186_v36  ;;  %v5164_v6 = vsel %vm5159_vm8, %v5067_v45, %v15187_v38  ;;  %v15196_v27 = vld [vmem:[#allocation444_spill] sm:$0xff]  ;;  %v15199_v51 = vld [vmem:[#allocation265_spill] sm:$0xff]  ;;  %v15201_v21 = vld [vmem:[#allocation262_spill] sm:$0xff] }
 0x58f   : > { %4420 = vrot.lane.b32.xlu0 %v1475_v24, %s9106_s27  ;;  %8837 = vmatmul.mubr.msk.f32.vlgmr.msra.gmra.mrb[0].mxu0 %vm5358_vm10, %v5258_v4  ;;  %v4875_v0 = vsel %vm4868_vm5, %v4778_v37, %v15188_v20  ;;  %v4971_v42 = vsel %vm4965_vm6, %v4874_v10, %v15189_v41  ;;  %v5261_v44 = vsel %vm5256_vm9, %v5164_v6, %v4299_v33  ;;  %v15192_v24 = vld [vmem:[#allocation352_spill] sm:$0xff]  ;;  %v15203_v30 = vld [vmem:[#allocation6_spill] sm:$0xff]  ;;  %v660_v38 = vld [vmem:[#allocation3 + $0xe0] sm:$0xff] }
 0x590   : > { %4036 = vrot.lane.b32.xlu1 %v1379_v43, %s9105_s14  ;;  %8839 = vmatprep.mubr.msk.f32.mxu0 %vm5358_vm10, %v5259_v35  ;;  %v11782_v16 = vsel %vm284_vm0, %v658_v53, %v15190_v48  ;;  %v4682_v63 = vsel %vm4674_vm2, %v11664_v32, %v15191_v52  ;;  %v4972_v54 = vsel %vm4965_vm6, %v4875_v0, %v15192_v24  ;;  %v1353_v43 = vld [vmem:[#allocation3 + $0x231] sm:$0xff]  ;;  %v15198_v4 = vld [vmem:[#allocation172_spill] sm:$0xff]  ;;  %v15207_v6 = vld [vmem:[#allocation83_spill] sm:$0xff] }
 0x591   : > { %v4303_v18 = vpop.permute.xlu0 %4302  ;;  %v4297_v15 = vpop.permute.xlu1 %4296  ;;  %v5068_v7 = vsel %vm5062_vm7, %v4971_v42, %v15193_v56  ;;  %v4683_v22 = vsel %vm4674_vm2, %v11653_v25, %v15194_v11  ;;  %v4779_v57 = vsel %vm4771_vm4, %v4682_v63, %v15195_v58  ;;  %v5069_v32 = vsel %vm5062_vm7, %v4972_v54, %v15196_v27  ;;  %v1476_v60 = vld [vmem:[#allocation3 + $0x3aa] sm:$0xff]  ;;  %v15204_v28 = vld [vmem:[#allocation86_spill] sm:$0xff]  ;;  %v15212_v63 = vld [vmem:[#allocation267_spill] sm:$0xff] }
 0x592   : > { %v5260_v59 = vsel %vm5256_vm9, %v5163_v19, %v4297_v15  ;;  %v5165_v5 = vsel %vm5159_vm8, %v5068_v7, %v15197_v9  ;;  %v4780_v31 = vsel %vm4771_vm4, %v4683_v22, %v15198_v4  ;;  %v4876_v35 = vsel %vm4868_vm5, %v4779_v57, %v15199_v51  ;;  %v15205_v15 = vld [vmem:[#allocation353_spill] sm:$0xff]  ;;  %v15206_v37 = vld [vmem:[#allocation448_spill] sm:$0xff]  ;;  %v15213_v54 = vld [vmem:[#allocation538_spill] sm:$0xff] }
 0x593   : > { %4366 = vrot.lane.b32.xlu0 %v1448_v23, %s9106_s27  ;;  %8840 = vmatmul.mubr.msk.f32.gmra.mrb[2].mxu0 %vm5358_vm10, %v5260_v59  ;;  %v15200_v23 = vld [vmem:[#allocation536_spill] sm:$0xff]  ;;  %v4877_v47 = vsel %vm4868_vm5, %v4780_v31, %v15201_v21  ;;  %v11818_v45 = vsel %vm284_vm0, %v663_v3, %v15203_v30  ;;  %v4684_v19 = vsel %vm4674_vm2, %v11674_v29, %v15204_v28  ;;  %v15209_v41 = vld [vmem:[#allocation445_spill] sm:$0xff]  ;;  %v15215_v3 = vld [vmem:[#allocation358_spill] sm:$0xff] }
 0x594   : > { %3982 = vrot.lane.b32.xlu1 %v1352_v8, %s9105_s14  ;;  %8842 = vmatprep.mubr.msk.f32.mxu0 %vm5358_vm10, %v5261_v44  ;;  %v5166_v1 = vsel %vm5159_vm8, %v5069_v32, %v15200_v23  ;;  %v15202_v8 = vld [vmem:[#allocation356_spill] sm:$0xff]  ;;  %v4974_v13 = vsel %vm4965_vm6, %v4877_v47, %v15205_v15  ;;  %v4685_v59 = vsel %vm4674_vm2, %v11660_v62, %v15207_v6  ;;  %v15210_v42 = vld [vmem:[#allocation541_spill] sm:$0xff]  ;;  %v15216_v57 = vld [vmem:[#allocation7_spill] sm:$0xff] }
 0x595   : > { %v4307_v33 = vpop.permute.xlu0 %4306  ;;  %v4301_v61 = vpop.permute.xlu1 %4300  ;;  %v4973_v53 = vsel %vm4965_vm6, %v4876_v35, %v15202_v8  ;;  %v5263_v14 = vsel %vm5256_vm9, %v5166_v1, %v4303_v18  ;;  %v1380_v10 = vld [vmem:[#allocation3 + $0x3a9] sm:$0xff]  ;;  %v5071_v29 = vsel %vm5062_vm7, %v4974_v13, %v15209_v41  ;;  %v1477_v58 = vld [vmem:[#allocation3 + $0x3b2] sm:$0xff]  ;;  %v11854_v27 = vsel %vm284_vm0, %v660_v38, %v15216_v57  ;;  %v665_v35 = vld [vmem:[#allocation3 + $0x120] sm:$0xff] }
 0x596   : > { %v5262_v25 = vsel %vm5256_vm9, %v5165_v5, %v4301_v61  ;;  %v5070_v36 = vsel %vm5062_vm7, %v4973_v53, %v15206_v37  ;;  %v15208_v20 = vld [vmem:[#allocation176_spill] sm:$0xff]  ;;  %v15211_v48 = vld [vmem:[#allocation173_spill] sm:$0xff]  ;;  %v5168_v56 = vsel %vm5159_vm8, %v5071_v29, %v15213_v54  ;;  %v15218_v5 = vld [vmem:[#allocation355_spill] sm:$0xff] }
 0x597   : > { %4368 = vrot.lane.b32.xlu0 %v1449_v17, %s9106_s27  ;;  %8843 = vmatmul.mubr.msk.f32.gmra.mrb[4].mxu0 %vm5358_vm10, %v5262_v25  ;;  %v4781_v0 = vsel %vm4771_vm4, %v4684_v19, %v15208_v20  ;;  %v5167_v44 = vsel %vm5159_vm8, %v5070_v36, %v15210_v42  ;;  %v4782_v52 = vsel %vm4771_vm4, %v4685_v59, %v15211_v48  ;;  %v15214_v7 = vld [vmem:[#allocation264_spill] sm:$0xff]  ;;  %v15219_v4 = vld [vmem:[#allocation450_spill] sm:$0xff]  ;;  %v15220_v23 = vld [vmem:[#allocation85_spill] sm:$0xff] }
 0x598   : > { %3984 = vrot.lane.b32.xlu1 %v1353_v43, %s9105_s14  ;;  %8845 = vmatprep.mubr.msk.f32.mxu0 %vm5358_vm10, %v5263_v14  ;;  %v4878_v24 = vsel %vm4868_vm5, %v4781_v0, %v15212_v63  ;;  %v4879_v43 = vsel %vm4868_vm5, %v4782_v52, %v15214_v7  ;;  %v5265_v22 = vsel %vm5256_vm9, %v5168_v56, %v4307_v33  ;;  %v15217_v32 = vld [vmem:[#allocation88_spill] sm:$0xff]  ;;  %v1381_v51 = vld [vmem:[#allocation3 + $0x3b1] sm:$0xff]  ;;  %v15222_v47 = vld [vmem:[#allocation447_spill] sm:$0xff] }
 0x599   : > { %v4311_v18 = vpop.permute.xlu0 %4310  ;;  %v4305_v17 = vpop.permute.xlu1 %4304  ;;  %v4975_v11 = vsel %vm4965_vm6, %v4878_v24, %v15215_v3  ;;  %v4686_v9 = vsel %vm4674_vm2, %v11688_v26, %v15217_v32  ;;  %v4976_v61 = vsel %vm4965_vm6, %v4879_v43, %v15218_v5  ;;  %v4687_v1 = vsel %vm4674_vm2, %v11668_v34, %v15220_v23  ;;  %v15221_v25 = vld [vmem:[#allocation178_spill] sm:$0xff]  ;;  %v15223_v8 = vld [vmem:[#allocation543_spill] sm:$0xff]  ;;  %v15225_v28 = vld [vmem:[#allocation269_spill] sm:$0xff] }
 0x59a   : > { %v5264_v62 = vsel %vm5256_vm9, %v5167_v44, %v4305_v17  ;;  %v5072_v31 = vsel %vm5062_vm7, %v4975_v11, %v15219_v4  ;;  %v4783_v21 = vsel %vm4771_vm4, %v4686_v9, %v15221_v25  ;;  %v5073_v26 = vsel %vm5062_vm7, %v4976_v61, %v15222_v47  ;;  %v15226_v15 = vld [vmem:[#allocation540_spill] sm:$0xff]  ;;  %v15227_v37 = vld [vmem:[#allocation266_spill] sm:$0xff]  ;;  %v15231_v42 = vld [vmem:[#allocation357_spill] sm:$0xff] }
 0x59b   : > { %4422 = vrot.lane.b32.xlu0 %v1476_v60, %s9106_s27  ;;  %8846 = vmatmul.mubr.msk.f32.gmra.mrb[6].mxu0 %vm5358_vm10, %v5264_v62  ;;  %v5169_v53 = vsel %vm5159_vm8, %v5072_v31, %v15223_v8  ;;  %v15224_v60 = vld [vmem:[#allocation175_spill] sm:$0xff]  ;;  %v4880_v19 = vsel %vm4868_vm5, %v4783_v21, %v15225_v28  ;;  %v5170_v13 = vsel %vm5159_vm8, %v5073_v26, %v15226_v15  ;;  %v15229_v20 = vld [vmem:[#allocation8_spill] sm:$0xff]  ;;  %v15230_v41 = vld [vmem:[#allocation90_spill] sm:$0xff] }
 0x59c   : > { %4038 = vrot.lane.b32.xlu1 %v1380_v10, %s9105_s14  ;;  %8848 = vmatprep.mubr.msk.f32.mxu0 %vm5358_vm10, %v5265_v22  ;;  %v4784_v30 = vsel %vm4771_vm4, %v4687_v1, %v15224_v60  ;;  %v15228_v10 = vld [vmem:[#allocation360_spill] sm:$0xff]  ;;  %v5267_v6 = vsel %vm5256_vm9, %v5170_v13, %v4311_v18  ;;  %v11890_v0 = vsel %vm284_vm0, %v665_v35, %v15229_v20  ;;  %v662_v63 = vld [vmem:[#allocation3 + $0xf8] sm:$0xff]  ;;  %v15233_v24 = vld [vmem:[#allocation87_spill] sm:$0xff] }
 0x59d   : > { %v4315_v33 = vpop.permute.xlu0 %4314  ;;  %v4309_v14 = vpop.permute.xlu1 %4308  ;;  %v4881_v36 = vsel %vm4868_vm5, %v4784_v30, %v15227_v37  ;;  %v4977_v38 = vsel %vm4965_vm6, %v4880_v19, %v15228_v10  ;;  %v1450_v59 = vld [vmem:[#allocation3 + $0x242] sm:$0xff]  ;;  %v4688_v29 = vsel %vm4674_vm2, %v11701_v2, %v15230_v41  ;;  %v4689_v54 = vsel %vm4674_vm2, %v11678_v40, %v15233_v24  ;;  %v15235_v7 = vld [vmem:[#allocation449_spill] sm:$0xff]  ;;  %v15239_v9 = vld [vmem:[#allocation542_spill] sm:$0xff] }
 0x59e   : > { %v5266_v34 = vsel %vm5256_vm9, %v5169_v53, %v4309_v14  ;;  %v4978_v44 = vsel %vm4965_vm6, %v4881_v36, %v15231_v42  ;;  %v15232_v17 = vld [vmem:[#allocation452_spill] sm:$0xff]  ;;  %v15236_v43 = vld [vmem:[#allocation545_spill] sm:$0xff]  ;;  %v15238_v57 = vld [vmem:[#allocation271_spill] sm:$0xff] }
 0x59f   : > { %4424 = vrot.lane.b32.xlu0 %v1477_v58, %s9106_s27  ;;  %8849 = vmatmul.mubr.msk.f32.gmra.mrb[8].mxu0 %vm5358_vm10, %v5266_v34  ;;  %v5074_v48 = vsel %vm5062_vm7, %v4977_v38, %v15232_v17  ;;  %v1354_v52 = vld [vmem:[#allocation3 + $0x241] sm:$0xff]  ;;  %v5075_v2 = vsel %vm5062_vm7, %v4978_v44, %v15235_v7  ;;  %v15237_v22 = vld [vmem:[#allocation177_spill] sm:$0xff]  ;;  %v15241_v31 = vld [vmem:[#allocation362_spill] sm:$0xff] }
 0x5a0   : > { %4040 = vrot.lane.b32.xlu1 %v1381_v51, %s9105_s14  ;;  %8851 = vmatprep.mubr.msk.f32.mxu0 %vm5358_vm10, %v5267_v6  ;;  %v15234_v56 = vld [vmem:[#allocation180_spill] sm:$0xff]  ;;  %v5171_v3 = vsel %vm5159_vm8, %v5074_v48, %v15236_v43  ;;  %v4786_v58 = vsel %vm4771_vm4, %v4689_v54, %v15237_v22  ;;  %v5172_v5 = vsel %vm5159_vm8, %v5075_v2, %v15239_v9  ;;  %v15242_v1 = vld [vmem:[#allocation9_spill] sm:$0xff]  ;;  %v15244_v26 = vld [vmem:[#allocation359_spill] sm:$0xff] }
 0x5a1   : > { %v4319_v18 = vpop.permute.xlu0 %4318  ;;  %v4785_v62 = vsel %vm4771_vm4, %v4688_v29, %v15234_v56  ;;  %v4313_v11 = vpop.permute.xlu1 %4312  ;;  %v15240_v61 = vld [vmem:[#allocation268_spill] sm:$0xff]  ;;  %v5269_v35 = vsel %vm5256_vm9, %v5172_v5, %v4315_v33  ;;  %v11926_v25 = vsel %vm284_vm0, %v662_v63, %v15242_v1  ;;  %v15245_v53 = vld [vmem:[#allocation454_spill] sm:$0xff]  ;;  %v15246_v28 = vld [vmem:[#allocation89_spill] sm:$0xff] }
 0x5a2   : > { %v4882_v32 = vsel %vm4868_vm5, %v4785_v62, %v15238_v57  ;;  %v5268_v40 = vsel %vm5256_vm9, %v5171_v3, %v4313_v11  ;;  %v4883_v4 = vsel %vm4868_vm5, %v4786_v58, %v15240_v61  ;;  %v1451_v23 = vld [vmem:[#allocation3 + $0x24a] sm:$0xff]  ;;  %v667_v30 = vld [vmem:[#allocation3 + $0x138] sm:$0xff]  ;;  %v4691_v19 = vsel %vm4674_vm2, %v11692_v46, %v15246_v28  ;;  %v15248_v34 = vld [vmem:[#allocation451_spill] sm:$0xff] }
 0x5a3   : > { %4370 = vrot.lane.b32.xlu0 %v1450_v59, %s9106_s27  ;;  %v4979_v51 = vsel %vm4965_vm6, %v4882_v32, %v15241_v31  ;;  %8852 = vmatmul.mubr.msk.f32.gmra.mrb[10].mxu0 %vm5358_vm10, %v5268_v40  ;;  %v15243_v21 = vld [vmem:[#allocation92_spill] sm:$0xff]  ;;  %v4980_v8 = vsel %vm4965_vm6, %v4883_v4, %v15244_v26  ;;  %v15247_v15 = vld [vmem:[#allocation182_spill] sm:$0xff]  ;;  %v15249_v37 = vld [vmem:[#allocation547_spill] sm:$0xff] }
 0x5a4   : > { %3986 = vrot.lane.b32.xlu1 %v1354_v52, %s9105_s14  ;;  %v4690_v47 = vsel %vm4674_vm2, %v11714_v49, %v15243_v21  ;;  %v5076_v14 = vsel %vm5062_vm7, %v4979_v51, %v15245_v53  ;;  %8854 = vmatprep.mubr.msk.f32.mxu0 %vm5358_vm10, %v5269_v35  ;;  %v1355_v60 = vld [vmem:[#allocation3 + $0x249] sm:$0xff]  ;;  %v5077_v49 = vsel %vm5062_vm7, %v4980_v8, %v15248_v34  ;;  %v15250_v38 = vld [vmem:[#allocation179_spill] sm:$0xff]  ;;  %v15253_v42 = vld [vmem:[#allocation270_spill] sm:$0xff] }
 0x5a5   : > { %v4323_v33 = vpop.permute.xlu0 %4322  ;;  %v4787_v13 = vsel %vm4771_vm4, %v4690_v47, %v15247_v15  ;;  %v5173_v36 = vsel %vm5159_vm8, %v5076_v14, %v15249_v37  ;;  %v4317_v10 = vpop.permute.xlu1 %4316  ;;  %v4788_v6 = vsel %vm4771_vm4, %v4691_v19, %v15250_v38  ;;  %v15251_v59 = vld [vmem:[#allocation273_spill] sm:$0xff]  ;;  %v15252_v41 = vld [vmem:[#allocation544_spill] sm:$0xff]  ;;  %v15255_v24 = vld [vmem:[#allocation10_spill] sm:$0xff] }
 0x5a6   : > { %v4884_v20 = vsel %vm4868_vm5, %v4787_v13, %v15251_v59  ;;  %v5174_v29 = vsel %vm5159_vm8, %v5077_v49, %v15252_v41  ;;  %v5270_v46 = vsel %vm5256_vm9, %v5173_v36, %v4317_v10  ;;  %v4885_v44 = vsel %vm4868_vm5, %v4788_v6, %v15253_v42  ;;  %v15254_v17 = vld [vmem:[#allocation364_spill] sm:$0xff]  ;;  %v15256_v56 = vld [vmem:[#allocation94_spill] sm:$0xff]  ;;  %v15257_v7 = vld [vmem:[#allocation361_spill] sm:$0xff] }
 0x5a7   : > { %4372 = vrot.lane.b32.xlu0 %v1451_v23, %s9106_s27  ;;  %v4981_v48 = vsel %vm4965_vm6, %v4884_v20, %v15254_v17  ;;  %v5271_v52 = vsel %vm5256_vm9, %v5174_v29, %v4319_v18  ;;  %8855 = vmatmul.mubr.msk.f32.gmra.mrb[12].mxu0 %vm5358_vm10, %v5270_v46  ;;  %v1478_v63 = vld [vmem:[#allocation3 + $0x3c2] sm:$0xff]  ;;  %v11962_v54 = vsel %vm284_vm0, %v667_v30, %v15255_v24  ;;  %v664_v22 = vld [vmem:[#allocation3 + $0x110] sm:$0xff]  ;;  %v15265_v1 = vld [vmem:[#allocation546_spill] sm:$0xff] }
 0x5a8   : > { %3988 = vrot.lane.b32.xlu1 %v1355_v60, %s9105_s14  ;;  %v4692_v62 = vsel %vm4674_vm2, %v11782_v16, %v15256_v56  ;;  %v4982_v2 = vsel %vm4965_vm6, %v4885_v44, %v15257_v7  ;;  %v15258_v43 = vld [vmem:[#allocation456_spill] sm:$0xff]  ;;  %8857 = vmatprep.mubr.msk.f32.mxu0 %vm5358_vm10, %v5271_v52  ;;  %v15259_v58 = vld [vmem:[#allocation91_spill] sm:$0xff]  ;;  %v15261_v5 = vld [vmem:[#allocation453_spill] sm:$0xff] }
 0x5a9   : > { %v5078_v3 = vsel %vm5062_vm7, %v4981_v48, %v15258_v43  ;;  %v4327_v18 = vpop.permute.xlu0 %4326  ;;  %v1382_v11 = vld [vmem:[#allocation3 + $0x3c1] sm:$0xff]  ;;  %v4693_v57 = vsel %vm4674_vm2, %v11705_v50, %v15259_v58  ;;  %v5079_v16 = vsel %vm5062_vm7, %v4982_v2, %v15261_v5  ;;  %v15262_v40 = vld [vmem:[#allocation549_spill] sm:$0xff]  ;;  %v4321_v4 = vpop.permute.xlu1 %4320  ;;  %v15267_v8 = vld [vmem:[#allocation366_spill] sm:$0xff] }
 0x5aa   : > { %v15260_v32 = vld [vmem:[#allocation184_spill] sm:$0xff]  ;;  %v5175_v61 = vsel %vm5159_vm8, %v5078_v3, %v15262_v40  ;;  %v15263_v31 = vld [vmem:[#allocation181_spill] sm:$0xff]  ;;  %v15264_v35 = vld [vmem:[#allocation275_spill] sm:$0xff]  ;;  %v5176_v21 = vsel %vm5159_vm8, %v5079_v16, %v15265_v1 }
 0x5ab   : > { %v4789_v9 = vsel %vm4771_vm4, %v4692_v62, %v15260_v32  ;;  %v4790_v51 = vsel %vm4771_vm4, %v4693_v57, %v15263_v31  ;;  %v5272_v50 = vsel %vm5256_vm9, %v5175_v61, %v4321_v4  ;;  %4426 = vrot.lane.b32.xlu0 %v1478_v63, %s9106_s27  ;;  %v15266_v47 = vld [vmem:[#allocation272_spill] sm:$0xff]  ;;  %v5273_v14 = vsel %vm5256_vm9, %v5176_v21, %v4323_v33  ;;  %v15268_v30 = vld [vmem:[#allocation11_spill] sm:$0xff]  ;;  %v15271_v49 = vld [vmem:[#allocation458_spill] sm:$0xff] }
 0x5ac   : > { %v4886_v23 = vsel %vm4868_vm5, %v4789_v9, %v15264_v35  ;;  %v4887_v26 = vsel %vm4868_vm5, %v4790_v51, %v15266_v47  ;;  %4042 = vrot.lane.b32.xlu1 %v1382_v11, %s9105_s14  ;;  %8858 = vmatmul.mubr.msk.f32.gmra.mrb[14].mxu0 %vm5358_vm10, %v5272_v50  ;;  %v1479_v60 = vld [vmem:[#allocation3 + $0x3ca] sm:$0xff]  ;;  %v4601_v28 = vsel %vm284_vm0, %v664_v22, %v15268_v30  ;;  %v15270_v13 = vld [vmem:[#allocation363_spill] sm:$0xff]  ;;  %v15273_v59 = vld [vmem:[#allocation186_spill] sm:$0xff] }
 0x5ad   : > { %v4983_v53 = vsel %vm4965_vm6, %v4886_v23, %v15267_v8  ;;  %v15269_v19 = vld [vmem:[#allocation96_spill] sm:$0xff]  ;;  %v4984_v34 = vsel %vm4965_vm6, %v4887_v26, %v15270_v13  ;;  %8860 = vmatprep.mubr.msk.f32.mxu0 %vm5358_vm10, %v5273_v14  ;;  %v4331_v33 = vpop.permute.xlu0 %4330  ;;  %v15272_v38 = vld [vmem:[#allocation93_spill] sm:$0xff]  ;;  %v15274_v41 = vld [vmem:[#allocation455_spill] sm:$0xff]  ;;  %v4325_v42 = vpop.permute.xlu1 %4324 }
 0x5ae   : > { %v4694_v15 = vsel %vm4674_vm2, %v11854_v27, %v15269_v19  ;;  %v5080_v37 = vsel %vm5062_vm7, %v4983_v53, %v15271_v49  ;;  %v1383_v36 = vld [vmem:[#allocation3 + $0x3c9] sm:$0xff]  ;;  %v4695_v6 = vsel %vm4674_vm2, %v11747_v55, %v15272_v38  ;;  %v5081_v27 = vsel %vm5062_vm7, %v4984_v34, %v15274_v41  ;;  %v15275_v29 = vld [vmem:[#allocation551_spill] sm:$0xff]  ;;  %v15279_v56 = vld [vmem:[#allocation274_spill] sm:$0xff] }
 0x5af   : > { %v666_v10 = vld [vmem:[#allocation3 + $0x128] sm:$0xff]  ;;  %v4791_v20 = vsel %vm4771_vm4, %v4694_v15, %v15273_v59  ;;  %v5177_v46 = vsel %vm5159_vm8, %v5080_v37, %v15275_v29  ;;  %v15276_v44 = vld [vmem:[#allocation183_spill] sm:$0xff]  ;;  %v15277_v48 = vld [vmem:[#allocation277_spill] sm:$0xff]  ;;  %4428 = vrot.lane.b32.xlu0 %v1479_v60, %s9106_s27 }
 0x5b0   : > { %v4792_v17 = vsel %vm4771_vm4, %v4695_v6, %v15276_v44  ;;  %v4888_v52 = vsel %vm4868_vm5, %v4791_v20, %v15277_v48  ;;  %v15278_v63 = vld [vmem:[#allocation548_spill] sm:$0xff]  ;;  %v5274_v55 = vsel %vm5256_vm9, %v5177_v46, %v4325_v42  ;;  %4044 = vrot.lane.b32.xlu1 %v1383_v36, %s9105_s14  ;;  %v1452_v3 = vld [vmem:[#allocation3 + $0x25a] sm:$0xff]  ;;  %v15281_v11 = vld [vmem:[#allocation13_spill] sm:$0xff] }
 0x5b1   : > { %v5178_v24 = vsel %vm5159_vm8, %v5081_v27, %v15278_v63  ;;  %v4889_v62 = vsel %vm4868_vm5, %v4792_v17, %v15279_v56  ;;  %v15280_v7 = vld [vmem:[#allocation368_spill] sm:$0xff]  ;;  %8861 = vmatmul.mubr.msk.f32.gmra.mrb[16].mxu0 %vm5358_vm10, %v5274_v55  ;;  %v4603_v22 = vsel %vm284_vm0, %v666_v10, %v15281_v11  ;;  %v15282_v58 = vld [vmem:[#allocation98_spill] sm:$0xff]  ;;  %v15283_v32 = vld [vmem:[#allocation365_spill] sm:$0xff]  ;;  %v4329_v21 = vpop.permute.xlu1 %4328 }
 0x5b2   : > { %v4985_v2 = vsel %vm4965_vm6, %v4888_v52, %v15280_v7  ;;  %v5275_v43 = vsel %vm5256_vm9, %v5178_v24, %v4327_v18  ;;  %v4696_v57 = vsel %vm4674_vm2, %v11926_v25, %v15282_v58  ;;  %v4986_v9 = vsel %vm4965_vm6, %v4889_v62, %v15283_v32  ;;  %v15284_v5 = vld [vmem:[#allocation460_spill] sm:$0xff]  ;;  %v4335_v18 = vpop.permute.xlu0 %4334  ;;  %v1356_v40 = vld [vmem:[#allocation3 + $0x259] sm:$0xff]  ;;  %v15287_v35 = vld [vmem:[#allocation457_spill] sm:$0xff] }
 0x5b3   : > { %v5082_v16 = vsel %vm5062_vm7, %v4985_v2, %v15284_v5  ;;  %8863 = vmatprep.mubr.msk.f32.mxu0 %vm5358_vm10, %v5275_v43  ;;  %v15285_v61 = vld [vmem:[#allocation95_spill] sm:$0xff]  ;;  %v15286_v31 = vld [vmem:[#allocation188_spill] sm:$0xff]  ;;  %v5083_v25 = vsel %vm5062_vm7, %v4986_v9, %v15287_v35  ;;  %v15288_v23 = vld [vmem:[#allocation553_spill] sm:$0xff]  ;;  %4374 = vrot.lane.b32.xlu0 %v1452_v3, %s9106_s27 }
 0x5b4   : > { %v4697_v4 = vsel %vm4674_vm2, %v11818_v45, %v15285_v61  ;;  %v4793_v51 = vsel %vm4771_vm4, %v4696_v57, %v15286_v31  ;;  %v5179_v1 = vsel %vm5159_vm8, %v5082_v16, %v15288_v23  ;;  %v15289_v50 = vld [vmem:[#allocation185_spill] sm:$0xff]  ;;  %v15290_v26 = vld [vmem:[#allocation279_spill] sm:$0xff]  ;;  %v15291_v53 = vld [vmem:[#allocation550_spill] sm:$0xff]  ;;  %3990 = vrot.lane.b32.xlu1 %v1356_v40, %s9105_s14 }
 0x5b5   : > { %v4794_v47 = vsel %vm4771_vm4, %v4697_v4, %v15289_v50  ;;  %v4890_v8 = vsel %vm4868_vm5, %v4793_v51, %v15290_v26  ;;  %v5180_v14 = vsel %vm5159_vm8, %v5083_v25, %v15291_v53  ;;  %v5276_v45 = vsel %vm5256_vm9, %v5179_v1, %v4329_v21  ;;  %v15292_v60 = vld [vmem:[#allocation276_spill] sm:$0xff]  ;;  %v15293_v19 = vld [vmem:[#allocation370_spill] sm:$0xff]  ;;  %v15294_v49 = vld [vmem:[#allocation97_spill] sm:$0xff]  ;;  %v4333_v48 = vpop.permute.xlu1 %4332 }
 0x5b6   : > { %v4891_v30 = vsel %vm4868_vm5, %v4794_v47, %v15292_v60  ;;  %v4987_v15 = vsel %vm4965_vm6, %v4890_v8, %v15293_v19  ;;  %v5277_v13 = vsel %vm5256_vm9, %v5180_v14, %v4331_v33  ;;  %8864 = vmatmul.mubr.msk.f32.gmra.mrb[18].mxu0 %vm5358_vm10, %v5276_v45  ;;  %v1453_v34 = vld [vmem:[#allocation3 + $0x262] sm:$0xff]  ;;  %v4699_v37 = vsel %vm4674_vm2, %v11890_v0, %v15294_v49  ;;  %v15297_v59 = vld [vmem:[#allocation462_spill] sm:$0xff]  ;;  %v4339_v33 = vpop.permute.xlu0 %4338  ;;  %v15303_v24 = vld [vmem:[#allocation281_spill] sm:$0xff] }
 0x5b7   : > { %v15295_v36 = vld [vmem:[#allocation100_spill] sm:$0xff]  ;;  %v15296_v38 = vld [vmem:[#allocation367_spill] sm:$0xff]  ;;  %v5084_v20 = vsel %vm5062_vm7, %v4987_v15, %v15297_v59  ;;  %8866 = vmatprep.mubr.msk.f32.mxu0 %vm5358_vm10, %v5277_v13  ;;  %v15299_v46 = vld [vmem:[#allocation190_spill] sm:$0xff]  ;;  %4376 = vrot.lane.b32.xlu0 %v1453_v34, %s9106_s27 }
 0x5b8   : > { %v4698_v10 = vsel %vm4674_vm2, %v4601_v28, %v15295_v36  ;;  %v4988_v6 = vsel %vm4965_vm6, %v4891_v30, %v15296_v38  ;;  %v1357_v41 = vld [vmem:[#allocation3 + $0x261] sm:$0xff]  ;;  %v15305_v7 = vld [vmem:[#allocation278_spill] sm:$0xff]  ;;  %v15308_v9 = vld [vmem:[#allocation189_spill] sm:$0xff] }
 0x5b9   : > { %v15298_v27 = vld [vmem:[#allocation99_spill] sm:$0xff]  ;;  %v4795_v0 = vsel %vm4771_vm4, %v4698_v10, %v15299_v46  ;;  %v15304_v56 = vld [vmem:[#allocation552_spill] sm:$0xff]  ;;  %3992 = vrot.lane.b32.xlu1 %v1357_v41, %s9105_s14  ;;  %v15307_v57 = vld [vmem:[#allocation102_spill] sm:$0xff]  ;;  %v4337_v50 = vpop.permute.xlu1 %4336 }
 0x5ba   : > { %v4701_v29 = vsel %vm4674_vm2, %v11962_v54, %v15298_v27  ;;  %v15300_v42 = vld [vmem:[#allocation459_spill] sm:$0xff]  ;;  %v4892_v55 = vsel %vm4868_vm5, %v4795_v0, %v15303_v24  ;;  %v15306_v43 = vld [vmem:[#allocation372_spill] sm:$0xff]  ;;  %v4700_v32 = vsel %vm4674_vm2, %v4603_v22, %v15307_v57  ;;  %v15309_v16 = vld [vmem:[#allocation369_spill] sm:$0xff] }
 0x5bb   : > { %v5085_v28 = vsel %vm5062_vm7, %v4988_v6, %v15300_v42  ;;  %v15301_v44 = vld [vmem:[#allocation555_spill] sm:$0xff]  ;;  %v4989_v3 = vsel %vm4965_vm6, %v4892_v55, %v15306_v43  ;;  %v4798_v5 = vsel %vm4771_vm4, %v4701_v29, %v15308_v9  ;;  %v15310_v61 = vld [vmem:[#allocation464_spill] sm:$0xff]  ;;  %v15313_v22 = vld [vmem:[#allocation461_spill] sm:$0xff] }
 0x5bc   : > { %v5181_v17 = vsel %vm5159_vm8, %v5084_v20, %v15301_v44  ;;  %v15302_v52 = vld [vmem:[#allocation187_spill] sm:$0xff]  ;;  %v5182_v62 = vsel %vm5159_vm8, %v5085_v28, %v15304_v56  ;;  %v5086_v4 = vsel %vm5062_vm7, %v4989_v3, %v15310_v61  ;;  %v15311_v51 = vld [vmem:[#allocation192_spill] sm:$0xff]  ;;  %v15316_v14 = vld [vmem:[#allocation554_spill] sm:$0xff] }
 0x5bd   : > { %v4796_v63 = vsel %vm4771_vm4, %v4699_v37, %v15302_v52  ;;  %v5278_v54 = vsel %vm5256_vm9, %v5181_v17, %v4333_v48  ;;  %v5279_v11 = vsel %vm5256_vm9, %v5182_v62, %v4335_v18  ;;  %v1480_v58 = vld [vmem:[#allocation3 + $0x3da] sm:$0xff]  ;;  %v3959_v18 = vpop.permute.xlu0 %3958  ;;  %v4797_v35 = vsel %vm4771_vm4, %v4700_v32, %v15311_v51  ;;  %v15312_v25 = vld [vmem:[#allocation280_spill] sm:$0xff]  ;;  %v669_v30 = vld [vmem:[#allocation3 + $0x150] sm:$0xff]  ;;  %v4341_v41 = vpop.permute.xlu1 %4340 }
 0x5be   : > { %v4893_v2 = vsel %vm4868_vm5, %v4796_v63, %v15305_v7  ;;  %8867 = vmatmul.mubr.msk.f32.gmra.mrb[20].mxu0 %vm5358_vm10, %v5278_v54  ;;  %v1384_v31 = vld [vmem:[#allocation3 + $0x3d9] sm:$0xff]  ;;  %v4895_v23 = vsel %vm4868_vm5, %v4798_v5, %v15312_v25  ;;  %v5183_v21 = vsel %vm5159_vm8, %v5086_v4, %v11634_v39  ;;  %4430 = vrot.lane.b32.xlu0 %v1480_v58, %s9106_s27  ;;  %v1481_v49 = vld [vmem:[#allocation3 + $0x3e2] sm:$0xff]  ;;  %v15322_v28 = vld [vmem:[#allocation101_spill] sm:$0xff] }
 0x5bf   : > { %v4990_v40 = vsel %vm4965_vm6, %v4893_v2, %v15309_v16  ;;  %8869 = vmatprep.mubr.msk.f32.mxu0 %vm5358_vm10, %v5279_v11  ;;  %v15314_v47 = vld [vmem:[#allocation283_spill] sm:$0xff]  ;;  %v5280_v60 = vsel %vm5256_vm9, %v5183_v21, %v4337_v50  ;;  %v15317_v19 = vld [vmem:[#allocation374_spill] sm:$0xff]  ;;  %4046 = vrot.lane.b32.xlu1 %v1384_v31, %s9105_s14  ;;  %v15320_v27 = vld [vmem:[#allocation12_spill] sm:$0xff] }
 0x5c0   : > { %v5087_v1 = vsel %vm5062_vm7, %v4990_v40, %v15313_v22  ;;  %v4894_v26 = vsel %vm4868_vm5, %v4797_v35, %v15314_v47  ;;  %v15315_v8 = vld [vmem:[#allocation371_spill] sm:$0xff]  ;;  %v15319_v36 = vld [vmem:[#allocation466_spill] sm:$0xff]  ;;  %v4606_v29 = vsel %vm284_vm0, %v669_v30, %v15320_v27  ;;  %v15323_v17 = vld [vmem:[#allocation104_spill] sm:$0xff] }
 0x5c1   : > { %v4992_v53 = vsel %vm4965_vm6, %v4895_v23, %v15315_v8  ;;  %v5184_v45 = vsel %vm5159_vm8, %v5087_v1, %v15316_v14  ;;  %v4991_v15 = vsel %vm4965_vm6, %v4894_v26, %v15317_v19  ;;  %v15318_v13 = vld [vmem:[#allocation463_spill] sm:$0xff]  ;;  %v4343_v6 = vpop.permute.xlu0 %4342  ;;  %v4703_v44 = vsel %vm4674_vm2, %v4606_v29, %v15322_v28  ;;  %v1358_v55 = vld [vmem:[#allocation3 + $0x271] sm:$0xff]  ;;  %v3961_v2 = vpop.permute.xlu1 %3960  ;;  %v671_v57 = vld [vmem:[#allocation3 + $0x168] sm:$0xff] }
 0x5c2   : > { %v5089_v39 = vsel %vm5062_vm7, %v4992_v53, %v15318_v13  ;;  %v5281_v34 = vsel %vm5256_vm9, %v5184_v45, %v4339_v33  ;;  %8870 = vmatmul.mubr.msk.f32.gmra.mrb[22].mxu0 %vm5358_vm10, %v5280_v60  ;;  %v668_v37 = vld [vmem:[#allocation3 + $0x140] sm:$0xff]  ;;  %v5088_v10 = vsel %vm5062_vm7, %v4991_v15, %v15319_v36  ;;  %4432 = vrot.lane.b32.xlu0 %v1481_v49, %s9106_s27  ;;  %v15325_v56 = vld [vmem:[#allocation194_spill] sm:$0xff]  ;;  %v15327_v43 = vld [vmem:[#allocation285_spill] sm:$0xff] }
 0x5c3   : > { %v5186_v38 = vsel %vm5159_vm8, %v5089_v39, %v3959_v18  ;;  %8872 = vmatprep.mubr.msk.f32.mxu0 %vm5358_vm10, %v5281_v34  ;;  %v1385_v59 = vld [vmem:[#allocation3 + $0x3e1] sm:$0xff]  ;;  %v5185_v20 = vsel %vm5159_vm8, %v5088_v10, %v11684_v12  ;;  %v1454_v12 = vld [vmem:[#allocation3 + $0x272] sm:$0xff] }
 0x5c4   : > { %v5283_v33 = vsel %vm5256_vm9, %v5186_v38, %v4343_v6  ;;  %v5282_v46 = vsel %vm5256_vm9, %v5185_v20, %v4341_v41  ;;  %v15321_v0 = vld [vmem:[#allocation15_spill] sm:$0xff]  ;;  %4048 = vrot.lane.b32.xlu1 %v1385_v59, %s9105_s14  ;;  %v15326_v54 = vld [vmem:[#allocation282_spill] sm:$0xff]  ;;  %v15328_v11 = vld [vmem:[#allocation373_spill] sm:$0xff] }
 0x5c5   : > { %v4605_v42 = vsel %vm284_vm0, %v668_v37, %v15321_v0  ;;  %v15324_v52 = vld [vmem:[#allocation191_spill] sm:$0xff]  ;;  %v3963_v24 = vpop.permute.xlu0 %3962  ;;  %v15329_v32 = vld [vmem:[#allocation376_spill] sm:$0xff]  ;;  %v15330_v5 = vld [vmem:[#allocation465_spill] sm:$0xff]  ;;  %v4345_v22 = vpop.permute.xlu1 %4344 }
 0x5c6   : > { %8873 = vmatmul.mubr.msk.f32.gmra.mrb[24].mxu0 %vm5358_vm10, %v5282_v46  ;;  %v4702_v48 = vsel %vm4674_vm2, %v4605_v42, %v15323_v17  ;;  %v4800_v63 = vsel %vm4771_vm4, %v4703_v44, %v15324_v52  ;;  %4378 = vrot.lane.b32.xlu0 %v1454_v12, %s9106_s27  ;;  %v1455_v40 = vld [vmem:[#allocation3 + $0x27a] sm:$0xff]  ;;  %v15331_v4 = vld [vmem:[#allocation468_spill] sm:$0xff]  ;;  %v15333_v47 = vld [vmem:[#allocation17_spill] sm:$0xff] }
 0x5c7   : > { %8875 = vmatprep.mubr.msk.f32.mxu0 %vm5358_vm10, %v5283_v33  ;;  %v4799_v62 = vsel %vm4771_vm4, %v4702_v48, %v15325_v56  ;;  %v4897_v7 = vsel %vm4868_vm5, %v4800_v63, %v15326_v54  ;;  %v670_v61 = vld [vmem:[#allocation3 + $0x158] sm:$0xff]  ;;  %v15334_v8 = vld [vmem:[#allocation103_spill] sm:$0xff]  ;;  %v15336_v30 = vld [vmem:[#allocation193_spill] sm:$0xff] }
 0x5c8   : > { %v4896_v3 = vsel %vm4868_vm5, %v4799_v62, %v15327_v43  ;;  %v4994_v58 = vsel %vm4965_vm6, %v4897_v7, %v15328_v11  ;;  %3994 = vrot.lane.b32.xlu1 %v1358_v55, %s9105_s14  ;;  %v1359_v35 = vld [vmem:[#allocation3 + $0x279] sm:$0xff]  ;;  %v4607_v26 = vsel %vm284_vm0, %v670_v61, %v15333_v47  ;;  %v1386_v13 = vld [vmem:[#allocation3 + $0x3f1] sm:$0xff]  ;;  %v15337_v39 = vld [vmem:[#allocation196_spill] sm:$0xff] }
 0x5c9   : > { %v4993_v9 = vsel %vm4965_vm6, %v4896_v3, %v15329_v32  ;;  %v5091_v16 = vsel %vm5062_vm7, %v4994_v58, %v15330_v5  ;;  %v4347_v51 = vpop.permute.xlu0 %4346  ;;  %v15332_v1 = vld [vmem:[#allocation14_spill] sm:$0xff]  ;;  %v15338_v49 = vld [vmem:[#allocation284_spill] sm:$0xff]  ;;  %v3965_v36 = vpop.permute.xlu1 %3964  ;;  %v15339_v10 = vld [vmem:[#allocation287_spill] sm:$0xff] }
 0x5ca   : > { %v5090_v18 = vsel %vm5062_vm7, %v4993_v9, %v15331_v4  ;;  %v5188_v31 = vsel %vm5159_vm8, %v5091_v16, %v3963_v24  ;;  %v4608_v21 = vsel %vm284_vm0, %v671_v57, %v15332_v1  ;;  %4380 = vrot.lane.b32.xlu0 %v1455_v40, %s9106_s27  ;;  %v1482_v14 = vld [vmem:[#allocation3 + $0x3f2] sm:$0xff]  ;;  %v15340_v6 = vld [vmem:[#allocation375_spill] sm:$0xff]  ;;  %v15344_v24 = vld [vmem:[#allocation16_spill] sm:$0xff] }
 0x5cb   : > { %v5187_v25 = vsel %vm5159_vm8, %v5090_v18, %v3961_v2  ;;  %v5285_v23 = vsel %vm5256_vm9, %v5188_v31, %v4347_v51  ;;  %v4705_v53 = vsel %vm4674_vm2, %v4608_v21, %v15334_v8  ;;  %v15335_v45 = vld [vmem:[#allocation106_spill] sm:$0xff]  ;;  %v673_v20 = vld [vmem:[#allocation3 + $0x1b0] sm:$0xff]  ;;  %v15342_v27 = vld [vmem:[#allocation467_spill] sm:$0xff] }
 0x5cc   : > { %v5284_v50 = vsel %vm5256_vm9, %v5187_v25, %v4345_v22  ;;  %3996 = vrot.lane.b32.xlu1 %v1359_v35, %s9105_s14  ;;  %v4704_v60 = vsel %vm4674_vm2, %v4607_v26, %v15335_v45  ;;  %v4802_v19 = vsel %vm4771_vm4, %v4705_v53, %v15336_v30  ;;  %v15341_v33 = vld [vmem:[#allocation378_spill] sm:$0xff]  ;;  %v672_v0 = vld [vmem:[#allocation3 + $0x170] sm:$0xff]  ;;  %v4610_v55 = vsel %vm284_vm0, %v673_v20, %v15344_v24  ;;  %v15345_v62 = vld [vmem:[#allocation19_spill] sm:$0xff] }
 0x5cd   : > { %8876 = vmatmul.mubr.msk.f32.gmra.mrb[26].mxu0 %vm5358_vm10, %v5284_v50  ;;  %v3967_v15 = vpop.permute.xlu0 %3966  ;;  %v4801_v34 = vsel %vm4771_vm4, %v4704_v60, %v15337_v39  ;;  %v4899_v37 = vsel %vm4868_vm5, %v4802_v19, %v15338_v49  ;;  %v1483_v46 = vld [vmem:[#allocation3 + $0x3fa] sm:$0xff]  ;;  %v4349_v63 = vpop.permute.xlu1 %4348  ;;  %v4609_v54 = vsel %vm284_vm0, %v672_v0, %v15345_v62  ;;  %v15346_v7 = vld [vmem:[#allocation105_spill] sm:$0xff]  ;;  %v15347_v3 = vld [vmem:[#allocation108_spill] sm:$0xff] }
 0x5ce   : > { %8878 = vmatprep.mubr.msk.f32.mxu0 %vm5358_vm10, %v5285_v23  ;;  %v4898_v38 = vsel %vm4868_vm5, %v4801_v34, %v15339_v10  ;;  %v4996_v59 = vsel %vm4965_vm6, %v4899_v37, %v15340_v6  ;;  %4434 = vrot.lane.b32.xlu0 %v1482_v14, %s9106_s27  ;;  %v15343_v42 = vld [vmem:[#allocation470_spill] sm:$0xff]  ;;  %v4707_v2 = vsel %vm4674_vm2, %v4610_v55, %v15346_v7  ;;  %v1456_v43 = vld [vmem:[#allocation3 + $0x28a] sm:$0xff]  ;;  %v15348_v58 = vld [vmem:[#allocation195_spill] sm:$0xff] }
 0x5cf   : > { %v4995_v41 = vsel %vm4965_vm6, %v4898_v38, %v15341_v33  ;;  %v5093_v29 = vsel %vm5062_vm7, %v4996_v59, %v15342_v27  ;;  %v1387_v17 = vld [vmem:[#allocation3 + $0x3f9] sm:$0xff]  ;;  %v4706_v11 = vsel %vm4674_vm2, %v4609_v54, %v15347_v3  ;;  %v4804_v57 = vsel %vm4771_vm4, %v4707_v2, %v15348_v58  ;;  %v1360_v9 = vld [vmem:[#allocation3 + $0x289] sm:$0xff]  ;;  %v1361_v60 = vld [vmem:[#allocation3 + $0x291] sm:$0xff] }
 0x5d0   : > { %4050 = vrot.lane.b32.xlu1 %v1386_v13, %s9105_s14  ;;  %v5092_v28 = vsel %vm5062_vm7, %v4995_v41, %v15343_v42  ;;  %v5190_v44 = vsel %vm5159_vm8, %v5093_v29, %v3967_v15  ;;  %v674_v5 = vld [vmem:[#allocation3 + $0x1b8] sm:$0xff]  ;;  %v15351_v31 = vld [vmem:[#allocation289_spill] sm:$0xff]  ;;  %v15353_v23 = vld [vmem:[#allocation380_spill] sm:$0xff] }
 0x5d1   : > { %v4351_v12 = vpop.permute.xlu0 %4350  ;;  %v5189_v48 = vsel %vm5159_vm8, %v5092_v28, %v3965_v36  ;;  %v15349_v16 = vld [vmem:[#allocation198_spill] sm:$0xff]  ;;  %v3969_v18 = vpop.permute.xlu1 %3968  ;;  %v15352_v35 = vld [vmem:[#allocation377_spill] sm:$0xff]  ;;  %v15356_v8 = vld [vmem:[#allocation472_spill] sm:$0xff] }
 0x5d2   : > { %v5287_v52 = vsel %vm5256_vm9, %v5190_v44, %v4351_v12  ;;  %v5286_v56 = vsel %vm5256_vm9, %v5189_v48, %v4349_v63  ;;  %4436 = vrot.lane.b32.xlu0 %v1483_v46, %s9106_s27  ;;  %v4803_v40 = vsel %vm4771_vm4, %v4706_v11, %v15349_v16  ;;  %v15350_v61 = vld [vmem:[#allocation286_spill] sm:$0xff]  ;;  %v15354_v1 = vld [vmem:[#allocation469_spill] sm:$0xff]  ;;  %v701_v30 = vld [vmem:[#allocation3 + $0x300] sm:$0xff] }
 0x5d3   : > { %8879 = vmatmul.mubr.msk.f32.gmra.mrb[28].mxu0 %vm5358_vm10, %v5286_v56  ;;  %v4901_v4 = vsel %vm4868_vm5, %v4804_v57, %v15350_v61  ;;  %v4900_v51 = vsel %vm4868_vm5, %v4803_v40, %v15351_v31  ;;  %v1457_v50 = vld [vmem:[#allocation3 + $0x292] sm:$0xff]  ;;  %v15358_v49 = vld [vmem:[#allocation200_spill] sm:$0xff]  ;;  %v15359_v10 = vld [vmem:[#allocation291_spill] sm:$0xff] }
 0x5d4   : > { %4052 = vrot.lane.b32.xlu1 %v1387_v17, %s9105_s14  ;;  %8881 = vmatprep.mubr.msk.f32.mxu0 %vm5358_vm10, %v5287_v52  ;;  %v4998_v25 = vsel %vm4965_vm6, %v4901_v4, %v15352_v35  ;;  %v4997_v22 = vsel %vm4965_vm6, %v4900_v51, %v15353_v23  ;;  %v15355_v47 = vld [vmem:[#allocation21_spill] sm:$0xff]  ;;  %v15357_v19 = vld [vmem:[#allocation110_spill] sm:$0xff]  ;;  %v15360_v59 = vld [vmem:[#allocation44_spill] sm:$0xff] }
 0x5d5   : > { %v3971_v32 = vpop.permute.xlu0 %3970  ;;  %v5095_v21 = vsel %vm5062_vm7, %v4998_v25, %v15354_v1  ;;  %v4611_v26 = vsel %vm284_vm0, %v674_v5, %v15355_v47  ;;  %v5094_v53 = vsel %vm5062_vm7, %v4997_v22, %v15356_v8  ;;  %v4353_v34 = vpop.permute.xlu1 %4352  ;;  %v1484_v6 = vld [vmem:[#allocation3 + $0x40a] sm:$0xff]  ;;  %v4638_v20 = vsel %vm284_vm0, %v701_v30, %v15360_v59  ;;  %v15361_v33 = vld [vmem:[#allocation382_spill] sm:$0xff]  ;;  %v15364_v17 = vld [vmem:[#allocation223_spill] sm:$0xff] }
 0x5d6   : > { %4382 = vrot.lane.b32.xlu0 %v1456_v43, %s9106_s27  ;;  %v5192_v14 = vsel %vm5159_vm8, %v5095_v21, %v3971_v32  ;;  %v4708_v15 = vsel %vm4674_vm2, %v4611_v26, %v15357_v19  ;;  %v5191_v13 = vsel %vm5159_vm8, %v5094_v53, %v3969_v18  ;;  %v1388_v29 = vld [vmem:[#allocation3 + $0x409] sm:$0xff]  ;;  %v15363_v28 = vld [vmem:[#allocation474_spill] sm:$0xff]  ;;  %v15371_v4 = vld [vmem:[#allocation319_spill] sm:$0xff] }
 0x5d7   : > { %v4805_v37 = vsel %vm4771_vm4, %v4708_v15, %v15358_v49  ;;  %v5288_v36 = vsel %vm5256_vm9, %v5191_v13, %v4353_v34  ;;  %v702_v46 = vld [vmem:[#allocation3 + $0x308] sm:$0xff]  ;;  %v15362_v0 = vld [vmem:[#allocation133_spill] sm:$0xff]  ;;  %v15365_v63 = vld [vmem:[#allocation314_spill] sm:$0xff] }
 0x5d8   : > { %3998 = vrot.lane.b32.xlu1 %v1360_v9, %s9105_s14  ;;  %v4902_v38 = vsel %vm4868_vm5, %v4805_v37, %v15359_v10  ;;  %8882 = vmatmul.mubr.msk.f32.gmra.mrb[30].mxu0 %vm5358_vm10, %v5288_v36  ;;  %v4735_v42 = vsel %vm4674_vm2, %v4638_v20, %v15362_v0  ;;  %v1485_v56 = vld [vmem:[#allocation3 + $0x412] sm:$0xff]  ;;  %v675_v11 = vld [vmem:[#allocation3 + $0x1c8] sm:$0xff]  ;;  %v15374_v47 = vld [vmem:[#allocation107_spill] sm:$0xff] }
 0x5d9   : > { %v4355_v45 = vpop.permute.xlu0 %4354  ;;  %v4999_v41 = vsel %vm4965_vm6, %v4902_v38, %v15361_v33  ;;  %v3973_v12 = vpop.permute.xlu1 %3972  ;;  %v4832_v48 = vsel %vm4771_vm4, %v4735_v42, %v15364_v17  ;;  %v15366_v62 = vld [vmem:[#allocation49_spill] sm:$0xff]  ;;  %v15368_v58 = vld [vmem:[#allocation138_spill] sm:$0xff]  ;;  %v15370_v16 = vld [vmem:[#allocation228_spill] sm:$0xff] }
 0x5da   : > { %v5289_v39 = vsel %vm5256_vm9, %v5192_v14, %v4355_v45  ;;  %4384 = vrot.lane.b32.xlu0 %v1457_v50, %s9106_s27  ;;  %v5096_v44 = vsel %vm5062_vm7, %v4999_v41, %v15363_v28  ;;  %v4929_v24 = vsel %vm4868_vm5, %v4832_v48, %v15365_v63  ;;  %v4639_v54 = vsel %vm284_vm0, %v702_v46, %v15366_v62  ;;  %v15367_v7 = vld [vmem:[#allocation405_spill] sm:$0xff]  ;;  %v1458_v51 = vld [vmem:[#allocation3 + $0x2a2] sm:$0xff]  ;;  %v15372_v35 = vld [vmem:[#allocation18_spill] sm:$0xff] }
 0x5db   : > { %8884 = vmatprep.mubr.msk.f32.mxu0 %vm5358_vm10, %v5289_v39  ;;  %v5193_v52 = vsel %vm5159_vm8, %v5096_v44, %v3973_v12  ;;  %v5026_v2 = vsel %vm4965_vm6, %v4929_v24, %v15367_v7  ;;  %v1389_v3 = vld [vmem:[#allocation3 + $0x411] sm:$0xff]  ;;  %v4736_v57 = vsel %vm4674_vm2, %v4639_v54, %v15368_v58  ;;  %v4612_v25 = vsel %vm284_vm0, %v675_v11, %v15372_v35  ;;  %v1362_v21 = vld [vmem:[#allocation3 + $0x2a1] sm:$0xff]  ;;  %v1363_v38 = vld [vmem:[#allocation3 + $0x2a9] sm:$0xff] }
 0x5dc   : > { %4000 = vrot.lane.b32.xlu1 %v1361_v60, %s9105_s14  ;;  %v15369_v32 = vld [vmem:[#allocation497_spill] sm:$0xff]  ;;  %v4833_v40 = vsel %vm4771_vm4, %v4736_v57, %v15370_v16  ;;  %v15373_v23 = vld [vmem:[#allocation410_spill] sm:$0xff]  ;;  %v4709_v26 = vsel %vm4674_vm2, %v4612_v25, %v15374_v47  ;;  %v15377_v19 = vld [vmem:[#allocation288_spill] sm:$0xff] }
 0x5dd   : > { %v4357_v27 = vpop.permute.xlu0 %4356  ;;  %v5123_v9 = vsel %vm5062_vm7, %v5026_v2, %v15369_v32  ;;  %v4027_v5 = vpop.permute.xlu1 %4026  ;;  %v4930_v18 = vsel %vm4868_vm5, %v4833_v40, %v15371_v4  ;;  %v676_v50 = vld [vmem:[#allocation3 + $0x1d0] sm:$0xff]  ;;  %v15375_v8 = vld [vmem:[#allocation502_spill] sm:$0xff]  ;;  %v15378_v34 = vld [vmem:[#allocation23_spill] sm:$0xff] }
 0x5de   : > { %4438 = vrot.lane.b32.xlu0 %v1484_v6, %s9106_s27  ;;  %v5290_v55 = vsel %vm5256_vm9, %v5193_v52, %v4357_v27  ;;  %v5220_v61 = vsel %vm5159_vm8, %v5123_v9, %v4027_v5  ;;  %v5027_v22 = vsel %vm4965_vm6, %v4930_v18, %v15373_v23  ;;  %v15376_v45 = vld [vmem:[#allocation197_spill] sm:$0xff]  ;;  %v4613_v49 = vsel %vm284_vm0, %v676_v50, %v15378_v34  ;;  %v15379_v37 = vld [vmem:[#allocation379_spill] sm:$0xff]  ;;  %v703_v6 = vld [vmem:[#allocation3 + $0x318] sm:$0xff] }
 0x5df   : > { %8885 = vmatmul.mubr.msk.f32.gmra.mrb[32].mxu0 %vm5358_vm10, %v5290_v55  ;;  %v5124_v53 = vsel %vm5062_vm7, %v5027_v22, %v15375_v8  ;;  %v4806_v60 = vsel %vm4771_vm4, %v4709_v26, %v15376_v45  ;;  %v1459_v39 = vld [vmem:[#allocation3 + $0x2aa] sm:$0xff]  ;;  %v15381_v33 = vld [vmem:[#allocation471_spill] sm:$0xff]  ;;  %v15384_v17 = vld [vmem:[#allocation46_spill] sm:$0xff] }
 0x5e0   : > { %4054 = vrot.lane.b32.xlu1 %v1388_v29, %s9105_s14  ;;  %v4903_v15 = vsel %vm4868_vm5, %v4806_v60, %v15377_v19  ;;  %v15380_v59 = vld [vmem:[#allocation112_spill] sm:$0xff]  ;;  %v15382_v29 = vld [vmem:[#allocation202_spill] sm:$0xff]  ;;  %v15383_v42 = vld [vmem:[#allocation293_spill] sm:$0xff]  ;;  %v4640_v48 = vsel %vm284_vm0, %v703_v6, %v15384_v17 }
 0x5e1   : > { %v4411_v43 = vpop.permute.xlu0 %4410  ;;  %v4029_v14 = vpop.permute.xlu1 %4028  ;;  %v5000_v36 = vsel %vm4965_vm6, %v4903_v15, %v15379_v37  ;;  %v4710_v20 = vsel %vm4674_vm2, %v4613_v49, %v15380_v59  ;;  %v1486_v12 = vld [vmem:[#allocation3 + $0x422] sm:$0xff]  ;;  %v1487_v5 = vld [vmem:[#allocation3 + $0x42a] sm:$0xff]  ;;  %v15404_v17 = vld [vmem:[#allocation114_spill] sm:$0xff] }
 0x5e2   : > { %4440 = vrot.lane.b32.xlu0 %v1485_v56, %s9106_s27  ;;  %v5317_v31 = vsel %vm5256_vm9, %v5220_v61, %v4411_v43  ;;  %v5221_v30 = vsel %vm5159_vm8, %v5124_v53, %v4029_v14  ;;  %v5097_v41 = vsel %vm5062_vm7, %v5000_v36, %v15381_v33  ;;  %v4807_v46 = vsel %vm4771_vm4, %v4710_v20, %v15382_v29  ;;  %v15385_v52 = vld [vmem:[#allocation384_spill] sm:$0xff]  ;;  %v704_v56 = vld [vmem:[#allocation3 + $0x320] sm:$0xff]  ;;  %v15395_v26 = vld [vmem:[#allocation321_spill] sm:$0xff] }
 0x5e3   : > { %8926 = vmatprep.mubr.msk.f32.mxu1 %vm5358_vm10, %v5317_v31  ;;  %v4904_v28 = vsel %vm4868_vm5, %v4807_v46, %v15383_v42  ;;  %v1390_v55 = vld [vmem:[#allocation3 + $0x421] sm:$0xff]  ;;  %v1391_v31 = vld [vmem:[#allocation3 + $0x429] sm:$0xff]  ;;  %v15401_v20 = vld [vmem:[#allocation290_spill] sm:$0xff] }
 0x5e4   : > { %4056 = vrot.lane.b32.xlu1 %v1389_v3, %s9105_s14  ;;  %v5001_v63 = vsel %vm4965_vm6, %v4904_v28, %v15385_v52  ;;  %v15386_v62 = vld [vmem:[#allocation135_spill] sm:$0xff]  ;;  %v15387_v7 = vld [vmem:[#allocation476_spill] sm:$0xff]  ;;  %v15388_v3 = vld [vmem:[#allocation225_spill] sm:$0xff] }
 0x5e5   : > { %v4413_v1 = vpop.permute.xlu0 %4412  ;;  %v3975_v27 = vpop.permute.xlu1 %3974  ;;  %v4737_v54 = vsel %vm4674_vm2, %v4640_v48, %v15386_v62  ;;  %v5098_v2 = vsel %vm5062_vm7, %v5001_v63, %v15387_v7  ;;  %v15389_v57 = vld [vmem:[#allocation316_spill] sm:$0xff]  ;;  %v15390_v16 = vld [vmem:[#allocation51_spill] sm:$0xff]  ;;  %v15398_v34 = vld [vmem:[#allocation109_spill] sm:$0xff] }
 0x5e6   : > { %4386 = vrot.lane.b32.xlu0 %v1458_v51, %s9106_s27  ;;  %v5318_v13 = vsel %vm5256_vm9, %v5221_v30, %v4413_v1  ;;  %v5194_v0 = vsel %vm5159_vm8, %v5097_v41, %v3975_v27  ;;  %v4834_v11 = vsel %vm4771_vm4, %v4737_v54, %v15388_v3  ;;  %v4641_v40 = vsel %vm284_vm0, %v704_v56, %v15390_v16  ;;  %v15391_v61 = vld [vmem:[#allocation407_spill] sm:$0xff]  ;;  %v15392_v35 = vld [vmem:[#allocation140_spill] sm:$0xff]  ;;  %v15402_v29 = vld [vmem:[#allocation25_spill] sm:$0xff] }
 0x5e7   : > { %8927 = vmatmul.mubr.msk.f32.vlgmr.msra.gmra.mrb[0].mxu1 %vm5358_vm10, %v5318_v13  ;;  %v4931_v32 = vsel %vm4868_vm5, %v4834_v11, %v15389_v57  ;;  %v677_v51 = vld [vmem:[#allocation3 + $0x1e0] sm:$0xff]  ;;  %v4738_v25 = vsel %vm4674_vm2, %v4641_v40, %v15392_v35  ;;  %v15396_v45 = vld [vmem:[#allocation20_spill] sm:$0xff]  ;;  %v15405_v52 = vld [vmem:[#allocation473_spill] sm:$0xff] }
 0x5e8   : > { %4002 = vrot.lane.b32.xlu1 %v1362_v21, %s9105_s14  ;;  %v5028_v4 = vsel %vm4965_vm6, %v4931_v32, %v15391_v61  ;;  %v15393_v23 = vld [vmem:[#allocation499_spill] sm:$0xff]  ;;  %v15394_v21 = vld [vmem:[#allocation230_spill] sm:$0xff]  ;;  %v4614_v60 = vsel %vm284_vm0, %v677_v51, %v15396_v45  ;;  %v15397_v30 = vld [vmem:[#allocation412_spill] sm:$0xff] }
 0x5e9   : > { %v4359_v10 = vpop.permute.xlu0 %4358  ;;  %v3977_v43 = vpop.permute.xlu1 %3976  ;;  %v5125_v22 = vsel %vm5062_vm7, %v5028_v4, %v15393_v23  ;;  %v4835_v50 = vsel %vm4771_vm4, %v4738_v25, %v15394_v21  ;;  %v1460_v14 = vld [vmem:[#allocation3 + $0x2ba] sm:$0xff]  ;;  %v4711_v49 = vsel %vm4674_vm2, %v4614_v60, %v15398_v34  ;;  %v15399_v37 = vld [vmem:[#allocation504_spill] sm:$0xff]  ;;  %v15410_v16 = vld [vmem:[#allocation137_spill] sm:$0xff] }
 0x5ea   : > { %4388 = vrot.lane.b32.xlu0 %v1459_v39, %s9106_s27  ;;  %v5291_v44 = vsel %vm5256_vm9, %v5194_v0, %v4359_v10  ;;  %v5195_v58 = vsel %vm5159_vm8, %v5098_v2, %v3977_v43  ;;  %v4932_v8 = vsel %vm4868_vm5, %v4835_v50, %v15395_v26  ;;  %v1364_v13 = vld [vmem:[#allocation3 + $0x2b9] sm:$0xff]  ;;  %v678_v39 = vld [vmem:[#allocation3 + $0x1e8] sm:$0xff]  ;;  %v15403_v0 = vld [vmem:[#allocation381_spill] sm:$0xff] }
 0x5eb   : > { %8887 = vmatprep.mubr.msk.f32.mxu0 %vm5358_vm10, %v5291_v44  ;;  %v5029_v19 = vsel %vm4965_vm6, %v4932_v8, %v15397_v30  ;;  %v1461_v27 = vld [vmem:[#allocation3 + $0x2c2] sm:$0xff]  ;;  %v4615_v46 = vsel %vm284_vm0, %v678_v39, %v15402_v29  ;;  %v1488_v43 = vld [vmem:[#allocation3 + $0x43a] sm:$0xff]  ;;  %v15415_v50 = vld [vmem:[#allocation53_spill] sm:$0xff] }
 0x5ec   : > { %4004 = vrot.lane.b32.xlu1 %v1363_v38, %s9105_s14  ;;  %v5126_v36 = vsel %vm5062_vm7, %v5029_v19, %v15399_v37  ;;  %v15400_v38 = vld [vmem:[#allocation199_spill] sm:$0xff]  ;;  %v4712_v48 = vsel %vm4674_vm2, %v4615_v46, %v15404_v17  ;;  %v15408_v3 = vld [vmem:[#allocation48_spill] sm:$0xff]  ;;  %v15411_v61 = vld [vmem:[#allocation478_spill] sm:$0xff] }
 0x5ed   : > { %v4361_v24 = vpop.permute.xlu0 %4360  ;;  %v4031_v1 = vpop.permute.xlu1 %4030  ;;  %v4808_v6 = vsel %vm4771_vm4, %v4711_v49, %v15400_v38  ;;  %v1365_v44 = vld [vmem:[#allocation3 + $0x2c1] sm:$0xff]  ;;  %v15414_v23 = vld [vmem:[#allocation318_spill] sm:$0xff]  ;;  %v15416_v26 = vld [vmem:[#allocation409_spill] sm:$0xff] }
 0x5ee   : > { %4442 = vrot.lane.b32.xlu0 %v1486_v12, %s9106_s27  ;;  %v5292_v9 = vsel %vm5256_vm9, %v5195_v58, %v4361_v24  ;;  %v5222_v47 = vsel %vm5159_vm8, %v5125_v22, %v4031_v1  ;;  %v4905_v33 = vsel %vm4868_vm5, %v4808_v6, %v15401_v20  ;;  %v705_v12 = vld [vmem:[#allocation3 + $0x360] sm:$0xff]  ;;  %v15409_v58 = vld [vmem:[#allocation386_spill] sm:$0xff]  ;;  %v15418_v19 = vld [vmem:[#allocation501_spill] sm:$0xff] }
 0x5ef   : > { %8888 = vmatmul.mubr.msk.f32.gmra.mrb[34].mxu0 %vm5358_vm10, %v5292_v9  ;;  %v5002_v42 = vsel %vm4965_vm6, %v4905_v33, %v15403_v0  ;;  %v15407_v54 = vld [vmem:[#allocation295_spill] sm:$0xff]  ;;  %v4642_v11 = vsel %vm284_vm0, %v705_v12, %v15408_v3  ;;  %v679_v45 = vld [vmem:[#allocation3 + $0x1f8] sm:$0xff]  ;;  %v15419_v39 = vld [vmem:[#allocation232_spill] sm:$0xff] }
 0x5f0   : > { %4058 = vrot.lane.b32.xlu1 %v1390_v55, %s9105_s14  ;;  %v5099_v63 = vsel %vm5062_vm7, %v5002_v42, %v15405_v52  ;;  %v15406_v55 = vld [vmem:[#allocation204_spill] sm:$0xff]  ;;  %v1392_v9 = vld [vmem:[#allocation3 + $0x439] sm:$0xff]  ;;  %v4739_v40 = vsel %vm4674_vm2, %v4642_v11, %v15410_v16  ;;  %v15425_v12 = vld [vmem:[#allocation201_spill] sm:$0xff] }
 0x5f1   : > { %v4415_v18 = vpop.permute.xlu0 %4414  ;;  %v4033_v10 = vpop.permute.xlu1 %4032  ;;  %v4809_v56 = vsel %vm4771_vm4, %v4712_v48, %v15406_v55  ;;  %v15413_v51 = vld [vmem:[#allocation227_spill] sm:$0xff]  ;;  %v15417_v60 = vld [vmem:[#allocation142_spill] sm:$0xff]  ;;  %v15426_v52 = vld [vmem:[#allocation292_spill] sm:$0xff] }
 0x5f2   : > { %4444 = vrot.lane.b32.xlu0 %v1487_v5, %s9106_s27  ;;  %v5319_v53 = vsel %vm5256_vm9, %v5222_v47, %v4415_v18  ;;  %v5223_v59 = vsel %vm5159_vm8, %v5126_v36, %v4033_v10  ;;  %v4906_v7 = vsel %vm4868_vm5, %v4809_v56, %v15407_v54  ;;  %v706_v5 = vld [vmem:[#allocation3 + $0x368] sm:$0xff]  ;;  %v4836_v35 = vsel %vm4771_vm4, %v4739_v40, %v15413_v51  ;;  %v15420_v37 = vld [vmem:[#allocation323_spill] sm:$0xff]  ;;  %v1462_v38 = vld [vmem:[#allocation3 + $0x2d2] sm:$0xff] }
 0x5f3   : > { %8929 = vmatprep.mubr.msk.f32.mxu1 %vm5358_vm10, %v5319_v53  ;;  %v5003_v57 = vsel %vm4965_vm6, %v4906_v7, %v15409_v58  ;;  %v4933_v22 = vsel %vm4868_vm5, %v4836_v35, %v15414_v23  ;;  %v1489_v21 = vld [vmem:[#allocation3 + $0x442] sm:$0xff]  ;;  %v4643_v47 = vsel %vm284_vm0, %v706_v5, %v15415_v50  ;;  %v15421_v6 = vld [vmem:[#allocation22_spill] sm:$0xff] }
 0x5f4   : > { %4060 = vrot.lane.b32.xlu1 %v1391_v31, %s9105_s14  ;;  %v5100_v4 = vsel %vm5062_vm7, %v5003_v57, %v15411_v61  ;;  %v15412_v31 = vmov 0.0   ;;  %v5030_v8 = vsel %vm4965_vm6, %v4933_v22, %v15416_v26  ;;  %v4740_v30 = vsel %vm4674_vm2, %v4643_v47, %v15417_v60  ;;  %v15422_v20 = vld [vmem:[#allocation414_spill] sm:$0xff]  ;;  %v680_v29 = vld [vmem:[#allocation3 + $0x200] sm:$0xff]  ;;  %v15429_v11 = vld [vmem:[#allocation116_spill] sm:$0xff] }
 0x5f5   : > { %v4417_v15 = vpop.permute.xlu0 %4416  ;;  %v3979_v24 = vpop.permute.xlu1 %3978  ;;  %6861 = vst.msk [vmem:[#allocation4 + $0x18] sm:$0x3] %vm6858_vm11, %v15412_v31  ;;  %6859 = vst.msk [vmem:[#allocation4 + $0x8] sm:$0x3] %vm6858_vm11, %v15412_v31  ;;  %v4837_v34 = vsel %vm4771_vm4, %v4740_v30, %v15419_v39  ;;  %v15423_v46 = vld [vmem:[#allocation111_spill] sm:$0xff]  ;;  %v15424_v42 = vld [vmem:[#allocation506_spill] sm:$0xff] }
 0x5f6   : > { %4390 = vrot.lane.b32.xlu0 %v1460_v14, %s9106_s27  ;;  %v5320_v41 = vsel %vm5256_vm9, %v5223_v59, %v4417_v15  ;;  %v5196_v62 = vsel %vm5159_vm8, %v5099_v63, %v3979_v24  ;;  %6863 = vst.msk [vmem:[#allocation4 + $0x28] sm:$0x3] %vm6858_vm11, %v15412_v31  ;;  %6865 = vst.msk [vmem:[#allocation4 + $0x38] sm:$0x3] %vm6858_vm11, %v15412_v31  ;;  %v1393_v14 = vld [vmem:[#allocation3 + $0x441] sm:$0xff]  ;;  %v5127_v15 = vsel %vm5062_vm7, %v5030_v8, %v15418_v19  ;;  %v707_v3 = vld [vmem:[#allocation3 + $0x378] sm:$0xff] }
 0x5f7   : > { %8930 = vmatmul.mubr.msk.f32.gmra.mrb[2].mxu1 %vm5358_vm10, %v5320_v41  ;;  %6867 = vst.msk [vmem:[#allocation4 + $0x48] sm:$0x3] %vm6858_vm11, %v15412_v31  ;;  %6869 = vst.msk [vmem:[#allocation4 + $0x58] sm:$0x3] %vm6858_vm11, %v15412_v31  ;;  %v4934_v36 = vsel %vm4868_vm5, %v4837_v34, %v15420_v37  ;;  %v4616_v59 = vsel %vm284_vm0, %v679_v45, %v15421_v6  ;;  %v1463_v55 = vld [vmem:[#allocation3 + $0x2da] sm:$0xff]  ;;  %v15432_v61 = vld [vmem:[#allocation297_spill] sm:$0xff] }
 0x5f8   : > { %4006 = vrot.lane.b32.xlu1 %v1364_v13, %s9105_s14  ;;  %6871 = vst.msk [vmem:[#allocation4 + $0x68] sm:$0x3] %vm6858_vm11, %v15412_v31  ;;  %6873 = vst.msk [vmem:[#allocation4 + $0x78] sm:$0x3] %vm6858_vm11, %v15412_v31  ;;  %v5031_v33 = vsel %vm4965_vm6, %v4934_v36, %v15422_v20  ;;  %v4713_v0 = vsel %vm4674_vm2, %v4616_v59, %v15423_v46  ;;  %v15427_v56 = vld [vmem:[#allocation27_spill] sm:$0xff]  ;;  %v15431_v5 = vld [vmem:[#allocation206_spill] sm:$0xff] }
 0x5f9   : > { %v4363_v28 = vpop.permute.xlu0 %4362  ;;  %6875 = vst.msk [vmem:[#allocation4 + $0x88] sm:$0x3] %vm6858_vm11, %v15412_v31  ;;  %6877 = vst.msk [vmem:[#allocation4 + $0x98] sm:$0x3] %vm6858_vm11, %v15412_v31  ;;  %v4810_v17 = vsel %vm4771_vm4, %v4713_v0, %v15425_v12  ;;  %v15428_v54 = vld [vmem:[#allocation383_spill] sm:$0xff]  ;;  %v15433_v51 = vld [vmem:[#allocation50_spill] sm:$0xff] }
 0x5fa   : > { %4392 = vrot.lane.b32.xlu0 %v1461_v27, %s9106_s27  ;;  %v5293_v2 = vsel %vm5256_vm9, %v5196_v62, %v4363_v28  ;;  %v3981_v18 = vpop.permute.xlu1 %3980  ;;  %6879 = vst.msk [vmem:[#allocation4 + $0xa8] sm:$0x3] %vm6858_vm11, %v15412_v31  ;;  %6881 = vst.msk [vmem:[#allocation4 + $0xb8] sm:$0x3] %vm6858_vm11, %v15412_v31  ;;  %v1366_v27 = vld [vmem:[#allocation3 + $0x2d1] sm:$0xff]  ;;  %v5128_v28 = vsel %vm5062_vm7, %v5031_v33, %v15424_v42  ;;  %v4907_v63 = vsel %vm4868_vm5, %v4810_v17, %v15426_v52  ;;  %v15430_v57 = vld [vmem:[#allocation475_spill] sm:$0xff] }
 0x5fb   : > { %8890 = vmatprep.mubr.msk.f32.mxu0 %vm5358_vm10, %v5293_v2  ;;  %6883 = vst.msk [vmem:[#allocation4 + $0xc8] sm:$0x3] %vm6858_vm11, %v15412_v31  ;;  %6885 = vst.msk [vmem:[#allocation4 + $0xd8] sm:$0x3] %vm6858_vm11, %v15412_v31  ;;  %v5197_v25 = vsel %vm5159_vm8, %v5100_v4, %v3981_v18  ;;  %v4617_v62 = vsel %vm284_vm0, %v680_v29, %v15427_v56  ;;  %v5004_v7 = vsel %vm4965_vm6, %v4907_v63, %v15428_v54  ;;  %v15435_v50 = vld [vmem:[#allocation139_spill] sm:$0xff]  ;;  %v15436_v26 = vld [vmem:[#allocation480_spill] sm:$0xff] }
 0x5fc   : > { %4008 = vrot.lane.b32.xlu1 %v1365_v44, %s9105_s14  ;;  %6887 = vst.msk [vmem:[#allocation4 + $0xe8] sm:$0x3] %vm6858_vm11, %v15412_v31  ;;  %6889 = vst.msk [vmem:[#allocation4 + $0xf8] sm:$0x3] %vm6858_vm11, %v15412_v31  ;;  %v4714_v58 = vsel %vm4674_vm2, %v4617_v62, %v15429_v11  ;;  %v4644_v35 = vsel %vm284_vm0, %v707_v3, %v15433_v51  ;;  %v15438_v30 = vld [vmem:[#allocation320_spill] sm:$0xff]  ;;  %v15439_v39 = vld [vmem:[#allocation55_spill] sm:$0xff] }
 0x5fd   : > { %v4365_v32 = vpop.permute.xlu0 %4364  ;;  %6891 = vst.msk [vmem:[#allocation4 + $0x108] sm:$0x3] %vm6858_vm11, %v15412_v31  ;;  %6893 = vst.msk [vmem:[#allocation4 + $0x118] sm:$0x3] %vm6858_vm11, %v15412_v31  ;;  %v4811_v16 = vsel %vm4771_vm4, %v4714_v58, %v15431_v5  ;;  %v4741_v47 = vsel %vm4674_vm2, %v4644_v35, %v15435_v50  ;;  %v15441_v6 = vld [vmem:[#allocation144_spill] sm:$0xff]  ;;  %v15442_v20 = vld [vmem:[#allocation503_spill] sm:$0xff] }
 0x5fe   : > { %6895 = vst.msk [vmem:[#allocation4 + $0x128] sm:$0x3] %vm6858_vm11, %v15412_v31  ;;  %6897 = vst.msk [vmem:[#allocation4 + $0x138] sm:$0x3] %vm6858_vm11, %v15412_v31  ;;  %4446 = vrot.lane.b32.xlu0 %v1488_v43, %s9106_s27  ;;  %v5294_v1 = vsel %vm5256_vm9, %v5197_v25, %v4365_v32  ;;  %v4035_v13 = vpop.permute.xlu1 %4034  ;;  %v1367_v43 = vld [vmem:[#allocation3 + $0x2d9] sm:$0xff]  ;;  %v5101_v32 = vsel %vm5062_vm7, %v5004_v7, %v15430_v57  ;;  %v4908_v4 = vsel %vm4868_vm5, %v4811_v16, %v15432_v61  ;;  %v15434_v25 = vld [vmem:[#allocation388_spill] sm:$0xff] }
 0x5ff   : > { %6899 = vst.msk [vmem:[#allocation4 + $0x148] sm:$0x3] %vm6858_vm11, %v15412_v31  ;;  %6901 = vst.msk [vmem:[#allocation4 + $0x158] sm:$0x3] %vm6858_vm11, %v15412_v31  ;;  %8891 = vmatmul.mubr.msk.f32.gmra.mrb[36].mxu0 %vm5358_vm10, %v5294_v1  ;;  %v5224_v49 = vsel %vm5159_vm8, %v5127_v15, %v4035_v13  ;;  %v5005_v23 = vsel %vm4965_vm6, %v4908_v4, %v15434_v25  ;;  %v1394_v1 = vld [vmem:[#allocation3 + $0x451] sm:$0xff]  ;;  %v1491_v13 = vld [vmem:[#allocation3 + $0x45a] sm:$0xff] }
 0x600   : > { %6903 = vst.msk [vmem:[#allocation4 + $0x168] sm:$0x3] %vm6858_vm11, %v15412_v31  ;;  %6905 = vst.msk [vmem:[#allocation4 + $0x178] sm:$0x3] %vm6858_vm11, %v15412_v31  ;;  %4062 = vrot.lane.b32.xlu1 %v1392_v9, %s9105_s14  ;;  %v5102_v8 = vsel %vm5062_vm7, %v5005_v23, %v15436_v26  ;;  %v15444_v0 = vld [vmem:[#allocation325_spill] sm:$0xff]  ;;  %v15445_v12 = vld [vmem:[#allocation24_spill] sm:$0xff] }
 0x601   : > { %6907 = vst.msk [vmem:[#allocation4 + $0x188] sm:$0x3] %vm6858_vm11, %v15412_v31  ;;  %6909 = vst.msk [vmem:[#allocation4 + $0x198] sm:$0x3] %vm6858_vm11, %v15412_v31  ;;  %v4419_v53 = vpop.permute.xlu0 %4418  ;;  %v15447_v56 = vld [vmem:[#allocation113_spill] sm:$0xff]  ;;  %v15448_v54 = vld [vmem:[#allocation508_spill] sm:$0xff] }
 0x602   : > { %6911 = vst.msk [vmem:[#allocation4 + $0x1a8] sm:$0x3] %vm6858_vm11, %v15412_v31  ;;  %6913 = vst.msk [vmem:[#allocation4 + $0x1b8] sm:$0x3] %vm6858_vm11, %v15412_v31  ;;  %4448 = vrot.lane.b32.xlu0 %v1489_v21, %s9106_s27  ;;  %v5321_v10 = vsel %vm5256_vm9, %v5224_v49, %v4419_v53  ;;  %v4037_v44 = vpop.permute.xlu1 %4036  ;;  %v708_v21 = vld [vmem:[#allocation3 + $0x380] sm:$0xff]  ;;  %v15450_v58 = vld [vmem:[#allocation294_spill] sm:$0xff] }
 0x603   : > { %6915 = vst.msk [vmem:[#allocation4 + $0x1c8] sm:$0x3] %vm6858_vm11, %v15412_v31  ;;  %6917 = vst.msk [vmem:[#allocation4 + $0x1d8] sm:$0x3] %vm6858_vm11, %v15412_v31  ;;  %8932 = vmatprep.mubr.msk.f32.mxu1 %vm5358_vm10, %v5321_v10  ;;  %v5225_v48 = vsel %vm5159_vm8, %v5128_v28, %v4037_v44  ;;  %v1490_v31 = vld [vmem:[#allocation3 + $0x452] sm:$0xff]  ;;  %v4645_v34 = vsel %vm284_vm0, %v708_v21, %v15439_v39  ;;  %v15440_v49 = vld [vmem:[#allocation411_spill] sm:$0xff] }
 0x604   : > { %4064 = vrot.lane.b32.xlu1 %v1393_v14, %s9105_s14  ;;  %v15437_v14 = vld [vmem:[#allocation229_spill] sm:$0xff]  ;;  %v1395_v10 = vld [vmem:[#allocation3 + $0x459] sm:$0xff]  ;;  %v4742_v59 = vsel %vm4674_vm2, %v4645_v34, %v15441_v6 }
 0x605   : > { %v4421_v41 = vpop.permute.xlu0 %4420  ;;  %v4838_v45 = vsel %vm4771_vm4, %v4741_v47, %v15437_v14  ;;  %v1464_v44 = vld [vmem:[#allocation3 + $0x2ea] sm:$0xff]  ;;  %v15453_v51 = vld [vmem:[#allocation118_spill] sm:$0xff]  ;;  %v15456_v47 = vld [vmem:[#allocation299_spill] sm:$0xff] }
 0x606   : > { %4394 = vrot.lane.b32.xlu0 %v1462_v38, %s9106_s27  ;;  %v5322_v24 = vsel %vm5256_vm9, %v5225_v48, %v4421_v41  ;;  %v3983_v9 = vpop.permute.xlu1 %3982  ;;  %v4935_v19 = vsel %vm4868_vm5, %v4838_v45, %v15438_v30  ;;  %v681_v38 = vld [vmem:[#allocation3 + $0x210] sm:$0xff]  ;;  %v15446_v48 = vld [vmem:[#allocation416_spill] sm:$0xff] }
 0x607   : > { %8933 = vmatmul.mubr.msk.f32.gmra.mrb[4].mxu1 %vm5358_vm10, %v5322_v24  ;;  %v5198_v40 = vsel %vm5159_vm8, %v5101_v32, %v3983_v9  ;;  %v5032_v37 = vsel %vm4965_vm6, %v4935_v19, %v15440_v49  ;;  %v4618_v17 = vsel %vm284_vm0, %v681_v38, %v15445_v12  ;;  %v1368_v24 = vld [vmem:[#allocation3 + $0x2e9] sm:$0xff]  ;;  %v1465_v9 = vld [vmem:[#allocation3 + $0x2f2] sm:$0xff] }
 0x608   : > { %4010 = vrot.lane.b32.xlu1 %v1366_v27, %s9105_s14  ;;  %v5129_v33 = vsel %vm5062_vm7, %v5032_v37, %v15442_v20  ;;  %v15443_v27 = vld [vmem:[#allocation234_spill] sm:$0xff]  ;;  %v4715_v62 = vsel %vm4674_vm2, %v4618_v17, %v15447_v56  ;;  %v15451_v5 = vld [vmem:[#allocation29_spill] sm:$0xff]  ;;  %v15457_v14 = vld [vmem:[#allocation52_spill] sm:$0xff] }
 0x609   : > { %v4367_v2 = vpop.permute.xlu0 %4366  ;;  %v4839_v29 = vsel %vm4771_vm4, %v4742_v59, %v15443_v27  ;;  %v15454_v25 = vld [vmem:[#allocation477_spill] sm:$0xff]  ;;  %v15460_v49 = vld [vmem:[#allocation482_spill] sm:$0xff] }
 0x60a   : > { %4396 = vrot.lane.b32.xlu0 %v1463_v55, %s9106_s27  ;;  %v5295_v18 = vsel %vm5256_vm9, %v5198_v40, %v4367_v2  ;;  %v3985_v53 = vpop.permute.xlu1 %3984  ;;  %v4936_v42 = vsel %vm4868_vm5, %v4839_v29, %v15444_v0  ;;  %v682_v55 = vld [vmem:[#allocation3 + $0x218] sm:$0xff]  ;;  %v15452_v40 = vld [vmem:[#allocation385_spill] sm:$0xff] }
 0x60b   : > { %8893 = vmatprep.mubr.msk.f32.mxu0 %vm5358_vm10, %v5295_v18  ;;  %v5199_v60 = vsel %vm5159_vm8, %v5102_v8, %v3985_v53  ;;  %v5033_v52 = vsel %vm4965_vm6, %v4936_v42, %v15446_v48  ;;  %v4619_v16 = vsel %vm284_vm0, %v682_v55, %v15451_v5  ;;  %v1369_v18 = vld [vmem:[#allocation3 + $0x2f1] sm:$0xff]  ;;  %v15471_v5 = vld [vmem:[#allocation115_spill] sm:$0xff] }
 0x60c   : > { %4012 = vrot.lane.b32.xlu1 %v1367_v43, %s9105_s14  ;;  %v5130_v7 = vsel %vm5062_vm7, %v5033_v52, %v15448_v54  ;;  %v15449_v43 = vld [vmem:[#allocation203_spill] sm:$0xff]  ;;  %v4716_v35 = vsel %vm4674_vm2, %v4619_v16, %v15453_v51  ;;  %v1492_v53 = vld [vmem:[#allocation3 + $0x46a] sm:$0xff]  ;;  %v15462_v59 = vld [vmem:[#allocation322_spill] sm:$0xff] }
 0x60d   : > { %v4369_v22 = vpop.permute.xlu0 %4368  ;;  %v4812_v3 = vsel %vm4771_vm4, %v4715_v62, %v15449_v43  ;;  %v15459_v39 = vld [vmem:[#allocation141_spill] sm:$0xff]  ;;  %v15465_v12 = vld [vmem:[#allocation146_spill] sm:$0xff]  ;;  %v15468_v62 = vld [vmem:[#allocation327_spill] sm:$0xff] }
 0x60e   : > { %4450 = vrot.lane.b32.xlu0 %v1490_v31, %s9106_s27  ;;  %v5296_v15 = vsel %vm5256_vm9, %v5199_v60, %v4369_v22  ;;  %v4039_v41 = vpop.permute.xlu1 %4038  ;;  %v4909_v57 = vsel %vm4868_vm5, %v4812_v3, %v15450_v58  ;;  %v709_v31 = vld [vmem:[#allocation3 + $0x390] sm:$0xff]  ;;  %v15458_v60 = vld [vmem:[#allocation390_spill] sm:$0xff] }
 0x60f   : > { %8894 = vmatmul.mubr.msk.f32.gmra.mrb[38].mxu0 %vm5358_vm10, %v5296_v15  ;;  %v5226_v46 = vsel %vm5159_vm8, %v5129_v33, %v4039_v41  ;;  %v5006_v61 = vsel %vm4965_vm6, %v4909_v57, %v15452_v40  ;;  %v4646_v45 = vsel %vm284_vm0, %v709_v31, %v15457_v14  ;;  %v1396_v15 = vld [vmem:[#allocation3 + $0x469] sm:$0xff]  ;;  %v1493_v41 = vld [vmem:[#allocation3 + $0x472] sm:$0xff] }
 0x610   : > { %4066 = vrot.lane.b32.xlu1 %v1394_v1, %s9105_s14  ;;  %v5103_v23 = vsel %vm5062_vm7, %v5006_v61, %v15454_v25  ;;  %v15455_v1 = vld [vmem:[#allocation208_spill] sm:$0xff]  ;;  %v4743_v34 = vsel %vm4674_vm2, %v4646_v45, %v15459_v39  ;;  %v15463_v27 = vld [vmem:[#allocation57_spill] sm:$0xff]  ;;  %v15469_v43 = vld [vmem:[#allocation26_spill] sm:$0xff] }
 0x611   : > { %v4423_v36 = vpop.permute.xlu0 %4422  ;;  %v4813_v21 = vsel %vm4771_vm4, %v4716_v35, %v15455_v1  ;;  %v15466_v48 = vld [vmem:[#allocation505_spill] sm:$0xff]  ;;  %v15472_v40 = vld [vmem:[#allocation510_spill] sm:$0xff]  ;;  %v15474_v35 = vld [vmem:[#allocation296_spill] sm:$0xff] }
 0x612   : > { %4452 = vrot.lane.b32.xlu0 %v1491_v13, %s9106_s27  ;;  %v5323_v28 = vsel %vm5256_vm9, %v5226_v46, %v4423_v36  ;;  %v4041_v2 = vpop.permute.xlu1 %4040  ;;  %v4910_v26 = vsel %vm4868_vm5, %v4813_v21, %v15456_v47  ;;  %v710_v13 = vld [vmem:[#allocation3 + $0x398] sm:$0xff]  ;;  %v15464_v46 = vld [vmem:[#allocation413_spill] sm:$0xff]  ;;  %v15475_v1 = vld [vmem:[#allocation31_spill] sm:$0xff] }
 0x613   : > { %8935 = vmatprep.mubr.msk.f32.mxu1 %vm5358_vm10, %v5323_v28  ;;  %v5227_v11 = vsel %vm5159_vm8, %v5130_v7, %v4041_v2  ;;  %v5007_v30 = vsel %vm4965_vm6, %v4910_v26, %v15458_v60  ;;  %v4647_v29 = vsel %vm284_vm0, %v710_v13, %v15463_v27  ;;  %v1397_v28 = vld [vmem:[#allocation3 + $0x471] sm:$0xff]  ;;  %v1466_v2 = vld [vmem:[#allocation3 + $0x302] sm:$0xff] }
 0x614   : > { %4068 = vrot.lane.b32.xlu1 %v1395_v10, %s9105_s14  ;;  %v5104_v37 = vsel %vm5062_vm7, %v5007_v30, %v15460_v49  ;;  %v15461_v10 = vld [vmem:[#allocation231_spill] sm:$0xff]  ;;  %v4744_v17 = vsel %vm4674_vm2, %v4647_v29, %v15465_v12  ;;  %v15477_v14 = vld [vmem:[#allocation120_spill] sm:$0xff] }
 0x615   : > { %v4425_v63 = vpop.permute.xlu0 %4424  ;;  %v4840_v38 = vsel %vm4771_vm4, %v4743_v34, %v15461_v10  ;;  %v15478_v60 = vld [vmem:[#allocation479_spill] sm:$0xff]  ;;  %v15480_v34 = vld [vmem:[#allocation301_spill] sm:$0xff]  ;;  %v15481_v10 = vld [vmem:[#allocation54_spill] sm:$0xff] }
 0x616   : > { %4398 = vrot.lane.b32.xlu0 %v1464_v44, %s9106_s27  ;;  %v5324_v32 = vsel %vm5256_vm9, %v5227_v11, %v4425_v63  ;;  %v3987_v22 = vpop.permute.xlu1 %3986  ;;  %v4937_v20 = vsel %vm4868_vm5, %v4840_v38, %v15462_v59  ;;  %v683_v44 = vld [vmem:[#allocation3 + $0x228] sm:$0xff]  ;;  %v15470_v11 = vld [vmem:[#allocation418_spill] sm:$0xff]  ;;  %v15483_v27 = vld [vmem:[#allocation143_spill] sm:$0xff] }
 0x617   : > { %8936 = vmatmul.mubr.msk.f32.gmra.mrb[6].mxu1 %vm5358_vm10, %v5324_v32  ;;  %v5200_v50 = vsel %vm5159_vm8, %v5103_v23, %v3987_v22  ;;  %v5034_v0 = vsel %vm4965_vm6, %v4937_v20, %v15464_v46  ;;  %v4620_v3 = vsel %vm284_vm0, %v683_v44, %v15469_v43  ;;  %v1370_v32 = vld [vmem:[#allocation3 + $0x301] sm:$0xff]  ;;  %v1467_v22 = vld [vmem:[#allocation3 + $0x30a] sm:$0xff] }
 0x618   : > { %4014 = vrot.lane.b32.xlu1 %v1368_v24, %s9105_s14  ;;  %v5131_v52 = vsel %vm5062_vm7, %v5034_v0, %v15466_v48  ;;  %v15467_v24 = vld [vmem:[#allocation236_spill] sm:$0xff]  ;;  %v4717_v16 = vsel %vm4674_vm2, %v4620_v3, %v15471_v5 }
 0x619   : > { %v4371_v4 = vpop.permute.xlu0 %4370  ;;  %v4841_v55 = vsel %vm4771_vm4, %v4744_v17, %v15467_v24  ;;  %v15484_v46 = vld [vmem:[#allocation484_spill] sm:$0xff]  ;;  %v15487_v24 = vld [vmem:[#allocation59_spill] sm:$0xff] }
 0x61a   : > { %4400 = vrot.lane.b32.xlu0 %v1465_v9, %s9106_s27  ;;  %v5297_v8 = vsel %vm5256_vm9, %v5200_v50, %v4371_v4  ;;  %v3989_v36 = vpop.permute.xlu1 %3988  ;;  %v4938_v54 = vsel %vm4868_vm5, %v4841_v55, %v15468_v62  ;;  %v684_v9 = vld [vmem:[#allocation3 + $0x230] sm:$0xff]  ;;  %v15476_v50 = vld [vmem:[#allocation387_spill] sm:$0xff]  ;;  %v15486_v17 = vld [vmem:[#allocation324_spill] sm:$0xff] }
 0x61b   : > { %8896 = vmatprep.mubr.msk.f32.mxu0 %vm5358_vm10, %v5297_v8  ;;  %v5201_v6 = vsel %vm5159_vm8, %v5104_v37, %v3989_v36  ;;  %v5035_v58 = vsel %vm4965_vm6, %v4938_v54, %v15470_v11  ;;  %v4621_v21 = vsel %vm284_vm0, %v684_v9, %v15475_v1  ;;  %v1371_v8 = vld [vmem:[#allocation3 + $0x309] sm:$0xff]  ;;  %v15490_v11 = vld [vmem:[#allocation507_spill] sm:$0xff] }
 0x61c   : > { %4016 = vrot.lane.b32.xlu1 %v1369_v18, %s9105_s14  ;;  %v5132_v61 = vsel %vm5062_vm7, %v5035_v58, %v15472_v40  ;;  %v15473_v18 = vld [vmem:[#allocation205_spill] sm:$0xff]  ;;  %v4718_v45 = vsel %vm4674_vm2, %v4621_v21, %v15477_v14  ;;  %v1494_v36 = vld [vmem:[#allocation3 + $0x482] sm:$0xff] }
 0x61d   : > { %v4373_v19 = vpop.permute.xlu0 %4372  ;;  %v4814_v31 = vsel %vm4771_vm4, %v4717_v16, %v15473_v18  ;;  %v15489_v43 = vld [vmem:[#allocation148_spill] sm:$0xff]  ;;  %v15492_v16 = vld [vmem:[#allocation329_spill] sm:$0xff] }
 0x61e   : > { %4454 = vrot.lane.b32.xlu0 %v1492_v53, %s9106_s27  ;;  %v5298_v33 = vsel %vm5256_vm9, %v5201_v6, %v4373_v19  ;;  %v4043_v63 = vpop.permute.xlu1 %4042  ;;  %v4911_v25 = vsel %vm4868_vm5, %v4814_v31, %v15474_v35  ;;  %v711_v53 = vld [vmem:[#allocation3 + $0x3a8] sm:$0xff]  ;;  %v15495_v1 = vld [vmem:[#allocation117_spill] sm:$0xff] }
 0x61f   : > { %8897 = vmatmul.mubr.msk.f32.gmra.mrb[40].mxu0 %vm5358_vm10, %v5298_v33  ;;  %v5228_v56 = vsel %vm5159_vm8, %v5131_v52, %v4043_v63  ;;  %v5008_v47 = vsel %vm4965_vm6, %v4911_v25, %v15476_v50  ;;  %v4648_v38 = vsel %vm284_vm0, %v711_v53, %v15481_v10  ;;  %v15482_v6 = vld [vmem:[#allocation392_spill] sm:$0xff]  ;;  %v15501_v10 = vld [vmem:[#allocation122_spill] sm:$0xff] }
 0x620   : > { %4070 = vrot.lane.b32.xlu1 %v1396_v15, %s9105_s14  ;;  %v5105_v30 = vsel %vm5062_vm7, %v5008_v47, %v15478_v60  ;;  %v15479_v15 = vld [vmem:[#allocation210_spill] sm:$0xff]  ;;  %v1398_v33 = vld [vmem:[#allocation3 + $0x481] sm:$0xff]  ;;  %v4745_v29 = vsel %vm4674_vm2, %v4648_v38, %v15483_v27  ;;  %v1495_v63 = vld [vmem:[#allocation3 + $0x48a] sm:$0xff] }
 0x621   : > { %v4427_v42 = vpop.permute.xlu0 %4426  ;;  %v4815_v13 = vsel %vm4771_vm4, %v4718_v45, %v15479_v15  ;;  %v15493_v18 = vld [vmem:[#allocation28_spill] sm:$0xff]  ;;  %v15498_v45 = vld [vmem:[#allocation298_spill] sm:$0xff]  ;;  %v15499_v15 = vld [vmem:[#allocation33_spill] sm:$0xff] }
 0x622   : > { %4456 = vrot.lane.b32.xlu0 %v1493_v41, %s9106_s27  ;;  %v5325_v7 = vsel %vm5256_vm9, %v5228_v56, %v4427_v42  ;;  %v4045_v4 = vpop.permute.xlu1 %4044  ;;  %v4912_v49 = vsel %vm4868_vm5, %v4815_v13, %v15480_v34  ;;  %v712_v41 = vld [vmem:[#allocation3 + $0x3b0] sm:$0xff]  ;;  %v15488_v56 = vld [vmem:[#allocation415_spill] sm:$0xff]  ;;  %v15496_v50 = vld [vmem:[#allocation512_spill] sm:$0xff] }
 0x623   : > { %8938 = vmatprep.mubr.msk.f32.mxu1 %vm5358_vm10, %v5325_v7  ;;  %v5229_v51 = vsel %vm5159_vm8, %v5132_v61, %v4045_v4  ;;  %v5009_v59 = vsel %vm4965_vm6, %v4912_v49, %v15482_v6  ;;  %v4649_v55 = vsel %vm284_vm0, %v712_v41, %v15487_v24  ;;  %v1399_v7 = vld [vmem:[#allocation3 + $0x489] sm:$0xff]  ;;  %v1468_v4 = vld [vmem:[#allocation3 + $0x31a] sm:$0xff] }
 0x624   : > { %4072 = vrot.lane.b32.xlu1 %v1397_v28, %s9105_s14  ;;  %v5106_v0 = vsel %vm5062_vm7, %v5009_v59, %v15484_v46  ;;  %v15485_v28 = vld [vmem:[#allocation233_spill] sm:$0xff]  ;;  %v4746_v3 = vsel %vm4674_vm2, %v4649_v55, %v15489_v43 }
 0x625   : > { %v4429_v57 = vpop.permute.xlu0 %4428  ;;  %v4842_v44 = vsel %vm4771_vm4, %v4745_v29, %v15485_v28  ;;  %v15502_v6 = vld [vmem:[#allocation481_spill] sm:$0xff]  ;;  %v15504_v29 = vld [vmem:[#allocation303_spill] sm:$0xff]  ;;  %v15505_v28 = vld [vmem:[#allocation56_spill] sm:$0xff] }
 0x626   : > { %4402 = vrot.lane.b32.xlu0 %v1466_v2, %s9106_s27  ;;  %v5326_v23 = vsel %vm5256_vm9, %v5229_v51, %v4429_v57  ;;  %v3991_v19 = vpop.permute.xlu1 %3990  ;;  %v4939_v48 = vsel %vm4868_vm5, %v4842_v44, %v15486_v17  ;;  %v685_v2 = vld [vmem:[#allocation3 + $0x240] sm:$0xff]  ;;  %v15494_v51 = vld [vmem:[#allocation420_spill] sm:$0xff]  ;;  %v15507_v24 = vld [vmem:[#allocation145_spill] sm:$0xff] }
 0x627   : > { %8939 = vmatmul.mubr.msk.f32.gmra.mrb[8].mxu1 %vm5358_vm10, %v5326_v23  ;;  %v5202_v39 = vsel %vm5159_vm8, %v5105_v30, %v3991_v19  ;;  %v5036_v62 = vsel %vm4965_vm6, %v4939_v48, %v15488_v56  ;;  %v4622_v31 = vsel %vm284_vm0, %v685_v2, %v15493_v18  ;;  %v1372_v23 = vld [vmem:[#allocation3 + $0x319] sm:$0xff]  ;;  %v1469_v19 = vld [vmem:[#allocation3 + $0x322] sm:$0xff] }
 0x628   : > { %4018 = vrot.lane.b32.xlu1 %v1370_v32, %s9105_s14  ;;  %v5133_v58 = vsel %vm5062_vm7, %v5036_v62, %v15490_v11  ;;  %v15491_v32 = vld [vmem:[#allocation238_spill] sm:$0xff]  ;;  %v4719_v21 = vsel %vm4674_vm2, %v4622_v31, %v15495_v1 }
 0x629   : > { %v4375_v26 = vpop.permute.xlu0 %4374  ;;  %v4843_v9 = vsel %vm4771_vm4, %v4746_v3, %v15491_v32  ;;  %v15508_v56 = vld [vmem:[#allocation486_spill] sm:$0xff]  ;;  %v15511_v32 = vld [vmem:[#allocation61_spill] sm:$0xff] }
 0x62a   : > { %4404 = vrot.lane.b32.xlu0 %v1467_v22, %s9106_s27  ;;  %v5299_v37 = vsel %vm5256_vm9, %v5202_v39, %v4375_v26  ;;  %v4940_v40 = vsel %vm4868_vm5, %v4843_v9, %v15492_v16  ;;  %v686_v22 = vld [vmem:[#allocation3 + $0x248] sm:$0xff]  ;;  %v15500_v39 = vld [vmem:[#allocation389_spill] sm:$0xff]  ;;  %v15510_v3 = vld [vmem:[#allocation326_spill] sm:$0xff] }
 0x62b   : > { %8899 = vmatprep.mubr.msk.f32.mxu0 %vm5358_vm10, %v5299_v37  ;;  %v3993_v42 = vpop.permute.xlu1 %3992  ;;  %v5037_v35 = vsel %vm4965_vm6, %v4940_v40, %v15494_v51  ;;  %v4623_v13 = vsel %vm284_vm0, %v686_v22, %v15499_v15  ;;  %v1373_v37 = vld [vmem:[#allocation3 + $0x321] sm:$0xff]  ;;  %v15513_v18 = vld [vmem:[#allocation150_spill] sm:$0xff]  ;;  %v15514_v51 = vld [vmem:[#allocation509_spill] sm:$0xff] }
 0x62c   : > { %4020 = vrot.lane.b32.xlu1 %v1371_v8, %s9105_s14  ;;  %v5203_v12 = vsel %vm5159_vm8, %v5106_v0, %v3993_v42  ;;  %v5134_v47 = vsel %vm5062_vm7, %v5037_v35, %v15496_v50  ;;  %v15497_v8 = vld [vmem:[#allocation207_spill] sm:$0xff]  ;;  %v4720_v38 = vsel %vm4674_vm2, %v4623_v13, %v15501_v10 }
 0x62d   : > { %v4377_v20 = vpop.permute.xlu0 %4376  ;;  %v4816_v53 = vsel %vm4771_vm4, %v4719_v21, %v15497_v8  ;;  %v1496_v42 = vld [vmem:[#allocation3 + $0x49a] sm:$0xff] }
 0x62e   : > { %4458 = vrot.lane.b32.xlu0 %v1494_v36, %s9106_s27  ;;  %v5300_v52 = vsel %vm5256_vm9, %v5203_v12, %v4377_v20  ;;  %v4913_v60 = vsel %vm4868_vm5, %v4816_v53, %v15498_v45  ;;  %v713_v36 = vld [vmem:[#allocation3 + $0x3c0] sm:$0xff]  ;;  %v15506_v12 = vld [vmem:[#allocation394_spill] sm:$0xff] }
 0x62f   : > { %8900 = vmatmul.mubr.msk.f32.gmra.mrb[42].mxu0 %vm5358_vm10, %v5300_v52  ;;  %v5010_v34 = vsel %vm4965_vm6, %v4913_v60, %v15500_v39  ;;  %v4650_v44 = vsel %vm284_vm0, %v713_v36, %v15505_v28  ;;  %v1400_v52 = vld [vmem:[#allocation3 + $0x499] sm:$0xff]  ;;  %v15525_v28 = vld [vmem:[#allocation124_spill] sm:$0xff] }
 0x630   : > { %4074 = vrot.lane.b32.xlu1 %v1398_v33, %s9105_s14  ;;  %v5107_v59 = vsel %vm5062_vm7, %v5010_v34, %v15502_v6  ;;  %v15503_v33 = vld [vmem:[#allocation212_spill] sm:$0xff]  ;;  %v4747_v55 = vsel %vm4674_vm2, %v4650_v44, %v15507_v24  ;;  %v15516_v21 = vld [vmem:[#allocation331_spill] sm:$0xff]  ;;  %v15517_v8 = vld [vmem:[#allocation30_spill] sm:$0xff] }
 0x631   : > { %v4431_v54 = vpop.permute.xlu0 %4430  ;;  %v4047_v57 = vpop.permute.xlu1 %4046  ;;  %v4817_v41 = vsel %vm4771_vm4, %v4720_v38, %v15503_v33  ;;  %v15519_v15 = vld [vmem:[#allocation119_spill] sm:$0xff]  ;;  %v15520_v39 = vld [vmem:[#allocation514_spill] sm:$0xff]  ;;  %v15522_v38 = vld [vmem:[#allocation300_spill] sm:$0xff] }
 0x632   : > { %v5230_v5 = vsel %vm5159_vm8, %v5133_v58, %v4047_v57  ;;  %4460 = vrot.lane.b32.xlu0 %v1495_v63, %s9106_s27  ;;  %v4914_v46 = vsel %vm4868_vm5, %v4817_v41, %v15504_v29  ;;  %v714_v63 = vld [vmem:[#allocation3 + $0x3c8] sm:$0xff]  ;;  %v1402_v57 = vld [vmem:[#allocation3 + $0x4b1] sm:$0xff]  ;;  %v15523_v33 = vld [vmem:[#allocation35_spill] sm:$0xff] }
 0x633   : > { %v5327_v61 = vsel %vm5256_vm9, %v5230_v5, %v4431_v54  ;;  %v5011_v17 = vsel %vm4965_vm6, %v4914_v46, %v15506_v12  ;;  %v4651_v9 = vsel %vm284_vm0, %v714_v63, %v15511_v32  ;;  %v15512_v5 = vld [vmem:[#allocation417_spill] sm:$0xff]  ;;  %v15526_v12 = vld [vmem:[#allocation483_spill] sm:$0xff] }
 0x634   : > { %4076 = vrot.lane.b32.xlu1 %v1399_v7, %s9105_s14  ;;  %8941 = vmatprep.mubr.msk.f32.mxu1 %vm5358_vm10, %v5327_v61  ;;  %v5108_v62 = vsel %vm5062_vm7, %v5011_v17, %v15508_v56  ;;  %v15509_v7 = vld [vmem:[#allocation235_spill] sm:$0xff]  ;;  %v4748_v31 = vsel %vm4674_vm2, %v4651_v9, %v15513_v18 }
 0x635   : > { %v4433_v25 = vpop.permute.xlu0 %4432  ;;  %v4844_v2 = vsel %vm4771_vm4, %v4747_v55, %v15509_v7  ;;  %v1401_v61 = vld [vmem:[#allocation3 + $0x4a1] sm:$0xff]  ;;  %v15528_v55 = vld [vmem:[#allocation305_spill] sm:$0xff]  ;;  %v15529_v7 = vld [vmem:[#allocation58_spill] sm:$0xff] }
 0x636   : > { %v4049_v26 = vpop.permute.xlu1 %4048  ;;  %4406 = vrot.lane.b32.xlu0 %v1468_v4, %s9106_s27  ;;  %v4941_v11 = vsel %vm4868_vm5, %v4844_v2, %v15510_v3  ;;  %v687_v4 = vld [vmem:[#allocation3 + $0x258] sm:$0xff]  ;;  %v15531_v32 = vld [vmem:[#allocation147_spill] sm:$0xff] }
 0x637   : > { %v5231_v14 = vsel %vm5159_vm8, %v5134_v47, %v4049_v26  ;;  %v5038_v16 = vsel %vm4965_vm6, %v4941_v11, %v15512_v5  ;;  %v1498_v26 = vld [vmem:[#allocation3 + $0x4b2] sm:$0xff]  ;;  %v4624_v53 = vsel %vm284_vm0, %v687_v4, %v15517_v8  ;;  %v15532_v5 = vld [vmem:[#allocation488_spill] sm:$0xff] }
 0x638   : > { %4022 = vrot.lane.b32.xlu1 %v1372_v23, %s9105_s14  ;;  %v5328_v30 = vsel %vm5256_vm9, %v5231_v14, %v4433_v25  ;;  %v5135_v35 = vsel %vm5062_vm7, %v5038_v16, %v15514_v51  ;;  %v15515_v23 = vld [vmem:[#allocation240_spill] sm:$0xff]  ;;  %v15518_v14 = vld [vmem:[#allocation422_spill] sm:$0xff]  ;;  %v4721_v13 = vsel %vm4674_vm2, %v4624_v53, %v15519_v15 }
 0x639   : > { %8942 = vmatmul.mubr.msk.f32.gmra.mrb[10].mxu1 %vm5358_vm10, %v5328_v30  ;;  %v4379_v49 = vpop.permute.xlu0 %4378  ;;  %v4845_v22 = vsel %vm4771_vm4, %v4748_v31, %v15515_v23  ;;  %v1497_v30 = vld [vmem:[#allocation3 + $0x4a2] sm:$0xff] }
 0x63a   : > { %v3995_v20 = vpop.permute.xlu1 %3994  ;;  %4408 = vrot.lane.b32.xlu0 %v1469_v19, %s9106_s27  ;;  %v4942_v50 = vsel %vm4868_vm5, %v4845_v22, %v15516_v21  ;;  %v688_v19 = vld [vmem:[#allocation3 + $0x260] sm:$0xff]  ;;  %v15534_v31 = vld [vmem:[#allocation328_spill] sm:$0xff] }
 0x63b   : > { %v5204_v27 = vsel %vm5159_vm8, %v5107_v59, %v3995_v20  ;;  %v5039_v45 = vsel %vm4965_vm6, %v4942_v50, %v15518_v14  ;;  %v1404_v20 = vld [vmem:[#allocation3 + $0x4c9] sm:$0xff]  ;;  %v4625_v41 = vsel %vm284_vm0, %v688_v19, %v15523_v33  ;;  %v15535_v23 = vld [vmem:[#allocation63_spill] sm:$0xff] }
 0x63c   : > { %4024 = vrot.lane.b32.xlu1 %v1373_v37, %s9105_s14  ;;  %v5301_v0 = vsel %vm5256_vm9, %v5204_v27, %v4379_v49  ;;  %v5136_v34 = vsel %vm5062_vm7, %v5039_v45, %v15520_v39  ;;  %v15521_v37 = vld [vmem:[#allocation209_spill] sm:$0xff]  ;;  %v15524_v27 = vld [vmem:[#allocation391_spill] sm:$0xff]  ;;  %v4722_v44 = vsel %vm4674_vm2, %v4625_v41, %v15525_v28  ;;  %v15537_v8 = vld [vmem:[#allocation152_spill] sm:$0xff] }
 0x63d   : > { %8902 = vmatprep.mubr.msk.f32.mxu0 %vm5358_vm10, %v5301_v0  ;;  %v4381_v48 = vpop.permute.xlu0 %4380  ;;  %v4818_v36 = vsel %vm4771_vm4, %v4721_v13, %v15521_v37  ;;  %v1403_v0 = vld [vmem:[#allocation3 + $0x4b9] sm:$0xff]  ;;  %v15540_v13 = vld [vmem:[#allocation333_spill] sm:$0xff]  ;;  %v15541_v37 = vld [vmem:[#allocation32_spill] sm:$0xff] }
 0x63e   : > { %v3997_v54 = vpop.permute.xlu1 %3996  ;;  %4462 = vrot.lane.b32.xlu0 %v1496_v42, %s9106_s27  ;;  %v4915_v6 = vsel %vm4868_vm5, %v4818_v36, %v15522_v38  ;;  %v715_v42 = vld [vmem:[#allocation3 + $0x3d8] sm:$0xff]  ;;  %v15538_v14 = vld [vmem:[#allocation511_spill] sm:$0xff]  ;;  %v15543_v33 = vld [vmem:[#allocation121_spill] sm:$0xff] }
 0x63f   : > { %v5205_v43 = vsel %vm5159_vm8, %v5108_v62, %v3997_v54  ;;  %v5012_v29 = vsel %vm4965_vm6, %v4915_v6, %v15524_v27  ;;  %v1500_v54 = vld [vmem:[#allocation3 + $0x4ca] sm:$0xff]  ;;  %v4652_v2 = vsel %vm284_vm0, %v715_v42, %v15529_v7  ;;  %v15549_v7 = vld [vmem:[#allocation126_spill] sm:$0xff] }
 0x640   : > { %4078 = vrot.lane.b32.xlu1 %v1400_v52, %s9105_s14  ;;  %v5302_v58 = vsel %vm5256_vm9, %v5205_v43, %v4381_v48  ;;  %v5109_v17 = vsel %vm5062_vm7, %v5012_v29, %v15526_v12  ;;  %v15527_v52 = vld [vmem:[#allocation214_spill] sm:$0xff]  ;;  %v15530_v43 = vld [vmem:[#allocation396_spill] sm:$0xff]  ;;  %v4749_v9 = vsel %vm4674_vm2, %v4652_v2, %v15531_v32 }
 0x641   : > { %8903 = vmatmul.mubr.msk.f32.gmra.mrb[44].mxu0 %vm5358_vm10, %v5302_v58  ;;  %v4435_v40 = vpop.permute.xlu0 %4434  ;;  %v4819_v63 = vsel %vm4771_vm4, %v4722_v44, %v15527_v52  ;;  %v1499_v58 = vld [vmem:[#allocation3 + $0x4ba] sm:$0xff]  ;;  %v15544_v27 = vld [vmem:[#allocation516_spill] sm:$0xff]  ;;  %v15547_v52 = vld [vmem:[#allocation37_spill] sm:$0xff] }
 0x642   : > { %v4051_v25 = vpop.permute.xlu1 %4050  ;;  %4082 = vrot.lane.b32.xlu0 %v1402_v57, %s9105_s14  ;;  %v4916_v56 = vsel %vm4868_vm5, %v4819_v63, %v15528_v55  ;;  %v716_v57 = vld [vmem:[#allocation3 + $0x3e0] sm:$0xff]  ;;  %v15546_v44 = vld [vmem:[#allocation302_spill] sm:$0xff] }
 0x643   : > { %v5232_v1 = vsel %vm5159_vm8, %v5135_v35, %v4051_v25  ;;  %v5013_v3 = vsel %vm4965_vm6, %v4916_v56, %v15530_v43  ;;  %v1406_v25 = vld [vmem:[#allocation3 + $0x4e1] sm:$0xff]  ;;  %v4653_v22 = vsel %vm284_vm0, %v716_v57, %v15535_v23  ;;  %v15550_v43 = vld [vmem:[#allocation485_spill] sm:$0xff] }
 0x644   : > { %4080 = vrot.lane.b32.xlu1 %v1401_v61, %s9105_s14  ;;  %v5329_v47 = vsel %vm5256_vm9, %v5232_v1, %v4435_v40  ;;  %v5110_v16 = vsel %vm5062_vm7, %v5013_v3, %v15532_v5  ;;  %v15533_v61 = vld [vmem:[#allocation237_spill] sm:$0xff]  ;;  %v15536_v1 = vld [vmem:[#allocation419_spill] sm:$0xff]  ;;  %v4750_v53 = vsel %vm4674_vm2, %v4653_v22, %v15537_v8 }
 0x645   : > { %8944 = vmatprep.mubr.msk.f32.mxu1 %vm5358_vm10, %v5329_v47  ;;  %v4437_v60 = vpop.permute.xlu0 %4436  ;;  %v4846_v4 = vsel %vm4771_vm4, %v4749_v9, %v15533_v61  ;;  %v1405_v47 = vld [vmem:[#allocation3 + $0x4d1] sm:$0xff]  ;;  %v15552_v9 = vld [vmem:[#allocation307_spill] sm:$0xff]  ;;  %v15553_v61 = vld [vmem:[#allocation60_spill] sm:$0xff] }
 0x646   : > { %v4053_v49 = vpop.permute.xlu1 %4052  ;;  %4466 = vrot.lane.b32.xlu0 %v1498_v26, %s9106_s27  ;;  %v4943_v51 = vsel %vm4868_vm5, %v4846_v4, %v15534_v31  ;;  %v689_v26 = vld [vmem:[#allocation3 + $0x270] sm:$0xff] }
 0x647   : > { %v5233_v10 = vsel %vm5159_vm8, %v5136_v34, %v4053_v49  ;;  %v5040_v21 = vsel %vm4965_vm6, %v4943_v51, %v15536_v1  ;;  %v1502_v49 = vld [vmem:[#allocation3 + $0x4e2] sm:$0xff]  ;;  %v4626_v36 = vsel %vm284_vm0, %v689_v26, %v15541_v37  ;;  %v15555_v23 = vld [vmem:[#allocation149_spill] sm:$0xff]  ;;  %v15556_v1 = vld [vmem:[#allocation490_spill] sm:$0xff] }
 0x648   : > { %4464 = vrot.lane.b32.xlu1 %v1497_v30, %s9106_s27  ;;  %v5330_v59 = vsel %vm5256_vm9, %v5233_v10, %v4437_v60  ;;  %v5137_v45 = vsel %vm5062_vm7, %v5040_v21, %v15538_v14  ;;  %v15539_v30 = vld [vmem:[#allocation242_spill] sm:$0xff]  ;;  %v15542_v10 = vld [vmem:[#allocation424_spill] sm:$0xff]  ;;  %v4723_v41 = vsel %vm4674_vm2, %v4626_v36, %v15543_v33 }
 0x649   : > { %8945 = vmatmul.mubr.msk.f32.gmra.mrb[12].mxu1 %vm5358_vm10, %v5330_v59  ;;  %v4383_v46 = vpop.permute.xlu0 %4382  ;;  %v4847_v19 = vsel %vm4771_vm4, %v4750_v53, %v15539_v30  ;;  %v1501_v59 = vld [vmem:[#allocation3 + $0x4d2] sm:$0xff] }
 0x64a   : > { %v3999_v48 = vpop.permute.xlu1 %3998  ;;  %4086 = vrot.lane.b32.xlu0 %v1404_v20, %s9105_s14  ;;  %v4944_v39 = vsel %vm4868_vm5, %v4847_v19, %v15540_v13  ;;  %v690_v20 = vld [vmem:[#allocation3 + $0x278] sm:$0xff]  ;;  %v15559_v30 = vld [vmem:[#allocation65_spill] sm:$0xff] }
 0x64b   : > { %v5206_v24 = vsel %vm5159_vm8, %v5109_v17, %v3999_v48  ;;  %v5041_v38 = vsel %vm4965_vm6, %v4944_v39, %v15542_v10  ;;  %v1408_v48 = vld [vmem:[#allocation3 + $0x4f9] sm:$0xff]  ;;  %v4627_v63 = vsel %vm284_vm0, %v690_v20, %v15547_v52  ;;  %v15562_v10 = vld [vmem:[#allocation513_spill] sm:$0xff] }
 0x64c   : > { %4084 = vrot.lane.b32.xlu1 %v1403_v0, %s9105_s14  ;;  %v5303_v62 = vsel %vm5256_vm9, %v5206_v24, %v4383_v46  ;;  %v5138_v29 = vsel %vm5062_vm7, %v5041_v38, %v15544_v27  ;;  %v15545_v0 = vld [vmem:[#allocation211_spill] sm:$0xff]  ;;  %v15548_v24 = vld [vmem:[#allocation393_spill] sm:$0xff]  ;;  %v4724_v2 = vsel %vm4674_vm2, %v4627_v63, %v15549_v7  ;;  %v15558_v53 = vld [vmem:[#allocation330_spill] sm:$0xff] }
 0x64d   : > { %8905 = vmatprep.mubr.msk.f32.mxu0 %vm5358_vm10, %v5303_v62  ;;  %v4385_v11 = vpop.permute.xlu0 %4384  ;;  %v4820_v42 = vsel %vm4771_vm4, %v4723_v41, %v15545_v0  ;;  %v1407_v62 = vld [vmem:[#allocation3 + $0x4e9] sm:$0xff]  ;;  %v15561_v37 = vld [vmem:[#allocation154_spill] sm:$0xff]  ;;  %v15564_v41 = vld [vmem:[#allocation335_spill] sm:$0xff] }
 0x64e   : > { %v4001_v40 = vpop.permute.xlu1 %4000  ;;  %4470 = vrot.lane.b32.xlu0 %v1500_v54, %s9106_s27  ;;  %v4917_v12 = vsel %vm4868_vm5, %v4820_v42, %v15546_v44  ;;  %v717_v54 = vld [vmem:[#allocation3 + $0x3f0] sm:$0xff]  ;;  %v15566_v42 = vld [vmem:[#allocation426_spill] sm:$0xff]  ;;  %v15567_v52 = vld [vmem:[#allocation123_spill] sm:$0xff] }
 0x64f   : > { %v5207_v18 = vsel %vm5159_vm8, %v5110_v16, %v4001_v40  ;;  %v5014_v55 = vsel %vm4965_vm6, %v4917_v12, %v15548_v24  ;;  %v1504_v40 = vld [vmem:[#allocation3 + $0x4fa] sm:$0xff]  ;;  %v4654_v4 = vsel %vm284_vm0, %v717_v54, %v15553_v61 }
 0x650   : > { %4468 = vrot.lane.b32.xlu1 %v1499_v58, %s9106_s27  ;;  %v5304_v35 = vsel %vm5256_vm9, %v5207_v18, %v4385_v11  ;;  %v5111_v3 = vsel %vm5062_vm7, %v5014_v55, %v15550_v43  ;;  %v15551_v58 = vld [vmem:[#allocation216_spill] sm:$0xff]  ;;  %v15554_v18 = vld [vmem:[#allocation398_spill] sm:$0xff]  ;;  %v4751_v22 = vsel %vm4674_vm2, %v4654_v4, %v15555_v23  ;;  %v12897_v12 = vld [vmem:[%s14624_s2] ss:$0 sm:$0xff] }
 0x651   : > { %8906 = vmatmul.mubr.msk.f32.gmra.mrb[46].mxu0 %vm5358_vm10, %v5304_v35  ;;  %v4439_v50 = vpop.permute.xlu0 %4438  ;;  %v4821_v57 = vsel %vm4771_vm4, %v4724_v2, %v15551_v58  ;;  %v1503_v35 = vld [vmem:[#allocation3 + $0x4ea] sm:$0xff]  ;;  %v15568_v24 = vld [vmem:[#allocation518_spill] sm:$0xff]  ;;  %v12909_v43 = vld [vmem:[%s14625_s3] ss:$0 sm:$0xff] }
 0x652   : > { %v4055_v60 = vpop.permute.xlu1 %4054  ;;  %4090 = vrot.lane.b32.xlu0 %v1406_v25, %s9105_s14  ;;  %v4918_v5 = vsel %vm4868_vm5, %v4821_v57, %v15552_v9  ;;  %v718_v25 = vld [vmem:[#allocation3 + $0x3f8] sm:$0xff]  ;;  %v15571_v9 = vld [vmem:[#allocation39_spill] sm:$0xff] }
 0x653   : > { %v5234_v15 = vsel %vm5159_vm8, %v5137_v45, %v4055_v60  ;;  %v5015_v31 = vsel %vm4965_vm6, %v4918_v5, %v15554_v18  ;;  %v6967_v60 = vld [vmem:[#allocation4 + $0x1] sm:$0xff]  ;;  %v4655_v19 = vsel %vm284_vm0, %v718_v25, %v15559_v30  ;;  %v719_v18 = vld [vmem:[#allocation3 + $0x408] sm:$0xff] }
 0x654   : > { %4088 = vrot.lane.b32.xlu1 %v1405_v47, %s9105_s14  ;;  %v5331_v34 = vsel %vm5256_vm9, %v5234_v15, %v4439_v50  ;;  %v5112_v21 = vsel %vm5062_vm7, %v5015_v31, %v15556_v1  ;;  %v15557_v47 = vld [vmem:[#allocation239_spill] sm:$0xff]  ;;  %v15560_v15 = vld [vmem:[#allocation421_spill] sm:$0xff]  ;;  %v4752_v36 = vsel %vm4674_vm2, %v4655_v19, %v15561_v37  ;;  %v15573_v31 = vld [vmem:[#allocation128_spill] sm:$0xff] }
 0x655   : > { %8947 = vmatprep.mubr.msk.f32.mxu1 %vm5358_vm10, %v5331_v34  ;;  %v4441_v6 = vpop.permute.xlu0 %4440  ;;  %v4848_v26 = vsel %vm4771_vm4, %v4751_v22, %v15557_v47  ;;  %v1409_v34 = vld [vmem:[#allocation3 + $0x501] sm:$0xff]  ;;  %v15575_v1 = vld [vmem:[#allocation218_spill] sm:$0xff] }
 0x656   : > { %v4057_v46 = vpop.permute.xlu1 %4056  ;;  %4474 = vrot.lane.b32.xlu0 %v1502_v49, %s9106_s27  ;;  %v4945_v14 = vsel %vm4868_vm5, %v4848_v26, %v15558_v53  ;;  %v691_v49 = vld [vmem:[#allocation3 + $0x288] sm:$0xff]  ;;  %v15577_v19 = vld [vmem:[#allocation62_spill] sm:$0xff] }
 0x657   : > { %v5235_v28 = vsel %vm5159_vm8, %v5138_v29, %v4057_v46  ;;  %v5042_v13 = vsel %vm4965_vm6, %v4945_v14, %v15560_v15  ;;  %v15565_v46 = vld [vmem:[#allocation34_spill] sm:$0xff]  ;;  %v4656_v15 = vsel %vm284_vm0, %v719_v18, %v15577_v19  ;;  %v694_v18 = vld [vmem:[#allocation3 + $0x2a8] sm:$0xff] }
 0x658   : > { %4472 = vrot.lane.b32.xlu1 %v1501_v59, %s9106_s27  ;;  %v5332_v17 = vsel %vm5256_vm9, %v5235_v28, %v4441_v6  ;;  %v5139_v38 = vsel %vm5062_vm7, %v5042_v13, %v15562_v10  ;;  %v15563_v59 = vld [vmem:[#allocation244_spill] sm:$0xff]  ;;  %v4628_v0 = vsel %vm284_vm0, %v691_v49, %v15565_v46  ;;  %v15579_v10 = vld [vmem:[#allocation151_spill] sm:$0xff] }
 0x659   : > { %8948 = vmatmul.mubr.msk.f32.gmra.mrb[14].mxu1 %vm5358_vm10, %v5332_v17  ;;  %v4387_v56 = vpop.permute.xlu0 %4386  ;;  %v4849_v20 = vsel %vm4771_vm4, %v4752_v36, %v15563_v59  ;;  %v1505_v17 = vld [vmem:[#allocation3 + $0x502] sm:$0xff]  ;;  %v4725_v63 = vsel %vm4674_vm2, %v4628_v0, %v15567_v52  ;;  %v720_v36 = vld [vmem:[#allocation3 + $0x410] sm:$0xff] }
 0x65a   : > { %v4003_v11 = vpop.permute.xlu1 %4002  ;;  %4094 = vrot.lane.b32.xlu0 %v1408_v48, %s9105_s14  ;;  %v4946_v27 = vsel %vm4868_vm5, %v4849_v20, %v15564_v41  ;;  %v692_v48 = vld [vmem:[#allocation3 + $0x290] sm:$0xff]  ;;  %v15578_v13 = vld [vmem:[#allocation400_spill] sm:$0xff] }
 0x65b   : > { %v5208_v32 = vsel %vm5159_vm8, %v5111_v3, %v4003_v11  ;;  %v5043_v28 = vsel %vm4965_vm6, %v4946_v27, %v15566_v42  ;;  %v15570_v3 = vld [vmem:[#allocation304_spill] sm:$0xff]  ;;  %v4629_v5 = vsel %vm284_vm0, %v692_v48, %v15571_v9  ;;  %v15581_v41 = vld [vmem:[#allocation241_spill] sm:$0xff] }
 0x65c   : > { %4092 = vrot.lane.b32.xlu1 %v1407_v62, %s9105_s14  ;;  %v5305_v16 = vsel %vm5256_vm9, %v5208_v32, %v4387_v56  ;;  %v5140_v55 = vsel %vm5062_vm7, %v5043_v28, %v15568_v24  ;;  %v15569_v62 = vld [vmem:[#allocation213_spill] sm:$0xff]  ;;  %v15582_v42 = vld [vmem:[#allocation332_spill] sm:$0xff] }
 0x65d   : > { %8908 = vmatprep.mubr.msk.f32.mxu0 %vm5358_vm10, %v5305_v16  ;;  %v4389_v51 = vpop.permute.xlu0 %4388  ;;  %v4822_v54 = vsel %vm4771_vm4, %v4725_v63, %v15569_v62  ;;  %v15572_v16 = vld [vmem:[#allocation395_spill] sm:$0xff] }
 0x65e   : > { %v4005_v50 = vpop.permute.xlu1 %4004  ;;  %4478 = vrot.lane.b32.xlu0 %v1504_v40, %s9106_s27  ;;  %v4919_v11 = vsel %vm4868_vm5, %v4822_v54, %v15570_v3  ;;  %v15583_v63 = vld [vmem:[#allocation67_spill] sm:$0xff]  ;;  %v15585_v3 = vld [vmem:[#allocation156_spill] sm:$0xff] }
 0x65f   : > { %v5209_v8 = vsel %vm5159_vm8, %v5112_v21, %v4005_v50  ;;  %v5016_v40 = vsel %vm4965_vm6, %v4919_v11, %v15572_v16  ;;  %v4657_v24 = vsel %vm284_vm0, %v720_v36, %v15583_v63  ;;  %v15598_v63 = vld [vmem:[#allocation64_spill] sm:$0xff] }
 0x660   : > { %4476 = vrot.lane.b32.xlu1 %v1503_v35, %s9106_s27  ;;  %v5306_v45 = vsel %vm5256_vm9, %v5209_v8, %v4389_v51  ;;  %v4726_v51 = vsel %vm4674_vm2, %v4629_v5, %v15573_v31  ;;  %v15574_v35 = vld [vmem:[#allocation487_spill] sm:$0xff]  ;;  %v15576_v8 = vld [vmem:[#allocation309_spill] sm:$0xff]  ;;  %v4754_v11 = vsel %vm4674_vm2, %v4657_v24, %v15585_v3  ;;  %v15587_v5 = vld [vmem:[#allocation246_spill] sm:$0xff] }
 0x661   : > { %8909 = vmatmul.mubr.msk.f32.gmra.mrb[48].mxu0 %vm5358_vm10, %v5306_v45  ;;  %v4443_v39 = vpop.permute.xlu0 %4442  ;;  %v5113_v25 = vsel %vm5062_vm7, %v5016_v40, %v15574_v35  ;;  %v4823_v21 = vsel %vm4771_vm4, %v4726_v51, %v15575_v1  ;;  %v4851_v16 = vsel %vm4771_vm4, %v4754_v11, %v15587_v5  ;;  %v15588_v31 = vld [vmem:[#allocation337_spill] sm:$0xff]  ;;  %v15589_v1 = vld [vmem:[#allocation36_spill] sm:$0xff] }
 0x662   : > { %v4059_v6 = vpop.permute.xlu1 %4058  ;;  %7184 = vrot.lane.b32.xlu0 %v6967_v60, %s9100_s9  ;;  %v8838_v2 = vpop.f32.mrb[0].mxu0  ;;  %v4920_v53 = vsel %vm4868_vm5, %v4823_v21, %v15576_v8  ;;  %v4948_v51 = vsel %vm4868_vm5, %v4851_v16, %v15588_v31  ;;  %v722_v16 = vld [vmem:[#allocation3 + $0x428] sm:$0xff] }
 0x663   : > { %v5236_v33 = vsel %vm5159_vm8, %v5139_v38, %v4059_v6  ;;  %v6204_v58 = vmul.f32 %v8838_v2, %v12897_v12  ;;  %v5717_v57 = vpop.f32.mrb[1].mxu0  ;;  %v4753_v38 = vsel %vm4674_vm2, %v4656_v15, %v15579_v10  ;;  %v15580_v6 = vld [vmem:[#allocation492_spill] sm:$0xff]  ;;  %v693_v2 = vld [vmem:[#allocation3 + $0x2a0] sm:$0xff] }
 0x664   : > { %4096 = vrot.lane.b32.xlu1 %v1409_v34, %s9105_s14  ;;  %v5333_v29 = vsel %vm5256_vm9, %v5236_v33, %v4443_v39  ;;  %v6203_v61 = vmul.f32 %v12897_v12, %v5717_v57  ;;  %v5017_v39 = vsel %vm4965_vm6, %v4920_v53, %v15578_v13  ;;  %v4850_v27 = vsel %vm4771_vm4, %v4753_v38, %v15581_v41  ;;  %v15593_v13 = vld [vmem:[#allocation41_spill] sm:$0xff] }
 0x665   : > { %8950 = vmatprep.mubr.msk.f32.mxu1 %vm5358_vm10, %v5333_v29  ;;  %v4445_v44 = vpop.permute.xlu0 %4444  ;;  %v6307_v23 = vadd.f32 %v12909_v43, %v6204_v58  ;;  %v5114_v59 = vsel %vm5062_vm7, %v5017_v39, %v15580_v6  ;;  %v4947_v28 = vsel %vm4868_vm5, %v4850_v27, %v15582_v42  ;;  %v15586_v58 = vld [vmem:[#allocation515_spill] sm:$0xff]  ;;  %v4630_v21 = vsel %vm284_vm0, %v693_v2, %v15589_v1  ;;  %v15595_v6 = vld [vmem:[#allocation306_spill] sm:$0xff] }
 0x666   : > { %v4061_v56 = vpop.permute.xlu1 %4060  ;;  %v6306_v50 = vadd.f32 %v12909_v43, %v6203_v61  ;;  %v8841_v26 = vpop.f32.mrb[2].mxu0  ;;  %v4631_v39 = vsel %vm284_vm0, %v694_v18, %v15593_v13 }
 0x667   : > { %v5237_v7 = vsel %vm5159_vm8, %v5140_v55, %v4061_v56  ;;  %v6403_v14 = vmax.f32 %v6307_v23, 0.0  ;;  %v6206_v45 = vmul.f32 %v8841_v26, %v12897_v12  ;;  %v5727_v60 = vpop.f32.mrb[3].mxu0  ;;  %v15584_v55 = vld [vmem:[#allocation423_spill] sm:$0xff] }
 0x668   : > { %4480 = vrot.lane.b32.xlu1 %v1505_v17, %s9106_s27  ;;  %v5334_v32 = vsel %vm5256_vm9, %v5237_v7, %v4445_v44  ;;  %v6402_v34 = vmax.f32 %v6306_v50, 0.0  ;;  %v6205_v49 = vmul.f32 %v12897_v12, %v5727_v60  ;;  %v5044_v56 = vsel %vm4965_vm6, %v4947_v28, %v15584_v55  ;;  %v15590_v50 = vld [vmem:[#allocation428_spill] sm:$0xff]  ;;  %v15597_v28 = vld [vmem:[#allocation397_spill] sm:$0xff] }
 0x669   : > { %8951 = vmatmul.mubr.msk.f32.gmra.mrb[16].mxu1 %vm5358_vm10, %v5334_v32  ;;  %v4391_v4 = vpop.permute.xlu0 %4390  ;;  %6499 = vst.msk [vmem:[#allocation2 + $0x8] sm:$0xff] %vm4674_vm2, %v6403_v14  ;;  %v6309_v20 = vadd.f32 %v12909_v43, %v6206_v45  ;;  %v5141_v57 = vsel %vm5062_vm7, %v5044_v56, %v15586_v58  ;;  %v15591_v14 = vld [vmem:[#allocation125_spill] sm:$0xff]  ;;  %v15592_v60 = vld [vmem:[#allocation520_spill] sm:$0xff] }
 0x66a   : > { %v4007_v22 = vpop.permute.xlu1 %4006  ;;  %6498 = vst.msk [vmem:[#allocation2] sm:$0xff] %vm4674_vm2, %v6402_v34  ;;  %v6308_v29 = vadd.f32 %v12909_v43, %v6205_v49  ;;  %v8844_v0 = vpop.f32.mrb[4].mxu0  ;;  %v4727_v45 = vsel %vm4674_vm2, %v4630_v21, %v15591_v14  ;;  %v721_v34 = vld [vmem:[#allocation3 + $0x420] sm:$0xff]  ;;  %v15599_v55 = vld [vmem:[#allocation220_spill] sm:$0xff] }
 0x66b   : > { %v5210_v47 = vsel %vm5159_vm8, %v5113_v25, %v4007_v22  ;;  %v6405_v44 = vmax.f32 %v6309_v20, 0.0  ;;  %v6208_v17 = vmul.f32 %v8844_v0, %v12897_v12  ;;  %v5737_v48 = vpop.f32.mrb[5].mxu0  ;;  %v15594_v49 = vld [vmem:[#allocation215_spill] sm:$0xff]  ;;  %v15596_v0 = vld [vmem:[#allocation130_spill] sm:$0xff]  ;;  %v4658_v24 = vsel %vm284_vm0, %v721_v34, %v15598_v63 }
 0x66c   : > { %v5307_v30 = vsel %vm5256_vm9, %v5210_v47, %v4391_v4  ;;  %v6404_v62 = vmax.f32 %v6308_v29, 0.0  ;;  %v6207_v54 = vmul.f32 %v12897_v12, %v5737_v48  ;;  %v5045_v47 = vsel %vm4965_vm6, %v4948_v51, %v15590_v50  ;;  %v15603_v50 = vld [vmem:[#allocation153_spill] sm:$0xff] }
 0x66d   : > { %8911 = vmatprep.mubr.msk.f32.mxu0 %vm5358_vm10, %v5307_v30  ;;  %v4393_v37 = vpop.permute.xlu0 %4392  ;;  %6501 = vst.msk [vmem:[#allocation2 + $0x18] sm:$0xff] %vm4674_vm2, %v6405_v44  ;;  %v6311_v32 = vadd.f32 %v12909_v43, %v6208_v17  ;;  %v5142_v30 = vsel %vm5062_vm7, %v5045_v47, %v15592_v60  ;;  %v4728_v42 = vsel %vm4674_vm2, %v4631_v39, %v15596_v0  ;;  %v15605_v60 = vld [vmem:[#allocation69_spill] sm:$0xff] }
 0x66e   : > { %v4009_v33 = vpop.permute.xlu1 %4008  ;;  %6500 = vst.msk [vmem:[#allocation2 + $0x10] sm:$0xff] %vm4674_vm2, %v6404_v62  ;;  %v6310_v40 = vadd.f32 %v12909_v43, %v6207_v54  ;;  %v8847_v4 = vpop.f32.mrb[6].mxu0  ;;  %v4825_v56 = vsel %vm4771_vm4, %v4728_v42, %v15599_v55  ;;  %v15600_v62 = vld [vmem:[#allocation489_spill] sm:$0xff]  ;;  %v4755_v47 = vsel %vm4674_vm2, %v4658_v24, %v15603_v50 }
 0x66f   : > { %v5211_v46 = vsel %vm5159_vm8, %v5114_v59, %v4009_v33  ;;  %v6407_v35 = vmax.f32 %v6311_v32, 0.0  ;;  %v6210_v25 = vmul.f32 %v8847_v4, %v12897_v12  ;;  %v5747_v23 = vpop.f32.mrb[7].mxu0 }
 0x670   : > { %v5308_v52 = vsel %vm5256_vm9, %v5211_v46, %v4393_v37  ;;  %v6406_v26 = vmax.f32 %v6310_v40, 0.0  ;;  %v6209_v8 = vmul.f32 %v12897_v12, %v5747_v23  ;;  %v4824_v37 = vsel %vm4771_vm4, %v4727_v45, %v15594_v49  ;;  %v15601_v40 = vld [vmem:[#allocation311_spill] sm:$0xff]  ;;  %v695_v45 = vld [vmem:[#allocation3 + $0x2b8] sm:$0xff] }
 0x671   : > { %8912 = vmatmul.mubr.msk.f32.gmra.mrb[50].mxu0 %vm5358_vm10, %v5308_v52  ;;  %v4447_v7 = vpop.permute.xlu0 %4446  ;;  %6503 = vst.msk [vmem:[#allocation2 + $0x28] sm:$0xff] %vm4674_vm2, %v6407_v35  ;;  %v6313_v19 = vadd.f32 %v12909_v43, %v6210_v25  ;;  %v4921_v59 = vsel %vm4868_vm5, %v4824_v37, %v15595_v6  ;;  %v6594_v20 = vld [vmem:[#allocation2] ss:$2 sm:$0xff]  ;;  %v6690_v33 = vld [vmem:[#allocation2 + $0x1] ss:$2 sm:$0xff]  ;;  %v15602_v35 = vld [vmem:[#allocation402_spill] sm:$0xff] }
 0x672   : > { %v4063_v9 = vpop.permute.xlu1 %4062  ;;  %6502 = vst.msk [vmem:[#allocation2 + $0x20] sm:$0xff] %vm4674_vm2, %v6406_v26  ;;  %v6312_v36 = vadd.f32 %v12909_v43, %v6209_v8  ;;  %v8850_v38 = vpop.f32.mrb[8].mxu0  ;;  %v5018_v44 = vsel %vm4965_vm6, %v4921_v59, %v15597_v28  ;;  %v6785_v58 = vmax.f32 %v6594_v20, %v6690_v33  ;;  %v15604_v26 = vld [vmem:[#allocation494_spill] sm:$0xff] }
 0x673   : > { %v5238_v61 = vsel %vm5159_vm8, %v5141_v57, %v4063_v9  ;;  %v6409_v41 = vmax.f32 %v6313_v19, 0.0  ;;  %v6212_v27 = vmul.f32 %v8850_v38, %v12897_v12  ;;  %v5757_v29 = vpop.f32.mrb[9].mxu0  ;;  %v5115_v54 = vsel %vm5062_vm7, %v5018_v44, %v15600_v62  ;;  %v15606_v19 = vld [vmem:[#allocation243_spill] sm:$0xff]  ;;  %v15607_v49 = vld [vmem:[#allocation334_spill] sm:$0xff] }
 0x674   : > { %v5335_v22 = vsel %vm5256_vm9, %v5238_v61, %v4447_v7  ;;  %v6408_v17 = vmax.f32 %v6312_v36, 0.0  ;;  %v6211_v48 = vmul.f32 %v12897_v12, %v5757_v29  ;;  %v4922_v61 = vsel %vm4868_vm5, %v4825_v56, %v15601_v40  ;;  %v15608_v33 = vld [vmem:[#allocation158_spill] sm:$0xff] }
 0x675   : > { %8953 = vmatprep.mubr.msk.f32.mxu1 %vm5358_vm10, %v5335_v22  ;;  %v4449_v53 = vpop.permute.xlu0 %4448  ;;  %v6596_v7 = vld [vmem:[#allocation2 + $0x10] ss:$2 sm:$0xff]  ;;  %v6692_v2 = vld [vmem:[#allocation2 + $0x11] ss:$2 sm:$0xff]  ;;  %6505 = vst.msk [vmem:[#allocation2 + $0x38] sm:$0xff] %vm4674_vm2, %v6409_v41  ;;  %v6315_v3 = vadd.f32 %v12909_v43, %v6212_v27  ;;  %v5019_v25 = vsel %vm4965_vm6, %v4922_v61, %v15602_v35 }
 0x676   : > { %v4065_v15 = vpop.permute.xlu1 %4064  ;;  %v6786_v57 = vmax.f32 %v6596_v7, %v6692_v2  ;;  %6504 = vst.msk [vmem:[#allocation2 + $0x30] sm:$0xff] %vm4674_vm2, %v6408_v17  ;;  %v6314_v32 = vadd.f32 %v12909_v43, %v6211_v48  ;;  %v8853_v5 = vpop.f32.mrb[10].mxu0  ;;  %v5116_v8 = vsel %vm5062_vm7, %v5019_v25, %v15604_v26  ;;  %v15609_v27 = vld [vmem:[#allocation425_spill] sm:$0xff]  ;;  %v15610_v28 = vld [vmem:[#allocation38_spill] sm:$0xff]  ;;  %v15611_v17 = vld [vmem:[#allocation248_spill] sm:$0xff] }
 0x677   : > { %v5239_v10 = vsel %vm5159_vm8, %v5142_v30, %v4065_v15  ;;  %v6411_v4 = vmax.f32 %v6315_v3, 0.0  ;;  %v6214_v18 = vmul.f32 %v8853_v5, %v12897_v12  ;;  %v5767_v31 = vpop.f32.mrb[11].mxu0  ;;  %v4659_v30 = vsel %vm284_vm0, %v722_v16, %v15605_v60  ;;  %v15614_v61 = vld [vmem:[#allocation430_spill] sm:$0xff]  ;;  %v15615_v25 = vld [vmem:[#allocation127_spill] sm:$0xff] }
 0x678   : > { %v5336_v46 = vsel %vm5256_vm9, %v5239_v10, %v4449_v53  ;;  %v6833_v23 = vmax.f32 %v6785_v58, %v6786_v57  ;;  %v6410_v22 = vmax.f32 %v6314_v32, 0.0  ;;  %v6213_v1 = vmul.f32 %v12897_v12, %v5767_v31  ;;  %v696_v58 = vld [vmem:[#allocation3 + $0x2c0] sm:$0xff] }
 0x679   : > { %8954 = vmatmul.mubr.msk.f32.gmra.mrb[18].mxu1 %vm5358_vm10, %v5336_v46  ;;  %v4395_v52 = vpop.permute.xlu0 %4394  ;;  %6507 = vst.msk [vmem:[#allocation2 + $0x48] sm:$0xff] %vm4674_vm2, %v6411_v4  ;;  %v6317_v53 = vadd.f32 %v12909_v43, %v6214_v18  ;;  %v4852_v15 = vsel %vm4771_vm4, %v4755_v47, %v15606_v19  ;;  %v6598_v36 = vld [vmem:[#allocation2 + $0x20] ss:$2 sm:$0xff]  ;;  %v6694_v10 = vld [vmem:[#allocation2 + $0x21] ss:$2 sm:$0xff]  ;;  %v4756_v41 = vsel %vm4674_vm2, %v4659_v30, %v15608_v33 }
 0x67a   : > { %v4011_v11 = vpop.permute.xlu1 %4010  ;;  %6506 = vst.msk [vmem:[#allocation2 + $0x40] sm:$0xff] %vm4674_vm2, %v6410_v22  ;;  %v6316_v13 = vadd.f32 %v12909_v43, %v6213_v1  ;;  %v8856_v34 = vpop.f32.mrb[12].mxu0  ;;  %6919 = vst.msk [vmem:[#allocation4 + $0x11] sm:$0xff] %vm4674_vm2, %v6833_v23  ;;  %v4949_v37 = vsel %vm4868_vm5, %v4852_v15, %v15607_v49  ;;  %v4632_v44 = vsel %vm284_vm0, %v695_v45, %v15610_v28  ;;  %v15613_v57 = vld [vmem:[#allocation339_spill] sm:$0xff]  ;;  %v15616_v22 = vld [vmem:[#allocation522_spill] sm:$0xff] }
 0x67b   : > { %v5212_v9 = vsel %vm5159_vm8, %v5115_v54, %v4011_v11  ;;  %v6413_v38 = vmax.f32 %v6317_v53, 0.0  ;;  %v6216_v6 = vmul.f32 %v8856_v34, %v12897_v12  ;;  %v5777_v59 = vpop.f32.mrb[13].mxu0  ;;  %v5046_v29 = vsel %vm4965_vm6, %v4949_v37, %v15609_v27  ;;  %v15617_v26 = vld [vmem:[#allocation43_spill] sm:$0xff]  ;;  %v723_v53 = vld [vmem:[#allocation3 + $0x438] sm:$0xff]  ;;  %v15619_v15 = vld [vmem:[#allocation308_spill] sm:$0xff] }
 0x67c   : > { %v5309_v51 = vsel %vm5256_vm9, %v5212_v9, %v4395_v52  ;;  %v6412_v46 = vmax.f32 %v6316_v13, 0.0  ;;  %v6215_v0 = vmul.f32 %v12897_v12, %v5777_v59  ;;  %v4853_v48 = vsel %vm4771_vm4, %v4756_v41, %v15611_v17  ;;  %v15612_v52 = vld [vmem:[#allocation517_spill] sm:$0xff]  ;;  %v15621_v59 = vld [vmem:[#allocation399_spill] sm:$0xff] }
 0x67d   : > { %8914 = vmatprep.mubr.msk.f32.mxu0 %vm5358_vm10, %v5309_v51  ;;  %v4397_v21 = vpop.permute.xlu0 %4396  ;;  %v5143_v63 = vsel %vm5062_vm7, %v5046_v29, %v15612_v52  ;;  %v6600_v24 = vld [vmem:[#allocation2 + $0x30] ss:$2 sm:$0xff]  ;;  %v6696_v55 = vld [vmem:[#allocation2 + $0x31] ss:$2 sm:$0xff]  ;;  %6509 = vst.msk [vmem:[#allocation2 + $0x58] sm:$0xff] %vm4674_vm2, %v6413_v38  ;;  %v6319_v56 = vadd.f32 %v12909_v43, %v6216_v6  ;;  %v6787_v54 = vmax.f32 %v6598_v36, %v6694_v10  ;;  %v15620_v38 = vld [vmem:[#allocation132_spill] sm:$0xff] }
 0x67e   : > { %v4013_v14 = vpop.permute.xlu1 %4012  ;;  %v6788_v7 = vmax.f32 %v6600_v24, %v6696_v55  ;;  %6508 = vst.msk [vmem:[#allocation2 + $0x50] sm:$0xff] %vm4674_vm2, %v6412_v46  ;;  %v6318_v2 = vadd.f32 %v12909_v43, %v6215_v0  ;;  %v4950_v32 = vsel %vm4868_vm5, %v4853_v48, %v15613_v57  ;;  %v4729_v23 = vsel %vm4674_vm2, %v4632_v44, %v15615_v25  ;;  %v15622_v29 = vld [vmem:[#allocation66_spill] sm:$0xff]  ;;  %v15624_v28 = vld [vmem:[#allocation491_spill] sm:$0xff] }
 0x67f   : > { %v5213_v39 = vsel %vm5159_vm8, %v5116_v8, %v4013_v14  ;;  %v8859_v11 = vpop.f32.mrb[14].mxu0  ;;  %v6415_v9 = vmax.f32 %v6319_v56, 0.0  ;;  %v5047_v4 = vsel %vm4965_vm6, %v4950_v32, %v15614_v61  ;;  %v4633_v8 = vsel %vm284_vm0, %v696_v58, %v15617_v26  ;;  %v15618_v14 = vld [vmem:[#allocation217_spill] sm:$0xff]  ;;  %v15623_v0 = vld [vmem:[#allocation222_spill] sm:$0xff] }
 0x680   : > { %v5310_v20 = vsel %vm5256_vm9, %v5213_v39, %v4397_v21  ;;  %v6218_v5 = vmul.f32 %v8859_v11, %v12897_v12  ;;  %v5787_v16 = vpop.f32.mrb[15].mxu0  ;;  %v6834_v18 = vmax.f32 %v6787_v54, %v6788_v7  ;;  %v6414_v31 = vmax.f32 %v6318_v2, 0.0  ;;  %v724_v7 = vld [vmem:[#allocation3 + $0x440] sm:$0xff]  ;;  %v15625_v2 = vld [vmem:[#allocation313_spill] sm:$0xff] }
 0x681   : > { %8915 = vmatmul.mubr.msk.f32.gmra.mrb[52].mxu0 %vm5358_vm10, %v5310_v20  ;;  %v4451_v42 = vpop.permute.xlu0 %4450  ;;  %v6217_v51 = vmul.f32 %v12897_v12, %v5787_v16  ;;  %v5144_v1 = vsel %vm5062_vm7, %v5047_v4, %v15616_v22  ;;  %6511 = vst.msk [vmem:[#allocation2 + $0x68] sm:$0xff] %vm4674_vm2, %v6415_v9  ;;  %v6968_v47 = vld [vmem:[#allocation4 + $0x11] sm:$0xff]  ;;  %v4826_v45 = vsel %vm4771_vm4, %v4729_v23, %v15618_v14 }
 0x682   : > { %v4067_v62 = vpop.permute.xlu1 %4066  ;;  %v6321_v21 = vadd.f32 %v12909_v43, %v6218_v5  ;;  %6510 = vst.msk [vmem:[#allocation2 + $0x60] sm:$0xff] %vm4674_vm2, %v6414_v31  ;;  %7186 = vrot.lane.b32.xlu1 %v6968_v47, %s9100_s9  ;;  %6920 = vst.msk [vmem:[#allocation4 + $0x21] sm:$0xff] %vm4674_vm2, %v6834_v18  ;;  %v4923_v13 = vsel %vm4868_vm5, %v4826_v45, %v15619_v15  ;;  %v6602_v39 = vld [vmem:[#allocation2 + $0x40] ss:$2 sm:$0xff]  ;;  %v6698_v34 = vld [vmem:[#allocation2 + $0x41] ss:$2 sm:$0xff]  ;;  %v4730_v6 = vsel %vm4674_vm2, %v4633_v8, %v15620_v38 }
 0x683   : > { %v5240_v3 = vsel %vm5159_vm8, %v5143_v63, %v4067_v62  ;;  %v6320_v60 = vadd.f32 %v12909_v43, %v6217_v51  ;;  %v5020_v20 = vsel %vm4965_vm6, %v4923_v13, %v15621_v59  ;;  %v4660_v46 = vsel %vm284_vm0, %v723_v53, %v15622_v29  ;;  %v15626_v9 = vld [vmem:[#allocation404_spill] sm:$0xff]  ;;  %v15627_v18 = vld [vmem:[#allocation155_spill] sm:$0xff]  ;;  %v15630_v47 = vld [vmem:[#allocation245_spill] sm:$0xff] }
 0x684   : > { %v5337_v40 = vsel %vm5256_vm9, %v5240_v3, %v4451_v42  ;;  %v8862_v19 = vpop.f32.mrb[16].mxu0  ;;  %v6417_v49 = vmax.f32 %v6321_v21, 0.0  ;;  %v4827_v42 = vsel %vm4771_vm4, %v4730_v6, %v15623_v0  ;;  %v5117_v44 = vsel %vm5062_vm7, %v5020_v20, %v15624_v28  ;;  %v15628_v51 = vld [vmem:[#allocation496_spill] sm:$0xff]  ;;  %v15629_v21 = vld [vmem:[#allocation71_spill] sm:$0xff] }
 0x685   : > { %8956 = vmatprep.mubr.msk.f32.mxu1 %vm5358_vm10, %v5337_v40  ;;  %v4453_v35 = vpop.permute.xlu0 %4452  ;;  %v6220_v37 = vmul.f32 %v8862_v19, %v12897_v12  ;;  %v5797_v36 = vpop.f32.mrb[17].mxu0  ;;  %v6416_v33 = vmax.f32 %v6320_v60, 0.0  ;;  %v6604_v17 = vld [vmem:[#allocation2 + $0x50] ss:$2 sm:$0xff]  ;;  %v6700_v48 = vld [vmem:[#allocation2 + $0x51] ss:$2 sm:$0xff]  ;;  %v6789_v24 = vmax.f32 %v6602_v39, %v6698_v34  ;;  %v4924_v3 = vsel %vm4868_vm5, %v4827_v42, %v15625_v2 }
 0x686   : > { %v4069_v50 = vpop.permute.xlu1 %4068  ;;  %v6219_v41 = vmul.f32 %v12897_v12, %v5797_v36  ;;  %6513 = vst.msk [vmem:[#allocation2 + $0x78] sm:$0xff] %vm4674_vm2, %v6417_v49  ;;  %v6790_v55 = vmax.f32 %v6604_v17, %v6700_v48  ;;  %v5021_v5 = vsel %vm4965_vm6, %v4924_v3, %v15626_v9  ;;  %v4757_v31 = vsel %vm4674_vm2, %v4660_v46, %v15627_v18  ;;  %v15631_v45 = vld [vmem:[#allocation336_spill] sm:$0xff]  ;;  %v15633_v36 = vld [vmem:[#allocation427_spill] sm:$0xff] }
 0x687   : > { %v5241_v30 = vsel %vm5159_vm8, %v5144_v1, %v4069_v50  ;;  %v6323_v52 = vadd.f32 %v12909_v43, %v6220_v37  ;;  %6512 = vst.msk [vmem:[#allocation2 + $0x70] sm:$0xff] %vm4674_vm2, %v6416_v33  ;;  %v697_v1 = vld [vmem:[#allocation3 + $0x2d0] sm:$0xff]  ;;  %v4661_v50 = vsel %vm284_vm0, %v724_v7, %v15629_v21  ;;  %v4854_v26 = vsel %vm4771_vm4, %v4757_v31, %v15630_v47  ;;  %v15632_v49 = vld [vmem:[#allocation160_spill] sm:$0xff]  ;;  %v15636_v29 = vld [vmem:[#allocation519_spill] sm:$0xff] }
 0x688   : > { %v5338_v10 = vsel %vm5256_vm9, %v5241_v30, %v4453_v35  ;;  %v6322_v56 = vadd.f32 %v12909_v43, %v6219_v41  ;;  %v6835_v16 = vmax.f32 %v6789_v24, %v6790_v55  ;;  %v5118_v35 = vsel %vm5062_vm7, %v5021_v5, %v15628_v51  ;;  %v15634_v20 = vld [vmem:[#allocation40_spill] sm:$0xff]  ;;  %v15635_v41 = vld [vmem:[#allocation250_spill] sm:$0xff] }
 0x689   : > { %8957 = vmatmul.mubr.msk.f32.gmra.mrb[20].mxu1 %vm5358_vm10, %v5338_v10  ;;  %v4399_v27 = vpop.permute.xlu0 %4398  ;;  %v8865_v54 = vpop.f32.mrb[18].mxu0  ;;  %v6419_v11 = vmax.f32 %v6323_v52, 0.0  ;;  %v6969_v22 = vld [vmem:[#allocation4 + $0x21] sm:$0xff]  ;;  %v4951_v60 = vsel %vm4868_vm5, %v4854_v26, %v15631_v45  ;;  %v6606_v30 = vld [vmem:[#allocation2 + $0x60] ss:$2 sm:$0xff]  ;;  %v4758_v37 = vsel %vm4674_vm2, %v4661_v50, %v15632_v49  ;;  %v4634_v33 = vsel %vm284_vm0, %v697_v1, %v15634_v20 }
 0x68a   : > { %v4015_v63 = vpop.permute.xlu1 %4014  ;;  %v6222_v58 = vmul.f32 %v8865_v54, %v12897_v12  ;;  %v5807_v57 = vpop.f32.mrb[19].mxu0  ;;  %v6418_v40 = vmax.f32 %v6322_v56, 0.0  ;;  %6921 = vst.msk [vmem:[#allocation4 + $0x31] sm:$0xff] %vm4674_vm2, %v6835_v16  ;;  %7188 = vrot.lane.b32.xlu0 %v6969_v22, %s9100_s9  ;;  %v6702_v19 = vld [vmem:[#allocation2 + $0x61] ss:$2 sm:$0xff]  ;;  %v5048_v10 = vsel %vm4965_vm6, %v4951_v60, %v15633_v36  ;;  %v698_v55 = vld [vmem:[#allocation3 + $0x2d8] sm:$0xff] }
 0x68b   : > { %v5214_v62 = vsel %vm5159_vm8, %v5117_v44, %v4015_v63  ;;  %v6221_v61 = vmul.f32 %v12897_v12, %v5807_v57  ;;  %6515 = vst.msk [vmem:[#allocation2 + $0x88] sm:$0xff] %vm4674_vm2, %v6419_v11  ;;  %v5145_v46 = vsel %vm5062_vm7, %v5048_v10, %v15636_v29  ;;  %v6791_v17 = vmax.f32 %v6606_v30, %v6702_v19  ;;  %v15637_v56 = vld [vmem:[#allocation341_spill] sm:$0xff]  ;;  %v15638_v11 = vld [vmem:[#allocation432_spill] sm:$0xff]  ;;  %v15643_v47 = vld [vmem:[#allocation310_spill] sm:$0xff] }
 0x68c   : > { %v5311_v32 = vsel %vm5256_vm9, %v5214_v62, %v4399_v27  ;;  %v6325_v25 = vadd.f32 %v12909_v43, %v6222_v58  ;;  %6514 = vst.msk [vmem:[#allocation2 + $0x80] sm:$0xff] %vm4674_vm2, %v6418_v40  ;;  %v4855_v27 = vsel %vm4771_vm4, %v4758_v37, %v15635_v41  ;;  %v15639_v16 = vld [vmem:[#allocation129_spill] sm:$0xff]  ;;  %v15644_v19 = vld [vmem:[#allocation134_spill] sm:$0xff]  ;;  %v15646_v10 = vld [vmem:[#allocation224_spill] sm:$0xff] }
 0x68d   : > { %8917 = vmatprep.mubr.msk.f32.mxu0 %vm5358_vm10, %v5311_v32  ;;  %v4401_v4 = vpop.permute.xlu0 %4400  ;;  %v6324_v8 = vadd.f32 %v12909_v43, %v6221_v61  ;;  %v4952_v62 = vsel %vm4868_vm5, %v4855_v27, %v15637_v56  ;;  %v4731_v40 = vsel %vm4674_vm2, %v4634_v33, %v15639_v16  ;;  %v15640_v61 = vld [vmem:[#allocation524_spill] sm:$0xff]  ;;  %v725_v36 = vld [vmem:[#allocation3 + $0x450] sm:$0xff] }
 0x68e   : > { %v4017_v23 = vpop.permute.xlu1 %4016  ;;  %v6421_v15 = vmax.f32 %v6325_v25, 0.0  ;;  %v6608_v0 = vld [vmem:[#allocation2 + $0x70] ss:$2 sm:$0xff]  ;;  %v6704_v42 = vld [vmem:[#allocation2 + $0x71] ss:$2 sm:$0xff]  ;;  %v5049_v58 = vsel %vm4965_vm6, %v4952_v62, %v15638_v11 }
 0x68f   : > { %v5215_v53 = vsel %vm5159_vm8, %v5118_v35, %v4017_v23  ;;  %v6420_v38 = vmax.f32 %v6324_v8, 0.0  ;;  %v6792_v48 = vmax.f32 %v6608_v0, %v6704_v42  ;;  %v15641_v35 = vld [vmem:[#allocation45_spill] sm:$0xff]  ;;  %v15642_v23 = vld [vmem:[#allocation219_spill] sm:$0xff]  ;;  %v15652_v11 = vld [vmem:[#allocation498_spill] sm:$0xff] }
 0x690   : > { %v5312_v34 = vsel %vm5256_vm9, %v5215_v53, %v4401_v4  ;;  %6517 = vst.msk [vmem:[#allocation2 + $0x98] sm:$0xff] %vm4674_vm2, %v6421_v15  ;;  %v5146_v4 = vsel %vm5062_vm7, %v5049_v58, %v15640_v61  ;;  %v4635_v25 = vsel %vm284_vm0, %v698_v55, %v15641_v35  ;;  %v4828_v22 = vsel %vm4771_vm4, %v4731_v40, %v15642_v23  ;;  %v15650_v55 = vld [vmem:[#allocation406_spill] sm:$0xff]  ;;  %v15654_v61 = vld [vmem:[#allocation73_spill] sm:$0xff] }
 0x691   : > { %v8868_v14 = vpop.f32.mrb[20].mxu0  ;;  %8918 = vmatmul.mubr.msk.f32.gmra.mrb[54].mxu0 %vm5358_vm10, %v5312_v34  ;;  %v4455_v59 = vpop.permute.xlu0 %4454  ;;  %6516 = vst.msk [vmem:[#allocation2 + $0x90] sm:$0xff] %vm4674_vm2, %v6420_v38  ;;  %v6836_v57 = vmax.f32 %v6791_v17, %v6792_v48  ;;  %v6970_v51 = vld [vmem:[#allocation4 + $0x31] sm:$0xff]  ;;  %v4925_v26 = vsel %vm4868_vm5, %v4828_v22, %v15643_v47  ;;  %v4732_v15 = vsel %vm4674_vm2, %v4635_v25, %v15644_v19 }
 0x692   : > { %v6224_v13 = vmul.f32 %v8868_v14, %v12897_v12  ;;  %v5817_v39 = vpop.f32.mrb[21].mxu0  ;;  %v4071_v44 = vpop.permute.xlu1 %4070  ;;  %7190 = vrot.lane.b32.xlu1 %v6970_v51, %s9100_s9  ;;  %v4829_v38 = vsel %vm4771_vm4, %v4732_v15, %v15646_v10  ;;  %v15660_v10 = vld [vmem:[#allocation343_spill] sm:$0xff] }
 0x693   : > { %v6223_v6 = vmul.f32 %v12897_v12, %v5817_v39  ;;  %v5242_v63 = vsel %vm5159_vm8, %v5145_v46, %v4071_v44  ;;  %6922 = vst.msk [vmem:[#allocation4 + $0x41] sm:$0xff] %vm4674_vm2, %v6836_v57  ;;  %v6610_v8 = vld [vmem:[#allocation2 + $0x80] ss:$2 sm:$0xff]  ;;  %v6706_v53 = vld [vmem:[#allocation2 + $0x81] ss:$2 sm:$0xff] }
 0x694   : > { %v6327_v28 = vadd.f32 %v12909_v43, %v6224_v13  ;;  %v5339_v3 = vsel %vm5256_vm9, %v5242_v63, %v4455_v59  ;;  %v15645_v13 = vld [vmem:[#allocation401_spill] sm:$0xff]  ;;  %v6793_v29 = vmax.f32 %v6610_v8, %v6706_v53  ;;  %v699_v53 = vld [vmem:[#allocation3 + $0x2e8] sm:$0xff] }
 0x695   : > { %v6326_v52 = vadd.f32 %v12909_v43, %v6223_v6  ;;  %v8871_v24 = vpop.f32.mrb[22].mxu0  ;;  %8959 = vmatprep.mubr.msk.f32.mxu1 %vm5358_vm10, %v5339_v3  ;;  %v4457_v5 = vpop.permute.xlu0 %4456  ;;  %v5022_v39 = vsel %vm4965_vm6, %v4925_v26, %v15645_v13  ;;  %v15647_v6 = vld [vmem:[#allocation493_spill] sm:$0xff] }
 0x696   : > { %v6423_v54 = vmax.f32 %v6327_v28, 0.0  ;;  %v6226_v7 = vmul.f32 %v8871_v24, %v12897_v12  ;;  %v5827_v2 = vpop.f32.mrb[23].mxu0  ;;  %v4073_v31 = vpop.permute.xlu1 %4072  ;;  %v5119_v59 = vsel %vm5062_vm7, %v5022_v39, %v15647_v6  ;;  %v15648_v28 = vld [vmem:[#allocation315_spill] sm:$0xff]  ;;  %v726_v24 = vld [vmem:[#allocation3 + $0x458] sm:$0xff] }
 0x697   : > { %v6422_v32 = vmax.f32 %v6326_v52, 0.0  ;;  %v6225_v9 = vmul.f32 %v12897_v12, %v5827_v2  ;;  %v5243_v21 = vsel %vm5159_vm8, %v5146_v4, %v4073_v31  ;;  %v4926_v44 = vsel %vm4868_vm5, %v4829_v38, %v15648_v28  ;;  %v15649_v52 = vld [vmem:[#allocation68_spill] sm:$0xff]  ;;  %v15651_v2 = vld [vmem:[#allocation157_spill] sm:$0xff]  ;;  %v15663_v28 = vld [vmem:[#allocation131_spill] sm:$0xff] }
 0x698   : > { %6519 = vst.msk [vmem:[#allocation2 + $0xa8] sm:$0xff] %vm4674_vm2, %v6423_v54  ;;  %v6329_v18 = vadd.f32 %v12909_v43, %v6226_v7  ;;  %v5340_v30 = vsel %vm5256_vm9, %v5243_v21, %v4457_v5  ;;  %v6612_v20 = vld [vmem:[#allocation2 + $0x90] ss:$2 sm:$0xff]  ;;  %v6708_v33 = vld [vmem:[#allocation2 + $0x91] ss:$2 sm:$0xff]  ;;  %v4662_v63 = vsel %vm284_vm0, %v725_v36, %v15649_v52  ;;  %v5023_v56 = vsel %vm4965_vm6, %v4926_v44, %v15650_v55 }
 0x699   : > { %6518 = vst.msk [vmem:[#allocation2 + $0xa0] sm:$0xff] %vm4674_vm2, %v6422_v32  ;;  %v6328_v1 = vadd.f32 %v12909_v43, %v6225_v9  ;;  %v8874_v50 = vpop.f32.mrb[24].mxu0  ;;  %8960 = vmatmul.mubr.msk.f32.gmra.mrb[22].mxu1 %vm5358_vm10, %v5340_v30  ;;  %v4403_v37 = vpop.permute.xlu0 %4402  ;;  %v6794_v46 = vmax.f32 %v6612_v20, %v6708_v33  ;;  %v4759_v3 = vsel %vm4674_vm2, %v4662_v63, %v15651_v2  ;;  %v15653_v9 = vld [vmem:[#allocation247_spill] sm:$0xff]  ;;  %v15661_v20 = vld [vmem:[#allocation42_spill] sm:$0xff] }
 0x69a   : > { %v6425_v14 = vmax.f32 %v6329_v18, 0.0  ;;  %v6228_v45 = vmul.f32 %v8874_v50, %v12897_v12  ;;  %v5837_v60 = vpop.f32.mrb[25].mxu0  ;;  %v4019_v27 = vpop.permute.xlu1 %4018  ;;  %v5120_v58 = vsel %vm5062_vm7, %v5023_v56, %v15652_v11  ;;  %v6971_v32 = vld [vmem:[#allocation4 + $0x41] sm:$0xff]  ;;  %v4856_v5 = vsel %vm4771_vm4, %v4759_v3, %v15653_v9 }
 0x69b   : > { %v6424_v34 = vmax.f32 %v6328_v1, 0.0  ;;  %v6227_v49 = vmul.f32 %v12897_v12, %v5837_v60  ;;  %v5216_v42 = vsel %vm5159_vm8, %v5119_v59, %v4019_v27  ;;  %v6837_v62 = vmax.f32 %v6793_v29, %v6794_v46  ;;  %7192 = vrot.lane.b32.xlu0 %v6971_v32, %s9100_s9  ;;  %v15655_v18 = vld [vmem:[#allocation338_spill] sm:$0xff]  ;;  %v15657_v50 = vld [vmem:[#allocation429_spill] sm:$0xff]  ;;  %v15668_v32 = vld [vmem:[#allocation403_spill] sm:$0xff] }
 0x69c   : > { %6521 = vst.msk [vmem:[#allocation2 + $0xb8] sm:$0xff] %vm4674_vm2, %v6425_v14  ;;  %v6331_v41 = vadd.f32 %v12909_v43, %v6228_v45  ;;  %v5313_v48 = vsel %vm5256_vm9, %v5216_v42, %v4403_v37  ;;  %v4663_v4 = vsel %vm284_vm0, %v726_v24, %v15654_v61  ;;  %v4953_v31 = vsel %vm4868_vm5, %v4856_v5, %v15655_v18  ;;  %v15656_v1 = vld [vmem:[#allocation162_spill] sm:$0xff]  ;;  %v15658_v14 = vld [vmem:[#allocation252_spill] sm:$0xff]  ;;  %v15659_v60 = vld [vmem:[#allocation521_spill] sm:$0xff] }
 0x69d   : > { %6520 = vst.msk [vmem:[#allocation2 + $0xb0] sm:$0xff] %vm4674_vm2, %v6424_v34  ;;  %v6330_v0 = vadd.f32 %v12909_v43, %v6227_v49  ;;  %8920 = vmatprep.mubr.msk.f32.mxu0 %vm5358_vm10, %v5313_v48  ;;  %v4405_v7 = vpop.permute.xlu0 %4404  ;;  %6923 = vst.msk [vmem:[#allocation4 + $0x51] sm:$0xff] %vm4674_vm2, %v6837_v62  ;;  %v4760_v21 = vsel %vm4674_vm2, %v4663_v4, %v15656_v1  ;;  %v5050_v47 = vsel %vm4965_vm6, %v4953_v31, %v15657_v50  ;;  %v700_v42 = vld [vmem:[#allocation3 + $0x2f0] sm:$0xff]  ;;  %v15669_v61 = vld [vmem:[#allocation136_spill] sm:$0xff] }
 0x69e   : > { %v6427_v17 = vmax.f32 %v6331_v41, 0.0  ;;  %v4021_v57 = vpop.permute.xlu1 %4020  ;;  %v4857_v45 = vsel %vm4771_vm4, %v4760_v21, %v15658_v14  ;;  %v5147_v30 = vsel %vm5062_vm7, %v5050_v47, %v15659_v60  ;;  %v4636_v33 = vsel %vm284_vm0, %v699_v53, %v15661_v20  ;;  %v15662_v41 = vld [vmem:[#allocation434_spill] sm:$0xff]  ;;  %v15665_v24 = vld [vmem:[#allocation221_spill] sm:$0xff]  ;;  %v15670_v18 = vld [vmem:[#allocation495_spill] sm:$0xff] }
 0x69f   : > { %v6426_v54 = vmax.f32 %v6330_v0, 0.0  ;;  %v5217_v16 = vsel %vm5159_vm8, %v5120_v58, %v4021_v57  ;;  %v4954_v38 = vsel %vm4868_vm5, %v4857_v45, %v15660_v10  ;;  %v4733_v44 = vsel %vm4674_vm2, %v4636_v33, %v15663_v28  ;;  %v15667_v58 = vld [vmem:[#allocation47_spill] sm:$0xff]  ;;  %v15672_v21 = vld [vmem:[#allocation317_spill] sm:$0xff]  ;;  %v15673_v14 = vld [vmem:[#allocation70_spill] sm:$0xff] }
 0x6a0   : > { %6523 = vst.msk [vmem:[#allocation2 + $0xc8] sm:$0xff] %vm4674_vm2, %v6427_v17  ;;  %v8877_v40 = vpop.f32.mrb[26].mxu0  ;;  %v6614_v51 = vld [vmem:[#allocation2 + $0xa0] ss:$2 sm:$0xff]  ;;  %v6710_v35 = vld [vmem:[#allocation2 + $0xa1] ss:$2 sm:$0xff]  ;;  %v5314_v22 = vsel %vm5256_vm9, %v5217_v16, %v4405_v7  ;;  %v5051_v27 = vsel %vm4965_vm6, %v4954_v38, %v15662_v41  ;;  %v4830_v55 = vsel %vm4771_vm4, %v4733_v44, %v15665_v24  ;;  %v4637_v57 = vsel %vm284_vm0, %v700_v42, %v15667_v58 }
 0x6a1   : > { %6522 = vst.msk [vmem:[#allocation2 + $0xc0] sm:$0xff] %vm4674_vm2, %v6426_v54  ;;  %v6230_v25 = vmul.f32 %v8877_v40, %v12897_v12  ;;  %v5847_v23 = vpop.f32.mrb[27].mxu0  ;;  %8921 = vmatmul.mubr.msk.f32.gmra.mrb[56].mxu0 %vm5358_vm10, %v5314_v22  ;;  %v4459_v8 = vpop.permute.xlu0 %4458  ;;  %v6795_v34 = vmax.f32 %v6614_v51, %v6710_v35  ;;  %v15664_v17 = vld [vmem:[#allocation526_spill] sm:$0xff]  ;;  %v15666_v54 = vld [vmem:[#allocation312_spill] sm:$0xff]  ;;  %v4734_v4 = vsel %vm4674_vm2, %v4637_v57, %v15669_v61 }
 0x6a2   : > { %v6229_v26 = vmul.f32 %v12897_v12, %v5847_v23  ;;  %v4075_v39 = vpop.permute.xlu1 %4074  ;;  %v5148_v48 = vsel %vm5062_vm7, %v5051_v27, %v15664_v17  ;;  %v4927_v7 = vsel %vm4868_vm5, %v4830_v55, %v15666_v54  ;;  %v727_v40 = vld [vmem:[#allocation3 + $0x468] sm:$0xff]  ;;  %v6975_v17 = vld [vmem:[#allocation4 + $0xa1] sm:$0xff] }
 0x6a3   : > { %v6333_v13 = vadd.f32 %v12909_v43, %v6230_v25  ;;  %v5244_v36 = vsel %vm5159_vm8, %v5147_v30, %v4075_v39  ;;  %v5024_v9 = vsel %vm4965_vm6, %v4927_v7, %v15668_v32  ;;  %v15671_v25 = vld [vmem:[#allocation226_spill] sm:$0xff]  ;;  %v4664_v45 = vsel %vm284_vm0, %v727_v40, %v15673_v14  ;;  %v15674_v60 = vld [vmem:[#allocation408_spill] sm:$0xff]  ;;  %v15682_v32 = vld [vmem:[#allocation75_spill] sm:$0xff] }
 0x6a4   : > { %v6616_v19 = vld [vmem:[#allocation2 + $0xb0] ss:$2 sm:$0xff]  ;;  %v6712_v15 = vld [vmem:[#allocation2 + $0xb1] ss:$2 sm:$0xff]  ;;  %v6332_v37 = vadd.f32 %v12909_v43, %v6229_v26  ;;  %v5341_v59 = vsel %vm5256_vm9, %v5244_v36, %v4459_v8  ;;  %v6972_v63 = vld [vmem:[#allocation4 + $0x51] sm:$0xff]  ;;  %v5121_v31 = vsel %vm5062_vm7, %v5024_v9, %v15670_v18  ;;  %v4831_v23 = vsel %vm4771_vm4, %v4734_v4, %v15671_v25 }
 0x6a5   : > { %v6796_v49 = vmax.f32 %v6616_v19, %v6712_v15  ;;  %v6429_v6 = vmax.f32 %v6333_v13, 0.0  ;;  %8962 = vmatprep.mubr.msk.f32.mxu1 %vm5358_vm10, %v5341_v59  ;;  %v4461_v0 = vpop.permute.xlu0 %4460  ;;  %7194 = vrot.lane.b32.xlu1 %v6972_v63, %s9100_s9  ;;  %v4928_v50 = vsel %vm4868_vm5, %v4831_v23, %v15672_v21  ;;  %v15675_v13 = vld [vmem:[#allocation159_spill] sm:$0xff]  ;;  %v15684_v18 = vld [vmem:[#allocation164_spill] sm:$0xff]  ;;  %v15686_v21 = vld [vmem:[#allocation254_spill] sm:$0xff] }
 0x6a6   : > { %v6428_v46 = vmax.f32 %v6332_v37, 0.0  ;;  %v4077_v52 = vpop.permute.xlu1 %4076  ;;  %v8880_v62 = vpop.f32.mrb[28].mxu0  ;;  %v5025_v30 = vsel %vm4965_vm6, %v4928_v50, %v15674_v60  ;;  %v4761_v39 = vsel %vm4674_vm2, %v4664_v45, %v15675_v13  ;;  %v15688_v14 = vld [vmem:[#allocation345_spill] sm:$0xff]  ;;  %v730_v13 = vld [vmem:[#allocation3 + $0x488] sm:$0xff] }
 0x6a7   : > { %v6838_v29 = vmax.f32 %v6795_v34, %v6796_v49  ;;  %6525 = vst.msk [vmem:[#allocation2 + $0xd8] sm:$0xff] %vm4674_vm2, %v6429_v6  ;;  %v5245_v56 = vsel %vm5159_vm8, %v5148_v48, %v4077_v52  ;;  %v6232_v2 = vmul.f32 %v8880_v62, %v12897_v12  ;;  %v5857_v3 = vpop.f32.mrb[29].mxu0  ;;  %v15676_v34 = vld [vmem:[#allocation500_spill] sm:$0xff]  ;;  %v15677_v6 = vld [vmem:[#allocation249_spill] sm:$0xff]  ;;  %v15679_v52 = vld [vmem:[#allocation431_spill] sm:$0xff] }
 0x6a8   : > { %6524 = vst.msk [vmem:[#allocation2 + $0xd0] sm:$0xff] %vm4674_vm2, %v6428_v46  ;;  %v5342_v11 = vsel %vm5256_vm9, %v5245_v56, %v4461_v0  ;;  %v6231_v5 = vmul.f32 %v12897_v12, %v5857_v3  ;;  %v6618_v47 = vld [vmem:[#allocation2 + $0xc0] ss:$2 sm:$0xff]  ;;  %v6714_v26 = vld [vmem:[#allocation2 + $0xc1] ss:$2 sm:$0xff]  ;;  %v5122_v49 = vsel %vm5062_vm7, %v5025_v30, %v15676_v34  ;;  %v4858_v59 = vsel %vm4771_vm4, %v4761_v39, %v15677_v6  ;;  %v728_v48 = vld [vmem:[#allocation3 + $0x470] sm:$0xff] }
 0x6a9   : > { %6924 = vst.msk [vmem:[#allocation4 + $0x61] sm:$0xff] %vm4674_vm2, %v6838_v29  ;;  %8963 = vmatmul.mubr.msk.f32.gmra.mrb[24].mxu1 %vm5358_vm10, %v5342_v11  ;;  %v4407_v16 = vpop.permute.xlu0 %4406  ;;  %v6335_v51 = vadd.f32 %v12909_v43, %v6232_v2  ;;  %v6797_v20 = vmax.f32 %v6618_v47, %v6714_v26  ;;  %v729_v29 = vld [vmem:[#allocation3 + $0x480] sm:$0xff]  ;;  %v15678_v46 = vld [vmem:[#allocation340_spill] sm:$0xff]  ;;  %v4665_v9 = vsel %vm284_vm0, %v728_v48, %v15682_v32  ;;  %v15687_v47 = vld [vmem:[#allocation342_spill] sm:$0xff] }
 0x6aa   : > { %v4023_v35 = vpop.permute.xlu1 %4022  ;;  %v6334_v22 = vadd.f32 %v12909_v43, %v6231_v5  ;;  %v4955_v0 = vsel %vm4868_vm5, %v4858_v59, %v15678_v46  ;;  %v15680_v62 = vld [vmem:[#allocation523_spill] sm:$0xff]  ;;  %v15681_v3 = vld [vmem:[#allocation72_spill] sm:$0xff]  ;;  %v15683_v5 = vld [vmem:[#allocation161_spill] sm:$0xff] }
 0x6ab   : > { %v5218_v1 = vsel %vm5159_vm8, %v5121_v31, %v4023_v35  ;;  %v6431_v8 = vmax.f32 %v6335_v51, 0.0  ;;  %v8883_v27 = vpop.f32.mrb[30].mxu0  ;;  %v5052_v63 = vsel %vm4965_vm6, %v4955_v0, %v15679_v52  ;;  %v4666_v11 = vsel %vm284_vm0, %v729_v29, %v15681_v3  ;;  %v15685_v51 = vld [vmem:[#allocation251_spill] sm:$0xff]  ;;  %v15689_v60 = vld [vmem:[#allocation433_spill] sm:$0xff]  ;;  %v15690_v39 = vld [vmem:[#allocation436_spill] sm:$0xff] }
 0x6ac   : > { %v5315_v53 = vsel %vm5256_vm9, %v5218_v1, %v4407_v16  ;;  %v6430_v19 = vmax.f32 %v6334_v22, 0.0  ;;  %v6234_v42 = vmul.f32 %v8883_v27, %v12897_v12  ;;  %v5867_v28 = vpop.f32.mrb[31].mxu0  ;;  %v5149_v54 = vsel %vm5062_vm7, %v5052_v63, %v15680_v62  ;;  %v15693_v0 = vld [vmem:[#allocation74_spill] sm:$0xff]  ;;  %v15697_v62 = vld [vmem:[#allocation253_spill] sm:$0xff] }
 0x6ad   : > { %8923 = vmatprep.mubr.msk.f32.mxu0 %vm5358_vm10, %v5315_v53  ;;  %v4409_v15 = vpop.permute.xlu0 %4408  ;;  %6527 = vst.msk [vmem:[#allocation2 + $0xe8] sm:$0xff] %vm4674_vm2, %v6431_v8  ;;  %v6233_v55 = vmul.f32 %v12897_v12, %v5867_v28  ;;  %v4763_v16 = vsel %vm4674_vm2, %v4666_v11, %v15683_v5  ;;  %v4762_v31 = vsel %vm4674_vm2, %v4665_v9, %v15684_v18  ;;  %v15694_v28 = vld [vmem:[#allocation77_spill] sm:$0xff]  ;;  %v15696_v52 = vld [vmem:[#allocation166_spill] sm:$0xff]  ;;  %v15700_v9 = vld [vmem:[#allocation347_spill] sm:$0xff] }
 0x6ae   : > { %v4025_v10 = vpop.permute.xlu1 %4024  ;;  %6526 = vst.msk [vmem:[#allocation2 + $0xe0] sm:$0xff] %vm4674_vm2, %v6430_v19  ;;  %v6337_v7 = vadd.f32 %v12909_v43, %v6234_v42  ;;  %v4860_v35 = vsel %vm4771_vm4, %v4763_v16, %v15685_v51  ;;  %v4859_v50 = vsel %vm4771_vm4, %v4762_v31, %v15686_v21  ;;  %v15701_v18 = vld [vmem:[#allocation435_spill] sm:$0xff] }
 0x6af   : > { %v6620_v37 = vld [vmem:[#allocation2 + $0xd0] ss:$2 sm:$0xff]  ;;  %v6716_v36 = vld [vmem:[#allocation2 + $0xd1] ss:$2 sm:$0xff]  ;;  %v5219_v41 = vsel %vm5159_vm8, %v5122_v49, %v4025_v10  ;;  %v6336_v58 = vadd.f32 %v12909_v43, %v6233_v55  ;;  %v4957_v26 = vsel %vm4868_vm5, %v4860_v35, %v15687_v47  ;;  %v4956_v45 = vsel %vm4868_vm5, %v4859_v50, %v15688_v14  ;;  %v15692_v10 = vld [vmem:[#allocation528_spill] sm:$0xff] }
 0x6b0   : > { %v6973_v38 = vld [vmem:[#allocation4 + $0x61] sm:$0xff]  ;;  %v6798_v33 = vmax.f32 %v6620_v37, %v6716_v36  ;;  %v5316_v44 = vsel %vm5256_vm9, %v5219_v41, %v4409_v15  ;;  %v6433_v40 = vmax.f32 %v6337_v7, 0.0  ;;  %v5054_v30 = vsel %vm4965_vm6, %v4957_v26, %v15689_v60  ;;  %v15698_v7 = vld [vmem:[#allocation256_spill] sm:$0xff]  ;;  %v15703_v50 = vld [vmem:[#allocation527_spill] sm:$0xff] }
 0x6b1   : > { %7196 = vrot.lane.b32.xlu0 %v6973_v38, %s9100_s9  ;;  %8924 = vmatmul.mubr.msk.f32.gmra.mrb[58].mxu0 %vm5358_vm10, %v5316_v44  ;;  %v4463_v56 = vpop.permute.xlu0 %4462  ;;  %v6432_v25 = vmax.f32 %v6336_v58, 0.0  ;;  %v731_v15 = vld [vmem:[#allocation3 + $0x498] sm:$0xff]  ;;  %v5053_v34 = vsel %vm4965_vm6, %v4956_v45, %v15690_v39  ;;  %v15691_v49 = vld [vmem:[#allocation525_spill] sm:$0xff] }
 0x6b2   : > { %v6839_v24 = vmax.f32 %v6797_v20, %v6798_v33  ;;  %v4079_v2 = vpop.permute.xlu1 %4078  ;;  %v8886_v61 = vpop.f32.mrb[32].mxu0  ;;  %6529 = vst.msk [vmem:[#allocation2 + $0xf8] sm:$0xff] %vm4674_vm2, %v6433_v40  ;;  %v5151_v37 = vsel %vm5062_vm7, %v5054_v30, %v15691_v49  ;;  %v5150_v38 = vsel %vm5062_vm7, %v5053_v34, %v15692_v10  ;;  %v4668_v42 = vsel %vm284_vm0, %v731_v15, %v15693_v0  ;;  %v15705_v49 = vld [vmem:[#allocation76_spill] sm:$0xff]  ;;  %v15706_v10 = vld [vmem:[#allocation79_spill] sm:$0xff] }
 0x6b3   : > { %v5246_v57 = vsel %vm5159_vm8, %v5149_v54, %v4079_v2  ;;  %v6236_v23 = vmul.f32 %v8886_v61, %v12897_v12  ;;  %v5877_v22 = vpop.f32.mrb[33].mxu0  ;;  %6528 = vst.msk [vmem:[#allocation2 + $0xf0] sm:$0xff] %vm4674_vm2, %v6432_v25  ;;  %v13360_v61 = vld [vmem:[%s14624_s2] ss:$0 sm:$0xff] }
 0x6b4   : > { %6925 = vst.msk [vmem:[#allocation4 + $0x71] sm:$0xff] %vm4674_vm2, %v6839_v24  ;;  %v5343_v4 = vsel %vm5256_vm9, %v5246_v57, %v4463_v56  ;;  %v6235_v8 = vmul.f32 %v12897_v12, %v5877_v22  ;;  %v15699_v57 = vld [vmem:[#allocation344_spill] sm:$0xff]  ;;  %v13368_v25 = vld [vmem:[%s14625_s3] ss:$0 sm:$0xff]  ;;  %v733_v22 = vld [vmem:[#allocation3 + $0x4b0] sm:$0xff] }
 0x6b5   : > { %7200 = vrot.lane.b32.xlu0 %v6975_v17, %s9100_s9  ;;  %8965 = vmatprep.mubr.msk.f32.mxu1 %vm5358_vm10, %v5343_v4  ;;  %v4083_v1 = vpop.permute.xlu0 %4082  ;;  %v6339_v19 = vadd.f32 %v12909_v43, %v6236_v23  ;;  %v15695_v17 = vld [vmem:[#allocation163_spill] sm:$0xff] }
 0x6b6   : > { %v4081_v53 = vpop.permute.xlu1 %4080  ;;  %v6338_v36 = vadd.f32 %v12909_v43, %v6235_v8  ;;  %v5248_v59 = vsel %vm5159_vm8, %v5151_v37, %v4083_v1  ;;  %v4667_v43 = vsel %vm284_vm0, %v730_v13, %v15694_v28  ;;  %v4765_v48 = vsel %vm4674_vm2, %v4668_v42, %v15695_v17  ;;  %v6622_v24 = vld [vmem:[#allocation2 + $0xe0] ss:$2 sm:$0xff]  ;;  %v6718_v55 = vld [vmem:[#allocation2 + $0xe1] ss:$2 sm:$0xff]  ;;  %v15702_v1 = vld [vmem:[#allocation438_spill] sm:$0xff] }
 0x6b7   : > { %v6435_v6 = vmax.f32 %v6339_v19, 0.0  ;;  %v5247_v41 = vsel %vm5159_vm8, %v5150_v38, %v4081_v53  ;;  %v4764_v63 = vsel %vm4674_vm2, %v4667_v43, %v15696_v52  ;;  %v4862_v54 = vsel %vm4771_vm4, %v4765_v48, %v15697_v62  ;;  %v732_v8 = vld [vmem:[#allocation3 + $0x4a0] sm:$0xff]  ;;  %v15704_v53 = vld [vmem:[#allocation530_spill] sm:$0xff] }
 0x6b8   : > { %v6434_v33 = vmax.f32 %v6338_v36, 0.0  ;;  %v4861_v2 = vsel %vm4771_vm4, %v4764_v63, %v15698_v7  ;;  %v4959_v32 = vsel %vm4868_vm5, %v4862_v54, %v15699_v57  ;;  %v6799_v51 = vmax.f32 %v6622_v24, %v6718_v55  ;;  %v15710_v28 = vld [vmem:[#allocation258_spill] sm:$0xff]  ;;  %v15712_v63 = vld [vmem:[#allocation349_spill] sm:$0xff]  ;;  %v735_v54 = vld [vmem:[#allocation3 + $0x4c8] sm:$0xff] }
 0x6b9   : > { %v4467_v20 = vpop.permute.xlu0 %4466  ;;  %6531 = vst.msk [vmem:[#allocation2 + $0x108] sm:$0xff] %vm4674_vm2, %v6435_v6  ;;  %v4958_v5 = vsel %vm4868_vm5, %v4861_v2, %v15700_v9  ;;  %v5056_v31 = vsel %vm4965_vm6, %v4959_v32, %v15701_v18  ;;  %v4670_v37 = vsel %vm284_vm0, %v733_v22, %v15705_v49  ;;  %v4669_v38 = vsel %vm284_vm0, %v732_v8, %v15706_v10  ;;  %v15707_v6 = vld [vmem:[#allocation165_spill] sm:$0xff]  ;;  %v15714_v7 = vld [vmem:[#allocation440_spill] sm:$0xff]  ;;  %v734_v57 = vld [vmem:[#allocation3 + $0x4b8] sm:$0xff] }
 0x6ba   : > { %v5345_v27 = vsel %vm5256_vm9, %v5248_v59, %v4467_v20  ;;  %v4465_v29 = vpop.permute.xlu1 %4464  ;;  %6530 = vst.msk [vmem:[#allocation2 + $0x100] sm:$0xff] %vm4674_vm2, %v6434_v33  ;;  %v8928_v56 = vpop.f32.mrb[0].mxu1  ;;  %v6624_v16 = vld [vmem:[#allocation2 + $0xf0] ss:$2 sm:$0xff]  ;;  %v6720_v40 = vld [vmem:[#allocation2 + $0xf1] ss:$2 sm:$0xff]  ;;  %v5055_v21 = vsel %vm4965_vm6, %v4958_v5, %v15702_v1  ;;  %v5153_v47 = vsel %vm5062_vm7, %v5056_v31, %v15703_v50  ;;  %v4767_v59 = vsel %vm4674_vm2, %v4670_v37, %v15707_v6 }
 0x6bb   : > { %v6974_v46 = vld [vmem:[#allocation4 + $0x71] sm:$0xff]  ;;  %v5344_v44 = vsel %vm5256_vm9, %v5247_v41, %v4465_v29  ;;  %v6264_v3 = vmul.f32 %v8928_v56, %v12897_v12  ;;  %v6017_v11 = vpop.f32.mrb[1].mxu1  ;;  %v6800_v35 = vmax.f32 %v6624_v16, %v6720_v40  ;;  %v5152_v14 = vsel %vm5062_vm7, %v5055_v21, %v15704_v53  ;;  %v15713_v55 = vld [vmem:[#allocation437_spill] sm:$0xff]  ;;  %v15724_v37 = vld [vmem:[#allocation350_spill] sm:$0xff] }
 0x6bc   : > { %7198 = vrot.lane.b32.xlu1 %v6974_v46, %s9100_s9  ;;  %8966 = vmatmul.mubr.msk.f32.gmra.mrb[26].mxu1 %vm5358_vm10, %v5344_v44  ;;  %v6263_v4 = vmul.f32 %v13360_v61, %v6017_v11  ;;  %v15708_v33 = vld [vmem:[#allocation168_spill] sm:$0xff]  ;;  %v15711_v44 = vld [vmem:[#allocation346_spill] sm:$0xff]  ;;  %v15719_v21 = vld [vmem:[#allocation167_spill] sm:$0xff] }
 0x6bd   : > { %8968 = vmatprep.mubr.msk.f32.mxu1 %vm5358_vm10, %v5345_v27  ;;  %v4087_v58 = vpop.permute.xlu0 %4086  ;;  %v6367_v23 = vadd.f32 %v13368_v25, %v6264_v3  ;;  %v6840_v45 = vmax.f32 %v6799_v51, %v6800_v35  ;;  %v4766_v41 = vsel %vm4674_vm2, %v4669_v38, %v15708_v33  ;;  %v15709_v27 = vld [vmem:[#allocation255_spill] sm:$0xff]  ;;  %v15715_v3 = vld [vmem:[#allocation529_spill] sm:$0xff]  ;;  %v15716_v32 = vld [vmem:[#allocation532_spill] sm:$0xff] }
 0x6be   : > { %v4085_v12 = vpop.permute.xlu1 %4084  ;;  %v6366_v26 = vadd.f32 %v13368_v25, %v6263_v4  ;;  %v5250_v30 = vsel %vm5159_vm8, %v5153_v47, %v4087_v58  ;;  %v4864_v29 = vsel %vm4771_vm4, %v4767_v59, %v15709_v27  ;;  %v4863_v43 = vsel %vm4771_vm4, %v4766_v41, %v15710_v28  ;;  %v15717_v51 = vld [vmem:[#allocation78_spill] sm:$0xff]  ;;  %v15718_v22 = vld [vmem:[#allocation80_spill] sm:$0xff]  ;;  %v15721_v53 = vld [vmem:[#allocation257_spill] sm:$0xff] }
 0x6bf   : > { %v6463_v60 = vmax.f32 %v6367_v23, 0.0  ;;  %v5249_v13 = vsel %vm5159_vm8, %v5152_v14, %v4085_v12  ;;  %6926 = vst.msk [vmem:[#allocation4 + $0x81] sm:$0xff] %vm4674_vm2, %v6840_v45  ;;  %v4961_v17 = vsel %vm4868_vm5, %v4864_v29, %v15711_v44  ;;  %v4960_v24 = vsel %vm4868_vm5, %v4863_v43, %v15712_v63  ;;  %v15725_v10 = vld [vmem:[#allocation439_spill] sm:$0xff]  ;;  %v15726_v59 = vld [vmem:[#allocation441_spill] sm:$0xff] }
 0x6c0   : > { %v6462_v15 = vmax.f32 %v6366_v26, 0.0  ;;  %v5058_v56 = vsel %vm4965_vm6, %v4961_v17, %v15713_v55  ;;  %v5057_v2 = vsel %vm4965_vm6, %v4960_v24, %v15714_v7  ;;  %v4672_v35 = vsel %vm284_vm0, %v735_v54, %v15717_v51  ;;  %v15720_v26 = vld [vmem:[#allocation169_spill] sm:$0xff]  ;;  %v15727_v33 = vld [vmem:[#allocation531_spill] sm:$0xff] }
 0x6c1   : > { %v4471_v19 = vpop.permute.xlu0 %4470  ;;  %6559 = vst.msk [vmem:[#allocation2 + $0x1e8] sm:$0xff] %vm4674_vm2, %v6463_v60  ;;  %v5155_v11 = vsel %vm5062_vm7, %v5058_v56, %v15715_v3  ;;  %v5154_v9 = vsel %vm5062_vm7, %v5057_v2, %v15716_v32  ;;  %v4671_v1 = vsel %vm284_vm0, %v734_v57, %v15718_v22  ;;  %v4769_v50 = vsel %vm4674_vm2, %v4672_v35, %v15719_v21  ;;  %v736_v29 = vld [vmem:[#allocation3 + $0x4d0] sm:$0xff]  ;;  %v6722_v28 = vld [vmem:[#allocation2 + $0x101] ss:$2 sm:$0xff]  ;;  %v15733_v35 = vld [vmem:[#allocation442_spill] sm:$0xff] }
 0x6c2   : > { %v5347_v39 = vsel %vm5256_vm9, %v5250_v30, %v4471_v19  ;;  %v4469_v34 = vpop.permute.xlu1 %4468  ;;  %6558 = vst.msk [vmem:[#allocation2 + $0x1e0] sm:$0xff] %vm4674_vm2, %v6462_v15  ;;  %v8889_v20 = vpop.f32.mrb[34].mxu0  ;;  %v4768_v8 = vsel %vm4674_vm2, %v4671_v1, %v15720_v26  ;;  %v4866_v14 = vsel %vm4771_vm4, %v4769_v50, %v15721_v53  ;;  %v15722_v19 = vld [vmem:[#allocation259_spill] sm:$0xff]  ;;  %v15729_v54 = vld [vmem:[#allocation81_spill] sm:$0xff]  ;;  %v15734_v1 = vld [vmem:[#allocation534_spill] sm:$0xff] }
 0x6c3   : > { %v5346_v36 = vsel %vm5256_vm9, %v5249_v13, %v4469_v34  ;;  %v6238_v46 = vmul.f32 %v13360_v61, %v8889_v20  ;;  %v5887_v0 = vpop.f32.mrb[35].mxu0  ;;  %v4865_v15 = vsel %vm4771_vm4, %v4768_v8, %v15722_v19  ;;  %v15723_v13 = vld [vmem:[#allocation348_spill] sm:$0xff]  ;;  %v4673_v7 = vsel %vm284_vm0, %v736_v29, %v15729_v54 }
 0x6c4   : > { %8969 = vmatmul.mubr.msk.f32.gmra.mrb[28].mxu1 %vm5358_vm10, %v5346_v36  ;;  %v6237_v48 = vmul.f32 %v13360_v61, %v5887_v0  ;;  %v4962_v36 = vsel %vm4868_vm5, %v4865_v15, %v15724_v37  ;;  %vm8133_vm0 = vcmask 588800  }
 0x6c5   : > { %8971 = vmatprep.mubr.msk.f32.mxu1 %vm5358_vm10, %v5347_v39  ;;  %v4091_v42 = vpop.permute.xlu0 %4090  ;;  %v6341_v62 = vadd.f32 %v13368_v25, %v6238_v46  ;;  %v4963_v39 = vsel %vm4868_vm5, %v4866_v14, %v15723_v13  ;;  %v5059_v20 = vsel %vm4965_vm6, %v4962_v36, %v15726_v59  ;;  %v15728_v46 = vld [vmem:[#allocation533_spill] sm:$0xff] }
 0x6c6   : > { %v4089_v52 = vpop.permute.xlu1 %4088  ;;  %v6340_v58 = vadd.f32 %v13368_v25, %v6237_v48  ;;  %v5252_v16 = vsel %vm5159_vm8, %v5155_v11, %v4091_v42  ;;  %v5060_v38 = vsel %vm4965_vm6, %v4963_v39, %v15725_v10  ;;  %v5156_v0 = vsel %vm5062_vm7, %v5059_v20, %v15728_v46  ;;  %v6626_v42 = vld [vmem:[#allocation2 + $0x100] ss:$2 sm:$0xff] }
 0x6c7   : > { %v6437_v5 = vmax.f32 %v6341_v62, 0.0  ;;  %v5251_v12 = vsel %vm5159_vm8, %v5154_v9, %v4089_v52  ;;  %v5157_v41 = vsel %vm5062_vm7, %v5060_v38, %v15727_v33  ;;  %v6801_v2 = vmax.f32 %v6626_v42, %v6722_v28 }
 0x6c8   : > { %v6436_v4 = vmax.f32 %v6340_v58, 0.0  ;;  %v15730_v58 = vld [vmem:[#allocation170_spill] sm:$0xff] }
 0x6c9   : > { %v4475_v40 = vpop.permute.xlu0 %4474  ;;  %6533 = vst.msk [vmem:[#allocation2 + $0x118] sm:$0xff] %vm4674_vm2, %v6437_v5  ;;  %v4770_v57 = vsel %vm4674_vm2, %v4673_v7, %v15730_v58  ;;  %v15731_v5 = vld [vmem:[#allocation260_spill] sm:$0xff] }
 0x6ca   : > { %v5349_v18 = vsel %vm5256_vm9, %v5252_v16, %v4475_v40  ;;  %v4473_v31 = vpop.permute.xlu1 %4472  ;;  %6532 = vst.msk [vmem:[#allocation2 + $0x110] sm:$0xff] %vm4674_vm2, %v6436_v4  ;;  %v8931_v47 = vpop.f32.mrb[2].mxu1  ;;  %v4867_v16 = vsel %vm4771_vm4, %v4770_v57, %v15731_v5  ;;  %v6654_v50 = vld [vmem:[#allocation2 + $0x1e0] ss:$2 sm:$0xff] }
 0x6cb   : > { %v5348_v23 = vsel %vm5256_vm9, %v5251_v12, %v4473_v31  ;;  %v6266_v45 = vmul.f32 %v13360_v61, %v8931_v47  ;;  %v6027_v60 = vpop.f32.mrb[3].mxu1  ;;  %v6750_v47 = vld [vmem:[#allocation2 + $0x1e1] ss:$2 sm:$0xff] }
 0x6cc   : > { %8972 = vmatmul.mubr.msk.f32.gmra.mrb[30].mxu1 %vm5358_vm10, %v5348_v23  ;;  %v6265_v34 = vmul.f32 %v13360_v61, %v6027_v60  ;;  %v6815_v19 = vmax.f32 %v6654_v50, %v6750_v47 }
 0x6cd   : > { %8974 = vmatprep.mubr.msk.f32.mxu1 %vm5358_vm10, %v5349_v18  ;;  %v4095_v30 = vpop.permute.xlu0 %4094  ;;  %v6369_v6 = vadd.f32 %v13368_v25, %v6266_v45  ;;  %v15732_v18 = vld [vmem:[#allocation351_spill] sm:$0xff] }
 0x6ce   : > { %v4093_v49 = vpop.permute.xlu1 %4092  ;;  %v6368_v27 = vadd.f32 %v13368_v25, %v6265_v34  ;;  %v5254_v44 = vsel %vm5159_vm8, %v5157_v41, %v4095_v30  ;;  %v4964_v31 = vsel %vm4868_vm5, %v4867_v16, %v15732_v18 }
 0x6cf   : > { %v6465_v43 = vmax.f32 %v6369_v6, 0.0  ;;  %v5253_v52 = vsel %vm5159_vm8, %v5156_v0, %v4093_v49  ;;  %v5061_v23 = vsel %vm4965_vm6, %v4964_v31, %v15733_v35 }
 0x6d0   : > { %v6464_v48 = vmax.f32 %v6368_v27, 0.0  ;;  %v5158_v21 = vsel %vm5062_vm7, %v5061_v23, %v15734_v1 }
 0x6d1   : > { %v4479_v17 = vpop.permute.xlu0 %4478  ;;  %v6628_v55 = vld [vmem:[#allocation2 + $0x110] ss:$2 sm:$0xff]  ;;  %v6724_v56 = vld [vmem:[#allocation2 + $0x111] ss:$2 sm:$0xff]  ;;  %6561 = vst.msk [vmem:[#allocation2 + $0x1f8] sm:$0xff] %vm4674_vm2, %v6465_v43 }
 0x6d2   : > { %v5351_v63 = vsel %vm5256_vm9, %v5254_v44, %v4479_v17  ;;  %v4477_v24 = vpop.permute.xlu1 %4476  ;;  %v6802_v3 = vmax.f32 %v6628_v55, %v6724_v56  ;;  %6560 = vst.msk [vmem:[#allocation2 + $0x1f0] sm:$0xff] %vm4674_vm2, %v6464_v48  ;;  %v8892_v11 = vpop.f32.mrb[36].mxu0 }
 0x6d3   : > { %v5350_v62 = vsel %vm5256_vm9, %v5253_v52, %v4477_v24  ;;  %v6240_v32 = vmul.f32 %v13360_v61, %v8892_v11  ;;  %v5897_v9 = vpop.f32.mrb[37].mxu0 }
 0x6d4   : > { %8975 = vmatmul.mubr.msk.f32.gmra.mrb[32].mxu1 %vm5358_vm10, %v5350_v62  ;;  %v6841_v40 = vmax.f32 %v6801_v2, %v6802_v3  ;;  %v6239_v4 = vmul.f32 %v13360_v61, %v5897_v9 }
 0x6d5   : > { %8977 = vmatprep.mubr.msk.f32.mxu1 %vm5358_vm10, %v5351_v63  ;;  %v6343_v51 = vadd.f32 %v13368_v25, %v6240_v32 }
 0x6d6   : > { %v4097_v12 = vpop.permute.xlu1 %4096  ;;  %6927 = vst.msk [vmem:[#allocation4 + $0xb1] sm:$0xff] %vm4674_vm2, %v6841_v40  ;;  %v6342_v22 = vadd.f32 %v13368_v25, %v6239_v4 }
 0x6d7   : > { %v6439_v26 = vmax.f32 %v6343_v51, 0.0  ;;  %v5255_v53 = vsel %vm5159_vm8, %v5158_v21, %v4097_v12 }
 0x6d8   : > { %v6438_v8 = vmax.f32 %v6342_v22, 0.0 }
 0x6d9   : > { %v6656_v45 = vld [vmem:[#allocation2 + $0x1f0] ss:$2 sm:$0xff]  ;;  %v6752_v60 = vld [vmem:[#allocation2 + $0x1f1] ss:$2 sm:$0xff]  ;;  %6535 = vst.msk [vmem:[#allocation2 + $0x128] sm:$0xff] %vm4674_vm2, %v6439_v26 }
 0x6da   : > { %v4481_v14 = vpop.permute.xlu1 %4480  ;;  %v6816_v15 = vmax.f32 %v6656_v45, %v6752_v60  ;;  %6534 = vst.msk [vmem:[#allocation2 + $0x120] sm:$0xff] %vm4674_vm2, %v6438_v8  ;;  %v8934_v13 = vpop.f32.mrb[4].mxu1 }
 0x6db   : > { %v5352_v30 = vsel %vm5256_vm9, %v5255_v53, %v4481_v14  ;;  %v6268_v39 = vmul.f32 %v13360_v61, %v8934_v13  ;;  %v6037_v34 = vpop.f32.mrb[5].mxu1 }
 0x6dc   : > { %8978 = vmatmul.mubr.msk.f32.gmra.mrb[34].mxu1 %vm5358_vm10, %v5352_v30  ;;  %v6848_v49 = vmax.f32 %v6815_v19, %v6816_v15  ;;  %v6267_v37 = vmul.f32 %v13360_v61, %v6037_v34 }
 0x6dd   : > { %v6371_v36 = vadd.f32 %v13368_v25, %v6268_v39  ;;  %v6976_v10 = vld [vmem:[#allocation4 + $0xb1] sm:$0xff] }
 0x6de   : > { %6934 = vst.msk [vmem:[#allocation4 + $0x121] sm:$0xff] %vm4674_vm2, %v6848_v49  ;;  %v6370_v38 = vadd.f32 %v13368_v25, %v6267_v37  ;;  %7202 = vrot.lane.b32.xlu1 %v6976_v10, %s9100_s9 }
 0x6df   : > { %v6467_v6 = vmax.f32 %v6371_v36, 0.0 }
 0x6e0   : > { %v6466_v59 = vmax.f32 %v6370_v38, 0.0 }
 0x6e1   : > { %6563 = vst.msk [vmem:[#allocation2 + $0x208] sm:$0xff] %vm4674_vm2, %v6467_v6  ;;  %v6630_v63 = vld [vmem:[#allocation2 + $0x120] ss:$2 sm:$0xff]  ;;  %v6726_v24 = vld [vmem:[#allocation2 + $0x121] ss:$2 sm:$0xff] }
 0x6e2   : > { %6562 = vst.msk [vmem:[#allocation2 + $0x200] sm:$0xff] %vm4674_vm2, %v6466_v59  ;;  %v8895_v20 = vpop.f32.mrb[38].mxu0  ;;  %v6803_v7 = vmax.f32 %v6630_v63, %v6726_v24 }
 0x6e3   : > { %v6242_v33 = vmul.f32 %v13360_v61, %v8895_v20  ;;  %v5907_v41 = vpop.f32.mrb[39].mxu0 }
 0x6e4   : > { %v6241_v27 = vmul.f32 %v13360_v61, %v5907_v41 }
 0x6e5   : > { %v6345_v29 = vadd.f32 %v13368_v25, %v6242_v33 }
 0x6e6   : > { %v6344_v46 = vadd.f32 %v13368_v25, %v6241_v27 }
 0x6e7   : > { %v6441_v0 = vmax.f32 %v6345_v29, 0.0 }
 0x6e8   : > { %v6440_v42 = vmax.f32 %v6344_v46, 0.0 }
 0x6e9   : > { %6537 = vst.msk [vmem:[#allocation2 + $0x138] sm:$0xff] %vm4674_vm2, %v6441_v0  ;;  %v6658_v16 = vld [vmem:[#allocation2 + $0x200] ss:$2 sm:$0xff]  ;;  %v6754_v40 = vld [vmem:[#allocation2 + $0x201] ss:$2 sm:$0xff] }
 0x6ea   : > { %6536 = vst.msk [vmem:[#allocation2 + $0x130] sm:$0xff] %vm4674_vm2, %v6440_v42  ;;  %v8937_v28 = vpop.f32.mrb[6].mxu1  ;;  %v6817_v51 = vmax.f32 %v6658_v16, %v6754_v40 }
 0x6eb   : > { %v6270_v43 = vmul.f32 %v13360_v61, %v8937_v28  ;;  %v6047_v44 = vpop.f32.mrb[7].mxu1 }
 0x6ec   : > { %v6269_v17 = vmul.f32 %v13360_v61, %v6047_v44 }
 0x6ed   : > { %v6373_v48 = vadd.f32 %v13368_v25, %v6270_v43 }
 0x6ee   : > { %v6372_v52 = vadd.f32 %v13368_v25, %v6269_v17 }
 0x6ef   : > { %v6469_v55 = vmax.f32 %v6373_v48, 0.0 }
 0x6f0   : > { %v6468_v56 = vmax.f32 %v6372_v52, 0.0 }
 0x6f1   : > { %v6632_v62 = vld [vmem:[#allocation2 + $0x130] ss:$2 sm:$0xff]  ;;  %v6728_v54 = vld [vmem:[#allocation2 + $0x131] ss:$2 sm:$0xff]  ;;  %6565 = vst.msk [vmem:[#allocation2 + $0x218] sm:$0xff] %vm4674_vm2, %v6469_v55 }
 0x6f2   : > { %v6804_v2 = vmax.f32 %v6632_v62, %v6728_v54  ;;  %6564 = vst.msk [vmem:[#allocation2 + $0x210] sm:$0xff] %vm4674_vm2, %v6468_v56  ;;  %v8898_v3 = vpop.f32.mrb[40].mxu0 }
 0x6f3   : > { %v6244_v11 = vmul.f32 %v13360_v61, %v8898_v3  ;;  %v5917_v58 = vpop.f32.mrb[41].mxu0 }
 0x6f4   : > { %v6842_v57 = vmax.f32 %v6803_v7, %v6804_v2  ;;  %v6243_v32 = vmul.f32 %v13360_v61, %v5917_v58 }
 0x6f5   : > { %v6347_v9 = vadd.f32 %v13368_v25, %v6244_v11 }
 0x6f6   : > { %6928 = vst.msk [vmem:[#allocation4 + $0xc1] sm:$0xff] %vm4674_vm2, %v6842_v57  ;;  %v6346_v5 = vadd.f32 %v13368_v25, %v6243_v32 }
 0x6f7   : > { %v6443_v4 = vmax.f32 %v6347_v9, 0.0 }
 0x6f8   : > { %v6442_v12 = vmax.f32 %v6346_v5, 0.0 }
 0x6f9   : > { %v6660_v18 = vld [vmem:[#allocation2 + $0x210] ss:$2 sm:$0xff]  ;;  %v6756_v31 = vld [vmem:[#allocation2 + $0x211] ss:$2 sm:$0xff]  ;;  %6539 = vst.msk [vmem:[#allocation2 + $0x148] sm:$0xff] %vm4674_vm2, %v6443_v4 }
 0x6fa   : > { %v6818_v35 = vmax.f32 %v6660_v18, %v6756_v31  ;;  %6538 = vst.msk [vmem:[#allocation2 + $0x140] sm:$0xff] %vm4674_vm2, %v6442_v12  ;;  %v8940_v23 = vpop.f32.mrb[8].mxu1 }
 0x6fb   : > { %v6272_v22 = vmul.f32 %v13360_v61, %v8940_v23  ;;  %v6057_v1 = vpop.f32.mrb[9].mxu1 }
 0x6fc   : > { %v6849_v21 = vmax.f32 %v6817_v51, %v6818_v35  ;;  %v6271_v50 = vmul.f32 %v13360_v61, %v6057_v1 }
 0x6fd   : > { %v6375_v47 = vadd.f32 %v13368_v25, %v6272_v22  ;;  %v6977_v26 = vld [vmem:[#allocation4 + $0xc1] sm:$0xff] }
 0x6fe   : > { %6935 = vst.msk [vmem:[#allocation4 + $0x151] sm:$0xff] %vm4674_vm2, %v6849_v21  ;;  %v6374_v8 = vadd.f32 %v13368_v25, %v6271_v50  ;;  %7204 = vrot.lane.b32.xlu0 %v6977_v26, %s9100_s9 }
 0x6ff   : > { %v6471_v53 = vmax.f32 %v6375_v47, 0.0 }
 0x700   : > { %v6470_v14 = vmax.f32 %v6374_v8, 0.0 }
 0x701   : > { %6567 = vst.msk [vmem:[#allocation2 + $0x228] sm:$0xff] %vm4674_vm2, %v6471_v53  ;;  %v6634_v59 = vld [vmem:[#allocation2 + $0x140] ss:$2 sm:$0xff]  ;;  %v6730_v20 = vld [vmem:[#allocation2 + $0x141] ss:$2 sm:$0xff] }
 0x702   : > { %6566 = vst.msk [vmem:[#allocation2 + $0x220] sm:$0xff] %vm4674_vm2, %v6470_v14  ;;  %v8901_v45 = vpop.f32.mrb[42].mxu0  ;;  %v6805_v46 = vmax.f32 %v6634_v59, %v6730_v20 }
 0x703   : > { %v6246_v60 = vmul.f32 %v13360_v61, %v8901_v45  ;;  %v5927_v30 = vpop.f32.mrb[43].mxu0 }
 0x704   : > { %v6245_v19 = vmul.f32 %v13360_v61, %v5927_v30 }
 0x705   : > { %v6349_v15 = vadd.f32 %v13368_v25, %v6246_v60 }
 0x706   : > { %v6348_v13 = vadd.f32 %v13368_v25, %v6245_v19 }
 0x707   : > { %v6445_v39 = vmax.f32 %v6349_v15, 0.0 }
 0x708   : > { %v6444_v34 = vmax.f32 %v6348_v13, 0.0 }
 0x709   : > { %6541 = vst.msk [vmem:[#allocation2 + $0x158] sm:$0xff] %vm4674_vm2, %v6445_v39  ;;  %v6662_v63 = vld [vmem:[#allocation2 + $0x220] ss:$2 sm:$0xff]  ;;  %v6758_v24 = vld [vmem:[#allocation2 + $0x221] ss:$2 sm:$0xff] }
 0x70a   : > { %6540 = vst.msk [vmem:[#allocation2 + $0x150] sm:$0xff] %vm4674_vm2, %v6444_v34  ;;  %v6819_v7 = vmax.f32 %v6662_v63, %v6758_v24 }
 0x70c   : > { %v8943_v49 = vpop.f32.mrb[10].mxu1 }
 0x70d   : > { %v6274_v37 = vmul.f32 %v13360_v61, %v8943_v49  ;;  %v6067_v36 = vpop.f32.mrb[11].mxu1 }
 0x70e   : > { %v6273_v10 = vmul.f32 %v13360_v61, %v6067_v36 }
 0x70f   : > { %v6377_v38 = vadd.f32 %v13368_v25, %v6274_v37 }
 0x710   : > { %v6376_v6 = vadd.f32 %v13368_v25, %v6273_v10 }
 0x711   : > { %v6473_v33 = vmax.f32 %v6377_v38, 0.0  ;;  %v6636_v27 = vld [vmem:[#allocation2 + $0x150] ss:$2 sm:$0xff]  ;;  %v6732_v29 = vld [vmem:[#allocation2 + $0x151] ss:$2 sm:$0xff] }
 0x712   : > { %v6472_v41 = vmax.f32 %v6376_v6, 0.0  ;;  %v6806_v0 = vmax.f32 %v6636_v27, %v6732_v29 }
 0x713   : > { %6569 = vst.msk [vmem:[#allocation2 + $0x238] sm:$0xff] %vm4674_vm2, %v6473_v33 }
 0x714   : > { %6568 = vst.msk [vmem:[#allocation2 + $0x230] sm:$0xff] %vm4674_vm2, %v6472_v41  ;;  %v8904_v42 = vpop.f32.mrb[44].mxu0  ;;  %v6843_v44 = vmax.f32 %v6805_v46, %v6806_v0 }
 0x715   : > { %v6248_v28 = vmul.f32 %v13360_v61, %v8904_v42  ;;  %v5937_v43 = vpop.f32.mrb[45].mxu0 }
 0x716   : > { %v6247_v17 = vmul.f32 %v13360_v61, %v5937_v43  ;;  %6929 = vst.msk [vmem:[#allocation4 + $0xd1] sm:$0xff] %vm4674_vm2, %v6843_v44 }
 0x717   : > { %v6351_v48 = vadd.f32 %v13368_v25, %v6248_v28 }
 0x718   : > { %v6350_v52 = vadd.f32 %v13368_v25, %v6247_v17 }
 0x719   : > { %v6447_v55 = vmax.f32 %v6351_v48, 0.0 }
 0x71a   : > { %v6446_v56 = vmax.f32 %v6350_v52, 0.0 }
 0x71b   : > { %v6664_v62 = vld [vmem:[#allocation2 + $0x230] ss:$2 sm:$0xff]  ;;  %v6760_v54 = vld [vmem:[#allocation2 + $0x231] ss:$2 sm:$0xff]  ;;  %6543 = vst.msk [vmem:[#allocation2 + $0x168] sm:$0xff] %vm4674_vm2, %v6447_v55 }
 0x71c   : > { %v6820_v2 = vmax.f32 %v6664_v62, %v6760_v54  ;;  %6542 = vst.msk [vmem:[#allocation2 + $0x160] sm:$0xff] %vm4674_vm2, %v6446_v56  ;;  %v8946_v3 = vpop.f32.mrb[12].mxu1 }
 0x71d   : > { %v6276_v11 = vmul.f32 %v13360_v61, %v8946_v3  ;;  %v6077_v58 = vpop.f32.mrb[13].mxu1  ;;  %v13538_v5 = vld [vmem:[#allocation4 + $0xd1] sm:$0xff] }
 0x71e   : > { %v6850_v57 = vmax.f32 %v6819_v7, %v6820_v2  ;;  %v6275_v32 = vmul.f32 %v13360_v61, %v6077_v58  ;;  %7206 = vrot.lane.b32.xlu1 %v13538_v5, %s9100_s9 }
 0x71f   : > { %v6379_v9 = vadd.f32 %v13368_v25, %v6276_v11 }
 0x720   : > { %6936 = vst.msk [vmem:[#allocation4 + $0x161] sm:$0xff] %vm4674_vm2, %v6850_v57  ;;  %v6378_v16 = vadd.f32 %v13368_v25, %v6275_v32 }
 0x721   : > { %v6475_v40 = vmax.f32 %v6379_v9, 0.0 }
 0x722   : > { %v6474_v4 = vmax.f32 %v6378_v16, 0.0 }
 0x723   : > { %6571 = vst.msk [vmem:[#allocation2 + $0x248] sm:$0xff] %vm4674_vm2, %v6475_v40  ;;  %v6638_v14 = vld [vmem:[#allocation2 + $0x160] ss:$2 sm:$0xff]  ;;  %v6734_v45 = vld [vmem:[#allocation2 + $0x161] ss:$2 sm:$0xff] }
 0x724   : > { %6570 = vst.msk [vmem:[#allocation2 + $0x240] sm:$0xff] %vm4674_vm2, %v6474_v4  ;;  %v8907_v12 = vpop.f32.mrb[46].mxu0  ;;  %v6807_v13 = vmax.f32 %v6638_v14, %v6734_v45 }
 0x725   : > { %v6250_v18 = vmul.f32 %v13360_v61, %v8907_v12  ;;  %v5947_v31 = vpop.f32.mrb[47].mxu0 }
 0x726   : > { %v6249_v51 = vmul.f32 %v13360_v61, %v5947_v31 }
 0x727   : > { %v6353_v35 = vadd.f32 %v13368_v25, %v6250_v18 }
 0x728   : > { %v6352_v23 = vadd.f32 %v13368_v25, %v6249_v51 }
 0x729   : > { %v6449_v22 = vmax.f32 %v6353_v35, 0.0 }
 0x72a   : > { %v6448_v1 = vmax.f32 %v6352_v23, 0.0 }
 0x72b   : > { %6545 = vst.msk [vmem:[#allocation2 + $0x178] sm:$0xff] %vm4674_vm2, %v6449_v22  ;;  %v6666_v59 = vld [vmem:[#allocation2 + $0x240] ss:$2 sm:$0xff]  ;;  %v6762_v20 = vld [vmem:[#allocation2 + $0x241] ss:$2 sm:$0xff] }
 0x72c   : > { %6544 = vst.msk [vmem:[#allocation2 + $0x170] sm:$0xff] %vm4674_vm2, %v6448_v1  ;;  %v8949_v21 = vpop.f32.mrb[14].mxu1  ;;  %v6821_v46 = vmax.f32 %v6666_v59, %v6762_v20 }
 0x72d   : > { %v6278_v50 = vmul.f32 %v13360_v61, %v8949_v21  ;;  %v6087_v47 = vpop.f32.mrb[15].mxu1 }
 0x72e   : > { %v6277_v26 = vmul.f32 %v13360_v61, %v6087_v47 }
 0x72f   : > { %v6381_v8 = vadd.f32 %v13368_v25, %v6278_v50 }
 0x730   : > { %v6380_v53 = vadd.f32 %v13368_v25, %v6277_v26 }
 0x731   : > { %v6477_v60 = vmax.f32 %v6381_v8, 0.0 }
 0x732   : > { %v6476_v30 = vmax.f32 %v6380_v53, 0.0 }
 0x733   : > { %v6640_v19 = vld [vmem:[#allocation2 + $0x170] ss:$2 sm:$0xff]  ;;  %v6736_v15 = vld [vmem:[#allocation2 + $0x171] ss:$2 sm:$0xff]  ;;  %6573 = vst.msk [vmem:[#allocation2 + $0x258] sm:$0xff] %vm4674_vm2, %v6477_v60 }
 0x734   : > { %v6808_v39 = vmax.f32 %v6640_v19, %v6736_v15  ;;  %6572 = vst.msk [vmem:[#allocation2 + $0x250] sm:$0xff] %vm4674_vm2, %v6476_v30  ;;  %v8910_v34 = vpop.f32.mrb[48].mxu0 }
 0x735   : > { %v6252_v49 = vmul.f32 %v13360_v61, %v8910_v34  ;;  %v5957_v37 = vpop.f32.mrb[49].mxu0 }
 0x736   : > { %v6844_v36 = vmax.f32 %v6807_v13, %v6808_v39  ;;  %v6251_v10 = vmul.f32 %v13360_v61, %v5957_v37 }
 0x737   : > { %v6355_v38 = vadd.f32 %v13368_v25, %v6252_v49 }
 0x738   : > { %6930 = vst.msk [vmem:[#allocation4 + $0xe1] sm:$0xff] %vm4674_vm2, %v6844_v36  ;;  %v6354_v6 = vadd.f32 %v13368_v25, %v6251_v10 }
 0x739   : > { %v6451_v33 = vmax.f32 %v6355_v38, 0.0 }
 0x73a   : > { %v6450_v41 = vmax.f32 %v6354_v6, 0.0 }
 0x73b   : > { %v6668_v27 = vld [vmem:[#allocation2 + $0x250] ss:$2 sm:$0xff]  ;;  %v6764_v29 = vld [vmem:[#allocation2 + $0x251] ss:$2 sm:$0xff]  ;;  %6547 = vst.msk [vmem:[#allocation2 + $0x188] sm:$0xff] %vm4674_vm2, %v6451_v33 }
 0x73c   : > { %v6822_v0 = vmax.f32 %v6668_v27, %v6764_v29  ;;  %6546 = vst.msk [vmem:[#allocation2 + $0x180] sm:$0xff] %vm4674_vm2, %v6450_v41  ;;  %v8952_v42 = vpop.f32.mrb[16].mxu1 }
 0x73d   : > { %v6280_v28 = vmul.f32 %v13360_v61, %v8952_v42  ;;  %v6097_v43 = vpop.f32.mrb[17].mxu1 }
 0x73e   : > { %v6851_v44 = vmax.f32 %v6821_v46, %v6822_v0  ;;  %v6279_v17 = vmul.f32 %v13360_v61, %v6097_v43 }
 0x73f   : > { %v6383_v48 = vadd.f32 %v13368_v25, %v6280_v28  ;;  %v13568_v52 = vld [vmem:[#allocation4 + $0xe1] sm:$0xff] }
 0x740   : > { %6937 = vst.msk [vmem:[#allocation4 + $0x171] sm:$0xff] %vm4674_vm2, %v6851_v44  ;;  %v6382_v63 = vadd.f32 %v13368_v25, %v6279_v17  ;;  %7208 = vrot.lane.b32.xlu0 %v13568_v52, %s9100_s9 }
 0x741   : > { %v6479_v24 = vmax.f32 %v6383_v48, 0.0 }
 0x742   : > { %v6478_v55 = vmax.f32 %v6382_v63, 0.0 }
 0x743   : > { %6575 = vst.msk [vmem:[#allocation2 + $0x268] sm:$0xff] %vm4674_vm2, %v6479_v24  ;;  %v6642_v12 = vld [vmem:[#allocation2 + $0x180] ss:$2 sm:$0xff]  ;;  %v6738_v18 = vld [vmem:[#allocation2 + $0x181] ss:$2 sm:$0xff] }
 0x744   : > { %6574 = vst.msk [vmem:[#allocation2 + $0x260] sm:$0xff] %vm4674_vm2, %v6478_v55  ;;  %v8913_v56 = vpop.f32.mrb[50].mxu0  ;;  %v6809_v22 = vmax.f32 %v6642_v12, %v6738_v18 }
 0x745   : > { %v6254_v62 = vmul.f32 %v13360_v61, %v8913_v56  ;;  %v5967_v54 = vpop.f32.mrb[51].mxu0 }
 0x746   : > { %v6253_v7 = vmul.f32 %v13360_v61, %v5967_v54 }
 0x747   : > { %v6357_v2 = vadd.f32 %v13368_v25, %v6254_v62 }
 0x748   : > { %v6356_v3 = vadd.f32 %v13368_v25, %v6253_v7 }
 0x749   : > { %v6453_v11 = vmax.f32 %v6357_v2, 0.0 }
 0x74a   : > { %v6452_v58 = vmax.f32 %v6356_v3, 0.0 }
 0x74b   : > { %6549 = vst.msk [vmem:[#allocation2 + $0x198] sm:$0xff] %vm4674_vm2, %v6453_v11  ;;  %v6670_v45 = vld [vmem:[#allocation2 + $0x260] ss:$2 sm:$0xff]  ;;  %v6766_v60 = vld [vmem:[#allocation2 + $0x261] ss:$2 sm:$0xff] }
 0x74c   : > { %6548 = vst.msk [vmem:[#allocation2 + $0x190] sm:$0xff] %vm4674_vm2, %v6452_v58  ;;  %v8955_v57 = vpop.f32.mrb[18].mxu1  ;;  %v6823_v39 = vmax.f32 %v6670_v45, %v6766_v60 }
 0x74d   : > { %v6282_v32 = vmul.f32 %v13360_v61, %v8955_v57  ;;  %v6107_v9 = vpop.f32.mrb[19].mxu1 }
 0x74e   : > { %v6281_v16 = vmul.f32 %v13360_v61, %v6107_v9 }
 0x74f   : > { %v6385_v40 = vadd.f32 %v13368_v25, %v6282_v32 }
 0x750   : > { %v6384_v4 = vadd.f32 %v13368_v25, %v6281_v16 }
 0x751   : > { %v6481_v31 = vmax.f32 %v6385_v40, 0.0 }
 0x752   : > { %v6480_v51 = vmax.f32 %v6384_v4, 0.0 }
 0x753   : > { %v6644_v35 = vld [vmem:[#allocation2 + $0x190] ss:$2 sm:$0xff]  ;;  %v6740_v23 = vld [vmem:[#allocation2 + $0x191] ss:$2 sm:$0xff]  ;;  %6577 = vst.msk [vmem:[#allocation2 + $0x278] sm:$0xff] %vm4674_vm2, %v6481_v31 }
 0x754   : > { %v6810_v1 = vmax.f32 %v6644_v35, %v6740_v23  ;;  %6576 = vst.msk [vmem:[#allocation2 + $0x270] sm:$0xff] %vm4674_vm2, %v6480_v51  ;;  %v8916_v21 = vpop.f32.mrb[52].mxu0 }
 0x755   : > { %v6256_v50 = vmul.f32 %v13360_v61, %v8916_v21  ;;  %v5977_v47 = vpop.f32.mrb[53].mxu0 }
 0x756   : > { %v6845_v26 = vmax.f32 %v6809_v22, %v6810_v1  ;;  %v6255_v8 = vmul.f32 %v13360_v61, %v5977_v47 }
 0x757   : > { %v6359_v53 = vadd.f32 %v13368_v25, %v6256_v50 }
 0x758   : > { %6931 = vst.msk [vmem:[#allocation4 + $0xf1] sm:$0xff] %vm4674_vm2, %v6845_v26  ;;  %v6358_v14 = vadd.f32 %v13368_v25, %v6255_v8 }
 0x759   : > { %v6455_v30 = vmax.f32 %v6359_v53, 0.0 }
 0x75a   : > { %v6454_v19 = vmax.f32 %v6358_v14, 0.0 }
 0x75b   : > { %v6672_v15 = vld [vmem:[#allocation2 + $0x270] ss:$2 sm:$0xff]  ;;  %v6768_v13 = vld [vmem:[#allocation2 + $0x271] ss:$2 sm:$0xff]  ;;  %6551 = vst.msk [vmem:[#allocation2 + $0x1a8] sm:$0xff] %vm4674_vm2, %v6455_v30 }
 0x75c   : > { %v6824_v34 = vmax.f32 %v6672_v15, %v6768_v13  ;;  %6550 = vst.msk [vmem:[#allocation2 + $0x1a0] sm:$0xff] %vm4674_vm2, %v6454_v19  ;;  %v8958_v49 = vpop.f32.mrb[20].mxu1  ;;  %v6983_v15 = vld [vmem:[#allocation4 + $0x141] sm:$0xff] }
 0x75d   : > { %v6284_v37 = vmul.f32 %v13360_v61, %v8958_v49  ;;  %v6117_v36 = vpop.f32.mrb[21].mxu1 }
 0x75e   : > { %v6852_v10 = vmax.f32 %v6823_v39, %v6824_v34  ;;  %v6283_v38 = vmul.f32 %v13360_v61, %v6117_v36 }
 0x75f   : > { %v6387_v6 = vadd.f32 %v13368_v25, %v6284_v37  ;;  %v13598_v59 = vld [vmem:[#allocation4 + $0xf1] sm:$0xff] }
 0x760   : > { %6938 = vst.msk [vmem:[#allocation4 + $0x181] sm:$0xff] %vm4674_vm2, %v6852_v10  ;;  %v6386_v20 = vadd.f32 %v13368_v25, %v6283_v38  ;;  %7210 = vrot.lane.b32.xlu1 %v13598_v59, %s9100_s9  ;;  %v13640_v10 = vld [vmem:[#allocation4 + $0x161] sm:$0xff] }
 0x761   : > { %v6483_v33 = vmax.f32 %v6387_v6, 0.0 }
 0x762   : > { %v6482_v41 = vmax.f32 %v6386_v20, 0.0 }
 0x763   : > { %6579 = vst.msk [vmem:[#allocation2 + $0x288] sm:$0xff] %vm4674_vm2, %v6483_v33  ;;  %v6646_v62 = vld [vmem:[#allocation2 + $0x1a0] ss:$2 sm:$0xff]  ;;  %v6742_v54 = vld [vmem:[#allocation2 + $0x1a1] ss:$2 sm:$0xff] }
 0x764   : > { %6578 = vst.msk [vmem:[#allocation2 + $0x280] sm:$0xff] %vm4674_vm2, %v6482_v41  ;;  %v8919_v27 = vpop.f32.mrb[54].mxu0  ;;  %v6811_v58 = vmax.f32 %v6646_v62, %v6742_v54 }
 0x765   : > { %v6258_v29 = vmul.f32 %v13360_v61, %v8919_v27  ;;  %v5987_v46 = vpop.f32.mrb[55].mxu0 }
 0x766   : > { %v6257_v0 = vmul.f32 %v13360_v61, %v5987_v46 }
 0x767   : > { %v6361_v42 = vadd.f32 %v13368_v25, %v6258_v29  ;;  %v6987_v33 = vld [vmem:[#allocation4 + $0x181] sm:$0xff] }
 0x768   : > { %v6360_v28 = vadd.f32 %v13368_v25, %v6257_v0 }
 0x769   : > { %v6457_v43 = vmax.f32 %v6361_v42, 0.0 }
 0x76a   : > { %v6456_v44 = vmax.f32 %v6360_v28, 0.0 }
 0x76b   : > { %6553 = vst.msk [vmem:[#allocation2 + $0x1b8] sm:$0xff] %vm4674_vm2, %v6457_v43  ;;  %v6674_v31 = vld [vmem:[#allocation2 + $0x280] ss:$2 sm:$0xff]  ;;  %v6770_v51 = vld [vmem:[#allocation2 + $0x281] ss:$2 sm:$0xff] }
 0x76c   : > { %6552 = vst.msk [vmem:[#allocation2 + $0x1b0] sm:$0xff] %vm4674_vm2, %v6456_v44  ;;  %v8961_v17 = vpop.f32.mrb[22].mxu1  ;;  %v6825_v21 = vmax.f32 %v6674_v31, %v6770_v51 }
 0x76d   : > { %v6286_v48 = vmul.f32 %v13360_v61, %v8961_v17  ;;  %v6127_v63 = vpop.f32.mrb[23].mxu1 }
 0x76e   : > { %v6285_v24 = vmul.f32 %v13360_v61, %v6127_v63 }
 0x76f   : > { %v6389_v55 = vadd.f32 %v13368_v25, %v6286_v48 }
 0x770   : > { %v6388_v56 = vadd.f32 %v13368_v25, %v6285_v24 }
 0x771   : > { %v6485_v7 = vmax.f32 %v6389_v55, 0.0 }
 0x772   : > { %v6484_v2 = vmax.f32 %v6388_v56, 0.0 }
 0x773   : > { %v6648_v3 = vld [vmem:[#allocation2 + $0x1b0] ss:$2 sm:$0xff]  ;;  %v6744_v11 = vld [vmem:[#allocation2 + $0x1b1] ss:$2 sm:$0xff]  ;;  %6581 = vst.msk [vmem:[#allocation2 + $0x298] sm:$0xff] %vm4674_vm2, %v6485_v7 }
 0x774   : > { %v6812_v57 = vmax.f32 %v6648_v3, %v6744_v11  ;;  %6580 = vst.msk [vmem:[#allocation2 + $0x290] sm:$0xff] %vm4674_vm2, %v6484_v2  ;;  %v8922_v32 = vpop.f32.mrb[56].mxu0 }
 0x775   : > { %v6260_v9 = vmul.f32 %v13360_v61, %v8922_v32  ;;  %v5997_v16 = vpop.f32.mrb[57].mxu0 }
 0x776   : > { %v6846_v40 = vmax.f32 %v6811_v58, %v6812_v57  ;;  %v6259_v4 = vmul.f32 %v13360_v61, %v5997_v16 }
 0x777   : > { %v6363_v12 = vadd.f32 %v13368_v25, %v6260_v9 }
 0x778   : > { %6932 = vst.msk [vmem:[#allocation4 + $0x101] sm:$0xff] %vm4674_vm2, %v6846_v40  ;;  %v6362_v18 = vadd.f32 %v13368_v25, %v6259_v4 }
 0x779   : > { %v6459_v35 = vmax.f32 %v6363_v12, 0.0 }
 0x77a   : > { %v6458_v23 = vmax.f32 %v6362_v18, 0.0 }
 0x77b   : > { %v6676_v22 = vld [vmem:[#allocation2 + $0x290] ss:$2 sm:$0xff]  ;;  %v6772_v1 = vld [vmem:[#allocation2 + $0x291] ss:$2 sm:$0xff]  ;;  %6555 = vst.msk [vmem:[#allocation2 + $0x1c8] sm:$0xff] %vm4674_vm2, %v6459_v35 }
 0x77c   : > { %v6826_v50 = vmax.f32 %v6676_v22, %v6772_v1  ;;  %6554 = vst.msk [vmem:[#allocation2 + $0x1c0] sm:$0xff] %vm4674_vm2, %v6458_v23  ;;  %v8964_v47 = vpop.f32.mrb[24].mxu1 }
 0x77d   : > { %v6288_v26 = vmul.f32 %v13360_v61, %v8964_v47  ;;  %v6137_v8 = vpop.f32.mrb[25].mxu1 }
 0x77e   : > { %v6853_v53 = vmax.f32 %v6825_v21, %v6826_v50  ;;  %v6287_v14 = vmul.f32 %v13360_v61, %v6137_v8  ;;  %v13670_v50 = vld [vmem:[#allocation4 + $0x151] sm:$0xff] }
 0x77f   : > { %v6391_v45 = vadd.f32 %v13368_v25, %v6288_v26  ;;  %v13628_v60 = vld [vmem:[#allocation4 + $0x101] sm:$0xff] }
 0x780   : > { %6939 = vst.msk [vmem:[#allocation4 + $0x191] sm:$0xff] %vm4674_vm2, %v6853_v53  ;;  %v6390_v30 = vadd.f32 %v13368_v25, %v6287_v14  ;;  %7212 = vrot.lane.b32.xlu0 %v13628_v60, %s9100_s9  ;;  %v13676_v53 = vld [vmem:[#allocation4 + $0x171] sm:$0xff] }
 0x781   : > { %v6487_v19 = vmax.f32 %v6391_v45, 0.0 }
 0x782   : > { %v6486_v13 = vmax.f32 %v6390_v30, 0.0 }
 0x783   : > { %6583 = vst.msk [vmem:[#allocation2 + $0x2a8] sm:$0xff] %vm4674_vm2, %v6487_v19  ;;  %v6650_v46 = vld [vmem:[#allocation2 + $0x1c0] ss:$2 sm:$0xff]  ;;  %v6746_v0 = vld [vmem:[#allocation2 + $0x1c1] ss:$2 sm:$0xff] }
 0x784   : > { %6582 = vst.msk [vmem:[#allocation2 + $0x2a0] sm:$0xff] %vm4674_vm2, %v6486_v13  ;;  %7216 = vrot.lane.b32.xlu0 %v6983_v15, %s9100_s9  ;;  %v8925_v39 = vpop.f32.mrb[58].mxu0  ;;  %v6813_v48 = vmax.f32 %v6650_v46, %v6746_v0 }
 0x785   : > { %v6262_v34 = vmul.f32 %v13360_v61, %v8925_v39  ;;  %v6007_v49 = vpop.f32.mrb[59].mxu0 }
 0x786   : > { %v6261_v37 = vmul.f32 %v13360_v61, %v6007_v49 }
 0x787   : > { %v6365_v36 = vadd.f32 %v13368_v25, %v6262_v34  ;;  %v6988_v39 = vld [vmem:[#allocation4 + $0x191] sm:$0xff] }
 0x788   : > { %v6364_v38 = vadd.f32 %v13368_v25, %v6261_v37  ;;  %7220 = vrot.lane.b32.xlu0 %v13640_v10, %s9100_s9 }
 0x789   : > { %v6461_v6 = vmax.f32 %v6365_v36, 0.0  ;;  %v6991_v36 = vld [vmem:[#allocation4 + $0x2] sm:$0xff] }
 0x78a   : > { %v6460_v20 = vmax.f32 %v6364_v38, 0.0 }
 0x78b   : > { %6557 = vst.msk [vmem:[#allocation2 + $0x1d8] sm:$0xff] %vm4674_vm2, %v6461_v6  ;;  %v6678_v58 = vld [vmem:[#allocation2 + $0x2a0] ss:$2 sm:$0xff]  ;;  %v6774_v57 = vld [vmem:[#allocation2 + $0x2a1] ss:$2 sm:$0xff] }
 0x78c   : > { %6556 = vst.msk [vmem:[#allocation2 + $0x1d0] sm:$0xff] %vm4674_vm2, %v6460_v20  ;;  %7224 = vrot.lane.b32.xlu0 %v6987_v33, %s9100_s9  ;;  %v6827_v4 = vmax.f32 %v6678_v58, %v6774_v57  ;;  %v8124_v58 = vld [vmem:[%s14626_s4] sm:$0xff]  ;;  %v8125_v57 = vld [vmem:[%s14626_s4 + $0x8] sm:$0xff] }
 0x78f   : > { %v8967_v41 = vpop.f32.mrb[26].mxu1 }
 0x790   : > { %v6290_v27 = vmul.f32 %v13360_v61, %v8967_v41  ;;  %v6147_v29 = vpop.f32.mrb[27].mxu1 }
 0x791   : > { %v6289_v42 = vmul.f32 %v13360_v61, %v6147_v29 }
 0x792   : > { %v6393_v28 = vadd.f32 %v13368_v25, %v6290_v27 }
 0x793   : > { %v6652_v43 = vld [vmem:[#allocation2 + $0x1d0] ss:$2 sm:$0xff]  ;;  %v6748_v44 = vld [vmem:[#allocation2 + $0x1d1] ss:$2 sm:$0xff]  ;;  %v6392_v17 = vadd.f32 %v13368_v25, %v6289_v42  ;;  %v9089_v42 = vld [vmem:[%s14625_s3] ss:$0 sm:$0xff] }
 0x794   : > { %v6814_v63 = vmax.f32 %v6652_v43, %v6748_v44  ;;  %v6489_v24 = vmax.f32 %v6393_v28, 0.0  ;;  %v13695_v43 = vld [vmem:[#allocation4 + $0x22] sm:$0xff] }
 0x795   : > { %v6488_v55 = vmax.f32 %v6392_v17, 0.0 }
 0x796   : > { %v6847_v56 = vmax.f32 %v6813_v48, %v6814_v63  ;;  %6585 = vst.msk [vmem:[#allocation2 + $0x2b8] sm:$0xff] %vm4674_vm2, %v6489_v24  ;;  %v13700_v63 = vld [vmem:[#allocation4 + $0x10] sm:$0xff] }
 0x797   : > { %6584 = vst.msk [vmem:[#allocation2 + $0x2b0] sm:$0xff] %vm4674_vm2, %v6488_v55  ;;  %v8970_v62 = vpop.f32.mrb[28].mxu1  ;;  %v7039_v24 = vld [vmem:[#allocation4 + $0x11] sm:$0xff] }
 0x798   : > { %6933 = vst.msk [vmem:[#allocation4 + $0x111] sm:$0xff] %vm4674_vm2, %v6847_v56  ;;  %v6292_v54 = vmul.f32 %v13360_v61, %v8970_v62  ;;  %v6157_v7 = vpop.f32.mrb[29].mxu1 }
 0x799   : > { %v6291_v2 = vmul.f32 %v13360_v61, %v6157_v7 }
 0x79a   : > { %v6395_v3 = vadd.f32 %v13368_v25, %v6292_v54 }
 0x79b   : > { %v6394_v11 = vadd.f32 %v13368_v25, %v6291_v2  ;;  %v7063_v2 = vld [vmem:[#allocation4 + $0x12] sm:$0xff] }
 0x79c   : > { %v6491_v32 = vmax.f32 %v6395_v3, 0.0 }
 0x79d   : > { %v6490_v9 = vmax.f32 %v6394_v11, 0.0 }
 0x79e   : > { %v6680_v16 = vld [vmem:[#allocation2 + $0x2b0] ss:$2 sm:$0xff]  ;;  %v6776_v40 = vld [vmem:[#allocation2 + $0x2b1] ss:$2 sm:$0xff]  ;;  %6587 = vst.msk [vmem:[#allocation2 + $0x2c8] sm:$0xff] %vm4674_vm2, %v6491_v32 }
 0x79f   : > { %v6828_v12 = vmax.f32 %v6680_v16, %v6776_v40  ;;  %6586 = vst.msk [vmem:[#allocation2 + $0x2c0] sm:$0xff] %vm4674_vm2, %v6490_v9  ;;  %v8973_v18 = vpop.f32.mrb[30].mxu1  ;;  %v13661_v31 = vld [vmem:[#allocation4 + $0x111] sm:$0xff]  ;;  %v9042_v9 = vpack.c.bf16 %v8125_v57, %v8124_v58  ;;  %v13716_v16 = vld [vmem:[#allocation4 + $0x20] sm:$0xff] }
 0x7a0   : > { %v6294_v51 = vmul.f32 %v13360_v61, %v8973_v18  ;;  %v6167_v35 = vpop.f32.mrb[31].mxu1  ;;  %7214 = vrot.lane.b32.xlu1 %v13661_v31, %s9100_s9  ;;  %v6994_v40 = vld [vmem:[#allocation4 + $0x32] sm:$0xff]  ;;  %v6999_v58 = vld [vmem:[#allocation4 + $0xa2] sm:$0xff] }
 0x7a1   : > { %v6854_v23 = vmax.f32 %v6827_v4, %v6828_v12  ;;  %v6293_v22 = vmul.f32 %v13360_v61, %v6167_v35  ;;  %9043 = vmatprep.subr.bf16.mxu1 %v9042_v9  ;;  %v8126_v4 = vld [vmem:[%s14626_s4 + $0x10] sm:$0xff]  ;;  %v8127_v12 = vld [vmem:[%s14626_s4 + $0x18] sm:$0xff]  ;;  %v8128_v35 = vld [vmem:[%s14626_s4 + $0x20] sm:$0xff] }
 0x7a2   : > { %v6397_v1 = vadd.f32 %v13368_v25, %v6294_v51  ;;  %9045 = vmatpush3.bf16.msra.mxu1 %v9042_v9  ;;  %v9046_v18 = vpack.c.bf16 %v8127_v12, %v8126_v4  ;;  %v13728_v51 = vld [vmem:[#allocation4 + $0x30] sm:$0xff]  ;;  %v13852_v9 = vld [vmem:[#allocation4 + $0xc0] sm:$0xff] }
 0x7a3   : > { %6940 = vst.msk [vmem:[#allocation4 + $0x1a1] sm:$0xff] %vm4674_vm2, %v6854_v23  ;;  %v6396_v21 = vadd.f32 %v13368_v25, %v6293_v22  ;;  %v8129_v23 = vld [vmem:[%s14626_s4 + $0x28] sm:$0xff] }
 0x7a4   : > { %v6493_v47 = vmax.f32 %v6397_v1, 0.0  ;;  %7218 = vrot.lane.b32.xlu1 %v13670_v50, %s9100_s9  ;;  %9047 = vmatprep.subr.bf16.mxu1 %v9046_v18  ;;  %v9050_v22 = vpack.c.bf16 %v8129_v23, %v8128_v35  ;;  %v13740_v1 = vld [vmem:[#allocation4 + $0x40] sm:$0xff]  ;;  %v13863_v35 = vld [vmem:[#allocation4 + $0xb0] sm:$0xff] }
 0x7a5   : > { %v6492_v26 = vmax.f32 %v6396_v21, 0.0  ;;  %v7040_v21 = vld [vmem:[#allocation4 + $0x21] sm:$0xff] }
 0x7a6   : > { %6589 = vst.msk [vmem:[#allocation2 + $0x2d8] sm:$0xff] %vm4674_vm2, %v6493_v47  ;;  %v6682_v34 = vld [vmem:[#allocation2 + $0x2c0] ss:$2 sm:$0xff]  ;;  %v6778_v49 = vld [vmem:[#allocation2 + $0x2c1] ss:$2 sm:$0xff]  ;;  %9049 = vmatpush3.bf16.msra.mxu1 %v9046_v18  ;;  %v8130_v47 = vld [vmem:[%s14626_s4 + $0x30] sm:$0xff] }
 0x7a7   : > { %6588 = vst.msk [vmem:[#allocation2 + $0x2d0] sm:$0xff] %vm4674_vm2, %v6492_v26  ;;  %v8976_v8 = vpop.f32.mrb[32].mxu1  ;;  %9051 = vmatprep.subr.bf16.mxu1 %v9050_v22  ;;  %v8131_v26 = vld [vmem:[%s14626_s4 + $0x38] sm:$0xff] }
 0x7a8   : > { %v6296_v14 = vmul.f32 %v13360_v61, %v8976_v8  ;;  %v6177_v45 = vpop.f32.mrb[33].mxu1  ;;  %7222 = vrot.lane.b32.xlu1 %v13676_v53, %s9100_s9  ;;  %v9054_v8 = vpack.c.bf16 %v8131_v26, %v8130_v47  ;;  %v7048_v23 = vld [vmem:[#allocation4 + $0xc1] sm:$0xff] }
 0x7a9   : > { %v6295_v30 = vmul.f32 %v13360_v61, %v6177_v45  ;;  %v6829_v61 = vmax.f32 %v6682_v34, %v6778_v49  ;;  %v7042_v45 = vld [vmem:[#allocation4 + $0x41] sm:$0xff]  ;;  %v13774_v34 = vpop.permute.xlu0 %7184  ;;  %v7115_v49 = vld [vmem:[#allocation4 + $0x51] sm:$0xff] }
 0x7aa   : > { %v6399_v19 = vadd.f32 %v13368_v25, %v6296_v14  ;;  %v6989_v15 = vld [vmem:[#allocation4 + $0x1a1] sm:$0xff]  ;;  %9053 = vmatpush3.bf16.msra.mxu1 %v9050_v22  ;;  %v7113_v14 = vld [vmem:[#allocation4 + $0x31] sm:$0xff] }
 0x7ab   : > { %v6398_v13 = vadd.f32 %v13368_v25, %v6295_v30  ;;  %7228 = vrot.lane.b32.xlu0 %v6989_v15, %s9100_s9  ;;  %v9088_v25 = vld [vmem:[%s14624_s2] ss:$0 sm:$0xff]  ;;  %9055 = vmatprep.subr.bf16.mxu1 %v9054_v8  ;;  %v6996_v15 = vld [vmem:[#allocation4 + $0x52] sm:$0xff] }
 0x7ac   : > { %v6495_v37 = vmax.f32 %v6399_v19, 0.0  ;;  %7226 = vrot.lane.b32.xlu1 %v6988_v39, %s9100_s9  ;;  %v8132_v30 = vld [vmem:[%s14626_s4 + $0x40] sm:$0xff]  ;;  %v7066_v19 = vld [vmem:[#allocation4 + $0x42] sm:$0xff] }
 0x7ad   : > { %v6494_v38 = vmax.f32 %v6398_v13, 0.0  ;;  %v13767_v13 = vld [vmem:[#allocation4 + $0x50] sm:$0xff]  ;;  %v13772_v39 = vld [vmem:[#allocation4 + $0x60] sm:$0xff] }
 0x7ae   : > { %v6684_v6 = vld [vmem:[#allocation2 + $0x2d0] ss:$2 sm:$0xff]  ;;  %v6780_v20 = vld [vmem:[#allocation2 + $0x2d1] ss:$2 sm:$0xff]  ;;  %6591 = vst.msk [vmem:[#allocation2 + $0x2e8] sm:$0xff] %vm4674_vm2, %v6495_v37  ;;  %9057 = vmatpush3.bf16.msra.mxu1 %v9054_v8  ;;  %v13782_v37 = vpop.permute.xlu0 %7188  ;;  %v7143_v22 = vld [vmem:[#allocation4 + $0x92] sm:$0xff] }
 0x7af   : > { %v6830_v33 = vmax.f32 %v6684_v6, %v6780_v20  ;;  %6590 = vst.msk [vmem:[#allocation2 + $0x2e0] sm:$0xff] %vm4674_vm2, %v6494_v38  ;;  %v8979_v41 = vpop.f32.mrb[34].mxu1  ;;  %7280 = vrot.lane.b32.xlu0 %v6991_v36, %s9102_s11  ;;  %8996 = vmatprep.subr.mxu1 %v8132_v30  ;;  %v7044_v36 = vld [vmem:[#allocation4 + $0x61] sm:$0xff] }
 0x7b0   : > { %v6298_v27 = vmul.f32 %v9088_v25, %v8979_v41  ;;  %v6187_v29 = vpop.f32.mrb[35].mxu1  ;;  %v7068_v20 = vld [vmem:[#allocation4 + $0x62] sm:$0xff]  ;;  %v13797_v41 = vpop.permute.xlu1 %7186 }
 0x7b1   : > { %v6855_v46 = vmax.f32 %v6829_v61, %v6830_v33  ;;  %v6297_v0 = vmul.f32 %v9088_v25, %v6187_v29  ;;  %v6998_v33 = vld [vmem:[#allocation4 + $0x72] sm:$0xff] }
 0x7b2   : > { %v6401_v28 = vadd.f32 %v9089_v42, %v6298_v27  ;;  %8997 = vmatpush3.msra.mxu1 %v8132_v30  ;;  %v13787_v38 = vpop.permute.xlu0 %7192  ;;  %v13801_v25 = vld [vmem:[#allocation4 + $0x70] sm:$0xff] }
 0x7b3   : > { %6941 = vst.msk [vmem:[#allocation4 + $0x1b1] sm:$0xff] %vm4674_vm2, %v6855_v46  ;;  %v6400_v44 = vadd.f32 %v9089_v42, %v6297_v0  ;;  %7284 = vrot.lane.b32.xlu0 %v13695_v43, %s9102_s11  ;;  %v7022_v46 = vld [vmem:[#allocation4 + $0x80] sm:$0xff] }
 0x7b4   : > { %v6497_v17 = vmax.f32 %v6401_v28, 0.0  ;;  %v13803_v27 = vpop.permute.xlu1 %7190  ;;  %v7117_v28 = vld [vmem:[#allocation4 + $0x71] sm:$0xff] }
 0x7b5   : > { %v6496_v48 = vmax.f32 %v6400_v44, 0.0 }
 0x7b6   : > { %6593 = vst.msk [vmem:[#allocation2 + $0x2f8] sm:$0xff] %vm4674_vm2, %v6497_v17  ;;  %v6686_v56 = vld [vmem:[#allocation2 + $0x2e0] ss:$2 sm:$0xff]  ;;  %v6782_v62 = vld [vmem:[#allocation2 + $0x2e1] ss:$2 sm:$0xff]  ;;  %v13791_v6 = vpop.permute.xlu0 %7196  ;;  %v7046_v17 = vld [vmem:[#allocation4 + $0x81] sm:$0xff] }
 0x7b7   : > { %6592 = vst.msk [vmem:[#allocation2 + $0x2f0] sm:$0xff] %vm4674_vm2, %v6496_v48  ;;  %7376 = vrot.lane.b32.xlu0 %v13700_v63, %s9104_s13  ;;  %v6831_v3 = vmax.f32 %v6686_v56, %v6782_v62  ;;  %v7070_v56 = vld [vmem:[#allocation4 + $0x82] sm:$0xff] }
 0x7b8   : > { %v13810_v0 = vpop.permute.xlu1 %7194 }
 0x7ba   : > { %v6990_v55 = vld [vmem:[#allocation4 + $0x1b1] sm:$0xff]  ;;  %v13795_v61 = vpop.permute.xlu0 %7200 }
 0x7bb   : > { %7472 = vrot.lane.b32.xlu0 %v7039_v24, %s9106_s27  ;;  %7230 = vrot.lane.b32.xlu1 %v6990_v55, %s9100_s9  ;;  %s9108_s9 = smov 48  }
 0x7be   : > { %v6688_v54 = vld [vmem:[#allocation2 + $0x2f0] ss:$2 sm:$0xff]  ;;  %v6784_v7 = vld [vmem:[#allocation2 + $0x2f1] ss:$2 sm:$0xff]  ;;  %v13805_v29 = vpop.permute.xlu0 %7204 }
 0x7bf   : > { %v6832_v11 = vmax.f32 %v6688_v54, %v6784_v7  ;;  %7568 = vrot.lane.b32.xlu0 %v7063_v2, %s9107_s20  ;;  %7282 = vrot.lane.b32.xlu1 %v7063_v2, %s9102_s11  ;;  %v7000_v7 = vld [vmem:[#allocation4 + $0xb2] sm:$0xff] }
 0x7c1   : > { %v6856_v32 = vmax.f32 %v6831_v3, %v6832_v11  ;;  %v7095_v3 = vld [vmem:[#allocation4 + $0x90] sm:$0xff] }
 0x7c2   : > { %v13812_v42 = vpop.permute.xlu0 %7208 }
 0x7c3   : > { %6942 = vst.msk [vmem:[#allocation4 + $0x1c1] sm:$0xff] %vm4674_vm2, %v6856_v32  ;;  %7664 = vrot.lane.b32.xlu0 %v13716_v16, %s9108_s9  ;;  %7286 = vrot.lane.b32.xlu1 %v6994_v40, %s9102_s11 }
 0x7c7   : > { %7666 = vrot.lane.b32.xlu0 %v13728_v51, %s9108_s9  ;;  %7378 = vrot.lane.b32.xlu1 %v13716_v16, %s9104_s13 }
 0x7cb   : > { %7382 = vrot.lane.b32.xlu0 %v13740_v1, %s9104_s13  ;;  %7474 = vrot.lane.b32.xlu1 %v7040_v21, %s9106_s27 }
 0x7cf   : > { %7762 = vrot.lane.b32.xlu0 %v7113_v14, %s9109_s21  ;;  %7570 = vrot.lane.b32.xlu1 %v13695_v43, %s9107_s20 }
 0x7d3   : > { %7478 = vrot.lane.b32.xlu0 %v7042_v45, %s9106_s27  ;;  %7380 = vrot.lane.b32.xlu1 %v13728_v51, %s9104_s13 }
 0x7d7   : > { %7858 = vrot.lane.b32.xlu0 %v6994_v40, %s9110_s26  ;;  %7760 = vrot.lane.b32.xlu1 %v7040_v21, %s9109_s21 }
 0x7db   : > { %7574 = vrot.lane.b32.xlu0 %v7066_v19, %s9107_s20  ;;  %7476 = vrot.lane.b32.xlu1 %v7113_v14, %s9106_s27  ;;  %v7072_v14 = vld [vmem:[#allocation4 + $0xc2] sm:$0xff] }
 0x7df   : > { %7290 = vrot.lane.b32.xlu0 %v6996_v15, %s9102_s11  ;;  %7856 = vrot.lane.b32.xlu1 %v13695_v43, %s9110_s26  ;;  %v13816_v43 = vpop.permute.xlu1 %7198 }
 0x7e3   : > { %7670 = vrot.lane.b32.xlu0 %v13767_v13, %s9108_s9  ;;  %7572 = vrot.lane.b32.xlu1 %v6994_v40, %s9107_s20  ;;  %v13823_v48 = vpop.permute.xlu1 %7202  ;;  %v7119_v40 = vld [vmem:[#allocation4 + $0x91] sm:$0xff] }
 0x7e7   : > { %7386 = vrot.lane.b32.xlu0 %v13772_v39, %s9104_s13  ;;  %7288 = vrot.lane.b32.xlu1 %v7066_v19, %s9102_s11  ;;  %v13830_v55 = vpop.permute.xlu1 %7206 }
 0x7eb   : > { %7766 = vrot.lane.b32.xlu0 %v7115_v49, %s9109_s21  ;;  %7668 = vrot.lane.b32.xlu1 %v13740_v1, %s9108_s9  ;;  %v13834_v62 = vpop.permute.xlu1 %7210 }
 0x7ef   : > { %7482 = vrot.lane.b32.xlu0 %v7044_v36, %s9106_s27  ;;  %7384 = vrot.lane.b32.xlu1 %v13767_v13, %s9104_s13 }
 0x7f2   : > { %v13818_v44 = vpop.permute.xlu0 %7212 }
 0x7f3   : > { %7862 = vrot.lane.b32.xlu0 %v6996_v15, %s9110_s26  ;;  %7764 = vrot.lane.b32.xlu1 %v7042_v45, %s9109_s21  ;;  %v7047_v45 = vld [vmem:[#allocation4 + $0xb1] sm:$0xff] }
 0x7f6   : > { %v13828_v24 = vpop.permute.xlu0 %7216 }
 0x7f7   : > { %7578 = vrot.lane.b32.xlu0 %v7068_v20, %s9107_s20  ;;  %7480 = vrot.lane.b32.xlu1 %v7115_v49, %s9106_s27 }
 0x7fa   : > { %v13836_v54 = vpop.permute.xlu0 %7220 }
 0x7fb   : > { %7294 = vrot.lane.b32.xlu0 %v6998_v33, %s9102_s11  ;;  %7860 = vrot.lane.b32.xlu1 %v7066_v19, %s9110_s26  ;;  %15735 = vst [vmem:[#allocation443_spill] sm:$0xff] %v13836_v54 }
 0x7fe   : > { %v13844_v11 = vpop.permute.xlu0 %7224 }
 0x7ff   : > { %7674 = vrot.lane.b32.xlu0 %v13801_v25, %s9108_s9  ;;  %7576 = vrot.lane.b32.xlu1 %v6996_v15, %s9107_s20  ;;  %15736 = vst [vmem:[#allocation537_spill] sm:$0xff] %v13844_v11  ;;  %v7002_v15 = vld [vmem:[#allocation4 + $0xd2] sm:$0xff] }
 0x803   : > { %7390 = vrot.lane.b32.xlu0 %v7022_v46, %s9104_s13  ;;  %7292 = vrot.lane.b32.xlu1 %v7068_v20, %s9102_s11 }
 0x807   : > { %7770 = vrot.lane.b32.xlu0 %v7117_v28, %s9109_s21  ;;  %7672 = vrot.lane.b32.xlu1 %v13772_v39, %s9108_s9 }
 0x80b   : > { %7486 = vrot.lane.b32.xlu0 %v7046_v17, %s9106_s27  ;;  %7388 = vrot.lane.b32.xlu1 %v13801_v25, %s9104_s13 }
 0x80f   : > { %7866 = vrot.lane.b32.xlu0 %v6998_v33, %s9110_s26  ;;  %7768 = vrot.lane.b32.xlu1 %v7044_v36, %s9109_s21 }
 0x812   : > { %v13840_v2 = vpop.permute.xlu1 %7214 }
 0x813   : > { %7582 = vrot.lane.b32.xlu0 %v7070_v56, %s9107_s20  ;;  %7484 = vrot.lane.b32.xlu1 %v7117_v28, %s9106_s27  ;;  %v13885_v28 = vld [vmem:[#allocation4 + $0xe0] sm:$0xff] }
 0x816   : > { %v13848_v57 = vpop.permute.xlu1 %7218 }
 0x817   : > { %7298 = vrot.lane.b32.xlu0 %v7000_v7, %s9102_s11  ;;  %7864 = vrot.lane.b32.xlu1 %v7068_v20, %s9110_s26  ;;  %v13880_v20 = vld [vmem:[#allocation4 + $0xd0] sm:$0xff] }
 0x81a   : > { %v13857_v12 = vpop.permute.xlu1 %7222 }
 0x81b   : > { %7678 = vrot.lane.b32.xlu0 %v7095_v3, %s9108_s9  ;;  %7580 = vrot.lane.b32.xlu1 %v6998_v33, %s9107_s20  ;;  %15738 = vst [vmem:[#allocation263_spill] sm:$0xff] %v13857_v12 }
 0x81d   : > { %v13850_v32 = vpop.permute.xlu0 %7228 }
 0x81e   : > { %15737 = vst [vmem:[#allocation171_spill] sm:$0xff] %v13850_v32  ;;  %v13868_v21 = vpop.permute.xlu1 %7226  ;;  %v13910_v32 = vld [vmem:[#allocation4 + $0xe2] sm:$0xff] }
 0x81f   : > { %7394 = vrot.lane.b32.xlu0 %v13852_v9, %s9104_s13  ;;  %7296 = vrot.lane.b32.xlu1 %v6999_v58, %s9102_s11  ;;  %15739 = vst [vmem:[#allocation535_spill] sm:$0xff] %v13868_v21  ;;  %v7049_v21 = vld [vmem:[#allocation4 + $0xd1] sm:$0xff] }
 0x821   : > { %v7281_v4 = vpop.permute.xlu0 %7280 }
 0x823   : > { %7774 = vrot.lane.b32.xlu0 %v7119_v40, %s9109_s21  ;;  %7676 = vrot.lane.b32.xlu1 %v7022_v46, %s9108_s9 }
 0x825   : > { %v13861_v18 = vpop.permute.xlu0 %7284 }
 0x827   : > { %7490 = vrot.lane.b32.xlu0 %v7048_v23, %s9106_s27  ;;  %7392 = vrot.lane.b32.xlu1 %v13863_v35, %s9104_s13 }
 0x829   : > { %v7377_v47 = vpop.permute.xlu0 %7376 }
 0x82b   : > { %7870 = vrot.lane.b32.xlu0 %v7143_v22, %s9110_s26  ;;  %7772 = vrot.lane.b32.xlu1 %v7046_v17, %s9109_s21  ;;  %v7929_v22 = vsel %vm4674_vm2, %v13700_v63, %v13797_v41 }
 0x82d   : > { %v7473_v26 = vpop.permute.xlu0 %7472  ;;  %v13872_v8 = vpop.permute.xlu1 %7230 }
 0x82e   : > { %15740 = vst [vmem:[#allocation261_spill] sm:$0xff] %v13872_v8 }
 0x82f   : > { %7586 = vrot.lane.b32.xlu0 %v7072_v14, %s9107_s20  ;;  %7488 = vrot.lane.b32.xlu1 %v7047_v45, %s9106_s27 }
 0x831   : > { %v7569_v30 = vpop.permute.xlu0 %7568  ;;  %v7283_v19 = vpop.permute.xlu1 %7282 }
 0x833   : > { %7302 = vrot.lane.b32.xlu0 %v7002_v15, %s9102_s11  ;;  %7868 = vrot.lane.b32.xlu1 %v7070_v56, %s9110_s26 }
 0x835   : > { %v7665_v49 = vpop.permute.xlu0 %7664  ;;  %v13878_v36 = vpop.permute.xlu1 %7286 }
 0x837   : > { %7682 = vrot.lane.b32.xlu0 %v13880_v20, %s9108_s9  ;;  %7584 = vrot.lane.b32.xlu1 %v7000_v7, %s9107_s20 }
 0x839   : > { %v7667_v33 = vpop.permute.xlu0 %7666  ;;  %v7379_v46 = vpop.permute.xlu1 %7378 }
 0x83b   : > { %7398 = vrot.lane.b32.xlu0 %v13885_v28, %s9104_s13  ;;  %7300 = vrot.lane.b32.xlu1 %v7072_v14, %s9102_s11 }
 0x83d   : > { %v13890_v17 = vpop.permute.xlu0 %7382  ;;  %v7475_v56 = vpop.permute.xlu1 %7474 }
 0x83f   : > { %7778 = vrot.lane.b32.xlu0 %v13538_v5, %s9109_s21  ;;  %7680 = vrot.lane.b32.xlu1 %v13852_v9, %s9108_s9  ;;  %v6943_v5 = vld [vmem:[#allocation4] sm:$0xff] }
 0x840   : > { %v7928_v11 = vsel %vm4674_vm2, %v6943_v5, %v13774_v34 }
 0x841   : > { %v7763_v3 = vpop.permute.xlu0 %7762  ;;  %v7571_v7 = vpop.permute.xlu1 %7570 }
 0x843   : > { %7494 = vrot.lane.b32.xlu0 %v13568_v52, %s9106_s27  ;;  %7396 = vrot.lane.b32.xlu1 %v13880_v20, %s9104_s13  ;;  %v7953_v52 = vsel %vm4868_vm5, %v7929_v22, %v7283_v19 }
 0x844   : > { %v7977_v12 = vsel %vm5062_vm7, %v7953_v52, %v7379_v46  ;;  %v13923_v46 = vld [vmem:[#allocation4 + $0xf2] sm:$0xff] }
 0x845   : > { %v13900_v58 = vpop.permute.xlu0 %7478  ;;  %v13902_v40 = vpop.permute.xlu1 %7380  ;;  %v8001_v63 = vsel %vm5256_vm9, %v7977_v12, %v7475_v56 }
 0x846   : > { %v8026_v19 = vsel %vm8024_vm12, %v8001_v63, %v7571_v7  ;;  %v7122_v63 = vld [vmem:[#allocation4 + $0xe1] sm:$0xff] }
 0x847   : > { %7874 = vrot.lane.b32.xlu0 %v7002_v15, %s9110_s26  ;;  %7776 = vrot.lane.b32.xlu1 %v7048_v23, %s9109_s21  ;;  %v7952_v23 = vsel %vm4868_vm5, %v7928_v11, %v7281_v4  ;;  %v8051_v4 = vsel %vm8049_vm13, %v8026_v19, %v7667_v33  ;;  %v13944_v33 = vld [vmem:[#allocation4 + $0x100] sm:$0xff] }
 0x848   : > { %v7976_v41 = vsel %vm5062_vm7, %v7952_v23, %v7377_v47  ;;  %v8076_v56 = vsel %vm8074_vm14, %v8051_v4, %v7763_v3  ;;  %v7931_v4 = vsel %vm4674_vm2, %v13728_v51, %v13803_v27 }
 0x849   : > { %v7859_v45 = vpop.permute.xlu0 %7858  ;;  %v7761_v8 = vpop.permute.xlu1 %7760  ;;  %v8000_v34 = vsel %vm5256_vm9, %v7976_v41, %v7473_v26  ;;  %v13934_v26 = vld [vmem:[#allocation4 + $0xf0] sm:$0xff] }
 0x84a   : > { %v8025_v5 = vsel %vm8024_vm12, %v8000_v34, %v7569_v30  ;;  %v13969_v34 = vld [vmem:[#allocation4 + $0x102] sm:$0xff] }
 0x84b   : > { %7590 = vrot.lane.b32.xlu0 %v13910_v32, %s9107_s20  ;;  %7492 = vrot.lane.b32.xlu1 %v7049_v21, %s9106_s27  ;;  %v8050_v11 = vsel %vm8049_vm13, %v8025_v5, %v7665_v49  ;;  %v7930_v5 = vsel %vm4674_vm2, %v13716_v16, %v13782_v37  ;;  %v7955_v16 = vsel %vm4868_vm5, %v7931_v4, %v13878_v36 }
 0x84c   : > { %v8075_v12 = vsel %vm8074_vm14, %v8050_v11, %v7761_v8  ;;  %v7954_v11 = vsel %vm4868_vm5, %v7930_v5, %v13861_v18  ;;  %v7054_v5 = vld [vmem:[#allocation4 + $0x121] sm:$0xff] }
 0x84d   : > { %v7575_v22 = vpop.permute.xlu0 %7574  ;;  %v7477_v54 = vpop.permute.xlu1 %7476 }
 0x84f   : > { %7306 = vrot.lane.b32.xlu0 %v13923_v46, %s9102_s11  ;;  %7872 = vrot.lane.b32.xlu1 %v7072_v14, %s9110_s26  ;;  %v8101_v14 = vsel %vm8099_vm15, %v8076_v56, %v7859_v45  ;;  %v13990_v56 = vld [vmem:[#allocation4 + $0x112] sm:$0xff] }
 0x851   : > { %v13932_v21 = vpop.permute.xlu0 %7290  ;;  %v7857_v47 = vpop.permute.xlu1 %7856 }
 0x852   : > { %v8100_v30 = vsel %vm8099_vm15, %v8075_v12, %v7857_v47  ;;  %v7978_v12 = vsel %vm5062_vm7, %v7954_v11, %v13902_v40 }
 0x853   : > { %7686 = vrot.lane.b32.xlu0 %v13934_v26, %s9108_s9  ;;  %7588 = vrot.lane.b32.xlu1 %v7002_v15, %s9107_s20  ;;  %v8002_v37 = vsel %vm5256_vm9, %v7978_v12, %v7477_v54 }
 0x854   : > { %8998 = vmatprep.mubr.msk.f32.mxu1 %vm8133_vm0, %v8100_v30 }
 0x855   : > { %8999 = vmatmul.mubr.msk.f32.vlgmr.msra.gmra.mrb[36].mxu1 %vm8133_vm0, %v8101_v14  ;;  %v7671_v8 = vpop.permute.xlu0 %7670  ;;  %v7573_v49 = vpop.permute.xlu1 %7572  ;;  %v14006_v14 = vld [vmem:[#allocation4 + $0x110] sm:$0xff] }
 0x856   : > { %v8027_v18 = vsel %vm8024_vm12, %v8002_v37, %v7573_v49  ;;  %v14040_v37 = vld [vmem:[#allocation4 + $0x122] sm:$0xff] }
 0x857   : > { %7402 = vrot.lane.b32.xlu0 %v13944_v33, %s9104_s13  ;;  %7304 = vrot.lane.b32.xlu1 %v13910_v32, %s9102_s11 }
 0x859   : > { %v13950_v3 = vpop.permute.xlu0 %7386  ;;  %v13952_v7 = vpop.permute.xlu1 %7288 }
 0x85b   : > { %7782 = vrot.lane.b32.xlu0 %v13598_v59, %s9109_s21  ;;  %7684 = vrot.lane.b32.xlu1 %v13885_v28, %s9108_s9 }
 0x85d   : > { %v7767_v15 = vpop.permute.xlu0 %7766  ;;  %v7669_v45 = vpop.permute.xlu1 %7668 }
 0x85e   : > { %v8052_v27 = vsel %vm8049_vm13, %v8027_v18, %v7669_v45 }
 0x85f   : > { %7498 = vrot.lane.b32.xlu0 %v13628_v60, %s9106_s27  ;;  %7400 = vrot.lane.b32.xlu1 %v13934_v26, %s9104_s13 }
 0x861   : > { %v13962_v52 = vpop.permute.xlu0 %7482  ;;  %v13964_v23 = vpop.permute.xlu1 %7384 }
 0x863   : > { %7878 = vrot.lane.b32.xlu0 %v13923_v46, %s9110_s26  ;;  %7780 = vrot.lane.b32.xlu1 %v7122_v63, %s9109_s21 }
 0x865   : > { %v7863_v41 = vpop.permute.xlu0 %7862  ;;  %v7765_v19 = vpop.permute.xlu1 %7764 }
 0x866   : > { %v8077_v36 = vsel %vm8074_vm14, %v8052_v27, %v7765_v19  ;;  %v7030_v19 = vld [vmem:[#allocation4 + $0x120] sm:$0xff] }
 0x867   : > { %7594 = vrot.lane.b32.xlu0 %v13969_v34, %s9107_s20  ;;  %7496 = vrot.lane.b32.xlu1 %v13598_v59, %s9106_s27  ;;  %v7979_v59 = vsel %vm5062_vm7, %v7955_v16, %v13890_v17 }
 0x868   : > { %v8003_v51 = vsel %vm5256_vm9, %v7979_v59, %v13900_v58  ;;  %v7932_v59 = vsel %vm4674_vm2, %v13740_v1, %v13787_v38 }
 0x869   : > { %v13985_v47 = vpop.permute.xlu0 %7578  ;;  %v7481_v30 = vpop.permute.xlu1 %7480  ;;  %v8028_v54 = vsel %vm8024_vm12, %v8003_v51, %v7575_v22  ;;  %v7956_v18 = vsel %vm4868_vm5, %v7932_v59, %v13952_v7  ;;  %v7151_v59 = vld [vmem:[#allocation4 + $0x132] sm:$0xff] }
 0x86a   : > { %v8053_v49 = vsel %vm8049_vm13, %v8028_v54, %v7671_v8  ;;  %v7980_v51 = vsel %vm5062_vm7, %v7956_v18, %v13964_v23 }
 0x86b   : > { %7310 = vrot.lane.b32.xlu0 %v13990_v56, %s9102_s11  ;;  %7876 = vrot.lane.b32.xlu1 %v13910_v32, %s9110_s26  ;;  %v8078_v32 = vsel %vm8074_vm14, %v8053_v49, %v7767_v15  ;;  %v8004_v38 = vsel %vm5256_vm9, %v7980_v51, %v7481_v30 }
 0x86c   : > { %v8103_v58 = vsel %vm8099_vm15, %v8078_v32, %v7863_v41 }
 0x86d   : > { %v14004_v40 = vpop.permute.xlu0 %7294  ;;  %v7861_v17 = vpop.permute.xlu1 %7860 }
 0x86e   : > { %v8102_v63 = vsel %vm8099_vm15, %v8077_v36, %v7861_v17  ;;  %v14061_v36 = vld [vmem:[#allocation4 + $0x152] sm:$0xff] }
 0x86f   : > { %7690 = vrot.lane.b32.xlu0 %v14006_v14, %s9108_s9  ;;  %7592 = vrot.lane.b32.xlu1 %v13923_v46, %s9107_s20 }
 0x870   : > { %9001 = vmatprep.mubr.msk.f32.mxu1 %vm8133_vm0, %v8102_v63 }
 0x871   : > { %9002 = vmatmul.mubr.msk.f32.gmra.mrb[38].mxu1 %vm8133_vm0, %v8103_v58  ;;  %v7675_v22 = vpop.permute.xlu0 %7674  ;;  %v7577_v45 = vpop.permute.xlu1 %7576 }
 0x872   : > { %v8029_v7 = vsel %vm8024_vm12, %v8004_v38, %v7577_v45  ;;  %v14087_v45 = vld [vmem:[#allocation4 + $0x160] sm:$0xff] }
 0x873   : > { %7406 = vrot.lane.b32.xlu0 %v7030_v19, %s9104_s13  ;;  %7308 = vrot.lane.b32.xlu1 %v13969_v34, %s9102_s11 }
 0x875   : > { %v14021_v8 = vpop.permute.xlu0 %7390  ;;  %v14023_v15 = vpop.permute.xlu1 %7292 }
 0x877   : > { %7786 = vrot.lane.b32.xlu0 %v13661_v31, %s9109_s21  ;;  %7688 = vrot.lane.b32.xlu1 %v13944_v33, %s9108_s9 }
 0x879   : > { %v7771_v46 = vpop.permute.xlu0 %7770  ;;  %v7673_v41 = vpop.permute.xlu1 %7672 }
 0x87b   : > { %7502 = vrot.lane.b32.xlu0 %v7054_v5, %s9106_s27  ;;  %7404 = vrot.lane.b32.xlu1 %v14006_v14, %s9104_s13 }
 0x87d   : > { %v14032_v11 = vpop.permute.xlu0 %7486  ;;  %v14034_v4 = vpop.permute.xlu1 %7388 }
 0x87f   : > { %7882 = vrot.lane.b32.xlu0 %v13990_v56, %s9110_s26  ;;  %7784 = vrot.lane.b32.xlu1 %v13628_v60, %s9109_s21  ;;  %v7933_v60 = vsel %vm4674_vm2, %v13767_v13, %v13810_v0  ;;  %v8054_v0 = vsel %vm8049_vm13, %v8029_v7, %v7673_v41 }
 0x880   : > { %v7957_v1 = vsel %vm4868_vm5, %v7933_v60, %v13932_v21  ;;  %v7103_v21 = vld [vmem:[#allocation4 + $0x130] sm:$0xff] }
 0x881   : > { %v7867_v12 = vpop.permute.xlu0 %7866  ;;  %v7769_v16 = vpop.permute.xlu1 %7768 }
 0x882   : > { %v8079_v30 = vsel %vm8074_vm14, %v8054_v0, %v7769_v16  ;;  %v14098_v16 = vld [vmem:[#allocation4 + $0x150] sm:$0xff] }
 0x883   : > { %7598 = vrot.lane.b32.xlu0 %v14040_v37, %s9107_s20  ;;  %7500 = vrot.lane.b32.xlu1 %v13661_v31, %s9106_s27  ;;  %v7981_v31 = vsel %vm5062_vm7, %v7957_v1, %v13950_v3  ;;  %v14110_v1 = vld [vmem:[#allocation4 + $0x162] sm:$0xff]  ;;  %v14131_v0 = vld [vmem:[#allocation4 + $0x172] sm:$0xff] }
 0x884   : > { %v8005_v13 = vsel %vm5256_vm9, %v7981_v31, %v13962_v52 }
 0x885   : > { %v14056_v27 = vpop.permute.xlu0 %7582  ;;  %v7485_v54 = vpop.permute.xlu1 %7484  ;;  %v8030_v23 = vsel %vm8024_vm12, %v8005_v13, %v13985_v47  ;;  %v7007_v47 = vld [vmem:[#allocation4 + $0x142] sm:$0xff] }
 0x886   : > { %v8055_v49 = vsel %vm8049_vm13, %v8030_v23, %v7675_v22  ;;  %v7127_v22 = vld [vmem:[#allocation4 + $0x131] sm:$0xff] }
 0x887   : > { %7314 = vrot.lane.b32.xlu0 %v14061_v36, %s9102_s11  ;;  %7880 = vrot.lane.b32.xlu1 %v13969_v34, %s9110_s26  ;;  %v8080_v34 = vsel %vm8074_vm14, %v8055_v49, %v7771_v46  ;;  %v14160_v49 = vld [vmem:[#allocation4 + $0x180] sm:$0xff] }
 0x888   : > { %v8105_v52 = vsel %vm8099_vm15, %v8080_v34, %v7867_v12 }
 0x889   : > { %v14076_v3 = vpop.permute.xlu0 %7298  ;;  %v7865_v17 = vpop.permute.xlu1 %7864 }
 0x88a   : > { %v8104_v63 = vsel %vm8099_vm15, %v8079_v30, %v7865_v17 }
 0x88b   : > { %7694 = vrot.lane.b32.xlu0 %v7103_v21, %s9108_s9  ;;  %7596 = vrot.lane.b32.xlu1 %v13990_v56, %s9107_s20  ;;  %v14148_v21 = vld [vmem:[#allocation4 + $0x170] sm:$0xff] }
 0x88c   : > { %9004 = vmatprep.mubr.msk.f32.mxu1 %vm8133_vm0, %v8104_v63 }
 0x88d   : > { %9005 = vmatmul.mubr.msk.f32.gmra.mrb[40].mxu1 %vm8133_vm0, %v8105_v52  ;;  %v7679_v32 = vpop.permute.xlu0 %7678  ;;  %v7581_v58 = vpop.permute.xlu1 %7580 }
 0x88f   : > { %7410 = vrot.lane.b32.xlu0 %v14087_v45, %s9104_s13  ;;  %7312 = vrot.lane.b32.xlu1 %v7007_v47, %s9102_s11  ;;  %v7058_v47 = vld [vmem:[#allocation4 + $0x181] sm:$0xff] }
 0x891   : > { %v14092_v46 = vpop.permute.xlu0 %7394  ;;  %v14094_v56 = vpop.permute.xlu1 %7296 }
 0x893   : > { %7790 = vrot.lane.b32.xlu0 %v7127_v22, %s9109_s21  ;;  %7692 = vrot.lane.b32.xlu1 %v7030_v19, %s9108_s9  ;;  %v7128_v22 = vld [vmem:[#allocation4 + $0x161] sm:$0xff] }
 0x895   : > { %v7775_v41 = vpop.permute.xlu0 %7774  ;;  %v7677_v12 = vpop.permute.xlu1 %7676 }
 0x897   : > { %7506 = vrot.lane.b32.xlu0 %v13640_v10, %s9106_s27  ;;  %7408 = vrot.lane.b32.xlu1 %v14098_v16, %s9104_s13  ;;  %v7934_v10 = vsel %vm4674_vm2, %v13772_v39, %v13791_v6 }
 0x898   : > { %v7958_v38 = vsel %vm4868_vm5, %v7934_v10, %v14023_v15 }
 0x899   : > { %v14104_v18 = vpop.permute.xlu0 %7490  ;;  %v14106_v60 = vpop.permute.xlu1 %7392  ;;  %v7982_v31 = vsel %vm5062_vm7, %v7958_v38, %v14034_v4  ;;  %v7937_v38 = vsel %vm4674_vm2, %v13863_v35, %v13823_v48 }
 0x89a   : > { %v8006_v6 = vsel %vm5256_vm9, %v7982_v31, %v7485_v54 }
 0x89b   : > { %7886 = vrot.lane.b32.xlu0 %v7151_v59, %s9110_s26  ;;  %7788 = vrot.lane.b32.xlu1 %v7054_v5, %s9109_s21  ;;  %v7935_v5 = vsel %vm4674_vm2, %v13801_v25, %v13816_v43  ;;  %v8031_v15 = vsel %vm8024_vm12, %v8006_v6, %v7581_v58 }
 0x89c   : > { %v7959_v39 = vsel %vm4868_vm5, %v7935_v5, %v14004_v40  ;;  %v8056_v43 = vsel %vm8049_vm13, %v8031_v15, %v7677_v12  ;;  %v14221_v15 = vld [vmem:[#allocation4 + $0x190] sm:$0xff] }
 0x89d   : > { %v7871_v19 = vpop.permute.xlu0 %7870  ;;  %v7773_v51 = vpop.permute.xlu1 %7772 }
 0x89e   : > { %v8081_v4 = vsel %vm8074_vm14, %v8056_v43, %v7773_v51 }
 0x89f   : > { %7602 = vrot.lane.b32.xlu0 %v14110_v1, %s9107_s20  ;;  %7504 = vrot.lane.b32.xlu1 %v13670_v50, %s9106_s27  ;;  %v7983_v50 = vsel %vm5062_vm7, %v7959_v39, %v14021_v8 }
 0x8a0   : > { %v8007_v25 = vsel %vm5256_vm9, %v7983_v50, %v14032_v11  ;;  %v14204_v50 = vld [vmem:[#allocation4 + $0x192] sm:$0xff] }
 0x8a1   : > { %v14126_v7 = vpop.permute.xlu0 %7586  ;;  %v7489_v13 = vpop.permute.xlu1 %7488  ;;  %v8032_v40 = vsel %vm8024_vm12, %v8007_v25, %v14056_v27 }
 0x8a2   : > { %v8057_v23 = vsel %vm8049_vm13, %v8032_v40, %v7679_v32 }
 0x8a3   : > { %7318 = vrot.lane.b32.xlu0 %v14131_v0, %s9102_s11  ;;  %7884 = vrot.lane.b32.xlu1 %v14040_v37, %s9110_s26  ;;  %v8082_v37 = vsel %vm8074_vm14, %v8057_v23, %v7775_v41  ;;  %v6951_v41 = vld [vmem:[#allocation4 + $0xa0] sm:$0xff] }
 0x8a4   : > { %v8107_v11 = vsel %vm8099_vm15, %v8082_v37, %v7871_v19  ;;  %v14184_v19 = vld [vmem:[#allocation4 + $0x182] sm:$0xff]  ;;  %v7936_v51 = vsel %vm4674_vm2, %v6951_v41, %v13795_v61  ;;  %v7961_v61 = vsel %vm4868_vm5, %v7937_v38, %v14076_v3  ;;  %v7938_v41 = vsel %vm4674_vm2, %v13852_v9, %v13805_v29  ;;  %v14274_v38 = vld [vmem:[#allocation4 + $0x1b2] sm:$0xff] }
 0x8a5   : > { %v14146_v54 = vpop.permute.xlu0 %7302  ;;  %v7869_v8 = vpop.permute.xlu1 %7868  ;;  %v7960_v10 = vsel %vm4868_vm5, %v7936_v51, %v14094_v56 }
 0x8a6   : > { %v8106_v30 = vsel %vm8099_vm15, %v8081_v4, %v7869_v8  ;;  %v7984_v5 = vsel %vm5062_vm7, %v7960_v10, %v14106_v60  ;;  %v14233_v4 = vld [vmem:[#allocation4 + $0x1a0] sm:$0xff] }
 0x8a7   : > { %7698 = vrot.lane.b32.xlu0 %v14148_v21, %s9108_s9  ;;  %7600 = vrot.lane.b32.xlu1 %v14061_v36, %s9107_s20  ;;  %v8008_v6 = vsel %vm5256_vm9, %v7984_v5, %v7489_v13 }
 0x8a8   : > { %9007 = vmatprep.mubr.msk.f32.mxu1 %vm8133_vm0, %v8106_v30 }
 0x8a9   : > { %9008 = vmatmul.mubr.msk.f32.gmra.mrb[42].mxu1 %vm8133_vm0, %v8107_v11  ;;  %v7683_v27 = vpop.permute.xlu0 %7682  ;;  %v7585_v17 = vpop.permute.xlu1 %7584  ;;  %v7060_v11 = vld [vmem:[#allocation4 + $0x1a1] sm:$0xff] }
 0x8aa   : > { %v8033_v56 = vsel %vm8024_vm12, %v8008_v6, %v7585_v17 }
 0x8ab   : > { %7414 = vrot.lane.b32.xlu0 %v14160_v49, %s9104_s13  ;;  %7316 = vrot.lane.b32.xlu1 %v14110_v1, %s9102_s11 }
 0x8ad   : > { %v14166_v63 = vpop.permute.xlu0 %7398  ;;  %v14168_v34 = vpop.permute.xlu1 %7300 }
 0x8af   : > { %7794 = vrot.lane.b32.xlu0 %v13676_v53, %s9109_s21  ;;  %7696 = vrot.lane.b32.xlu1 %v14087_v45, %s9108_s9 }
 0x8b1   : > { %v7779_v36 = vpop.permute.xlu0 %7778  ;;  %v7681_v52 = vpop.permute.xlu1 %7680 }
 0x8b2   : > { %v8058_v35 = vsel %vm8049_vm13, %v8033_v56, %v7681_v52 }
 0x8b3   : > { %7510 = vrot.lane.b32.xlu0 %v7058_v47, %s9106_s27  ;;  %7412 = vrot.lane.b32.xlu1 %v14148_v21, %s9104_s13 }
 0x8b5   : > { %v14177_v32 = vpop.permute.xlu0 %7494  ;;  %v14179_v58 = vpop.permute.xlu1 %7396 }
 0x8b7   : > { %7890 = vrot.lane.b32.xlu0 %v14131_v0, %s9110_s26  ;;  %7792 = vrot.lane.b32.xlu1 %v7128_v22, %s9109_s21  ;;  %v14256_v22 = vld [vmem:[#allocation4 + $0x1a2] sm:$0xff] }
 0x8b9   : > { %v7875_v12 = vpop.permute.xlu0 %7874  ;;  %v7777_v59 = vpop.permute.xlu1 %7776 }
 0x8ba   : > { %v8083_v60 = vsel %vm8074_vm14, %v8058_v35, %v7777_v59 }
 0x8bb   : > { %7606 = vrot.lane.b32.xlu0 %v14184_v19, %s9107_s20  ;;  %7508 = vrot.lane.b32.xlu1 %v13676_v53, %s9106_s27  ;;  %v7985_v53 = vsel %vm5062_vm7, %v7961_v61, %v14092_v46  ;;  %v14291_v61 = vld [vmem:[#allocation4 + $0x1b0] sm:$0xff] }
 0x8bc   : > { %v8009_v48 = vsel %vm5256_vm9, %v7985_v53, %v14104_v18 }
 0x8bd   : > { %v14199_v31 = vpop.permute.xlu0 %7590  ;;  %v7493_v39 = vpop.permute.xlu1 %7492  ;;  %v8034_v3 = vsel %vm8024_vm12, %v8009_v48, %v14126_v7  ;;  %v7038_v48 = vld [vmem:[#allocation4 + $0x1c0] sm:$0xff] }
 0x8be   : > { %v8059_v25 = vsel %vm8049_vm13, %v8034_v3, %v7683_v27 }
 0x8bf   : > { %7322 = vrot.lane.b32.xlu0 %v14204_v50, %s9102_s11  ;;  %7888 = vrot.lane.b32.xlu1 %v14110_v1, %s9110_s26  ;;  %v8084_v1 = vsel %vm8074_vm14, %v8059_v25, %v7779_v36  ;;  %v7062_v25 = vld [vmem:[#allocation4 + $0x1c1] sm:$0xff] }
 0x8c0   : > { %v8109_v18 = vsel %vm8099_vm15, %v8084_v1, %v7875_v12  ;;  %v7962_v12 = vsel %vm4868_vm5, %v7938_v41, %v14168_v34 }
 0x8c1   : > { %v14219_v13 = vpop.permute.xlu0 %7306  ;;  %v7873_v46 = vpop.permute.xlu1 %7872  ;;  %v7986_v59 = vsel %vm5062_vm7, %v7962_v12, %v14179_v58 }
 0x8c2   : > { %v8108_v43 = vsel %vm8099_vm15, %v8083_v60, %v7873_v46  ;;  %v8010_v9 = vsel %vm5256_vm9, %v7986_v59, %v7493_v39  ;;  %v7133_v60 = vld [vmem:[#allocation4 + $0x1b1] sm:$0xff]  ;;  %v7158_v59 = vld [vmem:[#allocation4 + $0x1c2] sm:$0xff] }
 0x8c3   : > { %7702 = vrot.lane.b32.xlu0 %v14221_v15, %s9108_s9  ;;  %7604 = vrot.lane.b32.xlu1 %v14131_v0, %s9107_s20  ;;  %v7131_v0 = vld [vmem:[#allocation4 + $0x191] sm:$0xff] }
 0x8c4   : > { %9010 = vmatprep.mubr.msk.f32.mxu1 %vm8133_vm0, %v8108_v43 }
 0x8c5   : > { %9011 = vmatmul.mubr.msk.f32.gmra.mrb[44].mxu1 %vm8133_vm0, %v8109_v18  ;;  %v7687_v7 = vpop.permute.xlu0 %7686  ;;  %v7589_v40 = vpop.permute.xlu1 %7588 }
 0x8c6   : > { %v8035_v34 = vsel %vm8024_vm12, %v8010_v9, %v7589_v40  ;;  %v7940_v40 = vsel %vm4674_vm2, %v13885_v28, %v13812_v42 }
 0x8c7   : > { %7418 = vrot.lane.b32.xlu0 %v14233_v4, %s9104_s13  ;;  %7320 = vrot.lane.b32.xlu1 %v14184_v19, %s9102_s11 }
 0x8c9   : > { %v14239_v8 = vpop.permute.xlu0 %7402  ;;  %v14241_v23 = vpop.permute.xlu1 %7304 }
 0x8cb   : > { %7798 = vrot.lane.b32.xlu0 %v7131_v0, %s9109_s21  ;;  %7700 = vrot.lane.b32.xlu1 %v14160_v49, %s9108_s9 }
 0x8cd   : > { %v7783_v30 = vpop.permute.xlu0 %7782  ;;  %v7685_v37 = vpop.permute.xlu1 %7684 }
 0x8cf   : > { %7514 = vrot.lane.b32.xlu0 %v7060_v11, %s9106_s27  ;;  %7416 = vrot.lane.b32.xlu1 %v14221_v15, %s9104_s13 }
 0x8d1   : > { %v14249_v27 = vpop.permute.xlu0 %7498  ;;  %v14251_v17 = vpop.permute.xlu1 %7400 }
 0x8d3   : > { %7894 = vrot.lane.b32.xlu0 %v14204_v50, %s9110_s26  ;;  %7796 = vrot.lane.b32.xlu1 %v7058_v47, %s9109_s21  ;;  %v7939_v47 = vsel %vm4674_vm2, %v13880_v20, %v13830_v55  ;;  %v8060_v20 = vsel %vm8049_vm13, %v8035_v34, %v7685_v37  ;;  %v7135_v34 = vld [vmem:[#allocation4 + $0x1d1] sm:$0xff] }
 0x8d4   : > { %v7963_v29 = vsel %vm4868_vm5, %v7939_v47, %v14146_v54 }
 0x8d5   : > { %v7879_v36 = vpop.permute.xlu0 %7878  ;;  %v7781_v52 = vpop.permute.xlu1 %7780  ;;  %v7987_v5 = vsel %vm5062_vm7, %v7963_v29, %v14166_v63  ;;  %v7111_v29 = vld [vmem:[#allocation4 + $0x1d0] sm:$0xff] }
 0x8d6   : > { %v8011_v55 = vsel %vm5256_vm9, %v7987_v5, %v14177_v32  ;;  %v8085_v58 = vsel %vm8074_vm14, %v8060_v20, %v7781_v52 }
 0x8d7   : > { %7610 = vrot.lane.b32.xlu0 %v14256_v22, %s9107_s20  ;;  %7512 = vrot.lane.b32.xlu1 %v7131_v0, %s9106_s27  ;;  %v8036_v54 = vsel %vm8024_vm12, %v8011_v55, %v14199_v31  ;;  %v7964_v0 = vsel %vm4868_vm5, %v7940_v40, %v14241_v23 }
 0x8d8   : > { %v8061_v6 = vsel %vm8049_vm13, %v8036_v54, %v7687_v7  ;;  %v7988_v37 = vsel %vm5062_vm7, %v7964_v0, %v14251_v17 }
 0x8d9   : > { %v7595_v51 = vpop.permute.xlu0 %7594  ;;  %v7497_v10 = vpop.permute.xlu1 %7496 }
 0x8da   : > { %v8012_v42 = vsel %vm5256_vm9, %v7988_v37, %v7497_v10 }
 0x8db   : > { %7326 = vrot.lane.b32.xlu0 %v14274_v38, %s9102_s11  ;;  %7892 = vrot.lane.b32.xlu1 %v14184_v19, %s9110_s26  ;;  %v8086_v19 = vsel %vm8074_vm14, %v8061_v6, %v7783_v30  ;;  %v7941_v30 = vsel %vm4674_vm2, %v13934_v26, %v13834_v62 }
 0x8dc   : > { %v8111_v32 = vsel %vm8099_vm15, %v8086_v19, %v7879_v36  ;;  %v7965_v52 = vsel %vm4868_vm5, %v7941_v30, %v14219_v13  ;;  %v7943_v19 = vsel %vm4674_vm2, %v14006_v14, %v13840_v2 }
 0x8dd   : > { %v14289_v39 = vpop.permute.xlu0 %7310  ;;  %v7877_v63 = vpop.permute.xlu1 %7876  ;;  %v7989_v28 = vsel %vm5062_vm7, %v7965_v52, %v14239_v8 }
 0x8de   : > { %v8110_v53 = vsel %vm8099_vm15, %v8085_v58, %v7877_v63  ;;  %v8013_v62 = vsel %vm5256_vm9, %v7989_v28, %v14249_v27 }
 0x8df   : > { %7706 = vrot.lane.b32.xlu0 %v14291_v61, %s9108_s9  ;;  %7608 = vrot.lane.b32.xlu1 %v14204_v50, %s9107_s20  ;;  %v8038_v23 = vsel %vm8024_vm12, %v8013_v62, %v7595_v51  ;;  %v6959_v62 = vld [vmem:[#allocation4 + $0x140] sm:$0xff] }
 0x8e0   : > { %9013 = vmatprep.mubr.msk.f32.mxu1 %vm8133_vm0, %v8110_v53  ;;  %v7942_v53 = vsel %vm4674_vm2, %v13944_v33, %v13818_v44 }
 0x8e1   : > { %9014 = vmatmul.mubr.msk.f32.gmra.mrb[46].mxu1 %vm8133_vm0, %v8111_v32  ;;  %v7691_v31 = vpop.permute.xlu0 %7690  ;;  %v7593_v56 = vpop.permute.xlu1 %7592 }
 0x8e2   : > { %v8037_v41 = vsel %vm8024_vm12, %v8012_v42, %v7593_v56  ;;  %v8063_v8 = vsel %vm8049_vm13, %v8038_v23, %v7691_v31  ;;  %v7967_v31 = vsel %vm4868_vm5, %v7943_v19, %v14289_v39  ;;  %v14404_v42 = vld [vmem:[%s14627_s5] ss:$0 sm:$0xff] }
 0x8e3   : > { %7422 = vrot.lane.b32.xlu0 %v7038_v48, %s9104_s13  ;;  %7324 = vrot.lane.b32.xlu1 %v14256_v22, %s9102_s11 }
 0x8e5   : > { %v14306_v35 = vpop.permute.xlu0 %7406  ;;  %v14308_v3 = vpop.permute.xlu1 %7308 }
 0x8e6   : > { %v7966_v32 = vsel %vm4868_vm5, %v7942_v53, %v14308_v3 }
 0x8e7   : > { %7802 = vrot.lane.b32.xlu0 %v7133_v60, %s9109_s21  ;;  %7704 = vrot.lane.b32.xlu1 %v14233_v4, %s9108_s9 }
 0x8e9   : > { %v7787_v50 = vpop.permute.xlu0 %7786  ;;  %v7689_v46 = vpop.permute.xlu1 %7688 }
 0x8ea   : > { %v8062_v26 = vsel %vm8049_vm13, %v8037_v41, %v7689_v46  ;;  %v8088_v10 = vsel %vm8074_vm14, %v8063_v8, %v7787_v50  ;;  %v7991_v50 = vsel %vm5062_vm7, %v7967_v31, %v14306_v35  ;;  %v14409_v41 = vld [vmem:[%s14628_s6] ss:$0 sm:$0xff] }
 0x8eb   : > { %7518 = vrot.lane.b32.xlu0 %v7062_v25, %s9106_s27  ;;  %7420 = vrot.lane.b32.xlu1 %v14291_v61, %s9104_s13 }
 0x8ed   : > { %v7503_v43 = vpop.permute.xlu0 %7502  ;;  %v7405_v1 = vpop.permute.xlu1 %7404 }
 0x8ee   : > { %v7990_v56 = vsel %vm5062_vm7, %v7966_v32, %v7405_v1  ;;  %v8015_v44 = vsel %vm5256_vm9, %v7991_v50, %v7503_v43 }
 0x8ef   : > { %7898 = vrot.lane.b32.xlu0 %v14274_v38, %s9110_s26  ;;  %7800 = vrot.lane.b32.xlu1 %v7060_v11, %s9109_s21 }
 0x8f1   : > { %v7883_v18 = vpop.permute.xlu0 %7882  ;;  %v7785_v7 = vpop.permute.xlu1 %7784 }
 0x8f2   : > { %v8087_v13 = vsel %vm8074_vm14, %v8062_v26, %v7785_v7  ;;  %v8113_v27 = vsel %vm8099_vm15, %v8088_v10, %v7883_v18 }
 0x8f3   : > { %7708 = vrot.lane.b32.xlu0 %v7038_v48, %s9108_s9  ;;  %7516 = vrot.lane.b32.xlu1 %v7133_v60, %s9106_s27  ;;  %s9064_s27 = smul.u32 192, %s15750_s25 }
 0x8f5   : > { %v7599_v11 = vpop.permute.xlu0 %7598  ;;  %v7501_v36 = vpop.permute.xlu1 %7500  ;;  %s14419_s29 = scalar_lea.vmem %s14629_s7, %s9064_s27 }
 0x8f6   : > { %v8014_v46 = vsel %vm5256_vm9, %v7990_v56, %v7501_v36  ;;  %v8040_v2 = vsel %vm8024_vm12, %v8015_v44, %v7599_v11 }
 0x8f7   : > { %7804 = vrot.lane.b32.xlu0 %v7062_v25, %s9109_s21  ;;  %7896 = vrot.lane.b32.xlu1 %v14256_v22, %s9110_s26 }
 0x8f9   : > { %v14345_v17 = vpop.permute.xlu0 %7314  ;;  %v7881_v12 = vpop.permute.xlu1 %7880 }
 0x8fa   : > { %v8112_v47 = vsel %vm8099_vm15, %v8087_v13, %v7881_v12 }
 0x8fb   : > { %7900 = vrot.lane.b32.xlu0 %v7158_v59, %s9110_s26  ;;  %7612 = vrot.lane.b32.xlu1 %v14274_v38, %s9107_s20  ;;  %v7159_v38 = vld [vmem:[#allocation4 + $0x1d2] sm:$0xff] }
 0x8fc   : > { %9016 = vmatprep.mubr.msk.f32.mxu1 %vm8133_vm0, %v8112_v47 }
 0x8fd   : > { %9017 = vmatmul.mubr.msk.f32.gmra.mrb[48].mxu1 %vm8133_vm0, %v8113_v27  ;;  %v7695_v22 = vpop.permute.xlu0 %7694  ;;  %v7597_v51 = vpop.permute.xlu1 %7596  ;;  %v7945_v27 = vsel %vm4674_vm2, %v14098_v16, %v13848_v57 }
 0x8fe   : > { %v8039_v33 = vsel %vm8024_vm12, %v8014_v46, %v7597_v51  ;;  %v8065_v39 = vsel %vm8049_vm13, %v8040_v2, %v7695_v22 }
 0x8ff   : > { %7614 = vrot.lane.b32.xlu1 %v7158_v59, %s9107_s20  ;;  %v7944_v59 = vsel %vm4674_vm2, %v6959_v62, %v13828_v24  ;;  %v7969_v24 = vsel %vm4868_vm5, %v7945_v27, %v14345_v17 }
 0x901   : > { %v14357_v9 = vpop.permute.xlu0 %7410  ;;  %v7313_v5 = vpop.permute.xlu1 %7312 }
 0x902   : > { %v7968_v22 = vsel %vm4868_vm5, %v7944_v59, %v7313_v5 }
 0x903   : > { %7710 = vrot.lane.b32.xlu1 %v7111_v29, %s9108_s9 }
 0x905   : > { %v7791_v55 = vpop.permute.xlu0 %7790  ;;  %v7693_v20 = vpop.permute.xlu1 %7692 }
 0x906   : > { %v8064_v14 = vsel %vm8049_vm13, %v8039_v33, %v7693_v20  ;;  %v8090_v35 = vsel %vm8074_vm14, %v8065_v39, %v7791_v55 }
 0x907   : > { %7806 = vrot.lane.b32.xlu1 %v7135_v34, %s9109_s21 }
 0x909   : > { %v14361_v54 = vpop.permute.xlu0 %7506  ;;  %v7409_v58 = vpop.permute.xlu1 %7408 }
 0x90a   : > { %v7992_v34 = vsel %vm5062_vm7, %v7968_v22, %v7409_v58 }
 0x90b   : > { %7902 = vrot.lane.b32.xlu1 %v7159_v38, %s9110_s26  ;;  %v7993_v38 = vsel %vm5062_vm7, %v7969_v24, %v14357_v9 }
 0x90c   : > { %v8017_v57 = vsel %vm5256_vm9, %v7993_v38, %v14361_v54 }
 0x90d   : > { %v7887_v63 = vpop.permute.xlu0 %7886  ;;  %v7789_v6 = vpop.permute.xlu1 %7788 }
 0x90e   : > { %v8089_v3 = vsel %vm8074_vm14, %v8064_v14, %v7789_v6  ;;  %v8115_v43 = vsel %vm8099_vm15, %v8090_v35, %v7887_v63 }
 0x911   : > { %v7603_v48 = vpop.permute.xlu0 %7602  ;;  %v7505_v60 = vpop.permute.xlu1 %7504 }
 0x912   : > { %v8016_v63 = vsel %vm5256_vm9, %v7992_v34, %v7505_v60  ;;  %v8042_v17 = vsel %vm8024_vm12, %v8017_v57, %v7603_v48 }
 0x915   : > { %v14384_v25 = vpop.permute.xlu0 %7318  ;;  %v7885_v1 = vpop.permute.xlu1 %7884 }
 0x916   : > { %v8114_v18 = vsel %vm8099_vm15, %v8089_v3, %v7885_v1 }
 0x917   : > { %9019 = vmatprep.mubr.msk.f32.mxu1 %vm8133_vm0, %v8114_v18 }
 0x918   : > { %9020 = vmatmul.mubr.msk.f32.gmra.mrb[50].mxu1 %vm8133_vm0, %v8115_v43  ;;  %v15741_v43 = vld [vmem:[#allocation443_spill] sm:$0xff] }
 0x919   : > { %v7699_v7 = vpop.permute.xlu0 %7698  ;;  %v7601_v40 = vpop.permute.xlu1 %7600 }
 0x91a   : > { %v8041_v16 = vsel %vm8024_vm12, %v8016_v63, %v7601_v40  ;;  %v8067_v6 = vsel %vm8049_vm13, %v8042_v17, %v7699_v7  ;;  %v7946_v7 = vsel %vm4674_vm2, %v14087_v45, %v15741_v43 }
 0x91d   : > { %v14391_v0 = vpop.permute.xlu0 %7414  ;;  %v14393_v30 = vpop.permute.xlu1 %7316 }
 0x921   : > { %v7795_v37 = vpop.permute.xlu0 %7794  ;;  %v7697_v11 = vpop.permute.xlu1 %7696 }
 0x922   : > { %v8066_v5 = vsel %vm8049_vm13, %v8041_v16, %v7697_v11  ;;  %v8092_v19 = vsel %vm8074_vm14, %v8067_v6, %v7795_v37  ;;  %v15742_v37 = vld [vmem:[#allocation263_spill] sm:$0xff] }
 0x923   : > { %v7947_v11 = vsel %vm4674_vm2, %v14148_v21, %v15742_v37 }
 0x925   : > { %v14397_v36 = vpop.permute.xlu0 %7510  ;;  %v14399_v52 = vpop.permute.xlu1 %7412 }
 0x928   : > { %v9000_v28 = vpop.f32.mrb[36].mxu1 }
 0x929   : > { %v8399_v26 = vmul.f32 %v9000_v28, %v14404_v42  ;;  %v8272_v23 = vpop.f32.mrb[37].mxu1  ;;  %v7891_v13 = vpop.permute.xlu0 %7890  ;;  %v7970_v28 = vsel %vm4868_vm5, %v7946_v7, %v14393_v30 }
 0x92a   : > { %v8398_v12 = vmul.f32 %v14404_v42, %v8272_v23  ;;  %v7793_v8 = vpop.permute.xlu1 %7792  ;;  %v8117_v54 = vsel %vm8099_vm15, %v8092_v19, %v7891_v13  ;;  %v7971_v23 = vsel %vm4868_vm5, %v7947_v11, %v14384_v25  ;;  %v7994_v13 = vsel %vm5062_vm7, %v7970_v28, %v14399_v52 }
 0x92b   : > { %v8430_v47 = vadd.f32 %v14409_v41, %v8399_v26  ;;  %v8091_v9 = vsel %vm8074_vm14, %v8066_v5, %v7793_v8  ;;  %v7995_v45 = vsel %vm5062_vm7, %v7971_v23, %v14391_v0 }
 0x92c   : > { %v8429_v10 = vadd.f32 %v14409_v41, %v8398_v12  ;;  %v8019_v21 = vsel %vm5256_vm9, %v7995_v45, %v14397_v36 }
 0x92d   : > { %v8454_v51 = vmax.f32 %v8430_v47, 0.0  ;;  %v7607_v29 = vpop.permute.xlu0 %7606 }
 0x92e   : > { %v8453_v55 = vmax.f32 %v8429_v10, 0.0  ;;  %v7509_v20 = vpop.permute.xlu1 %7508  ;;  %v8044_v25 = vsel %vm8024_vm12, %v8019_v21, %v7607_v29 }
 0x92f   : > { %8478 = vst.msk [vmem:[%s14419_s29 + $0x8] sm:$0xff] %vm4868_vm5, %v8454_v51  ;;  %v8018_v47 = vsel %vm5256_vm9, %v7994_v13, %v7509_v20 }
 0x930   : > { %8477 = vst.msk [vmem:[%s14419_s29] sm:$0xff] %vm4868_vm5, %v8453_v55 }
 0x931   : > { %v14441_v58 = vpop.permute.xlu0 %7322 }
 0x932   : > { %v7889_v53 = vpop.permute.xlu1 %7888 }
 0x933   : > { %v8116_v32 = vsel %vm8099_vm15, %v8091_v9, %v7889_v53 }
 0x934   : > { %9022 = vmatprep.mubr.msk.f32.mxu1 %vm8133_vm0, %v8116_v32  ;;  %v15743_v32 = vld [vmem:[#allocation537_spill] sm:$0xff] }
 0x935   : > { %9023 = vmatmul.mubr.msk.f32.gmra.mrb[52].mxu1 %vm8133_vm0, %v8117_v54  ;;  %v7703_v31 = vpop.permute.xlu0 %7702  ;;  %v7948_v54 = vsel %vm4674_vm2, %v14160_v49, %v15743_v32 }
 0x936   : > { %v7605_v56 = vpop.permute.xlu1 %7604  ;;  %v8069_v10 = vsel %vm8049_vm13, %v8044_v25, %v7703_v31 }
 0x937   : > { %v8043_v30 = vsel %vm8024_vm12, %v8018_v47, %v7605_v56  ;;  %v15744_v56 = vld [vmem:[#allocation535_spill] sm:$0xff] }
 0x939   : > { %v14450_v48 = vpop.permute.xlu0 %7418 }
 0x93a   : > { %v7321_v60 = vpop.permute.xlu1 %7320 }
 0x93d   : > { %v7799_v50 = vpop.permute.xlu0 %7798 }
 0x93e   : > { %v7701_v46 = vpop.permute.xlu1 %7700  ;;  %v8094_v22 = vsel %vm8074_vm14, %v8069_v10, %v7799_v50  ;;  %v7949_v50 = vsel %vm4674_vm2, %v14221_v15, %v15744_v56 }
 0x93f   : > { %v8068_v52 = vsel %vm8049_vm13, %v8043_v30, %v7701_v46  ;;  %v7972_v46 = vsel %vm4868_vm5, %v7948_v54, %v7321_v60 }
 0x941   : > { %v14452_v44 = vpop.permute.xlu0 %7514 }
 0x942   : > { %v7417_v33 = vpop.permute.xlu1 %7416 }
 0x944   : > { %v9003_v2 = vpop.f32.mrb[38].mxu1 }
 0x945   : > { %v8401_v14 = vmul.f32 %v9003_v2, %v14404_v42  ;;  %v8282_v39 = vpop.f32.mrb[39].mxu1  ;;  %v7895_v3 = vpop.permute.xlu0 %7894 }
 0x946   : > { %v8400_v1 = vmul.f32 %v14404_v42, %v8282_v39  ;;  %v7797_v35 = vpop.permute.xlu1 %7796  ;;  %v8119_v36 = vsel %vm8099_vm15, %v8094_v22, %v7895_v3  ;;  %v7973_v39 = vsel %vm4868_vm5, %v7949_v50, %v14441_v58  ;;  %v7996_v3 = vsel %vm5062_vm7, %v7972_v46, %v7417_v33 }
 0x947   : > { %v8432_v18 = vadd.f32 %v14409_v41, %v8401_v14  ;;  %v8093_v0 = vsel %vm8074_vm14, %v8068_v52, %v7797_v35  ;;  %v7997_v49 = vsel %vm5062_vm7, %v7973_v39, %v14450_v48  ;;  %v15746_v52 = vld [vmem:[#allocation261_spill] sm:$0xff] }
 0x948   : > { %v8431_v40 = vadd.f32 %v14409_v41, %v8400_v1  ;;  %v8021_v15 = vsel %vm5256_vm9, %v7997_v49, %v14452_v44  ;;  %v7951_v10 = vsel %vm4674_vm2, %v14291_v61, %v15746_v52 }
 0x949   : > { %v8456_v62 = vmax.f32 %v8432_v18, 0.0  ;;  %v7611_v26 = vpop.permute.xlu0 %7610 }
 0x94a   : > { %v8455_v12 = vmax.f32 %v8431_v40, 0.0  ;;  %v7513_v8 = vpop.permute.xlu1 %7512  ;;  %v8046_v58 = vsel %vm8024_vm12, %v8021_v15, %v7611_v26  ;;  %v15745_v40 = vld [vmem:[#allocation171_spill] sm:$0xff] }
 0x94b   : > { %8480 = vst.msk [vmem:[%s14419_s29 + $0x18] sm:$0xff] %vm4868_vm5, %v8456_v62  ;;  %v8020_v18 = vsel %vm5256_vm9, %v7996_v3, %v7513_v8  ;;  %v7950_v37 = vsel %vm4674_vm2, %v14233_v4, %v15745_v40 }
 0x94c   : > { %8479 = vst.msk [vmem:[%s14419_s29 + $0x10] sm:$0xff] %vm4868_vm5, %v8455_v12 }
 0x94d   : > { %v14482_v59 = vpop.permute.xlu0 %7326 }
 0x94e   : > { %v7893_v27 = vpop.permute.xlu1 %7892 }
 0x94f   : > { %v8118_v51 = vsel %vm8099_vm15, %v8093_v0, %v7893_v27  ;;  %v7975_v0 = vsel %vm4868_vm5, %v7951_v10, %v14482_v59 }
 0x950   : > { %9025 = vmatprep.mubr.msk.f32.mxu1 %vm8133_vm0, %v8118_v51 }
 0x951   : > { %9026 = vmatmul.mubr.msk.f32.gmra.mrb[54].mxu1 %vm8133_vm0, %v8119_v36  ;;  %v7707_v29 = vpop.permute.xlu0 %7706 }
 0x952   : > { %v7609_v24 = vpop.permute.xlu1 %7608  ;;  %v8071_v43 = vsel %vm8049_vm13, %v8046_v58, %v7707_v29 }
 0x953   : > { %v8045_v60 = vsel %vm8024_vm12, %v8020_v18, %v7609_v24 }
 0x955   : > { %v7423_v34 = vpop.permute.xlu0 %7422 }
 0x956   : > { %v7325_v55 = vpop.permute.xlu1 %7324  ;;  %v7999_v27 = vsel %vm5062_vm7, %v7975_v0, %v7423_v34 }
 0x957   : > { %v7974_v62 = vsel %vm4868_vm5, %v7950_v37, %v7325_v55 }
 0x959   : > { %v7803_v20 = vpop.permute.xlu0 %7802 }
 0x95a   : > { %v7705_v38 = vpop.permute.xlu1 %7704  ;;  %v8096_v11 = vsel %vm8074_vm14, %v8071_v43, %v7803_v20 }
 0x95b   : > { %v8070_v33 = vsel %vm8049_vm13, %v8045_v60, %v7705_v38 }
 0x95d   : > { %v7519_v63 = vpop.permute.xlu0 %7518 }
 0x95e   : > { %v7421_v57 = vpop.permute.xlu1 %7420  ;;  %v8023_v51 = vsel %vm5256_vm9, %v7999_v27, %v7519_v63 }
 0x95f   : > { %v7998_v23 = vsel %vm5062_vm7, %v7974_v62, %v7421_v57 }
 0x960   : > { %v9006_v16 = vpop.f32.mrb[40].mxu1 }
 0x961   : > { %v8403_v17 = vmul.f32 %v9006_v16, %v14404_v42  ;;  %v8292_v5 = vpop.f32.mrb[41].mxu1  ;;  %v7899_v6 = vpop.permute.xlu0 %7898 }
 0x962   : > { %v8402_v9 = vmul.f32 %v14404_v42, %v8292_v5  ;;  %v7801_v53 = vpop.permute.xlu1 %7800  ;;  %v8121_v26 = vsel %vm8099_vm15, %v8096_v11, %v7899_v6 }
 0x963   : > { %v8434_v19 = vadd.f32 %v14409_v41, %v8403_v17  ;;  %v8095_v7 = vsel %vm8074_vm14, %v8070_v33, %v7801_v53 }
 0x964   : > { %v8433_v31 = vadd.f32 %v14409_v41, %v8402_v9 }
 0x965   : > { %v8458_v2 = vmax.f32 %v8434_v19, 0.0  ;;  %v7709_v14 = vpop.permute.xlu0 %7708 }
 0x966   : > { %v8457_v1 = vmax.f32 %v8433_v31, 0.0  ;;  %v7517_v35 = vpop.permute.xlu1 %7516 }
 0x967   : > { %8482 = vst.msk [vmem:[%s14419_s29 + $0x28] sm:$0xff] %vm4868_vm5, %v8458_v2  ;;  %v8022_v13 = vsel %vm5256_vm9, %v7998_v23, %v7517_v35 }
 0x968   : > { %8481 = vst.msk [vmem:[%s14419_s29 + $0x20] sm:$0xff] %vm4868_vm5, %v8457_v1 }
 0x969   : > { %v7805_v44 = vpop.permute.xlu0 %7804 }
 0x96a   : > { %v7897_v48 = vpop.permute.xlu1 %7896 }
 0x96b   : > { %v8120_v28 = vsel %vm8099_vm15, %v8095_v7, %v7897_v48 }
 0x96c   : > { %9028 = vmatprep.mubr.msk.f32.mxu1 %vm8133_vm0, %v8120_v28 }
 0x96d   : > { %9029 = vmatmul.mubr.msk.f32.gmra.mrb[56].mxu1 %vm8133_vm0, %v8121_v26  ;;  %v7901_v45 = vpop.permute.xlu0 %7900 }
 0x96e   : > { %v7613_v12 = vpop.permute.xlu1 %7612 }
 0x96f   : > { %v8047_v4 = vsel %vm8024_vm12, %v8022_v13, %v7613_v12 }
 0x970   : > { %v8072_v8 = vsel %vm8049_vm13, %v8047_v4, %v7709_v14 }
 0x971   : > { %v8097_v47 = vsel %vm8074_vm14, %v8072_v8, %v7805_v44 }
 0x972   : > { %v7615_v21 = vpop.permute.xlu1 %7614  ;;  %v8122_v30 = vsel %vm8099_vm15, %v8097_v47, %v7901_v45 }
 0x973   : > { %9031 = vmatprep.mubr.msk.f32.mxu1 %vm8133_vm0, %v8122_v30  ;;  %v8048_v36 = vsel %vm8024_vm12, %v8023_v51, %v7615_v21 }
 0x976   : > { %v7711_v25 = vpop.permute.xlu1 %7710 }
 0x977   : > { %v8073_v24 = vsel %vm8049_vm13, %v8048_v36, %v7711_v25 }
 0x97a   : > { %v7807_v22 = vpop.permute.xlu1 %7806 }
 0x97b   : > { %v8098_v61 = vsel %vm8074_vm14, %v8073_v24, %v7807_v22 }
 0x97c   : > { %v9009_v29 = vpop.f32.mrb[42].mxu1 }
 0x97d   : > { %v8405_v55 = vmul.f32 %v9009_v29, %v14404_v42  ;;  %v8302_v20 = vpop.f32.mrb[43].mxu1 }
 0x97e   : > { %v8404_v38 = vmul.f32 %v14404_v42, %v8302_v20  ;;  %v7903_v59 = vpop.permute.xlu1 %7902 }
 0x97f   : > { %v8436_v34 = vadd.f32 %v14409_v41, %v8405_v55  ;;  %v8123_v57 = vsel %vm8099_vm15, %v8098_v61, %v7903_v59 }
 0x980   : > { %v8435_v63 = vadd.f32 %v14409_v41, %v8404_v38  ;;  %9032 = vmatmul.mubr.msk.f32.gmra.mrb[58].mxu1 %vm8133_vm0, %v8123_v57 }
 0x981   : > { %v8460_v16 = vmax.f32 %v8436_v34, 0.0 }
 0x982   : > { %v8459_v17 = vmax.f32 %v8435_v63, 0.0 }
 0x983   : > { %8484 = vst.msk [vmem:[%s14419_s29 + $0x38] sm:$0xff] %vm4868_vm5, %v8460_v16 }
 0x984   : > { %8483 = vst.msk [vmem:[%s14419_s29 + $0x30] sm:$0xff] %vm4868_vm5, %v8459_v17 }
 0x998   : > { %v9012_v5 = vpop.f32.mrb[44].mxu1 }
 0x999   : > { %v8407_v6 = vmul.f32 %v9012_v5, %v14404_v42  ;;  %v8312_v9 = vpop.f32.mrb[45].mxu1 }
 0x99a   : > { %v8406_v53 = vmul.f32 %v14404_v42, %v8312_v9 }
 0x99b   : > { %v8438_v19 = vadd.f32 %v14409_v41, %v8407_v6 }
 0x99c   : > { %v8437_v32 = vadd.f32 %v14409_v41, %v8406_v53 }
 0x99d   : > { %v8462_v54 = vmax.f32 %v8438_v19, 0.0 }
 0x99e   : > { %v8461_v31 = vmax.f32 %v8437_v32, 0.0 }
 0x99f   : > { %8486 = vst.msk [vmem:[%s14419_s29 + $0x48] sm:$0xff] %vm4868_vm5, %v8462_v54 }
 0x9a0   : > { %8485 = vst.msk [vmem:[%s14419_s29 + $0x40] sm:$0xff] %vm4868_vm5, %v8461_v31 }
 0x9b4   : > { %v9015_v56 = vpop.f32.mrb[46].mxu1 }
 0x9b5   : > { %v8409_v50 = vmul.f32 %v9015_v56, %v14404_v42  ;;  %v8322_v46 = vpop.f32.mrb[47].mxu1 }
 0x9b6   : > { %v8408_v2 = vmul.f32 %v14404_v42, %v8322_v46 }
 0x9b7   : > { %v8440_v14 = vadd.f32 %v14409_v41, %v8409_v50 }
 0x9b8   : > { %v8439_v39 = vadd.f32 %v14409_v41, %v8408_v2 }
 0x9b9   : > { %v8464_v3 = vmax.f32 %v8440_v14, 0.0 }
 0x9ba   : > { %v8463_v1 = vmax.f32 %v8439_v39, 0.0 }
 0x9bb   : > { %8488 = vst.msk [vmem:[%s14419_s29 + $0x58] sm:$0xff] %vm4868_vm5, %v8464_v3 }
 0x9bc   : > { %8487 = vst.msk [vmem:[%s14419_s29 + $0x50] sm:$0xff] %vm4868_vm5, %v8463_v1 }
 0x9d0   : > { %v9018_v35 = vpop.f32.mrb[48].mxu1 }
 0x9d1   : > { %v8411_v49 = vmul.f32 %v9018_v35, %v14404_v42  ;;  %v8332_v18 = vpop.f32.mrb[49].mxu1 }
 0x9d2   : > { %v8410_v15 = vmul.f32 %v14404_v42, %v8332_v18 }
 0x9d3   : > { %v8442_v60 = vadd.f32 %v14409_v41, %v8411_v49 }
 0x9d4   : > { %v8441_v58 = vadd.f32 %v14409_v41, %v8410_v15 }
 0x9d5   : > { %v8466_v33 = vmax.f32 %v8442_v60, 0.0 }
 0x9d6   : > { %v8465_v43 = vmax.f32 %v8441_v58, 0.0 }
 0x9d7   : > { %8490 = vst.msk [vmem:[%s14419_s29 + $0x68] sm:$0xff] %vm4868_vm5, %v8466_v33 }
 0x9d8   : > { %8489 = vst.msk [vmem:[%s14419_s29 + $0x60] sm:$0xff] %vm4868_vm5, %v8465_v43 }
 0x9eb   : > { %v9021_v7 = vpop.f32.mrb[50].mxu1 }
 0x9ec   : > { %v8413_v48 = vmul.f32 %v9021_v7, %v14404_v42  ;;  %v8342_v40 = vpop.f32.mrb[51].mxu1 }
 0x9ed   : > { %v8412_v37 = vmul.f32 %v14404_v42, %v8342_v40 }
 0x9ee   : > { %v8444_v11 = vadd.f32 %v14409_v41, %v8413_v48 }
 0x9ef   : > { %v8443_v44 = vadd.f32 %v14409_v41, %v8412_v37 }
 0x9f0   : > { %v8468_v28 = vmax.f32 %v8444_v11, 0.0 }
 0x9f1   : > { %v8467_v62 = vmax.f32 %v8443_v44, 0.0 }
 0x9f2   : > { %8492 = vst.msk [vmem:[%s14419_s29 + $0x78] sm:$0xff] %vm4868_vm5, %v8468_v28 }
 0x9f3   : > { %8491 = vst.msk [vmem:[%s14419_s29 + $0x70] sm:$0xff] %vm4868_vm5, %v8467_v62 }
 0xa08   : > { %v9024_v26 = vpop.f32.mrb[52].mxu1 }
 0xa09   : > { %v8415_v23 = vmul.f32 %v9024_v26, %v14404_v42  ;;  %v8352_v13 = vpop.f32.mrb[53].mxu1 }
 0xa0a   : > { %v8414_v12 = vmul.f32 %v14404_v42, %v8352_v13 }
 0xa0b   : > { %v8446_v4 = vadd.f32 %v14409_v41, %v8415_v23 }
 0xa0c   : > { %v8445_v8 = vadd.f32 %v14409_v41, %v8414_v12 }
 0xa0d   : > { %v8470_v45 = vmax.f32 %v8446_v4, 0.0 }
 0xa0e   : > { %v8469_v47 = vmax.f32 %v8445_v8, 0.0 }
 0xa0f   : > { %8494 = vst.msk [vmem:[%s14419_s29 + $0x88] sm:$0xff] %vm4868_vm5, %v8470_v45 }
 0xa10   : > { %8493 = vst.msk [vmem:[%s14419_s29 + $0x80] sm:$0xff] %vm4868_vm5, %v8469_v47 }
 0xa24   : > { %v9027_v21 = vpop.f32.mrb[54].mxu1 }
 0xa25   : > { %v8417_v30 = vmul.f32 %v9027_v21, %v14404_v42  ;;  %v8362_v25 = vpop.f32.mrb[55].mxu1 }
 0xa26   : > { %v8416_v52 = vmul.f32 %v14404_v42, %v8362_v25 }
 0xa27   : > { %v8448_v10 = vadd.f32 %v14409_v41, %v8417_v30 }
 0xa28   : > { %v8447_v0 = vadd.f32 %v14409_v41, %v8416_v52 }
 0xa29   : > { %v8472_v27 = vmax.f32 %v8448_v10, 0.0 }
 0xa2a   : > { %v8471_v22 = vmax.f32 %v8447_v0, 0.0 }
 0xa2b   : > { %8496 = vst.msk [vmem:[%s14419_s29 + $0x98] sm:$0xff] %vm4868_vm5, %v8472_v27 }
 0xa2c   : > { %8495 = vst.msk [vmem:[%s14419_s29 + $0x90] sm:$0xff] %vm4868_vm5, %v8471_v22 }
 0xa40   : > { %v9030_v51 = vpop.f32.mrb[56].mxu1 }
 0xa41   : > { %v8419_v36 = vmul.f32 %v9030_v51, %v14404_v42  ;;  %v8372_v29 = vpop.f32.mrb[57].mxu1 }
 0xa42   : > { %v8418_v24 = vmul.f32 %v14404_v42, %v8372_v29 }
 0xa43   : > { %v8450_v55 = vadd.f32 %v14409_v41, %v8419_v36 }
 0xa44   : > { %v8449_v20 = vadd.f32 %v14409_v41, %v8418_v24 }
 0xa45   : > { %v8474_v61 = vmax.f32 %v8450_v55, 0.0 }
 0xa46   : > { %v8473_v38 = vmax.f32 %v8449_v20, 0.0 }
 0xa47   : > { %8498 = vst.msk [vmem:[%s14419_s29 + $0xa8] sm:$0xff] %vm4868_vm5, %v8474_v61 }
 0xa48   : > { %8497 = vst.msk [vmem:[%s14419_s29 + $0xa0] sm:$0xff] %vm4868_vm5, %v8473_v38 }
 0xa53   : > { %v9033_v59 = vpop.f32.mrb[58].mxu1 }
 0xa54   : > { %v8421_v34 = vmul.f32 %v9033_v59, %v14404_v42  ;;  %v8382_v57 = vpop.f32.mrb[59].mxu1 }
 0xa55   : > { %v8420_v63 = vmul.f32 %v14404_v42, %v8382_v57 }
 0xa56   : > { %v8452_v16 = vadd.f32 %v14409_v41, %v8421_v34 }
 0xa57   : > { %v8451_v17 = vadd.f32 %v14409_v41, %v8420_v63 }
 0xa58   : > { %v8476_v5 = vmax.f32 %v8452_v16, 0.0 }
 0xa59   : > { %v8475_v6 = vmax.f32 %v8451_v17, 0.0 }
 0xa5a   : > { %8500 = vst.msk [vmem:[%s14419_s29 + $0xb8] sm:$0xff] %vm4868_vm5, %v8476_v5 }
 0xa5b   : > { %8499 = vst.msk [vmem:[%s14419_s29 + $0xb0] sm:$0xff] %vm4868_vm5, %v8475_v6 }
 0xa5c PF: > { %s17_s24 = sadd.s32 1, %s9096_s24  }
 0xa5d   : > { %p14_p5 = scmp.ge.s32.totalorder %s17_s24, 4  }
 0xa5f   :  { %16 = sbr.rel (!%p14_p5) target bundleno = 1 (0x1), region = 177 }

</bundles_post_ra>
